<compile_context>
chip_gen: v7x
topology: tpu7x:2x2x1
jax: 0.10.0
libtpu: 0.0.40
codegen_flags: <defaults>
</compile_context>

<pallas_src>
import jax
import jax.numpy as jnp
from jax.experimental import pallas as pl
from jax.experimental.pallas import tpu as pltpu

IN_DIM = 28 * 28        # 784 (also the output width: full-dim block, no padding)
IN_PAD = 896            # 7 * 128 (lane-aligned input feature dim; extra w1 rows are 0)
HIDDEN = 1024
LATENT = 64
LATENT_PAD = 128        # lane-aligned latent dim (extra w2 cols / w3 rows are 0)
MAX_TILE_B = 512        # cap on the batch tile (fits comfortably in VMEM on all gens)


def _round_up(n, m):
    return ((n + m - 1) // m) * m


def _choose_tile_b(batch):
    """Adaptive batch tile: small batches stay small; otherwise aim for >=2 grid
    steps (v7x 2-TC sharding) with tiles up to 512 rows (amortizes per-step
    overhead on v5e/v6e). Always a multiple of 16 (bf16 sublane pack)."""
    b_aligned = max(16, _round_up(batch, 16))
    if b_aligned <= 32:
        return b_aligned
    return min(MAX_TILE_B, _round_up(-(-batch // 2), 16))


def _resident_spec(shape):
    """Constant index_map keeps weights/biases VMEM-resident across the grid;
    single-buffer them (their block never changes) to free VMEM."""
    index_map = lambda i: (0, 0)
    if hasattr(pl, "Buffered"):
        try:
            return pl.BlockSpec(shape, index_map, pipeline_mode=pl.Buffered(1))
        except Exception:
            pass
    return pl.BlockSpec(shape, index_map)


def _autoencoder_kernel(x_ref,
                        w1_ref, b1_ref,   # encoder.hidden : 896 -> 1024 (rows >=784 zero)
                        w2_ref, b2_ref,   # encoder.encoder: 1024 -> 128 (cols >=64 zero)
                        w3_ref, b3_ref,   # decoder.hidden : 128 -> 1024 (rows >=64 zero)
                        w4_ref, b4_ref,   # decoder.decoder: 1024 -> 784
                        out_ref):
    tile_b = x_ref.shape[0]
    half = tile_b // 2                    # tile_b is a multiple of 16 -> half % 8 == 0

    # Two independent row-halves, fully unrolled in one basic block: the LLO
    # scheduler can run one half's bias/ReLU/cast/sigmoid (VPU/EUP) underneath the
    # other half's MXU pushes, and peak f32 intermediates are halved.
    for p in range(2):
        rows = pl.ds(p * half, half)
        x = x_ref[rows, :]                                                  # (half, 896) bf16

        # ---- Encoder ----
        h = jnp.dot(x, w1_ref[...], preferred_element_type=jnp.float32) + b1_ref[...]
        h = jnp.maximum(h, 0.0).astype(jnp.bfloat16)                        # ReLU
        z = jnp.dot(h, w2_ref[...], preferred_element_type=jnp.float32) + b2_ref[...]
        z = z.astype(jnp.bfloat16)                                          # padded latent cols are 0

        # ---- Decoder ----
        g = jnp.dot(z, w3_ref[...], preferred_element_type=jnp.float32) + b3_ref[...]
        g = jnp.maximum(g, 0.0).astype(jnp.bfloat16)                        # ReLU
        logits = jnp.dot(g, w4_ref[...], preferred_element_type=jnp.float32) + b4_ref[...]

        # Sigmoid: exp on EUP, approx reciprocal also on EUP (VALU-light epilogue).
        out_ref[rows, :] = pl.reciprocal(1.0 + jnp.exp(-logits), approx=True)


def autoencoder_forward(x_nchw, kernel_params):
    """x_nchw: (B, 1, 28, 28) float32. Returns (B, 1, 28, 28) float32."""
    batch = x_nchw.shape[0]
    x_flat = x_nchw.reshape(batch, IN_DIM).astype(jnp.bfloat16)             # == x.view(-1, 784)

    tile_b = _choose_tile_b(batch)
    num_tiles = pl.cdiv(batch, tile_b)
    b_pad = num_tiles * tile_b

    # Zero-pad batch to the tile multiple and input features to 896 (lane-dense
    # input tiles; w1 rows >= 784 are zero so the padding is a numeric no-op).
    x_padded = jnp.zeros((b_pad, IN_PAD), jnp.bfloat16).at[:batch, :IN_DIM].set(x_flat)

    w1, b1, w2, b2, w3, b3, w4, b4 = kernel_params

    out = pl.pallas_call(
        _autoencoder_kernel,
        # 784-wide f32 output: no post-kernel feature slice (784 == full array dim).
        out_shape=jax.ShapeDtypeStruct((b_pad, IN_DIM), jnp.float32),
        grid=(num_tiles,),
        in_specs=[
            pl.BlockSpec((tile_b, IN_PAD), lambda i: (i, 0)),               # x tile (pipelined)
            _resident_spec((IN_PAD, HIDDEN)), _resident_spec((1, HIDDEN)),          # w1, b1
            _resident_spec((HIDDEN, LATENT_PAD)), _resident_spec((1, LATENT_PAD)),  # w2, b2
            _resident_spec((LATENT_PAD, HIDDEN)), _resident_spec((1, HIDDEN)),      # w3, b3
            _resident_spec((HIDDEN, IN_DIM)), _resident_spec((1, IN_DIM)),          # w4, b4
        ],
        out_specs=pl.BlockSpec((tile_b, IN_DIM), lambda i: (i, 0)),
        compiler_params=pltpu.CompilerParams(
            dimension_semantics=("parallel",),
            vmem_limit_bytes=48 << 20,      # plenty for 512-row tiles, < v7x's 64 MiB
        ),
    )(x_padded, w1, b1, w2, b2, w3, b3, w4, b4)

    if b_pad != batch:
        out = out[:batch]                                                   # drop padded rows only
    return out.reshape(batch, 1, 28, 28)                                    # == z.view(-1, 1, 28, 28)


def init_params(key):
    """Canonical (unpadded, f32) params mimicking PyTorch Linear default init
    (U[-1/sqrt(fan_in), +1/sqrt(fan_in)]). Weights stored (in, out) so forward is x @ W + b."""
    def linear(k, fan_in, fan_out):
        kw, kb = jax.random.split(k)
        bound = 1.0 / jnp.sqrt(fan_in)
        w = jax.random.uniform(kw, (fan_in, fan_out), jnp.float32, -bound, bound)
        b = jax.random.uniform(kb, (1, fan_out), jnp.float32, -bound, bound)
        return w, b

    k1, k2, k3, k4 = jax.random.split(key, 4)
    w1, b1 = linear(k1, IN_DIM, HIDDEN)    # encoder.hidden
    w2, b2 = linear(k2, HIDDEN, LATENT)    # encoder.encoder
    w3, b3 = linear(k3, LATENT, HIDDEN)    # decoder.hidden
    w4, b4 = linear(k4, HIDDEN, IN_DIM)    # decoder.decoder
    return (w1, b1, w2, b2, w3, b3, w4, b4)


def prepare_kernel_params(params):
    """Pad input-side dims to lane-aligned shapes (784->896, 64->128), cast weights
    to bf16. Padded rows/cols and bias entries are exactly zero -> results unchanged.
    w4/b4 stay at their natural 1024x784 / 1x784 shapes (output is 784-wide)."""
    w1, b1, w2, b2, w3, b3, w4, b4 = params
    w1p = jnp.zeros((IN_PAD, HIDDEN), jnp.bfloat16).at[:IN_DIM, :].set(w1.astype(jnp.bfloat16))
    w2p = jnp.zeros((HIDDEN, LATENT_PAD), jnp.bfloat16).at[:, :LATENT].set(w2.astype(jnp.bfloat16))
    b2p = jnp.zeros((1, LATENT_PAD), jnp.float32).at[:, :LATENT].set(b2)
    w3p = jnp.zeros((LATENT_PAD, HIDDEN), jnp.bfloat16).at[:LATENT, :].set(w3.astype(jnp.bfloat16))
    w4p = w4.astype(jnp.bfloat16)
    return (w1p, b1.astype(jnp.float32), w2p, b2p, w3p, b3.astype(jnp.float32),
            w4p, b4.astype(jnp.float32))


def _reference_forward(x_nchw, params):
    """Pure-JAX reference with the same precision recipe (bf16 matmul inputs, f32 accum)."""
    w1, b1, w2, b2, w3, b3, w4, b4 = params

    def mm(a, w):
        return jnp.dot(a.astype(jnp.bfloat16), w.astype(jnp.bfloat16),
                       preferred_element_type=jnp.float32)

    x = x_nchw.reshape(x_nchw.shape[0], IN_DIM)
    h = jnp.maximum(mm(x, w1) + b1, 0.0)
    z = mm(h, w2) + b2
    g = jnp.maximum(mm(z, w3) + b3, 0.0)
    y = jax.nn.sigmoid(mm(g, w4) + b4)
    return y.reshape(-1, 1, 28, 28)


if __name__ == "__main__":
    key = jax.random.PRNGKey(0)
    k_params, k_x = jax.random.split(key)

    params = init_params(k_params)
    kernel_params = prepare_kernel_params(params)

    x = jax.random.uniform(k_x, (2, 1, 28, 28), jnp.float32)    # small batch, MNIST-shaped

    y = autoencoder_forward(x, kernel_params)
    y = jax.block_until_ready(y)

    # sanity check against a precision-matched pure-JAX reference
    y_ref = _reference_forward(x, params)
    assert y.shape == (2, 1, 28, 28)
    assert y.dtype == jnp.float32
    max_err = float(jnp.max(jnp.abs(y - y_ref)))
    assert max_err < 1e-2, max_err

    print("KERNEL_OK")
</pallas_src>

<mosaic_0001>
module attributes {stable_mosaic.version = 11 : i64} {
  func.func @_autoencoder_kernel(%arg0: i32, %arg1: memref<16x896xbf16, #tpu.memory_space<vmem>>, %arg2: memref<896x1024xbf16, #tpu.memory_space<vmem>>, %arg3: memref<1x1024xf32, #tpu.memory_space<vmem>>, %arg4: memref<1024x128xbf16, #tpu.memory_space<vmem>>, %arg5: memref<1x128xf32, #tpu.memory_space<vmem>>, %arg6: memref<128x1024xbf16, #tpu.memory_space<vmem>>, %arg7: memref<1x1024xf32, #tpu.memory_space<vmem>>, %arg8: memref<1024x784xbf16, #tpu.memory_space<vmem>>, %arg9: memref<1x784xf32, #tpu.memory_space<vmem>>, %arg10: memref<16x784xf32, #tpu.memory_space<vmem>>) attributes {dimension_semantics = [#tpu.dimension_semantics<parallel>], iteration_bounds = array<i64: 1>, scalar_prefetch = 0 : i64, scratch_operands = 0 : i64, tpu.core_type = #tpu.core_type<tc>, window_params = [{transform_indices = @transform_0, window_bounds = array<i64: 16, 896>}, {pipeline_mode = #tpu.pipeline_mode<synchronous>, transform_indices = @transform_1, window_bounds = array<i64: 896, 1024>}, {pipeline_mode = #tpu.pipeline_mode<synchronous>, transform_indices = @transform_2, window_bounds = array<i64: 1, 1024>}, {pipeline_mode = #tpu.pipeline_mode<synchronous>, transform_indices = @transform_3, window_bounds = array<i64: 1024, 128>}, {pipeline_mode = #tpu.pipeline_mode<synchronous>, transform_indices = @transform_4, window_bounds = array<i64: 1, 128>}, {pipeline_mode = #tpu.pipeline_mode<synchronous>, transform_indices = @transform_5, window_bounds = array<i64: 128, 1024>}, {pipeline_mode = #tpu.pipeline_mode<synchronous>, transform_indices = @transform_6, window_bounds = array<i64: 1, 1024>}, {pipeline_mode = #tpu.pipeline_mode<synchronous>, transform_indices = @transform_7, window_bounds = array<i64: 1024, 784>}, {pipeline_mode = #tpu.pipeline_mode<synchronous>, transform_indices = @transform_8, window_bounds = array<i64: 1, 784>}, {transform_indices = @transform_9, window_bounds = array<i64: 16, 784>}]} {
    %c0 = arith.constant 0 : index
    %c0_0 = arith.constant 0 : index
    %0 = vector.load %arg1[%c0, %c0_0] : memref<16x896xbf16, #tpu.memory_space<vmem>>, vector<8x896xbf16>
    %c0_1 = arith.constant 0 : index
    %c0_2 = arith.constant 0 : index
    %1 = vector.load %arg2[%c0_1, %c0_2] : memref<896x1024xbf16, #tpu.memory_space<vmem>>, vector<896x1024xbf16>
    %cst = arith.constant dense<0.000000e+00> : vector<8x1024xf32>
    %2 = tpu.matmul %0, %1, %cst {dimension_numbers = #tpu.dot_dimension_numbers<[1], [0], [0], [1], [0, 0, 1, 1], [], []>} : vector<8x896xbf16>, vector<896x1024xbf16>, vector<8x1024xf32> -> vector<8x1024xf32>
    %c0_3 = arith.constant 0 : index
    %c0_4 = arith.constant 0 : index
    %3 = vector.load %arg3[%c0_3, %c0_4] : memref<1x1024xf32, #tpu.memory_space<vmem>>, vector<1x1024xf32>
    %4 = vector.broadcast %3 : vector<1x1024xf32> to vector<8x1024xf32>
    %5 = arith.addf %2, %4 : vector<8x1024xf32>
    %cst_5 = arith.constant 0.000000e+00 : f32
    %6 = vector.broadcast %cst_5 : f32 to vector<8x1024xf32>
    %7 = arith.maximumf %5, %6 : vector<8x1024xf32>
    %8 = arith.truncf %7 : vector<8x1024xf32> to vector<8x1024xbf16>
    %c0_6 = arith.constant 0 : index
    %c0_7 = arith.constant 0 : index
    %9 = vector.load %arg4[%c0_6, %c0_7] : memref<1024x128xbf16, #tpu.memory_space<vmem>>, vector<1024x128xbf16>
    %cst_8 = arith.constant dense<0.000000e+00> : vector<8x128xf32>
    %10 = tpu.matmul %8, %9, %cst_8 {dimension_numbers = #tpu.dot_dimension_numbers<[1], [0], [0], [1], [0, 0, 1, 1], [], []>} : vector<8x1024xbf16>, vector<1024x128xbf16>, vector<8x128xf32> -> vector<8x128xf32>
    %c0_9 = arith.constant 0 : index
    %c0_10 = arith.constant 0 : index
    %11 = vector.load %arg5[%c0_9, %c0_10] : memref<1x128xf32, #tpu.memory_space<vmem>>, vector<1x128xf32>
    %12 = vector.broadcast %11 : vector<1x128xf32> to vector<8x128xf32>
    %13 = arith.addf %10, %12 : vector<8x128xf32>
    %14 = arith.truncf %13 : vector<8x128xf32> to vector<8x128xbf16>
    %c0_11 = arith.constant 0 : index
    %c0_12 = arith.constant 0 : index
    %15 = vector.load %arg6[%c0_11, %c0_12] : memref<128x1024xbf16, #tpu.memory_space<vmem>>, vector<128x1024xbf16>
    %cst_13 = arith.constant dense<0.000000e+00> : vector<8x1024xf32>
    %16 = tpu.matmul %14, %15, %cst_13 {dimension_numbers = #tpu.dot_dimension_numbers<[1], [0], [0], [1], [0, 0, 1, 1], [], []>} : vector<8x128xbf16>, vector<128x1024xbf16>, vector<8x1024xf32> -> vector<8x1024xf32>
    %c0_14 = arith.constant 0 : index
    %c0_15 = arith.constant 0 : index
    %17 = vector.load %arg7[%c0_14, %c0_15] : memref<1x1024xf32, #tpu.memory_space<vmem>>, vector<1x1024xf32>
    %18 = vector.broadcast %17 : vector<1x1024xf32> to vector<8x1024xf32>
    %19 = arith.addf %16, %18 : vector<8x1024xf32>
    %cst_16 = arith.constant 0.000000e+00 : f32
    %20 = vector.broadcast %cst_16 : f32 to vector<8x1024xf32>
    %21 = arith.maximumf %19, %20 : vector<8x1024xf32>
    %22 = arith.truncf %21 : vector<8x1024xf32> to vector<8x1024xbf16>
    %c0_17 = arith.constant 0 : index
    %c0_18 = arith.constant 0 : index
    %23 = vector.load %arg8[%c0_17, %c0_18] : memref<1024x784xbf16, #tpu.memory_space<vmem>>, vector<1024x784xbf16>
    %cst_19 = arith.constant dense<0.000000e+00> : vector<8x784xf32>
    %24 = tpu.matmul %22, %23, %cst_19 {dimension_numbers = #tpu.dot_dimension_numbers<[1], [0], [0], [1], [0, 0, 1, 1], [], []>} : vector<8x1024xbf16>, vector<1024x784xbf16>, vector<8x784xf32> -> vector<8x784xf32>
    %c0_20 = arith.constant 0 : index
    %c0_21 = arith.constant 0 : index
    %25 = vector.load %arg9[%c0_20, %c0_21] : memref<1x784xf32, #tpu.memory_space<vmem>>, vector<1x784xf32>
    %26 = vector.broadcast %25 : vector<1x784xf32> to vector<8x784xf32>
    %27 = arith.addf %24, %26 : vector<8x784xf32>
    %cst_22 = arith.constant 0.000000e+00 : f32
    %28 = vector.broadcast %cst_22 : f32 to vector<8x784xf32>
    %29 = arith.subf %28, %27 : vector<8x784xf32>
    %30 = math.exp %29 : vector<8x784xf32>
    %cst_23 = arith.constant 1.000000e+00 : f32
    %31 = vector.broadcast %cst_23 : f32 to vector<8x784xf32>
    %32 = arith.addf %31, %30 : vector<8x784xf32>
    %33 = tpu.reciprocal %32 {approx = true} : vector<8x784xf32> -> vector<8x784xf32>
    %c0_24 = arith.constant 0 : index
    %c0_25 = arith.constant 0 : index
    %34 = vector.load %arg10[%c0_24, %c0_25] : memref<16x784xf32, #tpu.memory_space<vmem>>, vector<8x784xf32>
    tpu.vector_store %arg10[%c0_24, %c0_25], %33 {strides = array<i32>} : memref<16x784xf32, #tpu.memory_space<vmem>>, vector<8x784xf32>,
    %c8 = arith.constant 8 : index
    %c0_26 = arith.constant 0 : index
    %35 = vector.load %arg1[%c8, %c0_26] : memref<16x896xbf16, #tpu.memory_space<vmem>>, vector<8x896xbf16>
    %c0_27 = arith.constant 0 : index
    %c0_28 = arith.constant 0 : index
    %36 = vector.load %arg2[%c0_27, %c0_28] : memref<896x1024xbf16, #tpu.memory_space<vmem>>, vector<896x1024xbf16>
    %cst_29 = arith.constant dense<0.000000e+00> : vector<8x1024xf32>
    %37 = tpu.matmul %35, %36, %cst_29 {dimension_numbers = #tpu.dot_dimension_numbers<[1], [0], [0], [1], [0, 0, 1, 1], [], []>} : vector<8x896xbf16>, vector<896x1024xbf16>, vector<8x1024xf32> -> vector<8x1024xf32>
    %c0_30 = arith.constant 0 : index
    %c0_31 = arith.constant 0 : index
    %38 = vector.load %arg3[%c0_30, %c0_31] : memref<1x1024xf32, #tpu.memory_space<vmem>>, vector<1x1024xf32>
    %39 = vector.broadcast %38 : vector<1x1024xf32> to vector<8x1024xf32>
    %40 = arith.addf %37, %39 : vector<8x1024xf32>
    %cst_32 = arith.constant 0.000000e+00 : f32
    %41 = vector.broadcast %cst_32 : f32 to vector<8x1024xf32>
    %42 = arith.maximumf %40, %41 : vector<8x1024xf32>
    %43 = arith.truncf %42 : vector<8x1024xf32> to vector<8x1024xbf16>
    %c0_33 = arith.constant 0 : index
    %c0_34 = arith.constant 0 : index
    %44 = vector.load %arg4[%c0_33, %c0_34] : memref<1024x128xbf16, #tpu.memory_space<vmem>>, vector<1024x128xbf16>
    %cst_35 = arith.constant dense<0.000000e+00> : vector<8x128xf32>
    %45 = tpu.matmul %43, %44, %cst_35 {dimension_numbers = #tpu.dot_dimension_numbers<[1], [0], [0], [1], [0, 0, 1, 1], [], []>} : vector<8x1024xbf16>, vector<1024x128xbf16>, vector<8x128xf32> -> vector<8x128xf32>
    %c0_36 = arith.constant 0 : index
    %c0_37 = arith.constant 0 : index
    %46 = vector.load %arg5[%c0_36, %c0_37] : memref<1x128xf32, #tpu.memory_space<vmem>>, vector<1x128xf32>
    %47 = vector.broadcast %46 : vector<1x128xf32> to vector<8x128xf32>
    %48 = arith.addf %45, %47 : vector<8x128xf32>
    %49 = arith.truncf %48 : vector<8x128xf32> to vector<8x128xbf16>
    %c0_38 = arith.constant 0 : index
    %c0_39 = arith.constant 0 : index
    %50 = vector.load %arg6[%c0_38, %c0_39] : memref<128x1024xbf16, #tpu.memory_space<vmem>>, vector<128x1024xbf16>
    %cst_40 = arith.constant dense<0.000000e+00> : vector<8x1024xf32>
    %51 = tpu.matmul %49, %50, %cst_40 {dimension_numbers = #tpu.dot_dimension_numbers<[1], [0], [0], [1], [0, 0, 1, 1], [], []>} : vector<8x128xbf16>, vector<128x1024xbf16>, vector<8x1024xf32> -> vector<8x1024xf32>
    %c0_41 = arith.constant 0 : index
    %c0_42 = arith.constant 0 : index
    %52 = vector.load %arg7[%c0_41, %c0_42] : memref<1x1024xf32, #tpu.memory_space<vmem>>, vector<1x1024xf32>
    %53 = vector.broadcast %52 : vector<1x1024xf32> to vector<8x1024xf32>
    %54 = arith.addf %51, %53 : vector<8x1024xf32>
    %cst_43 = arith.constant 0.000000e+00 : f32
    %55 = vector.broadcast %cst_43 : f32 to vector<8x1024xf32>
    %56 = arith.maximumf %54, %55 : vector<8x1024xf32>
    %57 = arith.truncf %56 : vector<8x1024xf32> to vector<8x1024xbf16>
    %c0_44 = arith.constant 0 : index
    %c0_45 = arith.constant 0 : index
    %58 = vector.load %arg8[%c0_44, %c0_45] : memref<1024x784xbf16, #tpu.memory_space<vmem>>, vector<1024x784xbf16>
    %cst_46 = arith.constant dense<0.000000e+00> : vector<8x784xf32>
    %59 = tpu.matmul %57, %58, %cst_46 {dimension_numbers = #tpu.dot_dimension_numbers<[1], [0], [0], [1], [0, 0, 1, 1], [], []>} : vector<8x1024xbf16>, vector<1024x784xbf16>, vector<8x784xf32> -> vector<8x784xf32>
    %c0_47 = arith.constant 0 : index
    %c0_48 = arith.constant 0 : index
    %60 = vector.load %arg9[%c0_47, %c0_48] : memref<1x784xf32, #tpu.memory_space<vmem>>, vector<1x784xf32>
    %61 = vector.broadcast %60 : vector<1x784xf32> to vector<8x784xf32>
    %62 = arith.addf %59, %61 : vector<8x784xf32>
    %cst_49 = arith.constant 0.000000e+00 : f32
    %63 = vector.broadcast %cst_49 : f32 to vector<8x784xf32>
    %64 = arith.subf %63, %62 : vector<8x784xf32>
    %65 = math.exp %64 : vector<8x784xf32>
    %cst_50 = arith.constant 1.000000e+00 : f32
    %66 = vector.broadcast %cst_50 : f32 to vector<8x784xf32>
    %67 = arith.addf %66, %65 : vector<8x784xf32>
    %68 = tpu.reciprocal %67 {approx = true} : vector<8x784xf32> -> vector<8x784xf32>
    %c8_51 = arith.constant 8 : index
    %c0_52 = arith.constant 0 : index
    %69 = vector.load %arg10[%c8_51, %c0_52] : memref<16x784xf32, #tpu.memory_space<vmem>>, vector<8x784xf32>
    tpu.vector_store %arg10[%c8_51, %c0_52], %68 {strides = array<i32>} : memref<16x784xf32, #tpu.memory_space<vmem>>, vector<8x784xf32>,
    return
  }
  func.func @transform_0(%arg0: i32) -> (i32, i32) {
    %c0_i32 = arith.constant 0 : i32
    %c0_i32_0 = arith.constant 0 : i32
    return %arg0, %c0_i32 : i32, i32
  }
  func.func @transform_1(%arg0: i32) -> (i32, i32) {
    %c0_i32 = arith.constant 0 : i32
    %c0_i32_0 = arith.constant 0 : i32
    %c0_i32_1 = arith.constant 0 : i32
    return %c0_i32, %c0_i32_0 : i32, i32
  }
  func.func @transform_2(%arg0: i32) -> (i32, i32) {
    %c0_i32 = arith.constant 0 : i32
    %c0_i32_0 = arith.constant 0 : i32
    %c0_i32_1 = arith.constant 0 : i32
    return %c0_i32, %c0_i32_0 : i32, i32
  }
  func.func @transform_3(%arg0: i32) -> (i32, i32) {
    %c0_i32 = arith.constant 0 : i32
    %c0_i32_0 = arith.constant 0 : i32
    %c0_i32_1 = arith.constant 0 : i32
    return %c0_i32, %c0_i32_0 : i32, i32
  }
  func.func @transform_4(%arg0: i32) -> (i32, i32) {
    %c0_i32 = arith.constant 0 : i32
    %c0_i32_0 = arith.constant 0 : i32
    %c0_i32_1 = arith.constant 0 : i32
    return %c0_i32, %c0_i32_0 : i32, i32
  }
  func.func @transform_5(%arg0: i32) -> (i32, i32) {
    %c0_i32 = arith.constant 0 : i32
    %c0_i32_0 = arith.constant 0 : i32
    %c0_i32_1 = arith.constant 0 : i32
    return %c0_i32, %c0_i32_0 : i32, i32
  }
  func.func @transform_6(%arg0: i32) -> (i32, i32) {
    %c0_i32 = arith.constant 0 : i32
    %c0_i32_0 = arith.constant 0 : i32
    %c0_i32_1 = arith.constant 0 : i32
    return %c0_i32, %c0_i32_0 : i32, i32
  }
  func.func @transform_7(%arg0: i32) -> (i32, i32) {
    %c0_i32 = arith.constant 0 : i32
    %c0_i32_0 = arith.constant 0 : i32
    %c0_i32_1 = arith.constant 0 : i32
    return %c0_i32, %c0_i32_0 : i32, i32
  }
  func.func @transform_8(%arg0: i32) -> (i32, i32) {
    %c0_i32 = arith.constant 0 : i32
    %c0_i32_0 = arith.constant 0 : i32
    %c0_i32_1 = arith.constant 0 : i32
    return %c0_i32, %c0_i32_0 : i32, i32
  }
  func.func @transform_9(%arg0: i32) -> (i32, i32) {
    %c0_i32 = arith.constant 0 : i32
    %c0_i32_0 = arith.constant 0 : i32
    return %arg0, %c0_i32 : i32, i32
  }
}

</mosaic_0001>

<bundles_post_ra>
// kernel: tpu_custom_call.1
= control target key start
LH: loop header
LB: loop body
LE: loop exit
PB: predicated region body
PF: predicated region fallthrough
CT: control target
= control target key end

     0   :  { %s27418_s0 = inlined_call_operand.vmem [shape: bf16[16,896], index: 0, kind: input, shape index: {}]   ;;  %s27419_s1 = inlined_call_operand.vmem [shape: bf16[896,1024], index: 1, kind: input, shape index: {}]   ;;  %s27420_s2 = inlined_call_operand.vmem [shape: f32[1,1024], index: 2, kind: input, shape index: {}]   ;;  %s27421_s3 = inlined_call_operand.vmem [shape: bf16[1024,128], index: 3, kind: input, shape index: {}]   ;;  %s27422_s4 = inlined_call_operand.vmem [shape: f32[1,128], index: 4, kind: input, shape index: {}]   ;;  %s27423_s5 = inlined_call_operand.vmem [shape: bf16[128,1024], index: 5, kind: input, shape index: {}]   ;;  %s27424_s6 = inlined_call_operand.vmem [shape: f32[1,1024], index: 6, kind: input, shape index: {}]   ;;  %s27425_s7 = inlined_call_operand.vmem [shape: bf16[1024,784], index: 7, kind: input, shape index: {}]   ;;  %s27426_s8 = inlined_call_operand.vmem [shape: f32[1,784], index: 8, kind: input, shape index: {}]   ;;  %s27427_s9 = inlined_call_operand.hbm [shape: f32[16,784], index: 9, kind: output, shape index: {}]  }
   0x1   :  { %v38_v0 = vld [vmem:[%s27419_s1] sm:$0xff]  ;;  %v20847_v54 = vld [vmem:[%s27418_s0 + $0x8] sm:$0xff] }
   0x2   :  { %v42_v1 = vld [vmem:[%s27419_s1 + $0x20] sm:$0xff]  ;;  %v20867_v61 = vcombine.high %v20847_v54, %v20847_v54 }
   0x3   :  { %v166_v2 = vld [vmem:[%s27419_s1 + $0x400] sm:$0xff]  ;;  %v16587_v3 = vcombine.high %v38_v0, %v42_v1  ;;  %v16586_v5 = vcombine.low %v38_v0, %v42_v1 }
   0x4   :  { %v170_v4 = vld [vmem:[%s27419_s1 + $0x420] sm:$0xff]  ;;  %2866 = vmatprep.mubr.bf16.mxu0 %v20867_v61 }
   0x5   :  { %v46_v6 = vld [vmem:[%s27419_s1 + $0x40] sm:$0xff]  ;;  %v16715_v8 = vcombine.high %v166_v2, %v170_v4  ;;  %v16714_v9 = vcombine.low %v166_v2, %v170_v4  ;;  %2793 = vmatprep.subr.bf16.mxu1 %v16587_v3 }
   0x6   :  { %v50_v7 = vld [vmem:[%s27419_s1 + $0x60] sm:$0xff]  ;;  %2794 = vmatpush1.bf16.msra.mxu1 %v16586_v5 }
   0x7   :  { %v16595_v10 = vcombine.high %v46_v6, %v50_v7  ;;  %v174_v11 = vld [vmem:[%s27419_s1 + $0x440] sm:$0xff]  ;;  %2834 = vmatprep.subr.bf16.mxu0 %v16715_v8  ;;  %v16594_v18 = vcombine.low %v46_v6, %v50_v7 }
   0x8   :  { %v178_v12 = vld [vmem:[%s27419_s1 + $0x460] sm:$0xff]  ;;  %2835 = vmatpush1.bf16.msra.mxu0 %v16714_v9 }
   0x9   :  { %v54_v13 = vld [vmem:[%s27419_s1 + $0x80] sm:$0xff]  ;;  %v16723_v14 = vcombine.high %v174_v11, %v178_v12  ;;  %2795 = vmatprep.subr.bf16.mxu1 %v16595_v10  ;;  %v16722_v19 = vcombine.low %v174_v11, %v178_v12 }
   0xa   :  { %v58_v15 = vld [vmem:[%s27419_s1 + $0xa0] sm:$0xff]  ;;  %2796 = vmatpush1.bf16.msra.mxu1 %v16594_v18 }
   0xb   :  { %v182_v16 = vld [vmem:[%s27419_s1 + $0x480] sm:$0xff]  ;;  %v16603_v20 = vcombine.high %v54_v13, %v58_v15  ;;  %2836 = vmatprep.subr.bf16.mxu0 %v16723_v14  ;;  %v16602_v26 = vcombine.low %v54_v13, %v58_v15 }
   0xc   :  { %v186_v17 = vld [vmem:[%s27419_s1 + $0x4a0] sm:$0xff]  ;;  %2837 = vmatpush1.bf16.msra.mxu0 %v16722_v19 }
   0xd   :  { %v16731_v21 = vcombine.high %v182_v16, %v186_v17  ;;  %v62_v22 = vld [vmem:[%s27419_s1 + $0xc0] sm:$0xff]  ;;  %2797 = vmatprep.subr.bf16.mxu1 %v16603_v20  ;;  %v16730_v27 = vcombine.low %v182_v16, %v186_v17 }
   0xe   :  { %v66_v23 = vld [vmem:[%s27419_s1 + $0xe0] sm:$0xff]  ;;  %2798 = vmatpush1.bf16.msra.mxu1 %v16602_v26 }
   0xf   :  { %v190_v24 = vld [vmem:[%s27419_s1 + $0x4c0] sm:$0xff]  ;;  %v16611_v28 = vcombine.high %v62_v22, %v66_v23  ;;  %2838 = vmatprep.subr.bf16.mxu0 %v16731_v21  ;;  %v16610_v34 = vcombine.low %v62_v22, %v66_v23 }
  0x10   :  { %v194_v25 = vld [vmem:[%s27419_s1 + $0x4e0] sm:$0xff]  ;;  %2839 = vmatpush1.bf16.msra.mxu0 %v16730_v27 }
  0x11   :  { %v16739_v29 = vcombine.high %v190_v24, %v194_v25  ;;  %v70_v30 = vld [vmem:[%s27419_s1 + $0x100] sm:$0xff]  ;;  %2799 = vmatprep.subr.bf16.mxu1 %v16611_v28  ;;  %v16738_v35 = vcombine.low %v190_v24, %v194_v25 }
  0x12   :  { %v74_v31 = vld [vmem:[%s27419_s1 + $0x120] sm:$0xff]  ;;  %2800 = vmatpush1.bf16.msra.mxu1 %v16610_v34 }
  0x13   :  { %v198_v32 = vld [vmem:[%s27419_s1 + $0x500] sm:$0xff]  ;;  %v16619_v36 = vcombine.high %v70_v30, %v74_v31  ;;  %2840 = vmatprep.subr.bf16.mxu0 %v16739_v29  ;;  %v16618_v42 = vcombine.low %v70_v30, %v74_v31 }
  0x14   :  { %v202_v33 = vld [vmem:[%s27419_s1 + $0x520] sm:$0xff]  ;;  %2841 = vmatpush1.bf16.msra.mxu0 %v16738_v35 }
  0x15   :  { %v16747_v37 = vcombine.high %v198_v32, %v202_v33  ;;  %v78_v38 = vld [vmem:[%s27419_s1 + $0x140] sm:$0xff]  ;;  %2801 = vmatprep.subr.bf16.mxu1 %v16619_v36  ;;  %v16746_v43 = vcombine.low %v198_v32, %v202_v33 }
  0x16   :  { %v82_v39 = vld [vmem:[%s27419_s1 + $0x160] sm:$0xff]  ;;  %2802 = vmatpush1.bf16.msra.mxu1 %v16618_v42 }
  0x17   :  { %v206_v40 = vld [vmem:[%s27419_s1 + $0x540] sm:$0xff]  ;;  %v16627_v44 = vcombine.high %v78_v38, %v82_v39  ;;  %2842 = vmatprep.subr.bf16.mxu0 %v16747_v37  ;;  %v16626_v50 = vcombine.low %v78_v38, %v82_v39 }
  0x18   :  { %v210_v41 = vld [vmem:[%s27419_s1 + $0x560] sm:$0xff]  ;;  %2843 = vmatpush1.bf16.msra.mxu0 %v16746_v43 }
  0x19   :  { %v16755_v45 = vcombine.high %v206_v40, %v210_v41  ;;  %v86_v46 = vld [vmem:[%s27419_s1 + $0x180] sm:$0xff]  ;;  %2803 = vmatprep.subr.bf16.mxu1 %v16627_v44  ;;  %v16754_v51 = vcombine.low %v206_v40, %v210_v41 }
  0x1a   :  { %v90_v47 = vld [vmem:[%s27419_s1 + $0x1a0] sm:$0xff]  ;;  %2804 = vmatpush1.bf16.msra.mxu1 %v16626_v50 }
  0x1b   :  { %v214_v48 = vld [vmem:[%s27419_s1 + $0x580] sm:$0xff]  ;;  %v16635_v52 = vcombine.high %v86_v46, %v90_v47  ;;  %2844 = vmatprep.subr.bf16.mxu0 %v16755_v45  ;;  %v16634_v62 = vcombine.low %v86_v46, %v90_v47 }
  0x1c   :  { %v218_v49 = vld [vmem:[%s27419_s1 + $0x5a0] sm:$0xff]  ;;  %2845 = vmatpush1.bf16.msra.mxu0 %v16754_v51 }
  0x1d   :  { %v20842_v53 = vld [vmem:[%s27418_s0] sm:$0xff]  ;;  %v16763_v55 = vcombine.high %v214_v48, %v218_v49  ;;  %2805 = vmatprep.subr.bf16.mxu1 %v16635_v52  ;;  %v16762_v63 = vcombine.low %v214_v48, %v218_v49 }
  0x1e   :  { %v94_v56 = vld [vmem:[%s27419_s1 + $0x1c0] sm:$0xff]  ;;  %v20857_v58 = vcombine.high %v20842_v53, %v20842_v53  ;;  %2806 = vmatpush1.bf16.msra.mxu1 %v16634_v62 }
  0x1f   :  { %v98_v57 = vld [vmem:[%s27419_s1 + $0x1e0] sm:$0xff]  ;;  %2846 = vmatprep.subr.bf16.mxu0 %v16763_v55 }
  0x20   :  { %v222_v59 = vld [vmem:[%s27419_s1 + $0x5c0] sm:$0xff]  ;;  %2825 = vmatprep.mubr.bf16.mxu1 %v20857_v58  ;;  %v16643_v0 = vcombine.high %v94_v56, %v98_v57  ;;  %v16642_v6 = vcombine.low %v94_v56, %v98_v57  ;;  %2847 = vmatpush1.bf16.msra.mxu0 %v16762_v63 }
  0x21   :  { %v226_v60 = vld [vmem:[%s27419_s1 + $0x5e0] sm:$0xff] }
  0x22   :  { %v16771_v1 = vcombine.high %v222_v59, %v226_v60  ;;  %v102_v2 = vld [vmem:[%s27419_s1 + $0x200] sm:$0xff]  ;;  %2807 = vmatprep.subr.bf16.mxu1 %v16643_v0  ;;  %v16770_v7 = vcombine.low %v222_v59, %v226_v60 }
  0x23   :  { %v106_v3 = vld [vmem:[%s27419_s1 + $0x220] sm:$0xff]  ;;  %2808 = vmatpush1.bf16.msra.mxu1 %v16642_v6  ;;  %v39_v6 = vld [vmem:[%s27419_s1 + $0x8] sm:$0xff] }
  0x24   :  { %v230_v4 = vld [vmem:[%s27419_s1 + $0x600] sm:$0xff]  ;;  %v16651_v8 = vcombine.high %v102_v2, %v106_v3  ;;  %2848 = vmatprep.subr.bf16.mxu0 %v16771_v1  ;;  %v16650_v14 = vcombine.low %v102_v2, %v106_v3 }
  0x25   :  { %v234_v5 = vld [vmem:[%s27419_s1 + $0x620] sm:$0xff]  ;;  %2849 = vmatpush1.bf16.msra.mxu0 %v16770_v7  ;;  %v43_v7 = vld [vmem:[%s27419_s1 + $0x28] sm:$0xff] }
  0x26   :  { %v16779_v9 = vcombine.high %v230_v4, %v234_v5  ;;  %v110_v10 = vld [vmem:[%s27419_s1 + $0x240] sm:$0xff]  ;;  %2809 = vmatprep.subr.bf16.mxu1 %v16651_v8  ;;  %v16778_v15 = vcombine.low %v230_v4, %v234_v5 }
  0x27   :  { %v114_v11 = vld [vmem:[%s27419_s1 + $0x260] sm:$0xff]  ;;  %2810 = vmatpush1.bf16.msra.mxu1 %v16650_v14  ;;  %v47_v14 = vld [vmem:[%s27419_s1 + $0x48] sm:$0xff] }
  0x28   :  { %v238_v12 = vld [vmem:[%s27419_s1 + $0x640] sm:$0xff]  ;;  %v16659_v16 = vcombine.high %v110_v10, %v114_v11  ;;  %2850 = vmatprep.subr.bf16.mxu0 %v16779_v9  ;;  %v16658_v22 = vcombine.low %v110_v10, %v114_v11 }
  0x29   :  { %v242_v13 = vld [vmem:[%s27419_s1 + $0x660] sm:$0xff]  ;;  %2851 = vmatpush1.bf16.msra.mxu0 %v16778_v15  ;;  %v51_v15 = vld [vmem:[%s27419_s1 + $0x68] sm:$0xff] }
  0x2a   :  { %v16787_v17 = vcombine.high %v238_v12, %v242_v13  ;;  %v118_v18 = vld [vmem:[%s27419_s1 + $0x280] sm:$0xff]  ;;  %2811 = vmatprep.subr.bf16.mxu1 %v16659_v16  ;;  %v16786_v23 = vcombine.low %v238_v12, %v242_v13  ;;  %v16589_v12 = vcombine.high %v39_v6, %v43_v7  ;;  %v20987_v16 = vcombine.low %v20842_v53, %v20842_v53 }
  0x2b   :  { %v122_v19 = vld [vmem:[%s27419_s1 + $0x2a0] sm:$0xff]  ;;  %2812 = vmatpush1.bf16.msra.mxu1 %v16658_v22  ;;  %v16597_v22 = vcombine.high %v47_v14, %v51_v15 }
  0x2c   :  { %v246_v20 = vld [vmem:[%s27419_s1 + $0x680] sm:$0xff]  ;;  %v16667_v24 = vcombine.high %v118_v18, %v122_v19  ;;  %2852 = vmatprep.subr.bf16.mxu0 %v16787_v17  ;;  %v16666_v30 = vcombine.low %v118_v18, %v122_v19  ;;  %v20998_v19 = vld [vmem:[%s27418_s0 + $0x10] sm:$0xff] }
  0x2d   :  { %v250_v21 = vld [vmem:[%s27419_s1 + $0x6a0] sm:$0xff]  ;;  %2853 = vmatpush1.bf16.msra.mxu0 %v16786_v23 }
  0x2e   :  { %v16795_v25 = vcombine.high %v246_v20, %v250_v21  ;;  %v126_v26 = vld [vmem:[%s27419_s1 + $0x2c0] sm:$0xff]  ;;  %2813 = vmatprep.subr.bf16.mxu1 %v16667_v24  ;;  %v16794_v31 = vcombine.low %v246_v20, %v250_v21  ;;  %v16588_v20 = vcombine.low %v39_v6, %v43_v7  ;;  %v21002_v21 = vcombine.low %v20847_v54, %v20847_v54  ;;  %v59_v54 = vld [vmem:[%s27419_s1 + $0xa8] sm:$0xff] }
  0x2f   :  { %v130_v27 = vld [vmem:[%s27419_s1 + $0x2e0] sm:$0xff]  ;;  %2814 = vmatpush1.bf16.msra.mxu1 %v16666_v30  ;;  %v99_v7 = vld [vmem:[%s27419_s1 + $0x1e8] sm:$0xff] }
  0x30   :  { %v254_v28 = vld [vmem:[%s27419_s1 + $0x6c0] sm:$0xff]  ;;  %v16675_v32 = vcombine.high %v126_v26, %v130_v27  ;;  %2854 = vmatprep.subr.bf16.mxu0 %v16795_v25  ;;  %v16674_v38 = vcombine.low %v126_v26, %v130_v27  ;;  %v55_v26 = vld [vmem:[%s27419_s1 + $0x88] sm:$0xff]  ;;  %v21018_v27 = vcombine.high %v20998_v19, %v20998_v19 }
  0x31   :  { %v258_v29 = vld [vmem:[%s27419_s1 + $0x6e0] sm:$0xff]  ;;  %2855 = vmatpush1.bf16.msra.mxu0 %v16794_v31  ;;  %v16605_v30 = vcombine.high %v55_v26, %v59_v54 }
  0x32   :  { %v16803_v33 = vcombine.high %v254_v28, %v258_v29  ;;  %v134_v34 = vld [vmem:[%s27419_s1 + $0x300] sm:$0xff]  ;;  %2815 = vmatprep.subr.bf16.mxu1 %v16675_v32  ;;  %v16802_v39 = vcombine.low %v254_v28, %v258_v29  ;;  %v16596_v28 = vcombine.low %v47_v14, %v51_v15  ;;  %v107_v15 = vld [vmem:[%s27419_s1 + $0x228] sm:$0xff] }
  0x33   :  { %v138_v35 = vld [vmem:[%s27419_s1 + $0x320] sm:$0xff]  ;;  %2816 = vmatpush1.bf16.msra.mxu1 %v16674_v38 }
  0x34   :  { %v262_v36 = vld [vmem:[%s27419_s1 + $0x700] sm:$0xff]  ;;  %v16683_v40 = vcombine.high %v134_v34, %v138_v35  ;;  %2856 = vmatprep.subr.bf16.mxu0 %v16803_v33  ;;  %v16682_v46 = vcombine.low %v134_v34, %v138_v35  ;;  %v63_v33 = vld [vmem:[%s27419_s1 + $0xc8] sm:$0xff] }
  0x35   :  { %v266_v37 = vld [vmem:[%s27419_s1 + $0x720] sm:$0xff]  ;;  %2857 = vmatpush1.bf16.msra.mxu0 %v16802_v39  ;;  %v67_v35 = vld [vmem:[%s27419_s1 + $0xe8] sm:$0xff] }
  0x36   :  { %v16811_v41 = vcombine.high %v262_v36, %v266_v37  ;;  %v142_v42 = vld [vmem:[%s27419_s1 + $0x340] sm:$0xff]  ;;  %2817 = vmatprep.subr.bf16.mxu1 %v16683_v40  ;;  %v16810_v47 = vcombine.low %v262_v36, %v266_v37  ;;  %v16604_v36 = vcombine.low %v55_v26, %v59_v54  ;;  %v16613_v38 = vcombine.high %v63_v33, %v67_v35 }
  0x37   :  { %v146_v43 = vld [vmem:[%s27419_s1 + $0x360] sm:$0xff]  ;;  %2818 = vmatpush1.bf16.msra.mxu1 %v16682_v46 }
  0x38   :  { %v270_v44 = vld [vmem:[%s27419_s1 + $0x740] sm:$0xff]  ;;  %v16691_v48 = vcombine.high %v142_v42, %v146_v43  ;;  %2858 = vmatprep.subr.bf16.mxu0 %v16811_v41  ;;  %v16690_v56 = vcombine.low %v142_v42, %v146_v43  ;;  %v71_v41 = vld [vmem:[%s27419_s1 + $0x108] sm:$0xff] }
  0x39   :  { %v274_v45 = vld [vmem:[%s27419_s1 + $0x760] sm:$0xff]  ;;  %2859 = vmatpush1.bf16.msra.mxu0 %v16810_v47  ;;  %v75_v43 = vld [vmem:[%s27419_s1 + $0x128] sm:$0xff] }
  0x3a   :  { %v16819_v49 = vcombine.high %v270_v44, %v274_v45  ;;  %v150_v50 = vld [vmem:[%s27419_s1 + $0x380] sm:$0xff]  ;;  %2819 = vmatprep.subr.bf16.mxu1 %v16691_v48  ;;  %v16818_v57 = vcombine.low %v270_v44, %v274_v45  ;;  %v16612_v44 = vcombine.low %v63_v33, %v67_v35  ;;  %v16621_v46 = vcombine.high %v71_v41, %v75_v43  ;;  %v123_v33 = vld [vmem:[%s27419_s1 + $0x2a8] sm:$0xff] }
  0x3b   :  { %v154_v51 = vld [vmem:[%s27419_s1 + $0x3a0] sm:$0xff]  ;;  %2820 = vmatpush1.bf16.msra.mxu1 %v16690_v56 }
  0x3c   :  { %v278_v52 = vld [vmem:[%s27419_s1 + $0x780] sm:$0xff]  ;;  %v16699_v59 = vcombine.high %v150_v50, %v154_v51  ;;  %2860 = vmatprep.subr.bf16.mxu0 %v16819_v49  ;;  %v16698_v2 = vcombine.low %v150_v50, %v154_v51  ;;  %v79_v49 = vld [vmem:[%s27419_s1 + $0x148] sm:$0xff] }
  0x3d   :  { %v282_v55 = vld [vmem:[%s27419_s1 + $0x7a0] sm:$0xff]  ;;  %2861 = vmatpush1.bf16.msra.mxu0 %v16818_v57  ;;  %v83_v51 = vld [vmem:[%s27419_s1 + $0x168] sm:$0xff] }
  0x3e   :  { %v16827_v60 = vcombine.high %v278_v52, %v282_v55  ;;  %v158_v62 = vld [vmem:[%s27419_s1 + $0x3c0] sm:$0xff]  ;;  %2821 = vmatprep.subr.bf16.mxu1 %v16699_v59  ;;  %v16826_v3 = vcombine.low %v278_v52, %v282_v55  ;;  %v16620_v52 = vcombine.low %v71_v41, %v75_v43  ;;  %v16629_v56 = vcombine.high %v79_v49, %v83_v51  ;;  %v131_v41 = vld [vmem:[%s27419_s1 + $0x2e8] sm:$0xff] }
  0x3f   :  { %v162_v63 = vld [vmem:[%s27419_s1 + $0x3e0] sm:$0xff]  ;;  %2822 = vmatpush1.bf16.msra.mxu1 %v16698_v2 }
  0x40   :  { %v286_v0 = vld [vmem:[%s27419_s1 + $0x7c0] sm:$0xff]  ;;  %v16707_v4 = vcombine.high %v158_v62, %v162_v63  ;;  %2862 = vmatprep.subr.bf16.mxu0 %v16827_v60  ;;  %v16706_v10 = vcombine.low %v158_v62, %v162_v63  ;;  %v87_v60 = vld [vmem:[%s27419_s1 + $0x188] sm:$0xff] }
  0x41   :  { %v290_v1 = vld [vmem:[%s27419_s1 + $0x7e0] sm:$0xff]  ;;  %2863 = vmatpush1.bf16.msra.mxu0 %v16826_v3  ;;  %v91_v63 = vld [vmem:[%s27419_s1 + $0x1a8] sm:$0xff] }
  0x42   :  { %v16835_v5 = vcombine.high %v286_v0, %v290_v1  ;;  %v294_v8 = vld [vmem:[%s27419_s1 + $0x800] sm:$0xff]  ;;  %2823 = vmatprep.subr.bf16.mxu1 %v16707_v4  ;;  %v16834_v11 = vcombine.low %v286_v0, %v290_v1  ;;  %v16628_v0 = vcombine.low %v79_v49, %v83_v51  ;;  %v16637_v2 = vcombine.high %v87_v60, %v91_v63  ;;  %v139_v49 = vld [vmem:[%s27419_s1 + $0x328] sm:$0xff] }
  0x43   :  { %v298_v9 = vld [vmem:[%s27419_s1 + $0x820] sm:$0xff]  ;;  %2824 = vmatpush1.bf16.msra.mxu1 %v16706_v10 }
  0x44   :  { %2864 = vmatprep.subr.bf16.mxu0 %v16835_v5  ;;  %v16843_v13 = vcombine.high %v294_v8, %v298_v9  ;;  %v302_v17 = vld [vmem:[%s27419_s1 + $0x840] sm:$0xff]  ;;  %v16842_v53 = vcombine.low %v294_v8, %v298_v9  ;;  %2957 = vmatprep.subr.bf16.mxu1 %v16589_v12  ;;  %v95_v5 = vld [vmem:[%s27419_s1 + $0x1c8] sm:$0xff]  ;;  %v16636_v8 = vcombine.low %v87_v60, %v91_v63 }
  0x45   :  { %v306_v18 = vld [vmem:[%s27419_s1 + $0x860] sm:$0xff]  ;;  %2865 = vmatpush1.bf16.msra.mxu0 %v16834_v11  ;;  %v16645_v10 = vcombine.high %v95_v5, %v99_v7  ;;  %v147_v60 = vld [vmem:[%s27419_s1 + $0x368] sm:$0xff] }
  0x46   :  { %v310_v23 = vld [vmem:[%s27419_s1 + $0x880] sm:$0xff]  ;;  %2875 = vmatprep.subr.bf16.mxu0 %v16843_v13  ;;  %v16851_v24 = vcombine.high %v302_v17, %v306_v18  ;;  %2826 = vmatmul.mubr.bf16.vlgmr.msra.gmra.mrb[0].mxu1 %v20987_v16  ;;  %v16850_v29 = vcombine.low %v302_v17, %v306_v18  ;;  %v103_v13 = vld [vmem:[%s27419_s1 + $0x208] sm:$0xff]  ;;  %v16644_v17 = vcombine.low %v95_v5, %v99_v7 }
  0x47   :  { %v314_v25 = vld [vmem:[%s27419_s1 + $0x8a0] sm:$0xff]  ;;  %2958 = vmatpush1.bf16.msra.mxu1 %v16588_v20  ;;  %2989 = vmatprep.mubr.bf16.mxu1 %v20857_v58  ;;  %v16653_v20 = vcombine.high %v103_v13, %v107_v15  ;;  %v16652_v26 = vcombine.low %v103_v13, %v107_v15  ;;  %v155_v5 = vld [vmem:[%s27419_s1 + $0x3a8] sm:$0xff] }
  0x48   :  { %2867 = vmatmul.mubr.bf16.vlgmr.msra.gmra.mrb[0].mxu0 %v21002_v21  ;;  %2959 = vmatprep.subr.bf16.mxu1 %v16597_v22  ;;  %v318_v31 = vld [vmem:[%s27419_s1 + $0x8c0] sm:$0xff]  ;;  %v16859_v34 = vcombine.high %v310_v23, %v314_v25  ;;  %v16858_v37 = vcombine.low %v310_v23, %v314_v25  ;;  %v111_v23 = vld [vmem:[%s27419_s1 + $0x248] sm:$0xff] }
  0x49   :  { %2876 = vmatpush1.bf16.msra.mxu0 %v16842_v53  ;;  %v322_v32 = vld [vmem:[%s27419_s1 + $0x8e0] sm:$0xff]  ;;  %2907 = vmatprep.mubr.bf16.mxu0 %v21018_v27  ;;  %v115_v25 = vld [vmem:[%s27419_s1 + $0x268] sm:$0xff] }
  0x4a   :  { %2877 = vmatprep.subr.bf16.mxu0 %v16851_v24  ;;  %v326_v39 = vld [vmem:[%s27419_s1 + $0x900] sm:$0xff]  ;;  %v16867_v42 = vcombine.high %v318_v31, %v322_v32  ;;  %v16866_v45 = vcombine.low %v318_v31, %v322_v32  ;;  %v119_v31 = vld [vmem:[%s27419_s1 + $0x288] sm:$0xff] }
  0x4b   :  { %2960 = vmatpush1.bf16.msra.mxu1 %v16596_v28  ;;  %v330_v40 = vld [vmem:[%s27419_s1 + $0x920] sm:$0xff]  ;;  %v16661_v28 = vcombine.high %v111_v23, %v115_v25  ;;  %v163_v13 = vld [vmem:[%s27419_s1 + $0x3e8] sm:$0xff] }
  0x4c   :  { %2961 = vmatprep.subr.bf16.mxu1 %v16605_v30  ;;  %v334_v47 = vld [vmem:[%s27419_s1 + $0x940] sm:$0xff]  ;;  %v16875_v50 = vcombine.high %v326_v39, %v330_v40  ;;  %v16874_v55 = vcombine.low %v326_v39, %v330_v40  ;;  %v127_v39 = vld [vmem:[%s27419_s1 + $0x2c8] sm:$0xff] }
  0x4d   :  { %2878 = vmatpush1.bf16.msra.mxu0 %v16850_v29  ;;  %v338_v48 = vld [vmem:[%s27419_s1 + $0x960] sm:$0xff] }
  0x4e   :  { %2879 = vmatprep.subr.bf16.mxu0 %v16859_v34  ;;  %v342_v57 = vld [vmem:[%s27419_s1 + $0x980] sm:$0xff]  ;;  %v16883_v62 = vcombine.high %v334_v47, %v338_v48  ;;  %v16882_v1 = vcombine.low %v334_v47, %v338_v48  ;;  %v16660_v34 = vcombine.low %v111_v23, %v115_v25  ;;  %v135_v47 = vld [vmem:[%s27419_s1 + $0x308] sm:$0xff] }
  0x4f   :  { %2962 = vmatpush1.bf16.msra.mxu1 %v16604_v36  ;;  %v346_v59 = vld [vmem:[%s27419_s1 + $0x9a0] sm:$0xff]  ;;  %v16669_v36 = vcombine.high %v119_v31, %v123_v33  ;;  %v171_v23 = vld [vmem:[%s27419_s1 + $0x428] sm:$0xff] }
  0x50   :  { %2963 = vmatprep.subr.bf16.mxu1 %v16613_v38  ;;  %v350_v3 = vld [vmem:[%s27419_s1 + $0x9c0] sm:$0xff]  ;;  %v16891_v6 = vcombine.high %v342_v57, %v346_v59  ;;  %v16890_v9 = vcombine.low %v342_v57, %v346_v59  ;;  %v143_v57 = vld [vmem:[%s27419_s1 + $0x348] sm:$0xff] }
  0x51   :  { %2880 = vmatpush1.bf16.msra.mxu0 %v16858_v37  ;;  %v354_v4 = vld [vmem:[%s27419_s1 + $0x9e0] sm:$0xff] }
  0x52   :  { %2881 = vmatprep.subr.bf16.mxu0 %v16867_v42  ;;  %v358_v11 = vld [vmem:[%s27419_s1 + $0xa00] sm:$0xff]  ;;  %v16899_v14 = vcombine.high %v350_v3, %v354_v4  ;;  %v16898_v18 = vcombine.low %v350_v3, %v354_v4  ;;  %v16668_v42 = vcombine.low %v119_v31, %v123_v33  ;;  %v151_v3 = vld [vmem:[%s27419_s1 + $0x388] sm:$0xff]  ;;  %v21206_v33 = vcombine.low %v20998_v19, %v20998_v19 }
  0x53   :  { %2964 = vmatpush1.bf16.msra.mxu1 %v16612_v44  ;;  %v362_v12 = vld [vmem:[%s27419_s1 + $0xa20] sm:$0xff]  ;;  %v16677_v44 = vcombine.high %v127_v39, %v131_v41  ;;  %v179_v31 = vld [vmem:[%s27419_s1 + $0x468] sm:$0xff] }
  0x54   :  { %2965 = vmatprep.subr.bf16.mxu1 %v16621_v46  ;;  %v366_v53 = vld [vmem:[%s27419_s1 + $0xa40] sm:$0xff]  ;;  %v16907_v24 = vcombine.high %v358_v11, %v362_v12  ;;  %v16906_v54 = vcombine.low %v358_v11, %v362_v12  ;;  %v159_v11 = vld [vmem:[%s27419_s1 + $0x3c8] sm:$0xff] }
  0x55   :  { %2882 = vmatpush1.bf16.msra.mxu0 %v16866_v45  ;;  %v370_v22 = vld [vmem:[%s27419_s1 + $0xa60] sm:$0xff]  ;;  %v187_v19 = vld [vmem:[%s27419_s1 + $0x4a8] sm:$0xff] }
  0x56   :  { %2883 = vmatprep.subr.bf16.mxu0 %v16875_v50  ;;  %v374_v29 = vld [vmem:[%s27419_s1 + $0xa80] sm:$0xff]  ;;  %v16915_v32 = vcombine.high %v366_v53, %v370_v22  ;;  %v16914_v35 = vcombine.low %v366_v53, %v370_v22  ;;  %v16676_v50 = vcombine.low %v127_v39, %v131_v41  ;;  %v167_v53 = vld [vmem:[%s27419_s1 + $0x408] sm:$0xff] }
  0x57   :  { %2966 = vmatpush1.bf16.msra.mxu1 %v16620_v52  ;;  %v378_v30 = vld [vmem:[%s27419_s1 + $0xaa0] sm:$0xff]  ;;  %v16685_v52 = vcombine.high %v135_v47, %v139_v49 }
  0x58   :  { %2967 = vmatprep.subr.bf16.mxu1 %v16629_v56  ;;  %v382_v37 = vld [vmem:[%s27419_s1 + $0xac0] sm:$0xff]  ;;  %v16923_v40 = vcombine.high %v374_v29, %v378_v30  ;;  %v16922_v43 = vcombine.low %v374_v29, %v378_v30  ;;  %v175_v29 = vld [vmem:[%s27419_s1 + $0x448] sm:$0xff] }
  0x59   :  { %2884 = vmatpush1.bf16.msra.mxu0 %v16874_v55  ;;  %v386_v38 = vld [vmem:[%s27419_s1 + $0xae0] sm:$0xff] }
  0x5a   :  { %2885 = vmatprep.subr.bf16.mxu0 %v16883_v62  ;;  %v390_v45 = vld [vmem:[%s27419_s1 + $0xb00] sm:$0xff]  ;;  %v16931_v48 = vcombine.high %v382_v37, %v386_v38  ;;  %v16930_v51 = vcombine.low %v382_v37, %v386_v38  ;;  %v16684_v62 = vcombine.low %v135_v47, %v139_v49  ;;  %v183_v38 = vld [vmem:[%s27419_s1 + $0x488] sm:$0xff] }
  0x5b   :  { %2968 = vmatpush1.bf16.msra.mxu1 %v16628_v0  ;;  %v394_v46 = vld [vmem:[%s27419_s1 + $0xb20] sm:$0xff]  ;;  %v16693_v0 = vcombine.high %v143_v57, %v147_v60  ;;  %v195_v47 = vld [vmem:[%s27419_s1 + $0x4e8] sm:$0xff]  ;;  %v16732_v49 = vcombine.low %v183_v38, %v187_v19 }
  0x5c   :  { %2969 = vmatprep.subr.bf16.mxu1 %v16637_v2  ;;  %v398_v55 = vld [vmem:[%s27419_s1 + $0xb40] sm:$0xff]  ;;  %v16939_v59 = vcombine.high %v390_v45, %v394_v46  ;;  %v16938_v63 = vcombine.low %v390_v45, %v394_v46  ;;  %v191_v45 = vld [vmem:[%s27419_s1 + $0x4c8] sm:$0xff] }
  0x5d   :  { %2886 = vmatpush1.bf16.msra.mxu0 %v16882_v1  ;;  %v402_v56 = vld [vmem:[%s27419_s1 + $0xb60] sm:$0xff] }
  0x5e   :  { %2887 = vmatprep.subr.bf16.mxu0 %v16891_v6  ;;  %v406_v1 = vld [vmem:[%s27419_s1 + $0xb80] sm:$0xff]  ;;  %v16947_v4 = vcombine.high %v398_v55, %v402_v56  ;;  %v16692_v6 = vcombine.low %v143_v57, %v147_v60  ;;  %v16946_v7 = vcombine.low %v398_v55, %v402_v56  ;;  %v199_v56 = vld [vmem:[%s27419_s1 + $0x508] sm:$0xff]  ;;  %v16740_v60 = vcombine.low %v191_v45, %v195_v47 }
  0x5f   :  { %2970 = vmatpush1.bf16.msra.mxu1 %v16636_v8  ;;  %v410_v2 = vld [vmem:[%s27419_s1 + $0xba0] sm:$0xff]  ;;  %v16701_v8 = vcombine.high %v151_v3, %v155_v5 }
  0x60   :  { %2971 = vmatprep.subr.bf16.mxu1 %v16645_v10  ;;  %v418_v10 = vld [vmem:[%s27419_s1 + $0xbe0] sm:$0xff]  ;;  %v16955_v12 = vcombine.high %v406_v1, %v410_v2  ;;  %v16954_v15 = vcombine.low %v406_v1, %v410_v2  ;;  %v207_v2 = vld [vmem:[%s27419_s1 + $0x548] sm:$0xff] }
  0x61   :  { %2888 = vmatpush1.bf16.msra.mxu0 %v16890_v9  ;;  %v414_v9 = vld [vmem:[%s27419_s1 + $0xbc0] sm:$0xff] }
  0x62   :  { %2889 = vmatprep.subr.bf16.mxu0 %v16899_v14  ;;  %v16700_v14 = vcombine.low %v151_v3, %v155_v5  ;;  %v16963_v22 = vcombine.high %v414_v9, %v418_v10  ;;  %v16962_v25 = vcombine.low %v414_v9, %v418_v10  ;;  %v442_v37 = vld [vmem:[%s27419_s1 + $0xca0] sm:$0xff]  ;;  %v215_v10 = vld [vmem:[%s27419_s1 + $0x588] sm:$0xff] }
  0x63   :  { %2972 = vmatpush1.bf16.msra.mxu1 %v16644_v17  ;;  %v16709_v17 = vcombine.high %v159_v11, %v163_v13  ;;  %v458_v55 = vld [vmem:[%s27419_s1 + $0xd20] sm:$0xff] }
  0x64   :  { %2973 = vmatprep.subr.bf16.mxu1 %v16653_v20  ;;  %v426_v20 = vld [vmem:[%s27419_s1 + $0xc20] sm:$0xff] }
  0x65   :  { %2890 = vmatpush1.bf16.msra.mxu0 %v16898_v18  ;;  %v422_v18 = vld [vmem:[%s27419_s1 + $0xc00] sm:$0xff] }
  0x66   :  { %2891 = vmatprep.subr.bf16.mxu0 %v16907_v24  ;;  %v16708_v24 = vcombine.low %v159_v11, %v163_v13  ;;  %v16971_v30 = vcombine.high %v422_v18, %v426_v20  ;;  %v466_v1 = vld [vmem:[%s27419_s1 + $0xd60] sm:$0xff] }
  0x67   :  { %2974 = vmatpush1.bf16.msra.mxu1 %v16652_v26  ;;  %v16717_v26 = vcombine.high %v167_v53, %v171_v23  ;;  %v474_v9 = vld [vmem:[%s27419_s1 + $0xda0] sm:$0xff] }
  0x68   :  { %2975 = vmatprep.subr.bf16.mxu1 %v16661_v28  ;;  %v434_v28 = vld [vmem:[%s27419_s1 + $0xc60] sm:$0xff] }
  0x69   :  { %2892 = vmatpush1.bf16.msra.mxu0 %v16906_v54  ;;  %v430_v54 = vld [vmem:[%s27419_s1 + $0xc40] sm:$0xff] }
  0x6a   :  { %2893 = vmatprep.subr.bf16.mxu0 %v16915_v32  ;;  %v16716_v32 = vcombine.low %v167_v53, %v171_v23  ;;  %v16979_v39 = vcombine.high %v430_v54, %v434_v28  ;;  %v16978_v41 = vcombine.low %v430_v54, %v434_v28  ;;  %v223_v53 = vld [vmem:[%s27419_s1 + $0x5c8] sm:$0xff]  ;;  %v40_v28 = vld [vmem:[%s27419_s1 + $0x10] sm:$0xff] }
  0x6b   :  { %2976 = vmatpush1.bf16.msra.mxu1 %v16660_v34  ;;  %v16970_v34 = vcombine.low %v422_v18, %v426_v20  ;;  %v482_v18 = vld [vmem:[%s27419_s1 + $0xde0] sm:$0xff]  ;;  %v235_v54 = vld [vmem:[%s27419_s1 + $0x628] sm:$0xff] }
  0x6c   :  { %2977 = vmatprep.subr.bf16.mxu1 %v16669_v36  ;;  %v438_v36 = vld [vmem:[%s27419_s1 + $0xc80] sm:$0xff] }
  0x6d   :  { %2894 = vmatpush1.bf16.msra.mxu0 %v16914_v35  ;;  %v16725_v35 = vcombine.high %v175_v29, %v179_v31  ;;  %v16987_v46 = vcombine.high %v438_v36, %v442_v37 }
  0x6e   :  { %2895 = vmatprep.subr.bf16.mxu0 %v16923_v40  ;;  %v16724_v40 = vcombine.low %v175_v29, %v179_v31 }
  0x6f   :  { %2978 = vmatpush1.bf16.msra.mxu1 %v16668_v42  ;;  %v16733_v42 = vcombine.high %v183_v38, %v187_v19  ;;  %v19199_v38 = vld [vmem:[%s27418_s0 + $0x18] ss:$0 sps:$4 sm:$0xff]   ;;  %v52_v19 = vld [vmem:[%s27419_s1 + $0x70] sm:$0xff] }
  0x70   :  { %2979 = vmatprep.subr.bf16.mxu1 %v16677_v44  ;;  %v450_v44 = vld [vmem:[%s27419_s1 + $0xce0] sm:$0xff] }
  0x71   :  { %2896 = vmatpush1.bf16.msra.mxu0 %v16922_v43  ;;  %v446_v43 = vld [vmem:[%s27419_s1 + $0xcc0] sm:$0xff] }
  0x72   :  { %2897 = vmatprep.subr.bf16.mxu0 %v16931_v48  ;;  %v20701_v48 = vmov 0   ;;  %v16995_v57 = vcombine.high %v446_v43, %v450_v44 }
  0x73   :  { %2980 = vmatpush1.bf16.msra.mxu1 %v16676_v50  ;;  %v16986_v50 = vcombine.low %v438_v36, %v442_v37  ;;  %v243_v36 = vld [vmem:[%s27419_s1 + $0x668] sm:$0xff]  ;;  %v48_v37 = vld [vmem:[%s27419_s1 + $0x50] sm:$0xff] }
  0x74   :  { %2981 = vmatprep.subr.bf16.mxu1 %v16685_v52  ;;  %v454_v52 = vld [vmem:[%s27419_s1 + $0xd00] sm:$0xff] }
  0x75   :  { %2898 = vmatpush1.bf16.msra.mxu0 %v16930_v51  ;;  %v16741_v51 = vcombine.high %v191_v45, %v195_v47  ;;  %v17003_v3 = vcombine.high %v454_v52, %v458_v55  ;;  %v56_v45 = vld [vmem:[%s27419_s1 + $0x90] sm:$0xff] }
  0x76   :  { %2899 = vmatprep.subr.bf16.mxu0 %v16939_v59  ;;  %v203_v59 = vld [vmem:[%s27419_s1 + $0x528] sm:$0xff]  ;;  %v60_v47 = vld [vmem:[%s27419_s1 + $0xb0] sm:$0xff] }
  0x77   :  { %2982 = vmatpush1.bf16.msra.mxu1 %v16684_v62  ;;  %v16994_v62 = vcombine.low %v446_v43, %v450_v44  ;;  %v16748_v5 = vcombine.low %v199_v56, %v203_v59  ;;  %v247_v43 = vld [vmem:[%s27419_s1 + $0x688] sm:$0xff] }
  0x78   :  { %2983 = vmatprep.subr.bf16.mxu1 %v16693_v0  ;;  %v462_v0 = vld [vmem:[%s27419_s1 + $0xd40] sm:$0xff]  ;;  %v251_v44 = vld [vmem:[%s27419_s1 + $0x6a8] sm:$0xff] }
  0x79   :  { %2900 = vmatpush1.bf16.msra.mxu0 %v16938_v63  ;;  %v16749_v63 = vcombine.high %v199_v56, %v203_v59  ;;  %v17011_v11 = vcombine.high %v462_v0, %v466_v1  ;;  %v64_v56 = vld [vmem:[%s27419_s1 + $0xd0] sm:$0xff] }
  0x7a   :  { %2901 = vmatprep.subr.bf16.mxu0 %v16947_v4  ;;  %v211_v4 = vld [vmem:[%s27419_s1 + $0x568] sm:$0xff]  ;;  %v68_v59 = vld [vmem:[%s27419_s1 + $0xf0] sm:$0xff] }
  0x7b   :  { %2984 = vmatpush1.bf16.msra.mxu1 %v16692_v6  ;;  %v17002_v6 = vcombine.low %v454_v52, %v458_v55  ;;  %v16756_v13 = vcombine.low %v207_v2, %v211_v4  ;;  %v255_v52 = vld [vmem:[%s27419_s1 + $0x6c8] sm:$0xff] }
  0x7c   :  { %2985 = vmatprep.subr.bf16.mxu1 %v16701_v8  ;;  %v470_v8 = vld [vmem:[%s27419_s1 + $0xd80] sm:$0xff]  ;;  %v259_v55 = vld [vmem:[%s27419_s1 + $0x6e8] sm:$0xff] }
  0x7d   :  { %2902 = vmatpush1.bf16.msra.mxu0 %v16946_v7  ;;  %v16757_v7 = vcombine.high %v207_v2, %v211_v4  ;;  %v17019_v20 = vcombine.high %v470_v8, %v474_v9  ;;  %v72_v2 = vld [vmem:[%s27419_s1 + $0x110] sm:$0xff] }
  0x7e   :  { %2903 = vmatprep.subr.bf16.mxu0 %v16955_v12  ;;  %v219_v12 = vld [vmem:[%s27419_s1 + $0x5a8] sm:$0xff]  ;;  %v76_v4 = vld [vmem:[%s27419_s1 + $0x130] sm:$0xff] }
  0x7f   :  { %2986 = vmatpush1.bf16.msra.mxu1 %v16700_v14  ;;  %v17010_v14 = vcombine.low %v462_v0, %v466_v1  ;;  %v16764_v23 = vcombine.low %v215_v10, %v219_v12  ;;  %v263_v0 = vld [vmem:[%s27419_s1 + $0x708] sm:$0xff] }
  0x80   :  { %2987 = vmatprep.subr.bf16.mxu1 %v16709_v17  ;;  %v478_v17 = vld [vmem:[%s27419_s1 + $0xdc0] sm:$0xff]  ;;  %v267_v1 = vld [vmem:[%s27419_s1 + $0x728] sm:$0xff] }
  0x81   :  { %2904 = vmatpush1.bf16.msra.mxu0 %v16954_v15  ;;  %v16765_v15 = vcombine.high %v215_v10, %v219_v12  ;;  %v17027_v29 = vcombine.high %v478_v17, %v482_v18  ;;  %v80_v10 = vld [vmem:[%s27419_s1 + $0x150] sm:$0xff] }
  0x82   :  { %2905 = vmatprep.subr.bf16.mxu0 %v16963_v22  ;;  %v227_v22 = vld [vmem:[%s27419_s1 + $0x5e8] sm:$0xff]  ;;  %v84_v12 = vld [vmem:[%s27419_s1 + $0x170] sm:$0xff] }
  0x83   :  { %2988 = vmatpush1.bf16.msra.mxu1 %v16708_v24  ;;  %v17018_v24 = vcombine.low %v470_v8, %v474_v9  ;;  %v16772_v31 = vcombine.low %v223_v53, %v227_v22  ;;  %v271_v8 = vld [vmem:[%s27419_s1 + $0x748] sm:$0xff] }
  0x84   :  { %2998 = vmatprep.subr.bf16.mxu1 %v16717_v26  ;;  %v231_v26 = vld [vmem:[%s27419_s1 + $0x608] sm:$0xff] }
  0x85   :  { %2906 = vmatpush1.bf16.msra.mxu0 %v16962_v25  ;;  %v16773_v25 = vcombine.high %v223_v53, %v227_v22  ;;  %v275_v9 = vld [vmem:[%s27419_s1 + $0x768] sm:$0xff]  ;;  %v16631_v53 = vcombine.high %v80_v10, %v84_v12  ;;  %v92_v22 = vld [vmem:[%s27419_s1 + $0x1b0] sm:$0xff] }
  0x86   :  { %2916 = vmatprep.subr.bf16.mxu0 %v16971_v30  ;;  %2990 = vmatmul.mubr.bf16.vlgmr.msra.gmra.mrb[4].mxu1 %v20987_v16  ;;  %v44_v30 = vld [vmem:[%s27419_s1 + $0x30] sm:$0xff] }
  0x87   :  { %2999 = vmatpush1.bf16.msra.mxu1 %v16716_v32  ;;  %3030 = vmatprep.mubr.bf16.mxu1 %v20867_v61  ;;  %v17026_v32 = vcombine.low %v478_v17, %v482_v18  ;;  %v279_v17 = vld [vmem:[%s27419_s1 + $0x788] sm:$0xff] }
  0x88   :  { %2908 = vmatmul.mubr.bf16.vlgmr.msra.gmra.mrb[0].mxu0 %v21206_v33  ;;  %3000 = vmatprep.subr.bf16.mxu1 %v16725_v35  ;;  %v239_v35 = vld [vmem:[%s27419_s1 + $0x648] sm:$0xff] }
  0x89   :  { %2917 = vmatpush1.bf16.msra.mxu0 %v16970_v34  ;;  %2948 = vmatprep.mubr.bf16.mxu0 %v20701_v48  ;;  %v16781_v34 = vcombine.high %v231_v26, %v235_v54  ;;  %v283_v18 = vld [vmem:[%s27419_s1 + $0x7a8] sm:$0xff] }
  0x8a   :  { %2918 = vmatprep.subr.bf16.mxu0 %v16979_v39  ;;  %v16591_v39 = vcombine.high %v40_v28, %v44_v30 }
  0x8b   :  { %3001 = vmatpush1.bf16.msra.mxu1 %v16724_v40  ;;  %v16780_v40 = vcombine.low %v231_v26, %v235_v54  ;;  %v287_v26 = vld [vmem:[%s27419_s1 + $0x7c8] sm:$0xff] }
  0x8c   :  { %3002 = vmatprep.subr.bf16.mxu1 %v16733_v42  ;;  %v16789_v42 = vcombine.high %v239_v35, %v243_v36  ;;  %v291_v54 = vld [vmem:[%s27419_s1 + $0x7e8] sm:$0xff] }
  0x8d   :  { %2919 = vmatpush1.bf16.msra.mxu0 %v16978_v41  ;;  %v16590_v41 = vcombine.low %v40_v28, %v44_v30  ;;  %v96_v28 = vld [vmem:[%s27419_s1 + $0x1d0] sm:$0xff] }
  0x8e   :  { %2920 = vmatprep.subr.bf16.mxu0 %v16987_v46  ;;  %v16599_v46 = vcombine.high %v48_v37, %v52_v19  ;;  %v100_v30 = vld [vmem:[%s27419_s1 + $0x1f0] sm:$0xff] }
  0x8f   :  { %3003 = vmatpush1.bf16.msra.mxu1 %v16732_v49  ;;  %v16788_v49 = vcombine.low %v239_v35, %v243_v36  ;;  %v295_v35 = vld [vmem:[%s27419_s1 + $0x808] sm:$0xff] }
  0x90   :  { %3004 = vmatprep.subr.bf16.mxu1 %v16741_v51  ;;  %v16797_v51 = vcombine.high %v247_v43, %v251_v44  ;;  %v299_v36 = vld [vmem:[%s27419_s1 + $0x828] sm:$0xff] }
  0x91   :  { %2921 = vmatpush1.bf16.msra.mxu0 %v16986_v50  ;;  %v16598_v50 = vcombine.low %v48_v37, %v52_v19  ;;  %v104_v37 = vld [vmem:[%s27419_s1 + $0x210] sm:$0xff]  ;;  %v16836_v19 = vcombine.low %v287_v26, %v291_v54 }
  0x92   :  { %2922 = vmatprep.subr.bf16.mxu0 %v16995_v57  ;;  %v16607_v57 = vcombine.high %v56_v45, %v60_v47 }
  0x93   :  { %3005 = vmatpush1.bf16.msra.mxu1 %v16740_v60  ;;  %v16796_v60 = vcombine.low %v247_v43, %v251_v44  ;;  %v307_v43 = vld [vmem:[%s27419_s1 + $0x868] sm:$0xff]  ;;  %v112_v44 = vld [vmem:[%s27419_s1 + $0x250] sm:$0xff] }
  0x94   :  { %3006 = vmatprep.subr.bf16.mxu1 %v16749_v63  ;;  %v16805_v63 = vcombine.high %v255_v52, %v259_v55 }
  0x95   :  { %2923 = vmatpush1.bf16.msra.mxu0 %v16994_v62  ;;  %v16606_v62 = vcombine.low %v56_v45, %v60_v47  ;;  %v16844_v47 = vcombine.low %v295_v35, %v299_v36 }
  0x96   :  { %2924 = vmatprep.subr.bf16.mxu0 %v17003_v3  ;;  %v16615_v3 = vcombine.high %v64_v56, %v68_v59 }
  0x97   :  { %3007 = vmatpush1.bf16.msra.mxu1 %v16748_v5  ;;  %v16804_v5 = vcombine.low %v255_v52, %v259_v55  ;;  %v315_v52 = vld [vmem:[%s27419_s1 + $0x8a8] sm:$0xff]  ;;  %v120_v55 = vld [vmem:[%s27419_s1 + $0x290] sm:$0xff] }
  0x98   :  { %3008 = vmatprep.subr.bf16.mxu1 %v16757_v7  ;;  %v16813_v7 = vcombine.high %v263_v0, %v267_v1 }
  0x99   :  { %2925 = vmatpush1.bf16.msra.mxu0 %v17002_v6  ;;  %v16614_v6 = vcombine.low %v64_v56, %v68_v59 }
  0x9a   :  { %2926 = vmatprep.subr.bf16.mxu0 %v17011_v11  ;;  %v16623_v11 = vcombine.high %v72_v2, %v76_v4 }
  0x9b   :  { %3009 = vmatpush1.bf16.msra.mxu1 %v16756_v13  ;;  %v16812_v13 = vcombine.low %v263_v0, %v267_v1  ;;  %v323_v0 = vld [vmem:[%s27419_s1 + $0x8e8] sm:$0xff]  ;;  %v128_v1 = vld [vmem:[%s27419_s1 + $0x2d0] sm:$0xff] }
  0x9c   :  { %3010 = vmatprep.subr.bf16.mxu1 %v16765_v15  ;;  %v16821_v15 = vcombine.high %v271_v8, %v275_v9 }
  0x9d   :  { %2927 = vmatpush1.bf16.msra.mxu0 %v17010_v14  ;;  %v16622_v14 = vcombine.low %v72_v2, %v76_v4 }
  0x9e   :  { %2928 = vmatprep.subr.bf16.mxu0 %v17019_v20  ;;  %v88_v20 = vld [vmem:[%s27419_s1 + $0x190] sm:$0xff] }
  0x9f   :  { %3011 = vmatpush1.bf16.msra.mxu1 %v16764_v23  ;;  %v16820_v23 = vcombine.low %v271_v8, %v275_v9  ;;  %v331_v8 = vld [vmem:[%s27419_s1 + $0x928] sm:$0xff]  ;;  %v136_v9 = vld [vmem:[%s27419_s1 + $0x310] sm:$0xff] }
  0xa0   :  { %3012 = vmatprep.subr.bf16.mxu1 %v16773_v25  ;;  %v16829_v25 = vcombine.high %v279_v17, %v283_v18 }
  0xa1   :  { %2929 = vmatpush1.bf16.msra.mxu0 %v17018_v24  ;;  %v16630_v24 = vcombine.low %v80_v10, %v84_v12 }
  0xa2   :  { %2930 = vmatprep.subr.bf16.mxu0 %v17027_v29  ;;  %v16639_v29 = vcombine.high %v88_v20, %v92_v22 }
  0xa3   :  { %3013 = vmatpush1.bf16.msra.mxu1 %v16772_v31  ;;  %v16828_v31 = vcombine.low %v279_v17, %v283_v18  ;;  %v339_v17 = vld [vmem:[%s27419_s1 + $0x968] sm:$0xff]  ;;  %v144_v18 = vld [vmem:[%s27419_s1 + $0x350] sm:$0xff] }
  0xa4   :  { %3014 = vmatprep.subr.bf16.mxu1 %v16781_v34  ;;  %v16837_v34 = vcombine.high %v287_v26, %v291_v54  ;;  %v347_v26 = vld [vmem:[%s27419_s1 + $0x9a8] sm:$0xff]  ;;  %v152_v54 = vld [vmem:[%s27419_s1 + $0x390] sm:$0xff] }
  0xa5   :  { %2931 = vmatpush1.bf16.msra.mxu0 %v17026_v32  ;;  %v16638_v32 = vcombine.low %v88_v20, %v92_v22 }
  0xa6   :  { %3121 = vmatprep.subr.bf16.mxu0 %v16591_v39  ;;  %v108_v39 = vld [vmem:[%s27419_s1 + $0x230] sm:$0xff] }
  0xa7   :  { %3015 = vmatpush1.bf16.msra.mxu1 %v16780_v40  ;;  %v16646_v40 = vcombine.low %v96_v28, %v100_v30  ;;  %v16655_v45 = vcombine.high %v104_v37, %v108_v39 }
  0xa8   :  { %2949 = vmatmul.mubr.bf16.vlgmr.msra.gmra.mrb[0].mxu0 %v19199_v38  ;;  %3016 = vmatprep.subr.bf16.mxu1 %v16789_v42  ;;  %v16647_v38 = vcombine.high %v96_v28, %v100_v30  ;;  %v303_v42 = vld [vmem:[%s27419_s1 + $0x848] sm:$0xff] }
  0xa9   :  { %3122 = vmatpush1.bf16.msra.mxu0 %v16590_v41  ;;  %3153 = vmatprep.mubr.bf16.mxu0 %v20857_v58  ;;  %v16845_v41 = vcombine.high %v295_v35, %v299_v36  ;;  %v16852_v59 = vcombine.low %v303_v42, %v307_v43  ;;  %v355_v35 = vld [vmem:[%s27419_s1 + $0x9e8] sm:$0xff]  ;;  %v160_v36 = vld [vmem:[%s27419_s1 + $0x3d0] sm:$0xff] }
  0xaa   :  { %3123 = vmatprep.subr.bf16.mxu0 %v16599_v46  ;;  %v116_v46 = vld [vmem:[%s27419_s1 + $0x270] sm:$0xff] }
  0xab   :  { %3017 = vmatpush1.bf16.msra.mxu1 %v16788_v49  ;;  %v16654_v49 = vcombine.low %v104_v37, %v108_v39  ;;  %v16663_v56 = vcombine.high %v112_v44, %v116_v46 }
  0xac   :  { %3018 = vmatprep.subr.bf16.mxu1 %v16797_v51  ;;  %v311_v51 = vld [vmem:[%s27419_s1 + $0x888] sm:$0xff] }
  0xad   :  { %3124 = vmatpush1.bf16.msra.mxu0 %v16598_v50  ;;  %v16853_v50 = vcombine.high %v303_v42, %v307_v43  ;;  %v16860_v4 = vcombine.low %v311_v51, %v315_v52  ;;  %v363_v42 = vld [vmem:[%s27419_s1 + $0xa28] sm:$0xff]  ;;  %v168_v43 = vld [vmem:[%s27419_s1 + $0x410] sm:$0xff] }
  0xae   :  { %3125 = vmatprep.subr.bf16.mxu0 %v16607_v57  ;;  %v124_v57 = vld [vmem:[%s27419_s1 + $0x2b0] sm:$0xff] }
  0xaf   :  { %3019 = vmatpush1.bf16.msra.mxu1 %v16796_v60  ;;  %v16662_v60 = vcombine.low %v112_v44, %v116_v46  ;;  %v16671_v2 = vcombine.high %v120_v55, %v124_v57 }
  0xb0   :  { %3020 = vmatprep.subr.bf16.mxu1 %v16805_v63  ;;  %v319_v63 = vld [vmem:[%s27419_s1 + $0x8c8] sm:$0xff] }
  0xb1   :  { %3126 = vmatpush1.bf16.msra.mxu0 %v16606_v62  ;;  %v16861_v62 = vcombine.high %v311_v51, %v315_v52  ;;  %v16868_v12 = vcombine.low %v319_v63, %v323_v0  ;;  %v371_v51 = vld [vmem:[%s27419_s1 + $0xa68] sm:$0xff]  ;;  %v176_v52 = vld [vmem:[%s27419_s1 + $0x450] sm:$0xff] }
  0xb2   :  { %3127 = vmatprep.subr.bf16.mxu0 %v16615_v3  ;;  %v132_v3 = vld [vmem:[%s27419_s1 + $0x2f0] sm:$0xff] }
  0xb3   :  { %3021 = vmatpush1.bf16.msra.mxu1 %v16804_v5  ;;  %v16670_v5 = vcombine.low %v120_v55, %v124_v57  ;;  %v16679_v10 = vcombine.high %v128_v1, %v132_v3 }
  0xb4   :  { %3022 = vmatprep.subr.bf16.mxu1 %v16813_v7  ;;  %v327_v7 = vld [vmem:[%s27419_s1 + $0x908] sm:$0xff] }
  0xb5   :  { %3128 = vmatpush1.bf16.msra.mxu0 %v16614_v6  ;;  %v16869_v6 = vcombine.high %v319_v63, %v323_v0  ;;  %v16876_v22 = vcombine.low %v327_v7, %v331_v8  ;;  %v379_v63 = vld [vmem:[%s27419_s1 + $0xaa8] sm:$0xff]  ;;  %v184_v0 = vld [vmem:[%s27419_s1 + $0x490] sm:$0xff] }
  0xb6   :  { %3129 = vmatprep.subr.bf16.mxu0 %v16623_v11  ;;  %v140_v11 = vld [vmem:[%s27419_s1 + $0x330] sm:$0xff] }
  0xb7   :  { %3023 = vmatpush1.bf16.msra.mxu1 %v16812_v13  ;;  %v16678_v13 = vcombine.low %v128_v1, %v132_v3  ;;  %v16687_v20 = vcombine.high %v136_v9, %v140_v11 }
  0xb8   :  { %3024 = vmatprep.subr.bf16.mxu1 %v16821_v15  ;;  %v335_v15 = vld [vmem:[%s27419_s1 + $0x948] sm:$0xff] }
  0xb9   :  { %3130 = vmatpush1.bf16.msra.mxu0 %v16622_v14  ;;  %v16877_v14 = vcombine.high %v327_v7, %v331_v8  ;;  %v16884_v30 = vcombine.low %v335_v15, %v339_v17  ;;  %v387_v7 = vld [vmem:[%s27419_s1 + $0xae8] sm:$0xff]  ;;  %v192_v8 = vld [vmem:[%s27419_s1 + $0x4d0] sm:$0xff] }
  0xba   :  { %3131 = vmatprep.subr.bf16.mxu0 %v16631_v53  ;;  %v148_v53 = vld [vmem:[%s27419_s1 + $0x370] sm:$0xff] }
  0xbb   :  { %3025 = vmatpush1.bf16.msra.mxu1 %v16820_v23  ;;  %v16686_v23 = vcombine.low %v136_v9, %v140_v11  ;;  %v16695_v28 = vcombine.high %v144_v18, %v148_v53 }
  0xbc   :  { %3026 = vmatprep.subr.bf16.mxu1 %v16829_v25  ;;  %v343_v25 = vld [vmem:[%s27419_s1 + $0x988] sm:$0xff] }
  0xbd   :  { %3132 = vmatpush1.bf16.msra.mxu0 %v16630_v24  ;;  %v16885_v24 = vcombine.high %v335_v15, %v339_v17  ;;  %v16892_v39 = vcombine.low %v343_v25, %v347_v26  ;;  %v395_v15 = vld [vmem:[%s27419_s1 + $0xb28] sm:$0xff]  ;;  %v200_v17 = vld [vmem:[%s27419_s1 + $0x510] sm:$0xff] }
  0xbe   :  { %3133 = vmatprep.subr.bf16.mxu0 %v16639_v29  ;;  %v156_v29 = vld [vmem:[%s27419_s1 + $0x3b0] sm:$0xff] }
  0xbf   :  { %3027 = vmatpush1.bf16.msra.mxu1 %v16828_v31  ;;  %v16694_v31 = vcombine.low %v144_v18, %v148_v53  ;;  %v16703_v37 = vcombine.high %v152_v54, %v156_v29 }
  0xc0   :  { %3028 = vmatprep.subr.bf16.mxu1 %v16837_v34  ;;  %v351_v34 = vld [vmem:[%s27419_s1 + $0x9c8] sm:$0xff] }
  0xc1   :  { %3134 = vmatpush1.bf16.msra.mxu0 %v16638_v32  ;;  %v16893_v32 = vcombine.high %v343_v25, %v347_v26  ;;  %v16900_v46 = vcombine.low %v351_v34, %v355_v35  ;;  %v403_v25 = vld [vmem:[%s27419_s1 + $0xb68] sm:$0xff]  ;;  %v208_v26 = vld [vmem:[%s27419_s1 + $0x550] sm:$0xff] }
  0xc2   :  { %3135 = vmatprep.subr.bf16.mxu0 %v16647_v38  ;;  %v164_v38 = vld [vmem:[%s27419_s1 + $0x3f0] sm:$0xff] }
  0xc3   :  { %3029 = vmatpush1.bf16.msra.mxu1 %v16836_v19  ;;  %v16702_v19 = vcombine.low %v152_v54, %v156_v29  ;;  %v16711_v44 = vcombine.high %v160_v36, %v164_v38 }
  0xc4   :  { %3039 = vmatprep.subr.bf16.mxu1 %v16845_v41  ;;  %v359_v41 = vld [vmem:[%s27419_s1 + $0xa08] sm:$0xff] }
  0xc5   :  { %3136 = vmatpush1.bf16.msra.mxu0 %v16646_v40  ;;  %v16901_v40 = vcombine.high %v351_v34, %v355_v35  ;;  %v16908_v57 = vcombine.low %v359_v41, %v363_v42  ;;  %v411_v34 = vld [vmem:[%s27419_s1 + $0xba8] sm:$0xff]  ;;  %v216_v35 = vld [vmem:[%s27419_s1 + $0x590] sm:$0xff] }
  0xc6   :  { %3137 = vmatprep.subr.bf16.mxu0 %v16655_v45  ;;  %3031 = vmatmul.mubr.bf16.vlgmr.msra.gmra.mrb[4].mxu1 %v21002_v21  ;;  %v172_v45 = vld [vmem:[%s27419_s1 + $0x430] sm:$0xff] }
  0xc7   :  { %3040 = vmatpush1.bf16.msra.mxu1 %v16844_v47  ;;  %3071 = vmatprep.mubr.bf16.mxu1 %v21018_v27  ;;  %v16710_v47 = vcombine.low %v160_v36, %v164_v38  ;;  %v16719_v55 = vcombine.high %v168_v43, %v172_v45 }
  0xc8   :  { %3041 = vmatprep.subr.bf16.mxu1 %v16853_v50  ;;  %v367_v50 = vld [vmem:[%s27419_s1 + $0xa48] sm:$0xff] }
  0xc9   :  { %3138 = vmatpush1.bf16.msra.mxu0 %v16654_v49  ;;  %v16909_v49 = vcombine.high %v359_v41, %v363_v42  ;;  %v16916_v3 = vcombine.low %v367_v50, %v371_v51  ;;  %v419_v41 = vld [vmem:[%s27419_s1 + $0xbe8] sm:$0xff]  ;;  %v224_v42 = vld [vmem:[%s27419_s1 + $0x5d0] sm:$0xff] }
  0xca   :  { %3139 = vmatprep.subr.bf16.mxu0 %v16663_v56  ;;  %v180_v56 = vld [vmem:[%s27419_s1 + $0x470] sm:$0xff] }
  0xcb   :  { %3042 = vmatpush1.bf16.msra.mxu1 %v16852_v59  ;;  %v16718_v59 = vcombine.low %v168_v43, %v172_v45  ;;  %v16727_v1 = vcombine.high %v176_v52, %v180_v56 }
  0xcc   :  { %3043 = vmatprep.subr.bf16.mxu1 %v16861_v62  ;;  %v375_v62 = vld [vmem:[%s27419_s1 + $0xa88] sm:$0xff] }
  0xcd   :  { %3140 = vmatpush1.bf16.msra.mxu0 %v16662_v60  ;;  %v16917_v60 = vcombine.high %v367_v50, %v371_v51  ;;  %v16924_v11 = vcombine.low %v375_v62, %v379_v63  ;;  %v427_v50 = vld [vmem:[%s27419_s1 + $0xc28] sm:$0xff]  ;;  %v232_v51 = vld [vmem:[%s27419_s1 + $0x610] sm:$0xff] }
  0xce   :  { %3141 = vmatprep.subr.bf16.mxu0 %v16671_v2  ;;  %v188_v2 = vld [vmem:[%s27419_s1 + $0x4b0] sm:$0xff] }
  0xcf   :  { %3044 = vmatpush1.bf16.msra.mxu1 %v16860_v4  ;;  %v16726_v4 = vcombine.low %v176_v52, %v180_v56  ;;  %v16735_v9 = vcombine.high %v184_v0, %v188_v2 }
  0xd0   :  { %3045 = vmatprep.subr.bf16.mxu1 %v16869_v6  ;;  %v383_v6 = vld [vmem:[%s27419_s1 + $0xac8] sm:$0xff] }
  0xd1   :  { %3142 = vmatpush1.bf16.msra.mxu0 %v16670_v5  ;;  %v16925_v5 = vcombine.high %v375_v62, %v379_v63  ;;  %v16932_v53 = vcombine.low %v383_v6, %v387_v7  ;;  %v435_v62 = vld [vmem:[%s27419_s1 + $0xc68] sm:$0xff]  ;;  %v240_v63 = vld [vmem:[%s27419_s1 + $0x650] sm:$0xff] }
  0xd2   :  { %3143 = vmatprep.subr.bf16.mxu0 %v16679_v10  ;;  %v196_v10 = vld [vmem:[%s27419_s1 + $0x4f0] sm:$0xff] }
  0xd3   :  { %3046 = vmatpush1.bf16.msra.mxu1 %v16868_v12  ;;  %v16734_v12 = vcombine.low %v184_v0, %v188_v2  ;;  %v16743_v18 = vcombine.high %v192_v8, %v196_v10 }
  0xd4   :  { %3047 = vmatprep.subr.bf16.mxu1 %v16877_v14  ;;  %v391_v14 = vld [vmem:[%s27419_s1 + $0xb08] sm:$0xff] }
  0xd5   :  { %3144 = vmatpush1.bf16.msra.mxu0 %v16678_v13  ;;  %v16933_v13 = vcombine.high %v383_v6, %v387_v7  ;;  %v16940_v29 = vcombine.low %v391_v14, %v395_v15  ;;  %v443_v6 = vld [vmem:[%s27419_s1 + $0xca8] sm:$0xff] }
  0xd6   :  { %3145 = vmatprep.subr.bf16.mxu0 %v16687_v20  ;;  %v204_v20 = vld [vmem:[%s27419_s1 + $0x530] sm:$0xff] }
  0xd7   :  { %3048 = vmatpush1.bf16.msra.mxu1 %v16876_v22  ;;  %v16742_v22 = vcombine.low %v192_v8, %v196_v10  ;;  %v16751_v54 = vcombine.high %v200_v17, %v204_v20  ;;  %v248_v8 = vld [vmem:[%s27419_s1 + $0x690] sm:$0xff] }
  0xd8   :  { %3049 = vmatprep.subr.bf16.mxu1 %v16885_v24  ;;  %v399_v24 = vld [vmem:[%s27419_s1 + $0xb48] sm:$0xff] }
  0xd9   :  { %3146 = vmatpush1.bf16.msra.mxu0 %v16686_v23  ;;  %v16941_v23 = vcombine.high %v391_v14, %v395_v15  ;;  %v16948_v38 = vcombine.low %v399_v24, %v403_v25  ;;  %v451_v14 = vld [vmem:[%s27419_s1 + $0xce8] sm:$0xff] }
  0xda   :  { %3147 = vmatprep.subr.bf16.mxu0 %v16695_v28  ;;  %v212_v28 = vld [vmem:[%s27419_s1 + $0x570] sm:$0xff] }
  0xdb   :  { %3050 = vmatpush1.bf16.msra.mxu1 %v16884_v30  ;;  %v16750_v30 = vcombine.low %v200_v17, %v204_v20  ;;  %v16759_v36 = vcombine.high %v208_v26, %v212_v28  ;;  %v256_v17 = vld [vmem:[%s27419_s1 + $0x6d0] sm:$0xff] }
  0xdc   :  { %3051 = vmatprep.subr.bf16.mxu1 %v16893_v32  ;;  %v407_v32 = vld [vmem:[%s27419_s1 + $0xb88] sm:$0xff] }
  0xdd   :  { %3148 = vmatpush1.bf16.msra.mxu0 %v16694_v31  ;;  %v16949_v31 = vcombine.high %v399_v24, %v403_v25  ;;  %v16956_v45 = vcombine.low %v407_v32, %v411_v34  ;;  %v459_v24 = vld [vmem:[%s27419_s1 + $0xd28] sm:$0xff]  ;;  %v264_v25 = vld [vmem:[%s27419_s1 + $0x710] sm:$0xff] }
  0xde   :  { %3149 = vmatprep.subr.bf16.mxu0 %v16703_v37  ;;  %v220_v37 = vld [vmem:[%s27419_s1 + $0x5b0] sm:$0xff] }
  0xdf   :  { %3052 = vmatpush1.bf16.msra.mxu1 %v16892_v39  ;;  %v16758_v39 = vcombine.low %v208_v26, %v212_v28  ;;  %v16767_v43 = vcombine.high %v216_v35, %v220_v37 }
  0xe0   :  { %3053 = vmatprep.subr.bf16.mxu1 %v16901_v40  ;;  %v415_v40 = vld [vmem:[%s27419_s1 + $0xbc8] sm:$0xff] }
  0xe1   :  { %3150 = vmatpush1.bf16.msra.mxu0 %v16702_v19  ;;  %v16957_v19 = vcombine.high %v407_v32, %v411_v34  ;;  %v16964_v56 = vcombine.low %v415_v40, %v419_v41  ;;  %v467_v32 = vld [vmem:[%s27419_s1 + $0xd68] sm:$0xff]  ;;  %v272_v34 = vld [vmem:[%s27419_s1 + $0x750] sm:$0xff] }
  0xe2   :  { %3151 = vmatprep.subr.bf16.mxu0 %v16711_v44  ;;  %v228_v44 = vld [vmem:[%s27419_s1 + $0x5f0] sm:$0xff] }
  0xe3   :  { %3054 = vmatpush1.bf16.msra.mxu1 %v16900_v46  ;;  %v16766_v46 = vcombine.low %v216_v35, %v220_v37  ;;  %v16775_v52 = vcombine.high %v224_v42, %v228_v44 }
  0xe4   :  { %3055 = vmatprep.subr.bf16.mxu1 %v16909_v49  ;;  %v423_v49 = vld [vmem:[%s27419_s1 + $0xc08] sm:$0xff] }
  0xe5   :  { %3152 = vmatpush1.bf16.msra.mxu0 %v16710_v47  ;;  %v16965_v47 = vcombine.high %v415_v40, %v419_v41  ;;  %v16972_v2 = vcombine.low %v423_v49, %v427_v50  ;;  %v475_v40 = vld [vmem:[%s27419_s1 + $0xda8] sm:$0xff]  ;;  %v280_v41 = vld [vmem:[%s27419_s1 + $0x790] sm:$0xff] }
  0xe6   :  { %3162 = vmatprep.subr.bf16.mxu0 %v16719_v55  ;;  %v236_v55 = vld [vmem:[%s27419_s1 + $0x630] sm:$0xff] }
  0xe7   :  { %3056 = vmatpush1.bf16.msra.mxu1 %v16908_v57  ;;  %v16774_v57 = vcombine.low %v224_v42, %v228_v44  ;;  %v16783_v0 = vcombine.high %v232_v51, %v236_v55 }
  0xe8   :  { %3154 = vmatmul.mubr.bf16.vlgmr.msra.gmra.mrb[4].mxu0 %v20987_v16  ;;  %3057 = vmatprep.subr.bf16.mxu1 %v16917_v60  ;;  %v431_v60 = vld [vmem:[%s27419_s1 + $0xc48] sm:$0xff] }
  0xe9   :  { %3163 = vmatpush1.bf16.msra.mxu0 %v16718_v59  ;;  %3194 = vmatprep.mubr.bf16.mxu0 %v20867_v61  ;;  %v16973_v59 = vcombine.high %v423_v49, %v427_v50  ;;  %v16980_v10 = vcombine.low %v431_v60, %v435_v62  ;;  %v483_v49 = vld [vmem:[%s27419_s1 + $0xde8] sm:$0xff]  ;;  %v288_v50 = vld [vmem:[%s27419_s1 + $0x7d0] sm:$0xff] }
  0xea   :  { %3164 = vmatprep.subr.bf16.mxu0 %v16727_v1  ;;  %v244_v1 = vld [vmem:[%s27419_s1 + $0x670] sm:$0xff] }
  0xeb   :  { %3058 = vmatpush1.bf16.msra.mxu1 %v16916_v3  ;;  %v16782_v3 = vcombine.low %v232_v51, %v236_v55  ;;  %v16791_v7 = vcombine.high %v240_v63, %v244_v1 }
  0xec   :  { %3059 = vmatprep.subr.bf16.mxu1 %v16925_v5  ;;  %v439_v5 = vld [vmem:[%s27419_s1 + $0xc88] sm:$0xff] }
  0xed   :  { %3165 = vmatpush1.bf16.msra.mxu0 %v16726_v4  ;;  %v16981_v4 = vcombine.high %v431_v60, %v435_v62  ;;  %v16988_v20 = vcombine.low %v439_v5, %v443_v6 }
  0xee   :  { %3166 = vmatprep.subr.bf16.mxu0 %v16735_v9  ;;  %v252_v9 = vld [vmem:[%s27419_s1 + $0x6b0] sm:$0xff] }
  0xef   :  { %3060 = vmatpush1.bf16.msra.mxu1 %v16924_v11  ;;  %v16790_v11 = vcombine.low %v240_v63, %v244_v1  ;;  %v16799_v15 = vcombine.high %v248_v8, %v252_v9  ;;  %v41_v1 = vld [vmem:[%s27419_s1 + $0x18] sm:$0xff] }
  0xf0   :  { %3061 = vmatprep.subr.bf16.mxu1 %v16933_v13  ;;  %v447_v13 = vld [vmem:[%s27419_s1 + $0xcc8] sm:$0xff] }
  0xf1   :  { %3167 = vmatpush1.bf16.msra.mxu0 %v16734_v12  ;;  %v16989_v12 = vcombine.high %v439_v5, %v443_v6  ;;  %v16996_v28 = vcombine.low %v447_v13, %v451_v14 }
  0xf2   :  { %3168 = vmatprep.subr.bf16.mxu0 %v16743_v18  ;;  %v260_v18 = vld [vmem:[%s27419_s1 + $0x6f0] sm:$0xff] }
  0xf3   :  { %3062 = vmatpush1.bf16.msra.mxu1 %v16932_v53  ;;  %v16798_v53 = vcombine.low %v248_v8, %v252_v9  ;;  %v16807_v26 = vcombine.high %v256_v17, %v260_v18  ;;  %v304_v8 = vld [vmem:[%s27419_s1 + $0x850] sm:$0xff]  ;;  %v49_v9 = vld [vmem:[%s27419_s1 + $0x58] sm:$0xff] }
  0xf4   :  { %3063 = vmatprep.subr.bf16.mxu1 %v16941_v23  ;;  %v455_v23 = vld [vmem:[%s27419_s1 + $0xd08] sm:$0xff] }
  0xf5   :  { %3169 = vmatpush1.bf16.msra.mxu0 %v16742_v22  ;;  %v16997_v22 = vcombine.high %v447_v13, %v451_v14  ;;  %v17004_v37 = vcombine.low %v455_v23, %v459_v24 }
  0xf6   :  { %3170 = vmatprep.subr.bf16.mxu0 %v16751_v54  ;;  %v268_v54 = vld [vmem:[%s27419_s1 + $0x730] sm:$0xff] }
  0xf7   :  { %3064 = vmatpush1.bf16.msra.mxu1 %v16940_v29  ;;  %v16806_v29 = vcombine.low %v256_v17, %v260_v18  ;;  %v16815_v35 = vcombine.high %v264_v25, %v268_v54  ;;  %v312_v17 = vld [vmem:[%s27419_s1 + $0x890] sm:$0xff] }
  0xf8   :  { %3065 = vmatprep.subr.bf16.mxu1 %v16949_v31  ;;  %v463_v31 = vld [vmem:[%s27419_s1 + $0xd48] sm:$0xff]  ;;  %v316_v18 = vld [vmem:[%s27419_s1 + $0x8b0] sm:$0xff] }
  0xf9   :  { %3171 = vmatpush1.bf16.msra.mxu0 %v16750_v30  ;;  %v17005_v30 = vcombine.high %v455_v23, %v459_v24  ;;  %v17012_v44 = vcombine.low %v463_v31, %v467_v32  ;;  %v20671_v23 = vld [vmem:[%s27418_s0 + $0x18] ss:$0 sps:$4 sm:$0xff]  }
  0xfa   :  { %3172 = vmatprep.subr.bf16.mxu0 %v16759_v36  ;;  %v276_v36 = vld [vmem:[%s27419_s1 + $0x770] sm:$0xff] }
  0xfb   :  { %3066 = vmatpush1.bf16.msra.mxu1 %v16948_v38  ;;  %v16814_v38 = vcombine.low %v264_v25, %v268_v54  ;;  %v16823_v42 = vcombine.high %v272_v34, %v276_v36  ;;  %v65_v25 = vld [vmem:[%s27419_s1 + $0xd8] sm:$0xff] }
  0xfc   :  { %3067 = vmatprep.subr.bf16.mxu1 %v16957_v19  ;;  %v471_v19 = vld [vmem:[%s27419_s1 + $0xd88] sm:$0xff] }
  0xfd   :  { %3173 = vmatpush1.bf16.msra.mxu0 %v16758_v39  ;;  %v17013_v39 = vcombine.high %v463_v31, %v467_v32  ;;  %v16863_v31 = vcombine.high %v312_v17, %v316_v18 }
  0xfe   :  { %3174 = vmatprep.subr.bf16.mxu0 %v16767_v43  ;;  %v284_v43 = vld [vmem:[%s27419_s1 + $0x7b0] sm:$0xff] }
  0xff   :  { %3068 = vmatpush1.bf16.msra.mxu1 %v16956_v45  ;;  %v16822_v45 = vcombine.low %v272_v34, %v276_v36  ;;  %v16830_v62 = vcombine.low %v280_v41, %v284_v43  ;;  %v73_v34 = vld [vmem:[%s27419_s1 + $0x118] sm:$0xff]  ;;  %v16862_v36 = vcombine.low %v312_v17, %v316_v18 }
 0x100   :  { %3069 = vmatprep.subr.bf16.mxu1 %v16965_v47  ;;  %v479_v47 = vld [vmem:[%s27419_s1 + $0xdc8] sm:$0xff]  ;;  %v117_v17 = vld [vmem:[%s27419_s1 + $0x278] sm:$0xff] }
 0x101   :  { %3175 = vmatpush1.bf16.msra.mxu0 %v16766_v46  ;;  %v17021_v46 = vcombine.high %v471_v19, %v475_v40  ;;  %v17029_v63 = vcombine.high %v479_v47, %v483_v49  ;;  %v17028_v5 = vcombine.low %v479_v47, %v483_v49  ;;  %v89_v49 = vld [vmem:[%s27419_s1 + $0x198] sm:$0xff] }
 0x102   :  { %3176 = vmatprep.subr.bf16.mxu0 %v16775_v52  ;;  %v16831_v52 = vcombine.high %v280_v41, %v284_v43  ;;  %v85_v41 = vld [vmem:[%s27419_s1 + $0x178] sm:$0xff] }
 0x103   :  { %3070 = vmatpush1.bf16.msra.mxu1 %v16964_v56  ;;  %v292_v56 = vld [vmem:[%s27419_s1 + $0x7f0] sm:$0xff] }
 0x104   :  { %3080 = vmatprep.subr.bf16.mxu1 %v16973_v59  ;;  %v17020_v59 = vcombine.low %v471_v19, %v475_v40  ;;  %v16838_v6 = vcombine.low %v288_v50, %v292_v56  ;;  %v81_v40 = vld [vmem:[%s27419_s1 + $0x158] sm:$0xff] }
 0x105   :  { %3177 = vmatpush1.bf16.msra.mxu0 %v16774_v57 }
 0x106   :  { %3178 = vmatprep.subr.bf16.mxu0 %v16783_v0  ;;  %3072 = vmatmul.mubr.bf16.vlgmr.msra.gmra.mrb[4].mxu1 %v21206_v33  ;;  %v296_v0 = vld [vmem:[%s27419_s1 + $0x810] sm:$0xff] }
 0x107   :  { %3081 = vmatpush1.bf16.msra.mxu1 %v16972_v2  ;;  %3112 = vmatprep.mubr.bf16.mxu1 %v20701_v48  ;;  %v45_v2 = vld [vmem:[%s27419_s1 + $0x38] sm:$0xff] }
 0x108   :  { %3082 = vmatprep.subr.bf16.mxu1 %v16981_v4  ;;  %v300_v4 = vld [vmem:[%s27419_s1 + $0x830] sm:$0xff]  ;;  %v16592_v13 = vcombine.low %v41_v1, %v45_v2 }
 0x109   :  { %3179 = vmatpush1.bf16.msra.mxu0 %v16782_v3  ;;  %v16839_v3 = vcombine.high %v288_v50, %v292_v56  ;;  %v16846_v14 = vcombine.low %v296_v0, %v300_v4  ;;  %v93_v50 = vld [vmem:[%s27419_s1 + $0x1b8] sm:$0xff]  ;;  %v16633_v56 = vcombine.high %v81_v40, %v85_v41 }
 0x10a   :  { %3180 = vmatprep.subr.bf16.mxu0 %v16791_v7  ;;  %v16593_v7 = vcombine.high %v41_v1, %v45_v2  ;;  %v16641_v2 = vcombine.high %v89_v49, %v93_v50 }
 0x10b   :  { %3083 = vmatpush1.bf16.msra.mxu1 %v16980_v10  ;;  %v53_v10 = vld [vmem:[%s27419_s1 + $0x78] sm:$0xff] }
 0x10c   :  { %3084 = vmatprep.subr.bf16.mxu1 %v16989_v12  ;;  %v308_v12 = vld [vmem:[%s27419_s1 + $0x870] sm:$0xff]  ;;  %v16600_v24 = vcombine.low %v49_v9, %v53_v10 }
 0x10d   :  { %3181 = vmatpush1.bf16.msra.mxu0 %v16790_v11  ;;  %v16847_v11 = vcombine.high %v296_v0, %v300_v4  ;;  %v16854_v54 = vcombine.low %v304_v8, %v308_v12  ;;  %v101_v0 = vld [vmem:[%s27419_s1 + $0x1f8] sm:$0xff]  ;;  %v356_v4 = vld [vmem:[%s27419_s1 + $0x9f0] sm:$0xff] }
 0x10e   :  { %3182 = vmatprep.subr.bf16.mxu0 %v16799_v15  ;;  %v16601_v15 = vcombine.high %v49_v9, %v53_v10 }
 0x10f   :  { %3085 = vmatpush1.bf16.msra.mxu1 %v16988_v20  ;;  %v57_v20 = vld [vmem:[%s27419_s1 + $0x98] sm:$0xff] }
 0x110   :  { %3086 = vmatprep.subr.bf16.mxu1 %v16997_v22  ;;  %v16855_v22 = vcombine.high %v304_v8, %v308_v12  ;;  %v109_v8 = vld [vmem:[%s27419_s1 + $0x238] sm:$0xff]  ;;  %v364_v12 = vld [vmem:[%s27419_s1 + $0xa30] sm:$0xff] }
 0x111   :  { %3183 = vmatpush1.bf16.msra.mxu0 %v16798_v53  ;;  %v61_v53 = vld [vmem:[%s27419_s1 + $0xb8] sm:$0xff] }
 0x112   :  { %3184 = vmatprep.subr.bf16.mxu0 %v16807_v26  ;;  %v69_v26 = vld [vmem:[%s27419_s1 + $0xf8] sm:$0xff]  ;;  %v16608_v32 = vcombine.low %v57_v20, %v61_v53 }
 0x113   :  { %3087 = vmatpush1.bf16.msra.mxu1 %v16996_v28  ;;  %v16609_v28 = vcombine.high %v57_v20, %v61_v53  ;;  %v16616_v19 = vcombine.low %v65_v25, %v69_v26  ;;  %v368_v53 = vld [vmem:[%s27419_s1 + $0xa50] sm:$0xff] }
 0x114   :  { %3088 = vmatprep.subr.bf16.mxu1 %v17005_v30  ;;  %v324_v30 = vld [vmem:[%s27419_s1 + $0x8f0] sm:$0xff] }
 0x115   :  { %3185 = vmatpush1.bf16.msra.mxu0 %v16806_v29  ;;  %v320_v29 = vld [vmem:[%s27419_s1 + $0x8d0] sm:$0xff] }
 0x116   :  { %3186 = vmatprep.subr.bf16.mxu0 %v16815_v35  ;;  %v77_v35 = vld [vmem:[%s27419_s1 + $0x138] sm:$0xff] }
 0x117   :  { %3089 = vmatpush1.bf16.msra.mxu1 %v17004_v37  ;;  %v16617_v37 = vcombine.high %v65_v25, %v69_v26  ;;  %v16625_v43 = vcombine.high %v73_v34, %v77_v35  ;;  %v16624_v47 = vcombine.low %v73_v34, %v77_v35  ;;  %v121_v25 = vld [vmem:[%s27419_s1 + $0x298] sm:$0xff] }
 0x118   :  { %3090 = vmatprep.subr.bf16.mxu1 %v17013_v39  ;;  %v16871_v39 = vcombine.high %v320_v29, %v324_v30  ;;  %v125_v26 = vld [vmem:[%s27419_s1 + $0x2b8] sm:$0xff] }
 0x119   :  { %3187 = vmatpush1.bf16.msra.mxu0 %v16814_v38  ;;  %v21675_v51 = vpop.f32.mrb[0].mxu1  ;;  %v328_v38 = vld [vmem:[%s27419_s1 + $0x910] sm:$0xff]  ;;  %v129_v34 = vld [vmem:[%s27419_s1 + $0x2d8] sm:$0xff] }
 0x11a   :  { %3188 = vmatprep.subr.bf16.mxu0 %v16823_v42  ;;  %v21677_v55 = vpop.f32.mrb[1].mxu1  ;;  %v16870_v42 = vcombine.low %v320_v29, %v324_v30  ;;  %v376_v29 = vld [vmem:[%s27419_s1 + $0xa90] sm:$0xff]  ;;  %v133_v35 = vld [vmem:[%s27419_s1 + $0x2f8] sm:$0xff] }
 0x11b   :  { %v2831_v57 = vpop.f32.mrb[2].mxu1  ;;  %3091 = vmatpush1.bf16.msra.mxu1 %v17012_v44  ;;  %v336_v44 = vld [vmem:[%s27419_s1 + $0x950] sm:$0xff] }
 0x11c   :  { %v2832_v60 = vpop.f32.mrb[3].mxu1  ;;  %3092 = vmatprep.subr.bf16.mxu1 %v17021_v46  ;;  %v344_v57 = vld [vmem:[%s27419_s1 + $0x990] sm:$0xff] }
 0x11d   :  { %3189 = vmatpush1.bf16.msra.mxu0 %v16822_v45  ;;  %v340_v45 = vld [vmem:[%s27419_s1 + $0x970] sm:$0xff] }
 0x11e   :  { %3190 = vmatprep.subr.bf16.mxu0 %v16831_v52  ;;  %v16887_v60 = vcombine.high %v336_v44, %v340_v45  ;;  %v16886_v1 = vcombine.low %v336_v44, %v340_v45  ;;  %v380_v30 = vld [vmem:[%s27419_s1 + $0xab0] sm:$0xff] }
 0x11f   :  { %3093 = vmatpush1.bf16.msra.mxu1 %v17020_v59  ;;  %v348_v59 = vld [vmem:[%s27419_s1 + $0x9b0] sm:$0xff] }
 0x120   :  { %3094 = vmatprep.subr.bf16.mxu1 %v17029_v63  ;;  %v97_v63 = vld [vmem:[%s27419_s1 + $0x1d8] sm:$0xff]  ;;  %v16894_v9 = vcombine.low %v344_v57, %v348_v59  ;;  %v392_v44 = vld [vmem:[%s27419_s1 + $0xb10] sm:$0xff] }
 0x121   :  { %3191 = vmatpush1.bf16.msra.mxu0 %v16830_v62  ;;  %v16632_v62 = vcombine.low %v81_v40, %v85_v41  ;;  %v16649_v10 = vcombine.high %v97_v63, %v101_v0  ;;  %v137_v40 = vld [vmem:[%s27419_s1 + $0x318] sm:$0xff]  ;;  %v396_v45 = vld [vmem:[%s27419_s1 + $0xb30] sm:$0xff] }
 0x122   :  { %3192 = vmatprep.subr.bf16.mxu0 %v16839_v3  ;;  %v352_v3 = vld [vmem:[%s27419_s1 + $0x9d0] sm:$0xff]  ;;  %v141_v41 = vld [vmem:[%s27419_s1 + $0x338] sm:$0xff] }
 0x123   :  { %3095 = vmatpush1.bf16.msra.mxu1 %v17028_v5  ;;  %v16895_v5 = vcombine.high %v344_v57, %v348_v59  ;;  %v16902_v18 = vcombine.low %v352_v3, %v356_v4  ;;  %v400_v57 = vld [vmem:[%s27419_s1 + $0xb50] sm:$0xff] }
 0x124   :  { %3285 = vmatprep.subr.bf16.mxu1 %v16593_v7  ;;  %v105_v7 = vld [vmem:[%s27419_s1 + $0x218] sm:$0xff]  ;;  %v404_v59 = vld [vmem:[%s27419_s1 + $0xb70] sm:$0xff] }
 0x125   :  { %3193 = vmatpush1.bf16.msra.mxu0 %v16838_v6  ;;  %v16640_v6 = vcombine.low %v89_v49, %v93_v50  ;;  %v16657_v20 = vcombine.high %v105_v7, %v109_v8  ;;  %v145_v49 = vld [vmem:[%s27419_s1 + $0x358] sm:$0xff] }
 0x126   :  { %3203 = vmatprep.subr.bf16.mxu0 %v16847_v11  ;;  %3113 = vmatmul.mubr.bf16.vlgmr.msra.gmra.mrb[4].mxu1 %v20671_v23  ;;  %v360_v11 = vld [vmem:[%s27419_s1 + $0xa10] sm:$0xff]  ;;  %v149_v50 = vld [vmem:[%s27419_s1 + $0x378] sm:$0xff] }
 0x127   :  { %3286 = vmatpush1.bf16.msra.mxu1 %v16592_v13  ;;  %3317 = vmatprep.mubr.bf16.mxu1 %v20857_v58  ;;  %v332_v58 = vld [vmem:[%s27419_s1 + $0x930] sm:$0xff]  ;;  %v16903_v13 = vcombine.high %v352_v3, %v356_v4  ;;  %v16911_v23 = vcombine.high %v360_v11, %v364_v12 }
 0x128   :  { %3195 = vmatmul.mubr.bf16.vlgmr.msra.gmra.mrb[4].mxu0 %v21002_v21  ;;  %3287 = vmatprep.subr.bf16.mxu1 %v16601_v15  ;;  %v16879_v46 = vcombine.high %v328_v38, %v332_v58  ;;  %v16878_v52 = vcombine.low %v328_v38, %v332_v58  ;;  %v113_v15 = vld [vmem:[%s27419_s1 + $0x258] sm:$0xff]  ;;  %v384_v38 = vld [vmem:[%s27419_s1 + $0xad0] sm:$0xff] }
 0x129   :  { %3204 = vmatpush1.bf16.msra.mxu0 %v16846_v14  ;;  %3235 = vmatprep.mubr.bf16.mxu0 %v21018_v27  ;;  %v16648_v14 = vcombine.low %v97_v63, %v101_v0  ;;  %v388_v58 = vld [vmem:[%s27419_s1 + $0xaf0] sm:$0xff]  ;;  %v153_v63 = vld [vmem:[%s27419_s1 + $0x398] sm:$0xff] }
 0x12a   :  { %3205 = vmatprep.subr.bf16.mxu0 %v16855_v22  ;;  %v372_v22 = vld [vmem:[%s27419_s1 + $0xa70] sm:$0xff]  ;;  %v157_v0 = vld [vmem:[%s27419_s1 + $0x3b8] sm:$0xff] }
 0x12b   :  { %3288 = vmatpush1.bf16.msra.mxu1 %v16600_v24  ;;  %v16656_v24 = vcombine.low %v105_v7, %v109_v8  ;;  %v408_v3 = vld [vmem:[%s27419_s1 + $0xb90] sm:$0xff]  ;;  %v161_v7 = vld [vmem:[%s27419_s1 + $0x3d8] sm:$0xff] }
 0x12c   :  { %3289 = vmatprep.subr.bf16.mxu1 %v16609_v28  ;;  %v16665_v28 = vcombine.high %v113_v15, %v117_v17  ;;  %v412_v4 = vld [vmem:[%s27419_s1 + $0xbb0] sm:$0xff]  ;;  %v165_v8 = vld [vmem:[%s27419_s1 + $0x3f8] sm:$0xff] }
 0x12d   :  { %3206 = vmatpush1.bf16.msra.mxu0 %v16854_v54  ;;  %v16910_v54 = vcombine.low %v360_v11, %v364_v12  ;;  %v416_v11 = vld [vmem:[%s27419_s1 + $0xbd0] sm:$0xff] }
 0x12e   :  { %3207 = vmatprep.subr.bf16.mxu0 %v16863_v31  ;;  %v16919_v31 = vcombine.high %v368_v53, %v372_v22  ;;  %v420_v12 = vld [vmem:[%s27419_s1 + $0xbf0] sm:$0xff] }
 0x12f   :  { %3290 = vmatpush1.bf16.msra.mxu1 %v16608_v32  ;;  %v16664_v32 = vcombine.low %v113_v15, %v117_v17  ;;  %v169_v15 = vld [vmem:[%s27419_s1 + $0x418] sm:$0xff] }
 0x130   :  { %3291 = vmatprep.subr.bf16.mxu1 %v16617_v37  ;;  %v16673_v37 = vcombine.high %v121_v25, %v125_v26  ;;  %v173_v17 = vld [vmem:[%s27419_s1 + $0x438] sm:$0xff] }
 0x131   :  { %3208 = vmatpush1.bf16.msra.mxu0 %v16862_v36  ;;  %v16918_v36 = vcombine.low %v368_v53, %v372_v22  ;;  %v424_v53 = vld [vmem:[%s27419_s1 + $0xc10] sm:$0xff] }
 0x132   :  { %3209 = vmatprep.subr.bf16.mxu0 %v16871_v39  ;;  %v16927_v39 = vcombine.high %v376_v29, %v380_v30  ;;  %v428_v22 = vld [vmem:[%s27419_s1 + $0xc30] sm:$0xff] }
 0x133   :  { %3292 = vmatpush1.bf16.msra.mxu1 %v16616_v19  ;;  %v16672_v19 = vcombine.low %v121_v25, %v125_v26  ;;  %v177_v25 = vld [vmem:[%s27419_s1 + $0x458] sm:$0xff] }
 0x134   :  { %3293 = vmatprep.subr.bf16.mxu1 %v16625_v43  ;;  %v16681_v43 = vcombine.high %v129_v34, %v133_v35  ;;  %v181_v26 = vld [vmem:[%s27419_s1 + $0x478] sm:$0xff] }
 0x135   :  { %3210 = vmatpush1.bf16.msra.mxu0 %v16870_v42  ;;  %v16926_v42 = vcombine.low %v376_v29, %v380_v30  ;;  %v432_v29 = vld [vmem:[%s27419_s1 + $0xc50] sm:$0xff] }
 0x136   :  { %3211 = vmatprep.subr.bf16.mxu0 %v16879_v46  ;;  %v16935_v46 = vcombine.high %v384_v38, %v388_v58  ;;  %v436_v30 = vld [vmem:[%s27419_s1 + $0xc70] sm:$0xff] }
 0x137   :  { %3294 = vmatpush1.bf16.msra.mxu1 %v16624_v47  ;;  %v16680_v47 = vcombine.low %v129_v34, %v133_v35  ;;  %v185_v34 = vld [vmem:[%s27419_s1 + $0x498] sm:$0xff] }
 0x138   :  { %3295 = vmatprep.subr.bf16.mxu1 %v16633_v56  ;;  %v16689_v56 = vcombine.high %v137_v40, %v141_v41  ;;  %v189_v35 = vld [vmem:[%s27419_s1 + $0x4b8] sm:$0xff] }
 0x139   :  { %3212 = vmatpush1.bf16.msra.mxu0 %v16878_v52  ;;  %v16934_v52 = vcombine.low %v384_v38, %v388_v58  ;;  %v440_v38 = vld [vmem:[%s27419_s1 + $0xc90] sm:$0xff] }
 0x13a   :  { %3213 = vmatprep.subr.bf16.mxu0 %v16887_v60  ;;  %v16943_v60 = vcombine.high %v392_v44, %v396_v45  ;;  %v444_v58 = vld [vmem:[%s27419_s1 + $0xcb0] sm:$0xff] }
 0x13b   :  { %3296 = vmatpush1.bf16.msra.mxu1 %v16632_v62  ;;  %v16688_v62 = vcombine.low %v137_v40, %v141_v41  ;;  %v193_v40 = vld [vmem:[%s27419_s1 + $0x4d8] sm:$0xff] }
 0x13c   :  { %3297 = vmatprep.subr.bf16.mxu1 %v16641_v2  ;;  %v16697_v2 = vcombine.high %v145_v49, %v149_v50  ;;  %v197_v41 = vld [vmem:[%s27419_s1 + $0x4f8] sm:$0xff] }
 0x13d   :  { %3214 = vmatpush1.bf16.msra.mxu0 %v16886_v1  ;;  %v16942_v1 = vcombine.low %v392_v44, %v396_v45  ;;  %v452_v44 = vld [vmem:[%s27419_s1 + $0xcf0] sm:$0xff]  ;;  %v488_v45 = vlaneseq }
 0x13e   :  { %3215 = vmatprep.subr.bf16.mxu0 %v16895_v5  ;;  %v16951_v5 = vcombine.high %v400_v57, %v404_v59 }
 0x13f   :  { %3298 = vmatpush1.bf16.msra.mxu1 %v16640_v6  ;;  %v16696_v6 = vcombine.low %v145_v49, %v149_v50  ;;  %v201_v49 = vld [vmem:[%s27419_s1 + $0x518] sm:$0xff] }
 0x140   :  { %3299 = vmatprep.subr.bf16.mxu1 %v16649_v10  ;;  %v16705_v10 = vcombine.high %v153_v63, %v157_v0  ;;  %v205_v50 = vld [vmem:[%s27419_s1 + $0x538] sm:$0xff] }
 0x141   :  { %3216 = vmatpush1.bf16.msra.mxu0 %v16894_v9  ;;  %v16950_v9 = vcombine.low %v400_v57, %v404_v59  ;;  %v456_v57 = vld [vmem:[%s27419_s1 + $0xd10] sm:$0xff]  ;;  %v21944_v59 = vshrl.u32 %v488_v45, 7  ;;  %v245_v45 = vld [vmem:[%s27419_s1 + $0x678] sm:$0xff] }
 0x142   :  { %3217 = vmatprep.subr.bf16.mxu0 %v16903_v13  ;;  %v16959_v13 = vcombine.high %v408_v3, %v412_v4 }
 0x143   :  { %3300 = vmatpush1.bf16.msra.mxu1 %v16648_v14  ;;  %v16704_v14 = vcombine.low %v153_v63, %v157_v0  ;;  %v209_v63 = vld [vmem:[%s27419_s1 + $0x558] sm:$0xff] }
 0x144   :  { %3301 = vmatprep.subr.bf16.mxu1 %v16657_v20  ;;  %v16713_v20 = vcombine.high %v161_v7, %v165_v8  ;;  %v213_v0 = vld [vmem:[%s27419_s1 + $0x578] sm:$0xff] }
 0x145   :  { %3218 = vmatpush1.bf16.msra.mxu0 %v16902_v18  ;;  %v16958_v18 = vcombine.low %v408_v3, %v412_v4  ;;  %v16753_v3 = vcombine.high %v201_v49, %v205_v50  ;;  %v464_v4 = vld [vmem:[%s27419_s1 + $0xd50] sm:$0xff] }
 0x146   :  { %3219 = vmatprep.subr.bf16.mxu0 %v16911_v23  ;;  %v16967_v23 = vcombine.high %v416_v11, %v420_v12 }
 0x147   :  { %3302 = vmatpush1.bf16.msra.mxu1 %v16656_v24  ;;  %v16712_v24 = vcombine.low %v161_v7, %v165_v8  ;;  %v21965_v8 = vsub.s32 1, %v21944_v59 }
 0x148   :  { %3303 = vmatprep.subr.bf16.mxu1 %v16665_v28  ;;  %v16721_v28 = vcombine.high %v169_v15, %v173_v17 }
 0x149   :  { %3220 = vmatpush1.bf16.msra.mxu0 %v16910_v54  ;;  %v16966_v54 = vcombine.low %v416_v11, %v420_v12  ;;  %v221_v11 = vld [vmem:[%s27419_s1 + $0x5b8] sm:$0xff] }
 0x14a   :  { %3221 = vmatprep.subr.bf16.mxu0 %v16919_v31  ;;  %v16975_v31 = vcombine.high %v424_v53, %v428_v22 }
 0x14b   :  { %3304 = vmatpush1.bf16.msra.mxu1 %v16664_v32  ;;  %v16720_v32 = vcombine.low %v169_v15, %v173_v17  ;;  %v476_v15 = vld [vmem:[%s27419_s1 + $0xdb0] sm:$0xff] }
 0x14c   :  { %3305 = vmatprep.subr.bf16.mxu1 %v16673_v37  ;;  %v16729_v37 = vcombine.high %v177_v25, %v181_v26 }
 0x14d   :  { %3222 = vmatpush1.bf16.msra.mxu0 %v16918_v36  ;;  %v16974_v36 = vcombine.low %v424_v53, %v428_v22  ;;  %v16760_v53 = vcombine.low %v209_v63, %v213_v0 }
 0x14e   :  { %3223 = vmatprep.subr.bf16.mxu0 %v16927_v39  ;;  %v16983_v39 = vcombine.high %v432_v29, %v436_v30 }
 0x14f   :  { %3306 = vmatpush1.bf16.msra.mxu1 %v16672_v19  ;;  %v16728_v19 = vcombine.low %v177_v25, %v181_v26  ;;  %v484_v25 = vld [vmem:[%s27419_s1 + $0xdf0] sm:$0xff]  ;;  %v225_v26 = vld [vmem:[%s27419_s1 + $0x5d8] sm:$0xff] }
 0x150   :  { %3307 = vmatprep.subr.bf16.mxu1 %v16681_v43  ;;  %v16737_v43 = vcombine.high %v185_v34, %v189_v35 }
 0x151   :  { %3224 = vmatpush1.bf16.msra.mxu0 %v16926_v42  ;;  %v16982_v42 = vcombine.low %v432_v29, %v436_v30 }
 0x152   :  { %3225 = vmatprep.subr.bf16.mxu0 %v16935_v46  ;;  %v16991_v46 = vcombine.high %v440_v38, %v444_v58 }
 0x153   :  { %3308 = vmatpush1.bf16.msra.mxu1 %v16680_v47  ;;  %v16736_v47 = vcombine.low %v185_v34, %v189_v35 }
 0x154   :  { %3309 = vmatprep.subr.bf16.mxu1 %v16689_v56  ;;  %v16745_v56 = vcombine.high %v193_v40, %v197_v41 }
 0x155   :  { %3226 = vmatpush1.bf16.msra.mxu0 %v16934_v52  ;;  %v16990_v52 = vcombine.low %v440_v38, %v444_v58  ;;  %v233_v58 = vld [vmem:[%s27419_s1 + $0x618] sm:$0xff] }
 0x156   :  { %3227 = vmatprep.subr.bf16.mxu0 %v16943_v60 }
 0x157   :  { %3310 = vmatpush1.bf16.msra.mxu1 %v16688_v62  ;;  %v16744_v62 = vcombine.low %v193_v40, %v197_v41 }
 0x158   :  { %3311 = vmatprep.subr.bf16.mxu1 %v16697_v2 }
 0x159   :  { %3228 = vmatpush1.bf16.msra.mxu0 %v16942_v1  ;;  %v486_v1 = vld [vmem:[%s27420_s2] sm:$0xff] }
 0x15a   :  { %3229 = vmatprep.subr.bf16.mxu0 %v16951_v5  ;;  %v468_v5 = vld [vmem:[%s27419_s1 + $0xd70] sm:$0xff] }
 0x15b   :  { %3312 = vmatpush1.bf16.msra.mxu1 %v16696_v6  ;;  %v21962_v6 = vsub.s32 0, %v21944_v59  ;;  %v17014_v22 = vcombine.low %v464_v4, %v468_v5 }
 0x15c   :  { %3313 = vmatprep.subr.bf16.mxu1 %v16705_v10  ;;  %v217_v10 = vld [vmem:[%s27419_s1 + $0x598] sm:$0xff] }
 0x15d   :  { %3230 = vmatpush1.bf16.msra.mxu0 %v16950_v9  ;;  %v16752_v9 = vcombine.low %v201_v49, %v205_v50  ;;  %v491_v17 = vrot.slane %v486_v1, %v21962_v6  ;;  %v16768_v35 = vcombine.low %v217_v10, %v221_v11  ;;  %v19202_v49 = vld [vmem:[%s27421_s3 + $0x48] sm:$0xff]   ;;  %v249_v50 = vld [vmem:[%s27419_s1 + $0x698] sm:$0xff] }
 0x15e   :  { %3231 = vmatprep.subr.bf16.mxu0 %v16959_v13  ;;  %v16761_v13 = vcombine.high %v209_v63, %v213_v0  ;;  %v19204_v63 = vld [vmem:[%s27421_s3 + $0x50] sm:$0xff]   ;;  %v257_v0 = vld [vmem:[%s27419_s1 + $0x6d8] sm:$0xff] }
 0x15f   :  { %3314 = vmatpush1.bf16.msra.mxu1 %v16704_v14  ;;  %v472_v14 = vld [vmem:[%s27419_s1 + $0xd90] sm:$0xff] }
 0x160   :  { %3315 = vmatprep.subr.bf16.mxu1 %v16713_v20  ;;  %v495_v20 = vrot.slane %v486_v1, %v21965_v8  ;;  %v17023_v29 = vcombine.high %v472_v14, %v476_v15 }
 0x161   :  { %3232 = vmatpush1.bf16.msra.mxu0 %v16958_v18  ;;  %v17015_v18 = vcombine.high %v464_v4, %v468_v5  ;;  %v19206_v5 = vld [vmem:[%s27421_s3 + $0x58] sm:$0xff]  }
 0x162   :  { %3233 = vmatprep.subr.bf16.mxu0 %v16967_v23  ;;  %v16769_v23 = vcombine.high %v217_v10, %v221_v11  ;;  %v2830_v30 = vadd.f32 %v21677_v55, %v495_v20  ;;  %v237_v55 = vld [vmem:[%s27419_s1 + $0x638] sm:$0xff] }
 0x163   :  { %3316 = vmatpush1.bf16.msra.mxu1 %v16712_v24  ;;  %v480_v24 = vld [vmem:[%s27419_s1 + $0xdd0] sm:$0xff]  ;;  %v269_v10 = vld [vmem:[%s27419_s1 + $0x738] sm:$0xff] }
 0x164   :  { %3326 = vmatprep.subr.bf16.mxu1 %v16721_v28  ;;  %v2828_v28 = vadd.f32 %v21675_v51, %v491_v17  ;;  %v19207_v11 = vld [vmem:[%s27421_s3 + $0x18] sm:$0xff]  }
 0x165   :  { %3234 = vmatpush1.bf16.msra.mxu0 %v16966_v54  ;;  %v229_v54 = vld [vmem:[%s27419_s1 + $0x5f8] sm:$0xff] }
 0x166   :  { %3244 = vmatprep.subr.bf16.mxu0 %v16975_v31  ;;  %3318 = vmatmul.mubr.bf16.vlgmr.msra.gmra.mrb[8].mxu1 %v20987_v16  ;;  %v448_v16 = vld [vmem:[%s27419_s1 + $0xcd0] sm:$0xff]  ;;  %v16777_v38 = vcombine.high %v225_v26, %v229_v54  ;;  %v16776_v41 = vcombine.low %v225_v26, %v229_v54  ;;  %v277_v17 = vld [vmem:[%s27419_s1 + $0x778] sm:$0xff] }
 0x167   :  { %3327 = vmatpush1.bf16.msra.mxu1 %v16720_v32  ;;  %3358 = vmatprep.mubr.bf16.mxu1 %v20867_v61  ;;  %v460_v61 = vld [vmem:[%s27419_s1 + $0xd30] sm:$0xff]  ;;  %v16999_v60 = vcombine.high %v448_v16, %v452_v44  ;;  %v16998_v2 = vcombine.low %v448_v16, %v452_v44  ;;  %v16785_v16 = vcombine.high %v233_v58, %v237_v55  ;;  %v241_v44 = vld [vmem:[%s27419_s1 + $0x658] sm:$0xff] }
 0x168   :  { %3236 = vmatmul.mubr.bf16.vlgmr.msra.gmra.mrb[4].mxu0 %v21206_v33  ;;  %3328 = vmatprep.subr.bf16.mxu1 %v16729_v37  ;;  %v17007_v7 = vcombine.high %v456_v57, %v460_v61  ;;  %v17006_v12 = vcombine.low %v456_v57, %v460_v61  ;;  %v17022_v37 = vcombine.low %v472_v14, %v476_v15  ;;  %v19203_v61 = vld [vmem:[%s27421_s3 + $0x8] sm:$0xff]   ;;  %v273_v14 = vld [vmem:[%s27419_s1 + $0x758] sm:$0xff]  ;;  %v19212_v54 = vld [vmem:[%s27421_s3 + $0x70] sm:$0xff]  }
 0x169   :  { %3245 = vmatpush1.bf16.msra.mxu0 %v16974_v36  ;;  %3276 = vmatprep.mubr.bf16.mxu0 %v20701_v48  ;;  %v16824_v26 = vcombine.low %v273_v14, %v277_v17 }
 0x16a   :  { %3246 = vmatprep.subr.bf16.mxu0 %v16983_v39  ;;  %v17031_v39 = vcombine.high %v480_v24, %v484_v25 }
 0x16b   :  { %3329 = vmatpush1.bf16.msra.mxu1 %v16728_v19 }
 0x16c   :  { %3330 = vmatprep.subr.bf16.mxu1 %v16737_v43  ;;  %v17030_v43 = vcombine.low %v480_v24, %v484_v25  ;;  %v285_v24 = vld [vmem:[%s27419_s1 + $0x7b8] sm:$0xff]  ;;  %v19211_v25 = vld [vmem:[%s27421_s3 + $0x28] sm:$0xff]  }
 0x16d   :  { %3247 = vmatpush1.bf16.msra.mxu0 %v16982_v42  ;;  %v19200_v42 = vld [vmem:[%s27421_s3 + $0x40] sm:$0xff]  }
 0x16e   :  { %3248 = vmatprep.subr.bf16.mxu0 %v16991_v46  ;;  %v19201_v46 = vld [vmem:[%s27421_s3] sm:$0xff]  }
 0x16f   :  { %3331 = vmatpush1.bf16.msra.mxu1 %v16736_v47  ;;  %v16784_v47 = vcombine.low %v233_v58, %v237_v55  ;;  %v19215_v58 = vld [vmem:[%s27421_s3 + $0x38] sm:$0xff]  }
 0x170   :  { %3332 = vmatprep.subr.bf16.mxu1 %v16745_v56  ;;  %v253_v56 = vld [vmem:[%s27419_s1 + $0x6b8] sm:$0xff] }
 0x171   :  { %3249 = vmatpush1.bf16.msra.mxu0 %v16990_v52  ;;  %v16793_v52 = vcombine.high %v241_v44, %v245_v45  ;;  %v16801_v1 = vcombine.high %v249_v50, %v253_v56  ;;  %v16800_v4 = vcombine.low %v249_v50, %v253_v56  ;;  %v325_v50 = vld [vmem:[%s27419_s1 + $0x8f8] sm:$0xff]  ;;  %v19236_v56 = vld [vmem:[%s27421_s3 + $0x150] sm:$0xff]  }
 0x172   :  { %3250 = vmatprep.subr.bf16.mxu0 %v16999_v60  ;;  %v20672_v60 = vld [vmem:[%s27418_s0 + $0x18] ss:$0 sps:$4 sm:$0xff]  }
 0x173   :  { %3333 = vmatpush1.bf16.msra.mxu1 %v16744_v62  ;;  %v16792_v62 = vcombine.low %v241_v44, %v245_v45  ;;  %v19232_v44 = vld [vmem:[%s27421_s3 + $0x140] sm:$0xff]  }
 0x174   :  { %3334 = vmatprep.subr.bf16.mxu1 %v16753_v3  ;;  %v19205_v3 = vld [vmem:[%s27421_s3 + $0x10] sm:$0xff]   ;;  %v19233_v45 = vld [vmem:[%s27421_s3 + $0x100] sm:$0xff]  }
 0x175   :  { %3251 = vmatpush1.bf16.msra.mxu0 %v16998_v2  ;;  %v261_v2 = vld [vmem:[%s27419_s1 + $0x6f8] sm:$0xff] }
 0x176   :  { %3252 = vmatprep.subr.bf16.mxu0 %v17007_v7  ;;  %v265_v7 = vld [vmem:[%s27419_s1 + $0x718] sm:$0xff] }
 0x177   :  { %3335 = vmatpush1.bf16.msra.mxu1 %v16752_v9  ;;  %v16809_v9 = vcombine.high %v257_v0, %v261_v2  ;;  %v16817_v15 = vcombine.high %v265_v7, %v269_v10  ;;  %v16816_v20 = vcombine.low %v265_v7, %v269_v10  ;;  %v349_v10 = vld [vmem:[%s27419_s1 + $0x9b8] sm:$0xff] }
 0x178   :  { %3336 = vmatprep.subr.bf16.mxu1 %v16761_v13  ;;  %v19208_v13 = vld [vmem:[%s27421_s3 + $0x60] sm:$0xff]  }
 0x179   :  { %3253 = vmatpush1.bf16.msra.mxu0 %v17006_v12  ;;  %v16808_v12 = vcombine.low %v257_v0, %v261_v2  ;;  %v341_v2 = vld [vmem:[%s27419_s1 + $0x978] sm:$0xff] }
 0x17a   :  { %3254 = vmatprep.subr.bf16.mxu0 %v17015_v18  ;;  %v19209_v18 = vld [vmem:[%s27421_s3 + $0x20] sm:$0xff]  }
 0x17b   :  { %v2950_v31 = vpop.f32.mrb[0].mxu0  ;;  %3337 = vmatpush1.bf16.msra.mxu1 %v16760_v53  ;;  %v19210_v53 = vld [vmem:[%s27421_s3 + $0x68] sm:$0xff]  }
 0x17c   :  { %v21995_v32 = vadd.f32 %v2950_v31, %v2828_v28  ;;  %v2952_v34 = vpop.f32.mrb[1].mxu0  ;;  %3338 = vmatprep.subr.bf16.mxu1 %v16769_v23  ;;  %v16825_v23 = vcombine.high %v273_v14, %v277_v17  ;;  %v289_v28 = vld [vmem:[%s27419_s1 + $0x7d8] sm:$0xff]  ;;  %v19213_v31 = vld [vmem:[%s27421_s3 + $0x30] sm:$0xff]  }
 0x17d   :  { %v18998_v36 = vadd.f32 %v2952_v34, %v2830_v30  ;;  %3255 = vmatpush1.bf16.msra.mxu0 %v17014_v22  ;;  %v2954_v51 = vpop.f32.mrb[2].mxu0  ;;  %v281_v22 = vld [vmem:[%s27419_s1 + $0x798] sm:$0xff] }
 0x17e   :  { %3256 = vmatprep.subr.bf16.mxu0 %v17023_v29  ;;  %v2955_v19 = vpop.f32.mrb[3].mxu0  ;;  %v16833_v29 = vcombine.high %v281_v22, %v285_v24  ;;  %v293_v30 = vld [vmem:[%s27419_s1 + $0x7f8] sm:$0xff]  ;;  %v16832_v34 = vcombine.low %v281_v22, %v285_v24  ;;  %v3449_v55 = vmax.f32 %v21995_v32, 0.0 }
 0x17f   :  { %v3450_v40 = vmax.f32 %v18998_v36, 0.0  ;;  %3339 = vmatpush1.bf16.msra.mxu1 %v16768_v35  ;;  %v19214_v35 = vld [vmem:[%s27421_s3 + $0x78] sm:$0xff]   ;;  %v16840_v51 = vcombine.low %v289_v28, %v293_v30 }
 0x180   :  { %3340 = vmatprep.subr.bf16.mxu1 %v16777_v38  ;;  %v297_v36 = vld [vmem:[%s27419_s1 + $0x818] sm:$0xff] }
 0x181   :  { %3257 = vmatpush1.bf16.msra.mxu0 %v17022_v37  ;;  %v3458_v57 = vpack.c.bf16 %v3450_v40, %v3450_v40  ;;  %v16841_v37 = vcombine.high %v289_v28, %v293_v30  ;;  %v301_v38 = vld [vmem:[%s27419_s1 + $0x838] sm:$0xff] }
 0x182   :  { %3258 = vmatprep.subr.bf16.mxu0 %v17031_v39  ;;  %v305_v39 = vld [vmem:[%s27419_s1 + $0x858] sm:$0xff]  ;;  %v16849_v19 = vcombine.high %v297_v36, %v301_v38 }
 0x183   :  { %3341 = vmatpush1.bf16.msra.mxu1 %v16776_v41  ;;  %v309_v40 = vld [vmem:[%s27419_s1 + $0x878] sm:$0xff]  ;;  %v16848_v41 = vcombine.low %v297_v36, %v301_v38 }
 0x184   :  { %3342 = vmatprep.subr.bf16.mxu1 %v16785_v16  ;;  %v16857_v32 = vcombine.high %v305_v39, %v309_v40  ;;  %v3457_v16 = vpack.c.bf16 %v3449_v55, %v3449_v55  ;;  %v357_v17 = vld [vmem:[%s27419_s1 + $0x9f8] sm:$0xff] }
 0x185   :  { %3259 = vmatpush1.bf16.msra.mxu0 %v17030_v43  ;;  %v317_v43 = vld [vmem:[%s27419_s1 + $0x8b8] sm:$0xff] }
 0x186   :  { %18643 = vmatprep.subr.bf16.mxu0 %v19200_v42  ;;  %v313_v42 = vld [vmem:[%s27419_s1 + $0x898] sm:$0xff] }
 0x187   :  { %3343 = vmatpush1.bf16.msra.mxu1 %v16784_v47  ;;  %v19234_v47 = vld [vmem:[%s27421_s3 + $0x148] sm:$0xff]   ;;  %v361_v22 = vld [vmem:[%s27419_s1 + $0xa18] sm:$0xff] }
 0x188   :  { %3277 = vmatmul.mubr.bf16.vlgmr.msra.gmra.mrb[4].mxu0 %v20672_v60  ;;  %3344 = vmatprep.subr.bf16.mxu1 %v16793_v52  ;;  %v19235_v52 = vld [vmem:[%s27421_s3 + $0x108] sm:$0xff]   ;;  %v377_v30 = vld [vmem:[%s27419_s1 + $0xa98] sm:$0xff] }
 0x189   :  { %18644 = vmatpush3.bf16.msra.mxu0 %v19201_v46  ;;  %4016 = vmatprep.mubr.bf16.mxu0 %v3458_v57  ;;  %v16856_v46 = vcombine.low %v305_v39, %v309_v40  ;;  %v16864_v57 = vcombine.low %v313_v42, %v317_v43  ;;  %v385_v36 = vld [vmem:[%s27419_s1 + $0xad8] sm:$0xff] }
 0x18a   :  { %18645 = vmatprep.subr.bf16.mxu0 %v19202_v49  ;;  %v16865_v49 = vcombine.high %v313_v42, %v317_v43  ;;  %v397_v39 = vld [vmem:[%s27419_s1 + $0xb38] sm:$0xff] }
 0x18b   :  { %3345 = vmatpush1.bf16.msra.mxu1 %v16792_v62  ;;  %v19237_v62 = vld [vmem:[%s27421_s3 + $0x110] sm:$0xff]   ;;  %v401_v40 = vld [vmem:[%s27419_s1 + $0xb58] sm:$0xff] }
 0x18c   :  { %3346 = vmatprep.subr.bf16.mxu1 %v16801_v1  ;;  %v337_v1 = vld [vmem:[%s27419_s1 + $0x958] sm:$0xff] }
 0x18d   :  { %18646 = vmatpush3.bf16.msra.mxu0 %v19203_v61  ;;  %v333_v61 = vld [vmem:[%s27419_s1 + $0x938] sm:$0xff]  ;;  %v16888_v14 = vcombine.low %v337_v1, %v341_v2 }
 0x18e   :  { %18647 = vmatprep.subr.bf16.mxu0 %v19204_v63  ;;  %v19238_v63 = vld [vmem:[%s27421_s3 + $0x158] sm:$0xff]  }
 0x18f   :  { %3347 = vmatpush1.bf16.msra.mxu1 %v16800_v4  ;;  %v19239_v4 = vld [vmem:[%s27421_s3 + $0x118] sm:$0xff]  }
 0x190   :  { %3348 = vmatprep.subr.bf16.mxu1 %v16809_v9  ;;  %v345_v9 = vld [vmem:[%s27419_s1 + $0x998] sm:$0xff] }
 0x191   :  { %18648 = vmatpush3.bf16.msra.mxu0 %v19205_v3 }
 0x192   :  { %18649 = vmatprep.subr.bf16.mxu0 %v19206_v5  ;;  %v19240_v5 = vld [vmem:[%s27421_s3 + $0x160] sm:$0xff]  }
 0x193   :  { %3349 = vmatpush1.bf16.msra.mxu1 %v16808_v12  ;;  %v19241_v12 = vld [vmem:[%s27421_s3 + $0x120] sm:$0xff]  }
 0x194   :  { %3350 = vmatprep.subr.bf16.mxu1 %v16817_v15  ;;  %v353_v15 = vld [vmem:[%s27419_s1 + $0x9d8] sm:$0xff] }
 0x195   :  { %18650 = vmatpush3.bf16.msra.mxu0 %v19207_v11  ;;  %v16889_v11 = vcombine.high %v337_v1, %v341_v2  ;;  %v16905_v24 = vcombine.high %v353_v15, %v357_v17 }
 0x196   :  { %18651 = vmatprep.subr.bf16.mxu0 %v19208_v13  ;;  %v19242_v13 = vld [vmem:[%s27421_s3 + $0x168] sm:$0xff]  }
 0x197   :  { %3351 = vmatpush1.bf16.msra.mxu1 %v16816_v20  ;;  %v19243_v20 = vld [vmem:[%s27421_s3 + $0x128] sm:$0xff]  }
 0x198   :  { %3352 = vmatprep.subr.bf16.mxu1 %v16825_v23  ;;  %v365_v23 = vld [vmem:[%s27419_s1 + $0xa38] sm:$0xff] }
 0x199   :  { %18652 = vmatpush3.bf16.msra.mxu0 %v19209_v18  ;;  %v16897_v18 = vcombine.high %v345_v9, %v349_v10  ;;  %v16913_v28 = vcombine.high %v361_v22, %v365_v23 }
 0x19a   :  { %18653 = vmatprep.subr.bf16.mxu0 %v19210_v53  ;;  %v16896_v53 = vcombine.low %v345_v9, %v349_v10  ;;  %v449_v9 = vld [vmem:[%s27419_s1 + $0xcd8] sm:$0xff] }
 0x19b   :  { %3353 = vmatpush1.bf16.msra.mxu1 %v16824_v26  ;;  %v369_v26 = vld [vmem:[%s27419_s1 + $0xa58] sm:$0xff] }
 0x19c   :  { %3354 = vmatprep.subr.bf16.mxu1 %v16833_v29  ;;  %v16912_v29 = vcombine.low %v361_v22, %v365_v23  ;;  %v453_v10 = vld [vmem:[%s27419_s1 + $0xcf8] sm:$0xff] }
 0x19d   :  { %18654 = vmatpush3.bf16.msra.mxu0 %v19211_v25  ;;  %v16904_v25 = vcombine.low %v353_v15, %v357_v17  ;;  %v17000_v15 = vcombine.low %v449_v9, %v453_v10  ;;  %v465_v17 = vld [vmem:[%s27419_s1 + $0xd58] sm:$0xff] }
 0x19e   :  { %18655 = vmatprep.subr.bf16.mxu0 %v19212_v54  ;;  %v373_v54 = vld [vmem:[%s27419_s1 + $0xa78] sm:$0xff] }
 0x19f   :  { %3355 = vmatpush1.bf16.msra.mxu1 %v16832_v34  ;;  %v16921_v34 = vcombine.high %v369_v26, %v373_v54  ;;  %v473_v22 = vld [vmem:[%s27419_s1 + $0xd98] sm:$0xff] }
 0x1a0   :  { %3356 = vmatprep.subr.bf16.mxu1 %v16841_v37  ;;  %v389_v37 = vld [vmem:[%s27419_s1 + $0xaf8] sm:$0xff] }
 0x1a1   :  { %18656 = vmatpush3.bf16.msra.mxu0 %v19213_v31  ;;  %v381_v31 = vld [vmem:[%s27419_s1 + $0xab8] sm:$0xff]  ;;  %v16937_v55 = vcombine.high %v385_v36, %v389_v37 }
 0x1a2   :  { %18657 = vmatprep.subr.bf16.mxu0 %v19214_v35  ;;  %v16920_v35 = vcombine.low %v369_v26, %v373_v54  ;;  %v16929_v38 = vcombine.high %v377_v30, %v381_v31  ;;  %v477_v23 = vld [vmem:[%s27419_s1 + $0xdb8] sm:$0xff] }
 0x1a3   :  { %3357 = vmatpush1.bf16.msra.mxu1 %v16840_v51  ;;  %v393_v51 = vld [vmem:[%s27419_s1 + $0xb18] sm:$0xff] }
 0x1a4   :  { %3367 = vmatprep.subr.bf16.mxu1 %v16849_v19  ;;  %v16936_v19 = vcombine.low %v385_v36, %v389_v37  ;;  %v16945_v42 = vcombine.high %v393_v51, %v397_v39  ;;  %v16944_v43 = vcombine.low %v393_v51, %v397_v39  ;;  %v481_v54 = vld [vmem:[%s27419_s1 + $0xdd8] sm:$0xff]  ;;  %v17024_v37 = vcombine.low %v473_v22, %v477_v23 }
 0x1a5   :  { %18658 = vmatpush3.bf16.msra.mxu0 %v19215_v58  ;;  %v16928_v58 = vcombine.low %v377_v30, %v381_v31  ;;  %v22299_v31 = vld [vmem:[%s27420_s2] sm:$0xff] }
 0x1a6   :  { %3359 = vmatmul.mubr.bf16.vlgmr.msra.gmra.mrb[8].mxu1 %v21002_v21  ;;  %v321_v21 = vld [vmem:[%s27419_s1 + $0x8d8] sm:$0xff]  ;;  %18687 = vmatprep.subr.bf16.mxu0 %v19232_v44 }
 0x1a7   :  { %3368 = vmatpush1.bf16.msra.mxu1 %v16848_v41  ;;  %3399 = vmatprep.mubr.bf16.mxu1 %v21018_v27  ;;  %v329_v27 = vld [vmem:[%s27419_s1 + $0x918] sm:$0xff]  ;;  %v16873_v60 = vcombine.high %v321_v21, %v325_v50  ;;  %v16872_v0 = vcombine.low %v321_v21, %v325_v50  ;;  %v19244_v21 = vld [vmem:[%s27421_s3 + $0x170] sm:$0xff]  }
 0x1a8   :  { %4017 = vmatmul.mubr.bf16.vlgmr.msra.gmra.mrb[8].mxu0 %v3457_v16  ;;  %3369 = vmatprep.subr.bf16.mxu1 %v16857_v32  ;;  %v16881_v3 = vcombine.high %v329_v27, %v333_v61  ;;  %v16880_v7 = vcombine.low %v329_v27, %v333_v61  ;;  %v405_v41 = vld [vmem:[%s27419_s1 + $0xb78] sm:$0xff]  ;;  %v19245_v50 = vld [vmem:[%s27421_s3 + $0x130] sm:$0xff]  }
 0x1a9   :  { %18688 = vmatpush3.bf16.msra.mxu0 %v19233_v45  ;;  %v409_v32 = vld [vmem:[%s27419_s1 + $0xb98] sm:$0xff]  ;;  %v16953_v44 = vcombine.high %v401_v40, %v405_v41  ;;  %v16952_v45 = vcombine.low %v401_v40, %v405_v41  ;;  %v19217_v40 = vld [vmem:[%s27421_s3 + $0x80] sm:$0xff]   ;;  %v19218_v41 = vld [vmem:[%s27421_s3 + $0xc8] sm:$0xff]  }
 0x1aa   :  { %18689 = vmatprep.subr.bf16.mxu0 %v19234_v47  ;;  %v413_v16 = vld [vmem:[%s27419_s1 + $0xbb8] sm:$0xff] }
 0x1ab   :  { %3370 = vmatpush1.bf16.msra.mxu1 %v16856_v46  ;;  %v417_v46 = vld [vmem:[%s27419_s1 + $0xbd8] sm:$0xff] }
 0x1ac   :  { %3371 = vmatprep.subr.bf16.mxu1 %v16865_v49  ;;  %v421_v47 = vld [vmem:[%s27419_s1 + $0xbf8] sm:$0xff]  ;;  %v16961_v49 = vcombine.high %v409_v32, %v413_v16 }
 0x1ad   :  { %18690 = vmatpush3.bf16.msra.mxu0 %v19235_v52  ;;  %v16960_v52 = vcombine.low %v409_v32, %v413_v16  ;;  %v16969_v27 = vcombine.high %v417_v46, %v421_v47  ;;  %v19246_v61 = vld [vmem:[%s27421_s3 + $0x178] sm:$0xff]   ;;  %v19220_v16 = vld [vmem:[%s27421_s3 + $0xd0] sm:$0xff]  }
 0x1ae   :  { %18691 = vmatprep.subr.bf16.mxu0 %v19236_v56  ;;  %v425_v56 = vld [vmem:[%s27419_s1 + $0xc18] sm:$0xff] }
 0x1af   :  { %3372 = vmatpush1.bf16.msra.mxu1 %v16864_v57  ;;  %v429_v57 = vld [vmem:[%s27419_s1 + $0xc38] sm:$0xff] }
 0x1b0   :  { %3373 = vmatprep.subr.bf16.mxu1 %v16873_v60  ;;  %v19247_v60 = vld [vmem:[%s27421_s3 + $0x138] sm:$0xff]   ;;  %v16977_v1 = vcombine.high %v425_v56, %v429_v57  ;;  %v16976_v2 = vcombine.low %v425_v56, %v429_v57  ;;  %v19228_v56 = vld [vmem:[%s27421_s3 + $0xf0] sm:$0xff]  }
 0x1b1   :  { %18692 = vmatpush3.bf16.msra.mxu0 %v19237_v62  ;;  %v16968_v62 = vcombine.low %v417_v46, %v421_v47  ;;  %v20674_v32 = vld [vmem:[%s27418_s0 + $0x18] ss:$0 sps:$4 sm:$0xff]   ;;  %v19224_v47 = vld [vmem:[%s27421_s3 + $0xe0] sm:$0xff]  }
 0x1b2   :  { %18693 = vmatprep.subr.bf16.mxu0 %v19238_v63  ;;  %v433_v63 = vld [vmem:[%s27419_s1 + $0xc58] sm:$0xff] }
 0x1b3   :  { %3374 = vmatpush1.bf16.msra.mxu1 %v16872_v0  ;;  %v437_v0 = vld [vmem:[%s27419_s1 + $0xc78] sm:$0xff] }
 0x1b4   :  { %3375 = vmatprep.subr.bf16.mxu1 %v16881_v3  ;;  %v441_v3 = vld [vmem:[%s27419_s1 + $0xc98] sm:$0xff] }
 0x1b5   :  { %18694 = vmatpush3.bf16.msra.mxu0 %v19239_v4  ;;  %v445_v4 = vld [vmem:[%s27419_s1 + $0xcb8] sm:$0xff] }
 0x1b6   :  { %18695 = vmatprep.subr.bf16.mxu0 %v19240_v5  ;;  %v16985_v5 = vcombine.high %v433_v63, %v437_v0  ;;  %v19223_v46 = vld [vmem:[%s27421_s3 + $0x98] sm:$0xff]  }
 0x1b7   :  { %3376 = vmatpush1.bf16.msra.mxu1 %v16880_v7  ;;  %v16984_v7 = vcombine.low %v433_v63, %v437_v0  ;;  %v19248_v63 = vld [vmem:[%s27421_s3 + $0x1c0] sm:$0xff]  }
 0x1b8   :  { %3377 = vmatprep.subr.bf16.mxu1 %v16889_v11  ;;  %v16993_v11 = vcombine.high %v441_v3, %v445_v4 }
 0x1b9   :  { %18696 = vmatpush3.bf16.msra.mxu0 %v19241_v12  ;;  %v16992_v12 = vcombine.low %v441_v3, %v445_v4  ;;  %v19251_v4 = vld [vmem:[%s27421_s3 + $0x188] sm:$0xff]  }
 0x1ba   :  { %18697 = vmatprep.subr.bf16.mxu0 %v19242_v13  ;;  %v461_v13 = vld [vmem:[%s27419_s1 + $0xd38] sm:$0xff] }
 0x1bb   :  { %3378 = vmatpush1.bf16.msra.mxu1 %v16888_v14  ;;  %v17001_v14 = vcombine.high %v449_v9, %v453_v10  ;;  %v19254_v9 = vld [vmem:[%s27421_s3 + $0x1d8] sm:$0xff]  }
 0x1bc   :  { %3379 = vmatprep.subr.bf16.mxu1 %v16897_v18  ;;  %v469_v18 = vld [vmem:[%s27419_s1 + $0xd78] sm:$0xff] }
 0x1bd   :  { %18698 = vmatpush3.bf16.msra.mxu0 %v19243_v20  ;;  %v17016_v26 = vcombine.low %v465_v17, %v469_v18  ;;  %v19255_v10 = vld [vmem:[%s27421_s3 + $0x198] sm:$0xff]  }
 0x1be   :  { %18699 = vmatprep.subr.bf16.mxu0 %v19244_v21  ;;  %v19226_v21 = vld [vmem:[%s27421_s3 + $0xe8] sm:$0xff]  }
 0x1bf   :  { %3380 = vmatpush1.bf16.msra.mxu1 %v16896_v53 }
 0x1c0   :  { %3381 = vmatprep.subr.bf16.mxu1 %v16905_v24  ;;  %v17017_v24 = vcombine.high %v465_v17, %v469_v18 }
 0x1c1   :  { %18700 = vmatpush3.bf16.msra.mxu0 %v19245_v50  ;;  %v22340_v50 = vsub.s32 2, %v21944_v59 }
 0x1c2   :  { %18701 = vmatprep.subr.bf16.mxu0 %v19246_v61  ;;  %v19230_v61 = vld [vmem:[%s27421_s3 + $0xf8] sm:$0xff]  }
 0x1c3   :  { %3382 = vmatpush1.bf16.msra.mxu1 %v16904_v25  ;;  %v22288_v25 = vsub.s32 3, %v21944_v59  ;;  %v499_v57 = vrot.slane %v22299_v31, %v22340_v50 }
 0x1c4   :  { %3383 = vmatprep.subr.bf16.mxu1 %v16913_v28  ;;  %v485_v28 = vld [vmem:[%s27419_s1 + $0xdf8] sm:$0xff] }
 0x1c5   :  { %18702 = vmatpush3.bf16.msra.mxu0 %v19247_v60  ;;  %v17032_v39 = vcombine.low %v481_v54, %v485_v28 }
 0x1c7   :  { %3384 = vmatpush1.bf16.msra.mxu1 %v16912_v29  ;;  %v17025_v29 = vcombine.high %v473_v22, %v477_v23  ;;  %v19261_v22 = vld [vmem:[%s27421_s3 + $0x1b0] sm:$0xff]  }
 0x1c8   :  { %3385 = vmatprep.subr.bf16.mxu1 %v16921_v34  ;;  %v503_v34 = vrot.slane %v22299_v31, %v22288_v25 }
 0x1cb   :  { %3386 = vmatpush1.bf16.msra.mxu1 %v16920_v35 }
 0x1cc   :  { %3387 = vmatprep.subr.bf16.mxu1 %v16929_v38 }
 0x1cf   :  { %3388 = vmatpush1.bf16.msra.mxu1 %v16928_v58  ;;  %v17033_v58 = vcombine.high %v481_v54, %v485_v28 }
 0x1d0   :  { %3389 = vmatprep.subr.bf16.mxu1 %v16937_v55  ;;  %v19216_v55 = vld [vmem:[%s27421_s3 + $0xc0] sm:$0xff]  }
 0x1d3   :  { %3390 = vmatpush1.bf16.msra.mxu1 %v16936_v19 }
 0x1d4   :  { %3391 = vmatprep.subr.bf16.mxu1 %v16945_v42 }
 0x1d7   :  { %3392 = vmatpush1.bf16.msra.mxu1 %v16944_v43  ;;  %v19219_v43 = vld [vmem:[%s27421_s3 + $0x88] sm:$0xff]  }
 0x1d8   :  { %3393 = vmatprep.subr.bf16.mxu1 %v16953_v44  ;;  %v19221_v44 = vld [vmem:[%s27421_s3 + $0x90] sm:$0xff]  }
 0x1db   :  { %3394 = vmatpush1.bf16.msra.mxu1 %v16952_v45  ;;  %v19222_v45 = vld [vmem:[%s27421_s3 + $0xd8] sm:$0xff]  }
 0x1dc   :  { %3395 = vmatprep.subr.bf16.mxu1 %v16961_v49  ;;  %v19225_v49 = vld [vmem:[%s27421_s3 + $0xa0] sm:$0xff]  }
 0x1df   :  { %3396 = vmatpush1.bf16.msra.mxu1 %v16960_v52  ;;  %v19227_v52 = vld [vmem:[%s27421_s3 + $0xa8] sm:$0xff]  }
 0x1e0   :  { %3397 = vmatprep.subr.bf16.mxu1 %v16969_v27  ;;  %v19229_v27 = vld [vmem:[%s27421_s3 + $0xb0] sm:$0xff]  }
 0x1e3   :  { %3398 = vmatpush1.bf16.msra.mxu1 %v16968_v62  ;;  %v19231_v62 = vld [vmem:[%s27421_s3 + $0xb8] sm:$0xff]  }
 0x1e4   :  { %3408 = vmatprep.subr.bf16.mxu1 %v16977_v1  ;;  %v19249_v1 = vld [vmem:[%s27421_s3 + $0x180] sm:$0xff]  }
 0x1e6   :  { %3400 = vmatmul.mubr.bf16.vlgmr.msra.gmra.mrb[8].mxu1 %v21206_v33  ;;  %v457_v33 = vld [vmem:[%s27419_s1 + $0xd18] sm:$0xff] }
 0x1e7   :  { %3409 = vmatpush1.bf16.msra.mxu1 %v16976_v2  ;;  %3440 = vmatprep.mubr.bf16.mxu1 %v20701_v48  ;;  %v17009_v20 = vcombine.high %v457_v33, %v461_v13  ;;  %v17008_v53 = vcombine.low %v457_v33, %v461_v13  ;;  %v19250_v2 = vld [vmem:[%s27421_s3 + $0x1c8] sm:$0xff]  }
 0x1e8   :  { %3410 = vmatprep.subr.bf16.mxu1 %v16985_v5  ;;  %v19252_v5 = vld [vmem:[%s27421_s3 + $0x1d0] sm:$0xff]   ;;  %v19258_v33 = vld [vmem:[%s27421_s3 + $0x1e8] sm:$0xff]  }
 0x1e9   :  { %v19259_v13 = vld [vmem:[%s27421_s3 + $0x1a8] sm:$0xff]  }
 0x1eb   :  { %3411 = vmatpush1.bf16.msra.mxu1 %v16984_v7  ;;  %v19253_v7 = vld [vmem:[%s27421_s3 + $0x190] sm:$0xff]  }
 0x1ec   :  { %3412 = vmatprep.subr.bf16.mxu1 %v16993_v11  ;;  %v19256_v11 = vld [vmem:[%s27421_s3 + $0x1e0] sm:$0xff]  }
 0x1ef   :  { %3413 = vmatpush1.bf16.msra.mxu1 %v16992_v12  ;;  %v19257_v12 = vld [vmem:[%s27421_s3 + $0x1a0] sm:$0xff]  }
 0x1f0   :  { %3414 = vmatprep.subr.bf16.mxu1 %v17001_v14  ;;  %v22396_v14 = vsub.s32 4, %v21944_v59 }
 0x1f2   :  { %v507_v17 = vrot.slane %v22299_v31, %v22396_v14 }
 0x1f3   :  { %3415 = vmatpush1.bf16.msra.mxu1 %v17000_v15  ;;  %v22399_v15 = vsub.s32 5, %v21944_v59 }
 0x1f4   :  { %3416 = vmatprep.subr.bf16.mxu1 %v17009_v20  ;;  %v19260_v20 = vld [vmem:[%s27421_s3 + $0x1f0] sm:$0xff]  }
 0x1f5   :  { %v511_v18 = vrot.slane %v22299_v31, %v22399_v15 }
 0x1f7   :  { %3417 = vmatpush1.bf16.msra.mxu1 %v17008_v53 }
 0x1f8   :  { %3418 = vmatprep.subr.bf16.mxu1 %v17017_v24 }
 0x1f9   :  { %v3114_v30 = vpop.f32.mrb[4].mxu1 }
 0x1fa   :  { %v3116_v35 = vpop.f32.mrb[5].mxu1  ;;  %v18999_v60 = vadd.f32 %v3114_v30, %v499_v57 }
 0x1fb   :  { %v3118_v36 = vpop.f32.mrb[6].mxu1  ;;  %3419 = vmatpush1.bf16.msra.mxu1 %v17016_v26  ;;  %v19000_v51 = vadd.f32 %v3116_v35, %v503_v34 }
 0x1fc   :  { %v3119_v38 = vpop.f32.mrb[7].mxu1  ;;  %3420 = vmatprep.subr.bf16.mxu1 %v17025_v29  ;;  %v3451_v0 = vmax.f32 %v18999_v60, 0.0 }
 0x1fd   :  { %v3452_v19 = vmax.f32 %v19000_v51, 0.0 }
 0x1fe   :  { %v3459_v3 = vpack.c.bf16 %v3451_v0, %v3451_v0 }
 0x1ff   :  { %3421 = vmatpush1.bf16.msra.mxu1 %v17024_v37  ;;  %v3460_v42 = vpack.c.bf16 %v3452_v19, %v3452_v19 }
 0x200   :  { %3422 = vmatprep.subr.bf16.mxu1 %v17033_v58 }
 0x203   :  { %3423 = vmatpush1.bf16.msra.mxu1 %v17032_v39 }
 0x204   :  { %18665 = vmatprep.subr.bf16.mxu1 %v19216_v55 }
 0x206   :  { %3441 = vmatmul.mubr.bf16.vlgmr.msra.gmra.mrb[8].mxu1 %v20674_v32 }
 0x207   :  { %18666 = vmatpush3.bf16.msra.mxu1 %v19217_v40  ;;  %4056 = vmatprep.mubr.bf16.mxu1 %v3460_v42 }
 0x208   :  { %18667 = vmatprep.subr.bf16.mxu1 %v19218_v41 }
 0x20b   :  { %18668 = vmatpush3.bf16.msra.mxu1 %v19219_v43 }
 0x20c   :  { %18669 = vmatprep.subr.bf16.mxu1 %v19220_v16 }
 0x20f   :  { %18670 = vmatpush3.bf16.msra.mxu1 %v19221_v44 }
 0x210   :  { %18671 = vmatprep.subr.bf16.mxu1 %v19222_v45 }
 0x213   :  { %18672 = vmatpush3.bf16.msra.mxu1 %v19223_v46 }
 0x214   :  { %18673 = vmatprep.subr.bf16.mxu1 %v19224_v47 }
 0x217   :  { %18674 = vmatpush3.bf16.msra.mxu1 %v19225_v49 }
 0x218   :  { %18675 = vmatprep.subr.bf16.mxu1 %v19226_v21 }
 0x21b   :  { %18676 = vmatpush3.bf16.msra.mxu1 %v19227_v52 }
 0x21c   :  { %18677 = vmatprep.subr.bf16.mxu1 %v19228_v56 }
 0x21f   :  { %18678 = vmatpush3.bf16.msra.mxu1 %v19229_v27 }
 0x220   :  { %18679 = vmatprep.subr.bf16.mxu1 %v19230_v61 }
 0x223   :  { %18680 = vmatpush3.bf16.msra.mxu1 %v19231_v62 }
 0x224   :  { %18709 = vmatprep.subr.bf16.mxu1 %v19248_v63 }
 0x226   :  { %4057 = vmatmul.mubr.bf16.vlgmr.msra.gmra.mrb[12].mxu1 %v3459_v3 }
 0x227   :  { %18710 = vmatpush3.bf16.msra.mxu1 %v19249_v1 }
 0x228   :  { %18711 = vmatprep.subr.bf16.mxu1 %v19250_v2 }
 0x22b   :  { %18712 = vmatpush3.bf16.msra.mxu1 %v19251_v4 }
 0x22c   :  { %18713 = vmatprep.subr.bf16.mxu1 %v19252_v5 }
 0x22f   :  { %18714 = vmatpush3.bf16.msra.mxu1 %v19253_v7 }
 0x230   :  { %18715 = vmatprep.subr.bf16.mxu1 %v19254_v9 }
 0x233   :  { %18716 = vmatpush3.bf16.msra.mxu1 %v19255_v10 }
 0x234   :  { %18717 = vmatprep.subr.bf16.mxu1 %v19256_v11 }
 0x237   :  { %18718 = vmatpush3.bf16.msra.mxu1 %v19257_v12 }
 0x238   :  { %18719 = vmatprep.subr.bf16.mxu1 %v19258_v33 }
 0x23b   :  { %18720 = vmatpush3.bf16.msra.mxu1 %v19259_v13 }
 0x25b   :  { %v3278_v53 = vpop.f32.mrb[4].mxu0 }
 0x25c   :  { %14 = vsyncpa [#allocation3], 0  ;;  %v19001_v23 = vadd.f32 %v3278_v53, %v507_v17  ;;  %v3280_v24 = vpop.f32.mrb[5].mxu0  ;;  %18721 = vmatprep.subr.bf16.mxu1 %v19260_v20  ;;  %v19262_v30 = vld [vmem:[%s27421_s3 + $0x1f8] sm:$0xff]   ;;  %v4145_v19 = vld [vmem:[%s27423_s5] sm:$0xff]  ;;  %v22475_v11 = vsub.s32 6, %v21944_v59 }
 0x25d   :  { %v19002_v26 = vadd.f32 %v3280_v24, %v511_v18  ;;  %v3282_v54 = vpop.f32.mrb[6].mxu0  ;;  %18722 = vmatpush3.bf16.msra.mxu1 %v19261_v22  ;;  %v19263_v35 = vld [vmem:[%s27421_s3 + $0x1b8] sm:$0xff]   ;;  %v4149_v40 = vld [vmem:[%s27423_s5 + $0x20] sm:$0xff]  ;;  %v22429_v41 = vld [vmem:[%s27423_s5 + $0x8] sm:$0xff]  ;;  %v22478_v33 = vsub.s32 7, %v21944_v59  ;;  %vm8297_vm0 = vcmask 130048  }
 0x25e   :  { %v3453_v28 = vmax.f32 %v19001_v23, 0.0  ;;  %v3283_v29 = vpop.f32.mrb[7].mxu0  ;;  %18723 = vmatprep.subr.bf16.mxu1 %v19262_v30  ;;  %v17099_v42 = vcombine.low %v4145_v19, %v4149_v40  ;;  %v17100_v43 = vcombine.high %v4145_v19, %v4149_v40  ;;  %v22434_v32 = vld [vmem:[%s27423_s5 + $0x28] sm:$0xff]  ;;  %v4153_v16 = vld [vmem:[%s27423_s5 + $0x40] sm:$0xff]  ;;  %v515_v13 = vrot.slane %v22299_v31, %v22475_v11 }
 0x25f   :  { %v3454_v34 = vmax.f32 %v19002_v26, 0.0  ;;  %v4157_v44 = vld [vmem:[%s27423_s5 + $0x60] sm:$0xff]  ;;  %v17102_v45 = vcombine.high %v22429_v41, %v22434_v32  ;;  %v519_v17 = vrot.slane %v22299_v31, %v22478_v33  ;;  %v4154_v59 = vld [vmem:[%s27423_s5 + $0x48] sm:$0xff]  ;;  %v17101_v31 = vcombine.low %v22429_v41, %v22434_v32 }
 0x260   :  { %v3461_v37 = vpack.c.bf16 %v3453_v28, %v3453_v28  ;;  %v17108_v46 = vcombine.high %v4153_v16, %v4157_v44  ;;  %v4161_v47 = vld [vmem:[%s27423_s5 + $0x80] sm:$0xff]  ;;  %4571 = vmatprep.subr.bf16.mxu0 %v17100_v43  ;;  %v17107_v21 = vcombine.low %v4153_v16, %v4157_v44  ;;  %v4158_v28 = vld [vmem:[%s27423_s5 + $0x68] sm:$0xff] }
 0x261   :  { %v3462_v36 = vpack.c.bf16 %v3454_v34, %v3454_v34  ;;  %18724 = vmatpush3.bf16.msra.mxu1 %v19263_v35  ;;  %v4165_v49 = vld [vmem:[%s27423_s5 + $0xa0] sm:$0xff]  ;;  %v17110_v34 = vcombine.high %v4154_v59, %v4158_v28  ;;  %v4162_v35 = vld [vmem:[%s27423_s5 + $0x88] sm:$0xff] }
 0x262   :  { %4612 = vmatprep.subr.bf16.mxu1 %v17102_v45  ;;  %v17116_v52 = vcombine.high %v4161_v47, %v4165_v49  ;;  %v4169_v56 = vld [vmem:[%s27423_s5 + $0xc0] sm:$0xff]  ;;  %v17115_v27 = vcombine.low %v4161_v47, %v4165_v49  ;;  %v4178_v40 = vld [vmem:[%s27423_s5 + $0x108] sm:$0xff] }
 0x263   :  { %4096 = vmatprep.mubr.bf16.mxu0 %v3462_v36  ;;  %v4173_v57 = vld [vmem:[%s27423_s5 + $0xe0] sm:$0xff]  ;;  %v4166_v36 = vld [vmem:[%s27423_s5 + $0xa8] sm:$0xff] }
 0x264   :  { %4097 = vmatmul.mubr.bf16.vlgmr.msra.gmra.mrb[12].mxu0 %v3461_v37  ;;  %v17124_v61 = vcombine.high %v4169_v56, %v4173_v57  ;;  %v4177_v60 = vld [vmem:[%s27423_s5 + $0x100] sm:$0xff]  ;;  %v17123_v63 = vcombine.low %v4169_v56, %v4173_v57  ;;  %v17109_v37 = vcombine.low %v4154_v59, %v4158_v28  ;;  %v4182_v41 = vld [vmem:[%s27423_s5 + $0x128] sm:$0xff] }
 0x265   :  { %4603 = vmatprep.mubr.bf16.mxu0 %v20701_v48  ;;  %4572 = vmatpush1.bf16.msra.mxu0 %v17099_v42  ;;  %v4181_v62 = vld [vmem:[%s27423_s5 + $0x120] sm:$0xff]  ;;  %v17134_v43 = vcombine.high %v4178_v40, %v4182_v41  ;;  %v4186_v32 = vld [vmem:[%s27423_s5 + $0x148] sm:$0xff]  ;;  %v17133_v44 = vcombine.low %v4178_v40, %v4182_v41  ;;  %v4163_v41 = vld [vmem:[%s27423_s5 + $0x90] sm:$0xff] }
 0x266   :  { %4573 = vmatprep.subr.bf16.mxu0 %v17108_v46  ;;  %v17132_v0 = vcombine.high %v4177_v60, %v4181_v62  ;;  %v4185_v1 = vld [vmem:[%s27423_s5 + $0x140] sm:$0xff]  ;;  %v17131_v3 = vcombine.low %v4177_v60, %v4181_v62  ;;  %v4190_v16 = vld [vmem:[%s27423_s5 + $0x168] sm:$0xff] }
 0x267   :  { %v4189_v2 = vld [vmem:[%s27423_s5 + $0x160] sm:$0xff]  ;;  %v17142_v45 = vcombine.high %v4186_v32, %v4190_v16  ;;  %v4194_v46 = vld [vmem:[%s27423_s5 + $0x188] sm:$0xff]  ;;  %v17141_v49 = vcombine.low %v4186_v32, %v4190_v16  ;;  %v4168_v32 = vld [vmem:[%s27423_s5 + $0xb8] sm:$0xff] }
 0x268   :  { %v17140_v4 = vcombine.high %v4185_v1, %v4189_v2  ;;  %v4193_v5 = vld [vmem:[%s27423_s5 + $0x180] sm:$0xff]  ;;  %v17139_v9 = vcombine.low %v4185_v1, %v4189_v2  ;;  %v4198_v47 = vld [vmem:[%s27423_s5 + $0x1a8] sm:$0xff] }
 0x269   :  { %4574 = vmatpush1.bf16.msra.mxu0 %v17107_v21  ;;  %v4197_v7 = vld [vmem:[%s27423_s5 + $0x1a0] sm:$0xff]  ;;  %v17150_v21 = vcombine.high %v4194_v46, %v4198_v47 }
 0x26a   :  { %4575 = vmatprep.subr.bf16.mxu0 %v17116_v52  ;;  %v17148_v10 = vcombine.high %v4193_v5, %v4197_v7  ;;  %v17147_v12 = vcombine.low %v4193_v5, %v4197_v7  ;;  %v17149_v52 = vcombine.low %v4194_v46, %v4198_v47  ;;  %v17034_v56 = vld [vmem:[%s27422_s4] ss:$0 sm:$0xff]  ;;  %v4206_v7 = vld [vmem:[%s27423_s5 + $0x1e8] sm:$0xff]  ;;  %v4171_v47 = vld [vmem:[%s27423_s5 + $0xd0] sm:$0xff] }
 0x26b   :  { %v4201_v2 = vld [vmem:[%s27423_s5 + $0x1c0] sm:$0xff] }
 0x26d   :  { %4576 = vmatpush1.bf16.msra.mxu0 %v17115_v27 }
 0x26e   :  { %4577 = vmatprep.subr.bf16.mxu0 %v17124_v61 }
 0x271   :  { %4578 = vmatpush1.bf16.msra.mxu0 %v17123_v63 }
 0x272   :  { %4579 = vmatprep.subr.bf16.mxu0 %v17132_v0 }
 0x275   :  { %4580 = vmatpush1.bf16.msra.mxu0 %v17131_v3  ;;  %v4205_v3 = vld [vmem:[%s27423_s5 + $0x1e0] sm:$0xff] }
 0x276   :  { %4581 = vmatprep.subr.bf16.mxu0 %v17140_v4  ;;  %v4202_v4 = vld [vmem:[%s27423_s5 + $0x1c8] sm:$0xff] }
 0x279   :  { %4582 = vmatpush1.bf16.msra.mxu0 %v17139_v9 }
 0x27a   :  { %4583 = vmatprep.subr.bf16.mxu0 %v17148_v10 }
 0x27b   :  { %v18659_v38 = vpop.f32.mrb[8].mxu0 }
 0x27c   :  { %v18660_v58 = vpop.f32.mrb[9].mxu0 }
 0x27d   :  { %v22418_v51 = vadd.f32 %v18660_v58, %v18659_v38  ;;  %v18662_v39 = vpop.f32.mrb[10].mxu0  ;;  %4584 = vmatpush1.bf16.msra.mxu0 %v17147_v12  ;;  %v17118_v38 = vcombine.high %v4162_v35, %v4166_v36  ;;  %v4170_v58 = vld [vmem:[%s27423_s5 + $0xc8] sm:$0xff]  ;;  %v17155_v12 = vcombine.low %v4201_v2, %v4205_v3 }
 0x27e   :  { %v18663_v55 = vpop.f32.mrb[11].mxu0  ;;  %v4174_v39 = vld [vmem:[%s27423_s5 + $0xe8] sm:$0xff] }
 0x27f   :  { %v17117_v55 = vcombine.low %v4162_v35, %v4166_v36  ;;  %v17126_v19 = vcombine.high %v4170_v58, %v4174_v39  ;;  %v17125_v42 = vcombine.low %v4170_v58, %v4174_v39  ;;  %v4019_v61 = vadd.f32 %v22418_v51, %v17034_v56  ;;  %v4155_v35 = vld [vmem:[%s27423_s5 + $0x50] sm:$0xff]  ;;  %v4160_v58 = vld [vmem:[%s27423_s5 + $0x78] sm:$0xff] }
 0x280   :  { %v17156_v51 = vcombine.high %v4201_v2, %v4205_v3 }
 0x282   :  { %4585 = vmatprep.subr.bf16.mxu0 %v17156_v51  ;;  %v4191_v51 = vld [vmem:[%s27423_s5 + $0x170] sm:$0xff] }
 0x283   :  { %4586 = vmatpush1.bf16.msra.mxu0 %v17155_v12 }
 0x2d9   :  { %v3442_v18 = vpop.f32.mrb[8].mxu1 }
 0x2da   :  { %v19003_v20 = vadd.f32 %v3442_v18, %v515_v13  ;;  %v3444_v53 = vpop.f32.mrb[9].mxu1  ;;  %v17157_v13 = vcombine.low %v4202_v4, %v4206_v7 }
 0x2db   :  { %v19004_v22 = vadd.f32 %v3444_v53, %v519_v17  ;;  %v3446_v23 = vpop.f32.mrb[10].mxu1  ;;  %v17158_v17 = vcombine.high %v4202_v4, %v4206_v7  ;;  %v4147_v53 = vld [vmem:[%s27423_s5 + $0x10] sm:$0xff]  ;;  %v4188_v7 = vld [vmem:[%s27423_s5 + $0x158] sm:$0xff] }
 0x2dc   :  { %v3455_v24 = vmax.f32 %v19003_v20, 0.0  ;;  %v3447_v26 = vpop.f32.mrb[11].mxu1  ;;  %v4148_v23 = vld [vmem:[%s27423_s5 + $0x18] sm:$0xff] }
 0x2dd   :  { %v3456_v54 = vmax.f32 %v19004_v22, 0.0  ;;  %v4151_v22 = vld [vmem:[%s27423_s5 + $0x30] sm:$0xff] }
 0x2de   :  { %v3463_v30 = vpack.c.bf16 %v3455_v24, %v3455_v24  ;;  %v17103_v24 = vcombine.low %v4147_v53, %v4151_v22  ;;  %v17104_v26 = vcombine.high %v4147_v53, %v4151_v22  ;;  %v4196_v53 = vld [vmem:[%s27423_s5 + $0x198] sm:$0xff] }
 0x2df   :  { %v3464_v29 = vpack.c.bf16 %v3456_v54, %v3456_v54  ;;  %v4152_v54 = vld [vmem:[%s27423_s5 + $0x38] sm:$0xff] }
 0x2e0   :  { %v17105_v59 = vcombine.low %v4148_v23, %v4152_v54  ;;  %v17106_v28 = vcombine.high %v4148_v23, %v4152_v54  ;;  %4653 = vmatprep.subr.bf16.mxu0 %v17104_v26  ;;  %v4200_v22 = vld [vmem:[%s27423_s5 + $0x1b8] sm:$0xff] }
 0x2e1   :  { %4136 = vmatprep.mubr.bf16.mxu1 %v3464_v29  ;;  %v17154_v54 = vcombine.high %v4196_v53, %v4200_v22 }
 0x2e2   :  { %4137 = vmatmul.mubr.bf16.vlgmr.msra.gmra.mrb[16].mxu1 %v3463_v30 }
 0x2e3   :  { %4613 = vmatpush1.bf16.msra.mxu1 %v17101_v31  ;;  %4644 = vmatprep.mubr.bf16.mxu1 %v20701_v48 }
 0x2e4   :  { %4614 = vmatprep.subr.bf16.mxu1 %v17110_v34 }
 0x2e7   :  { %4615 = vmatpush1.bf16.msra.mxu1 %v17109_v37  ;;  %v4159_v37 = vld [vmem:[%s27423_s5 + $0x70] sm:$0xff] }
 0x2e8   :  { %4616 = vmatprep.subr.bf16.mxu1 %v17118_v38  ;;  %v4156_v38 = vld [vmem:[%s27423_s5 + $0x58] sm:$0xff]  ;;  %v17111_v16 = vcombine.low %v4155_v35, %v4159_v37 }
 0x2e9   :  { %v17114_v40 = vcombine.high %v4156_v38, %v4160_v58 }
 0x2eb   :  { %4617 = vmatpush1.bf16.msra.mxu1 %v17117_v55 }
 0x2ec   :  { %4618 = vmatprep.subr.bf16.mxu1 %v17126_v19  ;;  %v17112_v19 = vcombine.high %v4155_v35, %v4159_v37 }
 0x2ef   :  { %4619 = vmatpush1.bf16.msra.mxu1 %v17125_v42  ;;  %v4167_v42 = vld [vmem:[%s27423_s5 + $0xb0] sm:$0xff] }
 0x2f0   :  { %4620 = vmatprep.subr.bf16.mxu1 %v17134_v43  ;;  %v4164_v43 = vld [vmem:[%s27423_s5 + $0x98] sm:$0xff]  ;;  %v17119_v56 = vcombine.low %v4163_v41, %v4167_v42 }
 0x2f1   :  { %v17122_v46 = vcombine.high %v4164_v43, %v4168_v32 }
 0x2f3   :  { %4621 = vmatpush1.bf16.msra.mxu1 %v17133_v44  ;;  %v17113_v44 = vcombine.low %v4156_v38, %v4160_v58  ;;  %v19266_v58 = vld [vmem:[%s27425_s7 + $0x4] ss:$28 sps:$4 sm:$0xff]  }
 0x2f4   :  { %4622 = vmatprep.subr.bf16.mxu1 %v17142_v45  ;;  %v17120_v45 = vcombine.high %v4163_v41, %v4167_v42  ;;  %v19272_v41 = vld [vmem:[%s27425_s7 + $0x3c] ss:$28 sps:$4 sm:$0xff]   ;;  %v19275_v42 = vld [vmem:[%s27425_s7 + $0x44] ss:$28 sps:$4 sm:$0xff]  }
 0x2f7   :  { %4623 = vmatpush1.bf16.msra.mxu1 %v17141_v49  ;;  %v4175_v49 = vld [vmem:[%s27423_s5 + $0xf0] sm:$0xff] }
 0x2f8   :  { %4624 = vmatprep.subr.bf16.mxu1 %v17150_v21  ;;  %v4172_v21 = vld [vmem:[%s27423_s5 + $0xd8] sm:$0xff] }
 0x2f9   :  { %v18681_v57 = vpop.f32.mrb[12].mxu1 }
 0x2fa   :  { %v18682_v27 = vpop.f32.mrb[13].mxu1 }
 0x2fb   :  { %v18683_v60 = vadd.f32 %v18682_v27, %v18681_v57  ;;  %v18684_v62 = vpop.f32.mrb[14].mxu1  ;;  %4625 = vmatpush1.bf16.msra.mxu1 %v17149_v52  ;;  %v4176_v52 = vld [vmem:[%s27423_s5 + $0xf8] sm:$0xff]  ;;  %v17121_v57 = vcombine.low %v4164_v43, %v4168_v32  ;;  %v17128_v27 = vcombine.high %v4171_v47, %v4175_v49 }
 0x2fc   :  { %v18685_v63 = vpop.f32.mrb[15].mxu1  ;;  %4626 = vmatprep.subr.bf16.mxu1 %v17158_v17  ;;  %v4183_v62 = vld [vmem:[%s27423_s5 + $0x130] sm:$0xff]  ;;  %v17129_v2 = vcombine.low %v4172_v21, %v4176_v52  ;;  %v19273_v32 = vld [vmem:[%s27425_s7 + $0x40] ss:$28 sps:$4 sm:$0xff]  }
 0x2fd   :  { %v4059_v0 = vadd.f32 %v18683_v60, %v4019_v61  ;;  %v17130_v61 = vcombine.high %v4172_v21, %v4176_v52  ;;  %v4179_v60 = vld [vmem:[%s27423_s5 + $0x110] sm:$0xff]  ;;  %v4180_v63 = vld [vmem:[%s27423_s5 + $0x118] sm:$0xff]  ;;  %v19290_v52 = vld [vmem:[%s27425_s7 + $0xe4] ss:$28 sps:$4 sm:$0xff]  }
 0x2fe   :  { %v17136_v3 = vcombine.high %v4179_v60, %v4183_v62  ;;  %v19270_v43 = vld [vmem:[%s27425_s7 + $0x38] ss:$28 sps:$4 sm:$0xff]   ;;  %v19285_v21 = vld [vmem:[%s27425_s7 + $0xb0] ss:$28 sps:$4 sm:$0xff]  }
 0x2ff   :  { %4627 = vmatpush1.bf16.msra.mxu1 %v17157_v13 }
 0x300   :  { %4694 = vmatprep.subr.bf16.mxu1 %v17106_v28  ;;  %v4207_v28 = vld [vmem:[%s27423_s5 + $0x1f0] sm:$0xff] }
 0x337   :  { %v18703_v1 = vpop.f32.mrb[12].mxu0 }
 0x338   :  { %v18704_v5 = vpop.f32.mrb[13].mxu0 }
 0x339   :  { %v18705_v9 = vadd.f32 %v18704_v5, %v18703_v1  ;;  %v18706_v10 = vpop.f32.mrb[14].mxu0  ;;  %v17127_v1 = vcombine.low %v4171_v47, %v4175_v49  ;;  %v4187_v5 = vld [vmem:[%s27423_s5 + $0x150] sm:$0xff]  ;;  %v19282_v49 = vld [vmem:[%s27425_s7 + $0xa8] ss:$28 sps:$4 sm:$0xff]  }
 0x33a   :  { %v18707_v18 = vpop.f32.mrb[15].mxu0  ;;  %v17135_v10 = vcombine.low %v4179_v60, %v4183_v62  ;;  %v17144_v13 = vcombine.high %v4187_v5, %v4191_v51  ;;  %v17143_v23 = vcombine.low %v4187_v5, %v4191_v51  ;;  %v19287_v47 = vld [vmem:[%s27425_s7 + $0xb4] ss:$28 sps:$4 sm:$0xff]   ;;  %v19299_v60 = vld [vmem:[%s27425_s7 + $0x124] ss:$28 sps:$4 sm:$0xff]  }
 0x33b   :  { %v4099_v20 = vadd.f32 %v18705_v9, %v4059_v0  ;;  %v4184_v0 = vld [vmem:[%s27423_s5 + $0x138] sm:$0xff]  ;;  %v4195_v18 = vld [vmem:[%s27423_s5 + $0x190] sm:$0xff]  ;;  %v19306_v51 = vld [vmem:[%s27425_s7 + $0x188] ss:$28 sps:$4 sm:$0xff]  }
 0x33c   :  { %v17138_v4 = vcombine.high %v4180_v63, %v4184_v0  ;;  %v4192_v9 = vld [vmem:[%s27423_s5 + $0x178] sm:$0xff]  ;;  %v17137_v12 = vcombine.low %v4180_v63, %v4184_v0  ;;  %v19302_v0 = vld [vmem:[%s27425_s7 + $0x154] ss:$28 sps:$4 sm:$0xff]  }
 0x33d   :  { %v17146_v17 = vcombine.high %v4188_v7, %v4192_v9  ;;  %v19294_v62 = vld [vmem:[%s27425_s7 + $0x118] ss:$28 sps:$4 sm:$0xff]   ;;  %v19297_v63 = vld [vmem:[%s27425_s7 + $0x120] ss:$28 sps:$4 sm:$0xff]  }
 0x33e   :  { %v19311_v5 = vld [vmem:[%s27425_s7 + $0x194] ss:$28 sps:$4 sm:$0xff]  }
 0x3b5   :  { %v18725_v29 = vpop.f32.mrb[16].mxu1 }
 0x3b6   :  { %v18726_v31 = vpop.f32.mrb[17].mxu1 }
 0x3b7   :  { %v18727_v30 = vadd.f32 %v18726_v31, %v18725_v29  ;;  %v18728_v34 = vpop.f32.mrb[18].mxu1  ;;  %v4204_v29 = vld [vmem:[%s27423_s5 + $0x1d8] sm:$0xff] }
 0x3b8   :  { %v18729_v36 = vpop.f32.mrb[19].mxu1  ;;  %v4208_v31 = vld [vmem:[%s27423_s5 + $0x1f8] sm:$0xff]  ;;  %v17153_v34 = vcombine.low %v4196_v53, %v4200_v22  ;;  %v19326_v22 = vld [vmem:[%s27425_s7 + $0x234] ss:$28 sps:$4 sm:$0xff]  }
 0x3b9   :  { %v4139_v39 = vadd.f32 %v18727_v30, %v4099_v20  ;;  %v4199_v20 = vld [vmem:[%s27423_s5 + $0x1b0] sm:$0xff]  ;;  %v17162_v36 = vcombine.high %v4204_v29, %v4208_v31  ;;  %v17161_v38 = vcombine.low %v4204_v29, %v4208_v31  ;;  %v19321_v53 = vld [vmem:[%s27425_s7 + $0x200] ss:$28 sps:$4 sm:$0xff]  }
 0x3ba   :  { %v17152_v26 = vcombine.high %v4195_v18, %v4199_v20  ;;  %v17151_v30 = vcombine.low %v4195_v18, %v4199_v20  ;;  %v19323_v18 = vld [vmem:[%s27425_s7 + $0x204] ss:$28 sps:$4 sm:$0xff]   ;;  %v19318_v20 = vld [vmem:[%s27425_s7 + $0x1f8] ss:$28 sps:$4 sm:$0xff]   ;;  %v19333_v29 = vld [vmem:[%s27425_s7 + $0x270] ss:$28 sps:$4 sm:$0xff]  }
 0x3bb   :  { %v22563_v55 = vpack.c.bf16 %v4139_v39, %v4139_v39  ;;  %v19269_v39 = vld [vmem:[%s27425_s7 + $0xc] ss:$28 sps:$4 sm:$0xff]   ;;  %v19338_v31 = vld [vmem:[%s27425_s7 + $0x2a4] ss:$28 sps:$4 sm:$0xff]  }
 0x3bd   :  { %4604 = vmatmul.mubr.bf16.vlgmr.msra.gmra.mrb[16].mxu0 %v22563_v55  ;;  %4645 = vmatmul.mubr.bf16.vlgmr.msra.gmra.mrb[20].mxu1 %v22563_v55 }
 0x3be   :  { %4654 = vmatpush1.bf16.msra.mxu0 %v17103_v24  ;;  %4695 = vmatpush1.bf16.msra.mxu1 %v17105_v59  ;;  %v17145_v24 = vcombine.low %v4188_v7, %v4192_v9  ;;  %v4203_v59 = vld [vmem:[%s27423_s5 + $0x1d0] sm:$0xff]  ;;  %v19314_v9 = vld [vmem:[%s27425_s7 + $0x1c4] ss:$28 sps:$4 sm:$0xff]  }
 0x3bf   :  { %4655 = vmatprep.subr.bf16.mxu0 %v17112_v19  ;;  %4696 = vmatprep.subr.bf16.mxu1 %v17114_v40  ;;  %v17160_v35 = vcombine.high %v4203_v59, %v4207_v28  ;;  %v17159_v37 = vcombine.low %v4203_v59, %v4207_v28  ;;  %v19264_v19 = vld [vmem:[%s27425_s7] ss:$28 sps:$4 sm:$0xff]   ;;  %v19267_v40 = vld [vmem:[%s27425_s7 + $0x8] ss:$28 sps:$4 sm:$0xff]   ;;  %v19309_v7 = vld [vmem:[%s27425_s7 + $0x190] ss:$28 sps:$4 sm:$0xff]  }
 0x3c0   :  { %4685 = vmatprep.mubr.bf16.mxu0 %v20701_v48  ;;  %4726 = vmatprep.mubr.bf16.mxu1 %v20701_v48  ;;  %v19335_v59 = vld [vmem:[%s27425_s7 + $0x274] ss:$28 sps:$4 sm:$0xff]   ;;  %v19330_v28 = vld [vmem:[%s27425_s7 + $0x268] ss:$28 sps:$4 sm:$0xff]  }
 0x3c2   :  { %4656 = vmatpush1.bf16.msra.mxu0 %v17111_v16  ;;  %4697 = vmatpush1.bf16.msra.mxu1 %v17113_v44  ;;  %v19278_v16 = vld [vmem:[%s27425_s7 + $0x74] ss:$28 sps:$4 sm:$0xff]  }
 0x3c3   :  { %4657 = vmatprep.subr.bf16.mxu0 %v17120_v45  ;;  %4698 = vmatprep.subr.bf16.mxu1 %v17122_v46  ;;  %v19276_v44 = vld [vmem:[%s27425_s7 + $0x70] ss:$28 sps:$4 sm:$0xff]   ;;  %v19279_v45 = vld [vmem:[%s27425_s7 + $0x78] ss:$28 sps:$4 sm:$0xff]  }
 0x3c4   :  { %v19284_v46 = vld [vmem:[%s27425_s7 + $0xac] ss:$28 sps:$4 sm:$0xff]  }
 0x3c6   :  { %4658 = vmatpush1.bf16.msra.mxu0 %v17119_v56  ;;  %4699 = vmatpush1.bf16.msra.mxu1 %v17121_v57  ;;  %v19293_v56 = vld [vmem:[%s27425_s7 + $0xec] ss:$28 sps:$4 sm:$0xff]   ;;  %v19288_v57 = vld [vmem:[%s27425_s7 + $0xe0] ss:$28 sps:$4 sm:$0xff]  }
 0x3c7   :  { %4659 = vmatprep.subr.bf16.mxu0 %v17128_v27  ;;  %4700 = vmatprep.subr.bf16.mxu1 %v17130_v61  ;;  %v19291_v27 = vld [vmem:[%s27425_s7 + $0xe8] ss:$28 sps:$4 sm:$0xff]   ;;  %v19296_v61 = vld [vmem:[%s27425_s7 + $0x11c] ss:$28 sps:$4 sm:$0xff]  }
 0x3ca   :  { %4660 = vmatpush1.bf16.msra.mxu0 %v17127_v1  ;;  %4701 = vmatpush1.bf16.msra.mxu1 %v17129_v2  ;;  %v19305_v1 = vld [vmem:[%s27425_s7 + $0x15c] ss:$28 sps:$4 sm:$0xff]   ;;  %v19300_v2 = vld [vmem:[%s27425_s7 + $0x150] ss:$28 sps:$4 sm:$0xff]  }
 0x3cb   :  { %4661 = vmatprep.subr.bf16.mxu0 %v17136_v3  ;;  %4702 = vmatprep.subr.bf16.mxu1 %v17138_v4  ;;  %v19303_v3 = vld [vmem:[%s27425_s7 + $0x158] ss:$28 sps:$4 sm:$0xff]   ;;  %v19308_v4 = vld [vmem:[%s27425_s7 + $0x18c] ss:$28 sps:$4 sm:$0xff]  }
 0x3ce   :  { %4662 = vmatpush1.bf16.msra.mxu0 %v17135_v10  ;;  %4703 = vmatpush1.bf16.msra.mxu1 %v17137_v12  ;;  %v19317_v10 = vld [vmem:[%s27425_s7 + $0x1cc] ss:$28 sps:$4 sm:$0xff]   ;;  %v19312_v12 = vld [vmem:[%s27425_s7 + $0x1c0] ss:$28 sps:$4 sm:$0xff]  }
 0x3cf   :  { %4663 = vmatprep.subr.bf16.mxu0 %v17144_v13  ;;  %4704 = vmatprep.subr.bf16.mxu1 %v17146_v17  ;;  %v19315_v13 = vld [vmem:[%s27425_s7 + $0x1c8] ss:$28 sps:$4 sm:$0xff]   ;;  %v19320_v17 = vld [vmem:[%s27425_s7 + $0x1fc] ss:$28 sps:$4 sm:$0xff]  }
 0x3d2   :  { %4664 = vmatpush1.bf16.msra.mxu0 %v17143_v23  ;;  %4705 = vmatpush1.bf16.msra.mxu1 %v17145_v24  ;;  %v19329_v23 = vld [vmem:[%s27425_s7 + $0x23c] ss:$28 sps:$4 sm:$0xff]   ;;  %v19324_v24 = vld [vmem:[%s27425_s7 + $0x230] ss:$28 sps:$4 sm:$0xff]  }
 0x3d3   :  { %4665 = vmatprep.subr.bf16.mxu0 %v17152_v26  ;;  %4706 = vmatprep.subr.bf16.mxu1 %v17154_v54  ;;  %v19327_v26 = vld [vmem:[%s27425_s7 + $0x238] ss:$28 sps:$4 sm:$0xff]   ;;  %v19332_v54 = vld [vmem:[%s27425_s7 + $0x26c] ss:$28 sps:$4 sm:$0xff]  }
 0x3d6   :  { %4666 = vmatpush1.bf16.msra.mxu0 %v17151_v30  ;;  %4707 = vmatpush1.bf16.msra.mxu1 %v17153_v34  ;;  %v19341_v30 = vld [vmem:[%s27425_s7 + $0x2ac] ss:$28 sps:$4 sm:$0xff]   ;;  %v19336_v34 = vld [vmem:[%s27425_s7 + $0x2a0] ss:$28 sps:$4 sm:$0xff]  }
 0x3d7   :  { %4667 = vmatprep.subr.bf16.mxu0 %v17160_v35  ;;  %4708 = vmatprep.subr.bf16.mxu1 %v17162_v36  ;;  %v19339_v35 = vld [vmem:[%s27425_s7 + $0x2a8] ss:$28 sps:$4 sm:$0xff]   ;;  %v19344_v36 = vld [vmem:[%s27425_s7 + $0x2dc] ss:$28 sps:$4 sm:$0xff]  }
 0x3da   :  { %4668 = vmatpush1.bf16.msra.mxu0 %v17159_v37  ;;  %4709 = vmatpush1.bf16.msra.mxu1 %v17161_v38  ;;  %v19347_v37 = vld [vmem:[%s27425_s7 + $0x2e4] ss:$28 sps:$4 sm:$0xff]   ;;  %v19342_v38 = vld [vmem:[%s27425_s7 + $0x2d8] ss:$28 sps:$4 sm:$0xff]  }
 0x3db   :  { %7604 = vmatprep.subr.bf16.mxu0 %v19266_v58  ;;  %7768 = vmatprep.subr.bf16.mxu1 %v19269_v39  ;;  %v19345_v58 = vld [vmem:[%s27425_s7 + $0x2e0] ss:$28 sps:$4 sm:$0xff]   ;;  %v19350_v39 = vld [vmem:[%s27425_s7 + $0x314] ss:$28 sps:$4 sm:$0xff]  }
 0x3dd   :  { %4686 = vmatmul.mubr.bf16.vlgmr.msra.gmra.mrb[20].mxu0 %v22563_v55  ;;  %4727 = vmatmul.mubr.bf16.vlgmr.msra.gmra.mrb[24].mxu1 %v22563_v55  ;;  %v19281_v55 = vld [vmem:[%s27425_s7 + $0x7c] ss:$28 sps:$4 sm:$0xff]  }
 0x3de   :  { %7605 = vmatpush1.bf16.msra.mxu0 %v19264_v19  ;;  %7769 = vmatpush1.bf16.msra.mxu1 %v19267_v40  ;;  %v19353_v19 = vld [vmem:[%s27425_s7 + $0x31c] ss:$28 sps:$4 sm:$0xff]   ;;  %v19348_v40 = vld [vmem:[%s27425_s7 + $0x310] ss:$28 sps:$4 sm:$0xff]  }
 0x3df   :  { %7606 = vmatprep.subr.bf16.mxu0 %v19272_v41  ;;  %7770 = vmatprep.subr.bf16.mxu1 %v19275_v42  ;;  %v19351_v41 = vld [vmem:[%s27425_s7 + $0x318] ss:$28 sps:$4 sm:$0xff]   ;;  %v19356_v42 = vld [vmem:[%s27425_s7 + $0x34c] ss:$28 sps:$4 sm:$0xff]  }
 0x3e2   :  { %7607 = vmatpush1.bf16.msra.mxu0 %v19270_v43  ;;  %7771 = vmatpush1.bf16.msra.mxu1 %v19273_v32  ;;  %v19359_v43 = vld [vmem:[%s27425_s7 + $0x354] ss:$28 sps:$4 sm:$0xff]   ;;  %v19354_v32 = vld [vmem:[%s27425_s7 + $0x348] ss:$28 sps:$4 sm:$0xff]  }
 0x3e3   :  { %7608 = vmatprep.subr.bf16.mxu0 %v19278_v16  ;;  %7772 = vmatprep.subr.bf16.mxu1 %v19281_v55  ;;  %v19357_v16 = vld [vmem:[%s27425_s7 + $0x350] ss:$28 sps:$4 sm:$0xff]   ;;  %v19362_v55 = vld [vmem:[%s27425_s7 + $0x384] ss:$28 sps:$4 sm:$0xff]  }
 0x3e6   :  { %7609 = vmatpush1.bf16.msra.mxu0 %v19276_v44  ;;  %7773 = vmatpush1.bf16.msra.mxu1 %v19279_v45  ;;  %v19365_v44 = vld [vmem:[%s27425_s7 + $0x38c] ss:$28 sps:$4 sm:$0xff]   ;;  %v22844_v45 = vld [vmem:[%s27424_s6] sm:$0xff] }
 0x3e7   :  { %7610 = vmatprep.subr.bf16.mxu0 %v19284_v46  ;;  %7774 = vmatprep.subr.bf16.mxu1 %v19287_v47  ;;  %v4214_v46 = vrot.slane %v22844_v45, %v21962_v6  ;;  %v4218_v47 = vrot.slane %v22844_v45, %v21965_v8 }
 0x3ea   :  { %7611 = vmatpush1.bf16.msra.mxu0 %v19282_v49  ;;  %7775 = vmatpush1.bf16.msra.mxu1 %v19285_v21  ;;  %v4226_v49 = vrot.slane %v22844_v45, %v22288_v25 }
 0x3eb   :  { %7612 = vmatprep.subr.bf16.mxu0 %v19290_v52  ;;  %7776 = vmatprep.subr.bf16.mxu1 %v19293_v56 }
 0x3ee   :  { %7613 = vmatpush1.bf16.msra.mxu0 %v19288_v57  ;;  %7777 = vmatpush1.bf16.msra.mxu1 %v19291_v27 }
 0x3ef   :  { %7614 = vmatprep.subr.bf16.mxu0 %v19296_v61  ;;  %7778 = vmatprep.subr.bf16.mxu1 %v19299_v60 }
 0x3f2   :  { %7615 = vmatpush1.bf16.msra.mxu0 %v19294_v62  ;;  %7779 = vmatpush1.bf16.msra.mxu1 %v19297_v63 }
 0x3f3   :  { %7616 = vmatprep.subr.bf16.mxu0 %v19302_v0  ;;  %7780 = vmatprep.subr.bf16.mxu1 %v19305_v1 }
 0x3f6   :  { %7617 = vmatpush1.bf16.msra.mxu0 %v19300_v2  ;;  %7781 = vmatpush1.bf16.msra.mxu1 %v19303_v3 }
 0x3f7   :  { %7618 = vmatprep.subr.bf16.mxu0 %v19308_v4  ;;  %7782 = vmatprep.subr.bf16.mxu1 %v19311_v5 }
 0x3fa   :  { %7619 = vmatpush1.bf16.msra.mxu0 %v19306_v51  ;;  %7783 = vmatpush1.bf16.msra.mxu1 %v19309_v7  ;;  %v19360_v51 = vld [vmem:[%s27425_s7 + $0x380] ss:$28 sps:$4 sm:$0xff]   ;;  %v19363_v7 = vld [vmem:[%s27425_s7 + $0x388] ss:$28 sps:$4 sm:$0xff]  }
 0x3fb   :  { %7620 = vmatprep.subr.bf16.mxu0 %v19314_v9  ;;  %7784 = vmatprep.subr.bf16.mxu1 %v19317_v10  ;;  %v19368_v10 = vld [vmem:[%s27425_s7 + $0x3bc] ss:$28 sps:$4 sm:$0xff]  }
 0x3fe   :  { %7621 = vmatpush1.bf16.msra.mxu0 %v19312_v12  ;;  %7785 = vmatpush1.bf16.msra.mxu1 %v19315_v13  ;;  %v19371_v12 = vld [vmem:[%s27425_s7 + $0x3c4] ss:$28 sps:$4 sm:$0xff]  }
 0x3ff   :  { %7622 = vmatprep.subr.bf16.mxu0 %v19320_v17  ;;  %7786 = vmatprep.subr.bf16.mxu1 %v19323_v18  ;;  %v19366_v17 = vld [vmem:[%s27425_s7 + $0x3b8] ss:$28 sps:$4 sm:$0xff]   ;;  %v19369_v18 = vld [vmem:[%s27425_s7 + $0x3c0] ss:$28 sps:$4 sm:$0xff]  }
 0x402   :  { %7623 = vmatpush1.bf16.msra.mxu0 %v19318_v20  ;;  %7787 = vmatpush1.bf16.msra.mxu1 %v19321_v53  ;;  %v19374_v20 = vld [vmem:[%s27425_s7 + $0x3f4] ss:$28 sps:$4 sm:$0xff]   ;;  %v19377_v53 = vld [vmem:[%s27425_s7 + $0x3fc] ss:$28 sps:$4 sm:$0xff]  }
 0x403   :  { %7624 = vmatprep.subr.bf16.mxu0 %v19326_v22  ;;  %7788 = vmatprep.subr.bf16.mxu1 %v19329_v23  ;;  %v19372_v22 = vld [vmem:[%s27425_s7 + $0x3f0] ss:$28 sps:$4 sm:$0xff]   ;;  %v19375_v23 = vld [vmem:[%s27425_s7 + $0x3f8] ss:$28 sps:$4 sm:$0xff]  }
 0x406   :  { %7625 = vmatpush1.bf16.msra.mxu0 %v19324_v24  ;;  %7789 = vmatpush1.bf16.msra.mxu1 %v19327_v26  ;;  %v19380_v24 = vld [vmem:[%s27425_s7 + $0x42c] ss:$28 sps:$4 sm:$0xff]   ;;  %v19383_v26 = vld [vmem:[%s27425_s7 + $0x434] ss:$28 sps:$4 sm:$0xff]  }
 0x407   :  { %7626 = vmatprep.subr.bf16.mxu0 %v19332_v54  ;;  %7790 = vmatprep.subr.bf16.mxu1 %v19335_v59  ;;  %v19378_v54 = vld [vmem:[%s27425_s7 + $0x428] ss:$28 sps:$4 sm:$0xff]   ;;  %v19381_v59 = vld [vmem:[%s27425_s7 + $0x430] ss:$28 sps:$4 sm:$0xff]  }
 0x40a   :  { %7627 = vmatpush1.bf16.msra.mxu0 %v19330_v28  ;;  %7791 = vmatpush1.bf16.msra.mxu1 %v19333_v29  ;;  %v19386_v28 = vld [vmem:[%s27425_s7 + $0x464] ss:$28 sps:$4 sm:$0xff]   ;;  %v19389_v29 = vld [vmem:[%s27425_s7 + $0x46c] ss:$28 sps:$4 sm:$0xff]  }
 0x40b   :  { %7628 = vmatprep.subr.bf16.mxu0 %v19338_v31  ;;  %7792 = vmatprep.subr.bf16.mxu1 %v19341_v30  ;;  %v19384_v31 = vld [vmem:[%s27425_s7 + $0x460] ss:$28 sps:$4 sm:$0xff]   ;;  %v19387_v30 = vld [vmem:[%s27425_s7 + $0x468] ss:$28 sps:$4 sm:$0xff]  }
 0x40e   :  { %7629 = vmatpush1.bf16.msra.mxu0 %v19336_v34  ;;  %7793 = vmatpush1.bf16.msra.mxu1 %v19339_v35  ;;  %v19392_v34 = vld [vmem:[%s27425_s7 + $0x49c] ss:$28 sps:$4 sm:$0xff]   ;;  %v19395_v35 = vld [vmem:[%s27425_s7 + $0x4a4] ss:$28 sps:$4 sm:$0xff]  }
 0x40f   :  { %7630 = vmatprep.subr.bf16.mxu0 %v19344_v36  ;;  %7794 = vmatprep.subr.bf16.mxu1 %v19347_v37  ;;  %v19390_v36 = vld [vmem:[%s27425_s7 + $0x498] ss:$28 sps:$4 sm:$0xff]   ;;  %v19393_v37 = vld [vmem:[%s27425_s7 + $0x4a0] ss:$28 sps:$4 sm:$0xff]  }
 0x412   :  { %7631 = vmatpush1.bf16.msra.mxu0 %v19342_v38  ;;  %7795 = vmatpush1.bf16.msra.mxu1 %v19345_v58  ;;  %v19398_v38 = vld [vmem:[%s27425_s7 + $0x4d4] ss:$28 sps:$4 sm:$0xff]   ;;  %v19401_v58 = vld [vmem:[%s27425_s7 + $0x4dc] ss:$28 sps:$4 sm:$0xff]  }
 0x413   :  { %7632 = vmatprep.subr.bf16.mxu0 %v19350_v39  ;;  %7796 = vmatprep.subr.bf16.mxu1 %v19353_v19  ;;  %v19396_v39 = vld [vmem:[%s27425_s7 + $0x4d0] ss:$28 sps:$4 sm:$0xff]   ;;  %v19399_v19 = vld [vmem:[%s27425_s7 + $0x4d8] ss:$28 sps:$4 sm:$0xff]  }
 0x416   :  { %7633 = vmatpush1.bf16.msra.mxu0 %v19348_v40  ;;  %7797 = vmatpush1.bf16.msra.mxu1 %v19351_v41  ;;  %v19404_v40 = vld [vmem:[%s27425_s7 + $0x50c] ss:$28 sps:$4 sm:$0xff]   ;;  %v19407_v41 = vld [vmem:[%s27425_s7 + $0x514] ss:$28 sps:$4 sm:$0xff]  }
 0x417   :  { %7634 = vmatprep.subr.bf16.mxu0 %v19356_v42  ;;  %7798 = vmatprep.subr.bf16.mxu1 %v19359_v43 }
 0x41a   :  { %7635 = vmatpush1.bf16.msra.mxu0 %v19354_v32  ;;  %7799 = vmatpush1.bf16.msra.mxu1 %v19357_v16 }
 0x41b   :  { %7645 = vmatprep.subr.bf16.mxu0 %v19362_v55  ;;  %7809 = vmatprep.subr.bf16.mxu1 %v19365_v44 }
 0x490   :  { %v4605_v21 = vpop.f32.mrb[16].mxu0  ;;  %v22852_v52 = vpop.f32.mrb[20].mxu1 }
 0x491   :  { %v4606_v56 = vadd.f32 %v4605_v21, %v4214_v46  ;;  %v4607_v57 = vpop.f32.mrb[17].mxu0  ;;  %v4648_v27 = vpop.f32.mrb[21].mxu1  ;;  %v19402_v46 = vld [vmem:[%s27425_s7 + $0x508] ss:$28 sps:$4 sm:$0xff]  }
 0x492   :  { %v4608_v61 = vadd.f32 %v4607_v57, %v4218_v47  ;;  %v4649_v60 = vadd.f32 %v4648_v27, %v4226_v49  ;;  %v4609_v62 = vpop.f32.mrb[18].mxu0  ;;  %v4650_v63 = vpop.f32.mrb[22].mxu1  ;;  %v19405_v47 = vld [vmem:[%s27425_s7 + $0x510] ss:$28 sps:$4 sm:$0xff]   ;;  %v19408_v27 = vld [vmem:[%s27425_s7 + $0x540] ss:$28 sps:$4 sm:$0xff]  }
 0x493   :  { %v4735_v0 = vmax.f32 %v4606_v56, 0.0  ;;  %v4610_v1 = vpop.f32.mrb[19].mxu0  ;;  %v4651_v2 = vpop.f32.mrb[23].mxu1  ;;  %v19410_v56 = vld [vmem:[%s27425_s7 + $0x544] ss:$28 sps:$4 sm:$0xff]  }
 0x494   :  { %v4736_v3 = vmax.f32 %v4608_v61, 0.0  ;;  %v4738_v4 = vmax.f32 %v4649_v60, 0.0  ;;  %v19413_v57 = vld [vmem:[%s27425_s7 + $0x54c] ss:$28 sps:$4 sm:$0xff]   ;;  %v19416_v60 = vld [vmem:[%s27425_s7 + $0x57c] ss:$28 sps:$4 sm:$0xff]  }
 0x495   :  { %v22862_v9 = vpack.c.bf16 %v4735_v0, %v4735_v0  ;;  %v19411_v61 = vld [vmem:[%s27425_s7 + $0x548] ss:$28 sps:$4 sm:$0xff]   ;;  %v19414_v63 = vld [vmem:[%s27425_s7 + $0x578] ss:$28 sps:$4 sm:$0xff]   ;;  %v19417_v0 = vld [vmem:[%s27425_s7 + $0x580] ss:$28 sps:$4 sm:$0xff]  }
 0x496   :  { %v22854_v5 = vpack.c.bf16 %v4736_v3, %v4736_v3  ;;  %v22872_v13 = vpack.c.bf16 %v4738_v4, %v4738_v4  ;;  %v19419_v62 = vld [vmem:[%s27425_s7 + $0x584] ss:$28 sps:$4 sm:$0xff]   ;;  %v19422_v1 = vld [vmem:[%s27425_s7 + $0x5b4] ss:$28 sps:$4 sm:$0xff]   ;;  %v19425_v2 = vld [vmem:[%s27425_s7 + $0x5bc] ss:$28 sps:$4 sm:$0xff]  }
 0x497   :  { %v19420_v3 = vld [vmem:[%s27425_s7 + $0x5b0] ss:$28 sps:$4 sm:$0xff]   ;;  %v19423_v4 = vld [vmem:[%s27425_s7 + $0x5b8] ss:$28 sps:$4 sm:$0xff]  }
 0x498   :  { %7636 = vmatprep.mubr.bf16.mxu0 %v22854_v5  ;;  %7800 = vmatprep.mubr.bf16.mxu1 %v22854_v5 }
 0x499   :  { %7637 = vmatmul.mubr.bf16.vlgmr.msra.gmra.mrb[24].mxu0 %v22862_v9  ;;  %7801 = vmatmul.mubr.bf16.vlgmr.msra.gmra.mrb[28].mxu1 %v22862_v9 }
 0x49a   :  { %7646 = vmatpush1.bf16.msra.mxu0 %v19360_v51  ;;  %7810 = vmatpush1.bf16.msra.mxu1 %v19363_v7  ;;  %v19428_v51 = vld [vmem:[%s27425_s7 + $0x5ec] ss:$28 sps:$4 sm:$0xff]   ;;  %v19431_v7 = vld [vmem:[%s27425_s7 + $0x5f4] ss:$28 sps:$4 sm:$0xff]  }
 0x49b   :  { %7677 = vmatprep.mubr.bf16.mxu0 %v22872_v13  ;;  %7841 = vmatprep.mubr.bf16.mxu1 %v22872_v13 }
 0x49c   :  { %7647 = vmatprep.subr.bf16.mxu0 %v19368_v10  ;;  %7811 = vmatprep.subr.bf16.mxu1 %v19371_v12  ;;  %v19426_v10 = vld [vmem:[%s27425_s7 + $0x5e8] ss:$28 sps:$4 sm:$0xff]   ;;  %v19429_v12 = vld [vmem:[%s27425_s7 + $0x5f0] ss:$28 sps:$4 sm:$0xff]  }
 0x49e   :  { %7648 = vmatpush1.bf16.msra.mxu0 %v19366_v17  ;;  %7812 = vmatpush1.bf16.msra.mxu1 %v19369_v18  ;;  %v19434_v17 = vld [vmem:[%s27425_s7 + $0x624] ss:$28 sps:$4 sm:$0xff]   ;;  %v19437_v18 = vld [vmem:[%s27425_s7 + $0x62c] ss:$28 sps:$4 sm:$0xff]  }
 0x49f   :  { %7649 = vmatprep.subr.bf16.mxu0 %v19374_v20  ;;  %7813 = vmatprep.subr.bf16.mxu1 %v19377_v53  ;;  %v19432_v20 = vld [vmem:[%s27425_s7 + $0x620] ss:$28 sps:$4 sm:$0xff]   ;;  %v19435_v53 = vld [vmem:[%s27425_s7 + $0x628] ss:$28 sps:$4 sm:$0xff]  }
 0x4a2   :  { %7650 = vmatpush1.bf16.msra.mxu0 %v19372_v22  ;;  %7814 = vmatpush1.bf16.msra.mxu1 %v19375_v23  ;;  %v19440_v22 = vld [vmem:[%s27425_s7 + $0x65c] ss:$28 sps:$4 sm:$0xff]   ;;  %v19443_v23 = vld [vmem:[%s27425_s7 + $0x664] ss:$28 sps:$4 sm:$0xff]  }
 0x4a3   :  { %7651 = vmatprep.subr.bf16.mxu0 %v19380_v24  ;;  %7815 = vmatprep.subr.bf16.mxu1 %v19383_v26  ;;  %v19438_v24 = vld [vmem:[%s27425_s7 + $0x658] ss:$28 sps:$4 sm:$0xff]   ;;  %v19441_v26 = vld [vmem:[%s27425_s7 + $0x660] ss:$28 sps:$4 sm:$0xff]  }
 0x4a6   :  { %7652 = vmatpush1.bf16.msra.mxu0 %v19378_v54  ;;  %7816 = vmatpush1.bf16.msra.mxu1 %v19381_v59  ;;  %v4222_v54 = vrot.slane %v22844_v45, %v22340_v50  ;;  %v19446_v59 = vld [vmem:[%s27425_s7 + $0x694] ss:$28 sps:$4 sm:$0xff]  }
 0x4a7   :  { %7653 = vmatprep.subr.bf16.mxu0 %v19386_v28  ;;  %7817 = vmatprep.subr.bf16.mxu1 %v19389_v29  ;;  %v19449_v28 = vld [vmem:[%s27425_s7 + $0x69c] ss:$28 sps:$4 sm:$0xff]   ;;  %v4234_v29 = vrot.slane %v22844_v45, %v22399_v15 }
 0x4aa   :  { %7654 = vmatpush1.bf16.msra.mxu0 %v19384_v31  ;;  %7818 = vmatpush1.bf16.msra.mxu1 %v19387_v30  ;;  %v19444_v31 = vld [vmem:[%s27425_s7 + $0x690] ss:$28 sps:$4 sm:$0xff]   ;;  %v19447_v30 = vld [vmem:[%s27425_s7 + $0x698] ss:$28 sps:$4 sm:$0xff]  }
 0x4ab   :  { %7655 = vmatprep.subr.bf16.mxu0 %v19392_v34  ;;  %7819 = vmatprep.subr.bf16.mxu1 %v19395_v35  ;;  %v4647_v34 = vadd.f32 %v22852_v52, %v4222_v54  ;;  %v19452_v35 = vld [vmem:[%s27425_s7 + $0x6cc] ss:$28 sps:$4 sm:$0xff]   ;;  %v19506_v54 = vld [vmem:[%s27425_s7 + $0x8c4] ss:$28 sps:$4 sm:$0xff]  }
 0x4ac   :  { %v19453_v52 = vld [vmem:[%s27425_s7 + $0x6d0] ss:$28 sps:$4 sm:$0xff]  }
 0x4ae   :  { %7656 = vmatpush1.bf16.msra.mxu0 %v19390_v36  ;;  %7820 = vmatpush1.bf16.msra.mxu1 %v19393_v37  ;;  %v19455_v36 = vld [vmem:[%s27425_s7 + $0x6d4] ss:$28 sps:$4 sm:$0xff]  }
 0x4af   :  { %7657 = vmatprep.subr.bf16.mxu0 %v19398_v38  ;;  %7821 = vmatprep.subr.bf16.mxu1 %v19401_v58  ;;  %v19450_v38 = vld [vmem:[%s27425_s7 + $0x6c8] ss:$28 sps:$4 sm:$0xff]   ;;  %v4737_v58 = vmax.f32 %v4647_v34, 0.0  ;;  %v19510_v34 = vld [vmem:[%s27425_s7 + $0x8f8] ss:$28 sps:$4 sm:$0xff]  }
 0x4b0   :  { %v22950_v42 = vpop.f32.mrb[20].mxu0  ;;  %v22952_v43 = vpop.f32.mrb[24].mxu1 }
 0x4b1   :  { %v22954_v32 = vpop.f32.mrb[21].mxu0  ;;  %v22956_v16 = vpop.f32.mrb[25].mxu1 }
 0x4b2   :  { %v4691_v55 = vpop.f32.mrb[22].mxu0  ;;  %v4732_v44 = vpop.f32.mrb[26].mxu1  ;;  %7658 = vmatpush1.bf16.msra.mxu0 %v19396_v39  ;;  %7822 = vmatpush1.bf16.msra.mxu1 %v19399_v19  ;;  %v4690_v37 = vadd.f32 %v22954_v32, %v4234_v29  ;;  %v19458_v39 = vld [vmem:[%s27425_s7 + $0x704] ss:$28 sps:$4 sm:$0xff]   ;;  %v19461_v19 = vld [vmem:[%s27425_s7 + $0x70c] ss:$28 sps:$4 sm:$0xff]   ;;  %v23075_v32 = vpack.c.bf16 %v4737_v58, %v4737_v58 }
 0x4b3   :  { %v4692_v49 = vpop.f32.mrb[23].mxu0  ;;  %v4733_v21 = vpop.f32.mrb[27].mxu1  ;;  %7659 = vmatprep.subr.bf16.mxu0 %v19404_v40  ;;  %7823 = vmatprep.subr.bf16.mxu1 %v19407_v41  ;;  %v19456_v41 = vld [vmem:[%s27425_s7 + $0x700] ss:$28 sps:$4 sm:$0xff]   ;;  %v19459_v55 = vld [vmem:[%s27425_s7 + $0x708] ss:$28 sps:$4 sm:$0xff]  }
 0x4b4   :  { %v4740_v40 = vmax.f32 %v4690_v37, 0.0  ;;  %v19462_v49 = vld [vmem:[%s27425_s7 + $0x738] ss:$28 sps:$4 sm:$0xff]   ;;  %v19465_v21 = vld [vmem:[%s27425_s7 + $0x740] ss:$28 sps:$4 sm:$0xff]  }
 0x4b5   :  { %v19507_v29 = vld [vmem:[%s27425_s7 + $0x8c8] ss:$28 sps:$4 sm:$0xff]   ;;  %v19521_v37 = vld [vmem:[%s27425_s7 + $0x93c] ss:$28 sps:$4 sm:$0xff]  }
 0x4b6   :  { %7660 = vmatpush1.bf16.msra.mxu0 %v19402_v46  ;;  %7824 = vmatpush1.bf16.msra.mxu1 %v19405_v47  ;;  %v23080_v44 = vpack.c.bf16 %v4740_v40, %v4740_v40  ;;  %v19464_v46 = vld [vmem:[%s27425_s7 + $0x73c] ss:$28 sps:$4 sm:$0xff]   ;;  %v19467_v47 = vld [vmem:[%s27425_s7 + $0x744] ss:$28 sps:$4 sm:$0xff]   ;;  %v19524_v58 = vld [vmem:[%s27425_s7 + $0x96c] ss:$28 sps:$4 sm:$0xff]  }
 0x4b7   :  { %7661 = vmatprep.subr.bf16.mxu0 %v19410_v56  ;;  %7825 = vmatprep.subr.bf16.mxu1 %v19413_v57  ;;  %v19470_v56 = vld [vmem:[%s27425_s7 + $0x774] ss:$28 sps:$4 sm:$0xff]   ;;  %v19473_v57 = vld [vmem:[%s27425_s7 + $0x77c] ss:$28 sps:$4 sm:$0xff]  }
 0x4b8   :  { %v19525_v40 = vld [vmem:[%s27425_s7 + $0x970] ss:$28 sps:$4 sm:$0xff]  }
 0x4ba   :  { %7662 = vmatpush1.bf16.msra.mxu0 %v19408_v27  ;;  %7826 = vmatpush1.bf16.msra.mxu1 %v19411_v61  ;;  %v19468_v27 = vld [vmem:[%s27425_s7 + $0x770] ss:$28 sps:$4 sm:$0xff]   ;;  %v19471_v61 = vld [vmem:[%s27425_s7 + $0x778] ss:$28 sps:$4 sm:$0xff]  }
 0x4bb   :  { %7663 = vmatprep.subr.bf16.mxu0 %v19416_v60  ;;  %7827 = vmatprep.subr.bf16.mxu1 %v19419_v62  ;;  %v19476_v60 = vld [vmem:[%s27425_s7 + $0x7ac] ss:$28 sps:$4 sm:$0xff]   ;;  %v19479_v62 = vld [vmem:[%s27425_s7 + $0x7b4] ss:$28 sps:$4 sm:$0xff]  }
 0x4be   :  { %7664 = vmatpush1.bf16.msra.mxu0 %v19414_v63  ;;  %7828 = vmatpush1.bf16.msra.mxu1 %v19417_v0  ;;  %v19474_v63 = vld [vmem:[%s27425_s7 + $0x7a8] ss:$28 sps:$4 sm:$0xff]   ;;  %v19477_v0 = vld [vmem:[%s27425_s7 + $0x7b0] ss:$28 sps:$4 sm:$0xff]  }
 0x4bf   :  { %7665 = vmatprep.subr.bf16.mxu0 %v19422_v1  ;;  %7829 = vmatprep.subr.bf16.mxu1 %v19425_v2  ;;  %v19482_v1 = vld [vmem:[%s27425_s7 + $0x7e4] ss:$28 sps:$4 sm:$0xff]   ;;  %v19485_v2 = vld [vmem:[%s27425_s7 + $0x7ec] ss:$28 sps:$4 sm:$0xff]  }
 0x4c2   :  { %7666 = vmatpush1.bf16.msra.mxu0 %v19420_v3  ;;  %7830 = vmatpush1.bf16.msra.mxu1 %v19423_v4  ;;  %v19480_v3 = vld [vmem:[%s27425_s7 + $0x7e0] ss:$28 sps:$4 sm:$0xff]   ;;  %v19483_v4 = vld [vmem:[%s27425_s7 + $0x7e8] ss:$28 sps:$4 sm:$0xff]  }
 0x4c3   :  { %7667 = vmatprep.subr.bf16.mxu0 %v19428_v51  ;;  %7831 = vmatprep.subr.bf16.mxu1 %v19431_v7  ;;  %v19488_v51 = vld [vmem:[%s27425_s7 + $0x81c] ss:$28 sps:$4 sm:$0xff]   ;;  %v19491_v7 = vld [vmem:[%s27425_s7 + $0x824] ss:$28 sps:$4 sm:$0xff]  }
 0x4c6   :  { %7668 = vmatpush1.bf16.msra.mxu0 %v19426_v10  ;;  %7832 = vmatpush1.bf16.msra.mxu1 %v19429_v12  ;;  %v19486_v10 = vld [vmem:[%s27425_s7 + $0x818] ss:$28 sps:$4 sm:$0xff]   ;;  %v19489_v12 = vld [vmem:[%s27425_s7 + $0x820] ss:$28 sps:$4 sm:$0xff]  }
 0x4c7   :  { %7669 = vmatprep.subr.bf16.mxu0 %v19434_v17  ;;  %7833 = vmatprep.subr.bf16.mxu1 %v19437_v18  ;;  %v19494_v17 = vld [vmem:[%s27425_s7 + $0x854] ss:$28 sps:$4 sm:$0xff]   ;;  %v19497_v18 = vld [vmem:[%s27425_s7 + $0x85c] ss:$28 sps:$4 sm:$0xff]  }
 0x4ca   :  { %7670 = vmatpush1.bf16.msra.mxu0 %v19432_v20  ;;  %7834 = vmatpush1.bf16.msra.mxu1 %v19435_v53  ;;  %v19492_v20 = vld [vmem:[%s27425_s7 + $0x850] ss:$28 sps:$4 sm:$0xff]   ;;  %v19495_v53 = vld [vmem:[%s27425_s7 + $0x858] ss:$28 sps:$4 sm:$0xff]  }
 0x4cb   :  { %7671 = vmatprep.subr.bf16.mxu0 %v19440_v22  ;;  %7835 = vmatprep.subr.bf16.mxu1 %v19443_v23  ;;  %v19500_v22 = vld [vmem:[%s27425_s7 + $0x88c] ss:$28 sps:$4 sm:$0xff]   ;;  %v19503_v23 = vld [vmem:[%s27425_s7 + $0x894] ss:$28 sps:$4 sm:$0xff]  }
 0x4ce   :  { %7672 = vmatpush1.bf16.msra.mxu0 %v19438_v24  ;;  %7836 = vmatpush1.bf16.msra.mxu1 %v19441_v26  ;;  %v19498_v24 = vld [vmem:[%s27425_s7 + $0x888] ss:$28 sps:$4 sm:$0xff]   ;;  %v19501_v26 = vld [vmem:[%s27425_s7 + $0x890] ss:$28 sps:$4 sm:$0xff]  }
 0x4cf   :  { %7673 = vmatprep.subr.bf16.mxu0 %v19446_v59  ;;  %7837 = vmatprep.subr.bf16.mxu1 %v19449_v28  ;;  %v19509_v59 = vld [vmem:[%s27425_s7 + $0x8cc] ss:$28 sps:$4 sm:$0xff]   ;;  %v19504_v28 = vld [vmem:[%s27425_s7 + $0x8c0] ss:$28 sps:$4 sm:$0xff]  }
 0x4d2   :  { %7674 = vmatpush1.bf16.msra.mxu0 %v19444_v31  ;;  %7838 = vmatpush1.bf16.msra.mxu1 %v19447_v30  ;;  %v19512_v31 = vld [vmem:[%s27425_s7 + $0x8fc] ss:$28 sps:$4 sm:$0xff]   ;;  %v19515_v30 = vld [vmem:[%s27425_s7 + $0x904] ss:$28 sps:$4 sm:$0xff]  }
 0x4d3   :  { %7675 = vmatprep.subr.bf16.mxu0 %v19452_v35  ;;  %7839 = vmatprep.subr.bf16.mxu1 %v19455_v36  ;;  %v19513_v35 = vld [vmem:[%s27425_s7 + $0x900] ss:$28 sps:$4 sm:$0xff]   ;;  %v19518_v36 = vld [vmem:[%s27425_s7 + $0x934] ss:$28 sps:$4 sm:$0xff]  }
 0x4d6   :  { %7676 = vmatpush1.bf16.msra.mxu0 %v19450_v38  ;;  %7840 = vmatpush1.bf16.msra.mxu1 %v19453_v52  ;;  %v19516_v38 = vld [vmem:[%s27425_s7 + $0x930] ss:$28 sps:$4 sm:$0xff]   ;;  %v19519_v52 = vld [vmem:[%s27425_s7 + $0x938] ss:$28 sps:$4 sm:$0xff]  }
 0x4d7   :  { %7686 = vmatprep.subr.bf16.mxu0 %v19458_v39  ;;  %7850 = vmatprep.subr.bf16.mxu1 %v19461_v19  ;;  %v19527_v39 = vld [vmem:[%s27425_s7 + $0x974] ss:$28 sps:$4 sm:$0xff]   ;;  %v19522_v19 = vld [vmem:[%s27425_s7 + $0x968] ss:$28 sps:$4 sm:$0xff]  }
 0x4d9   :  { %7678 = vmatmul.mubr.bf16.vlgmr.msra.gmra.mrb[24].mxu0 %v23075_v32  ;;  %7842 = vmatmul.mubr.bf16.vlgmr.msra.gmra.mrb[28].mxu1 %v23075_v32 }
 0x4da   :  { %7687 = vmatpush1.bf16.msra.mxu0 %v19456_v41  ;;  %7718 = vmatprep.mubr.bf16.mxu0 %v23080_v44  ;;  %v19530_v41 = vld [vmem:[%s27425_s7 + $0x9a4] ss:$28 sps:$4 sm:$0xff]  }
 0x4db   :  { %7851 = vmatpush1.bf16.msra.mxu1 %v19459_v55  ;;  %7882 = vmatprep.mubr.bf16.mxu1 %v23080_v44  ;;  %v19533_v55 = vld [vmem:[%s27425_s7 + $0x9ac] ss:$28 sps:$4 sm:$0xff]  }
 0x4dc   :  { %7688 = vmatprep.subr.bf16.mxu0 %v19464_v46  ;;  %7852 = vmatprep.subr.bf16.mxu1 %v19467_v47  ;;  %v19528_v46 = vld [vmem:[%s27425_s7 + $0x9a0] ss:$28 sps:$4 sm:$0xff]   ;;  %v19531_v47 = vld [vmem:[%s27425_s7 + $0x9a8] ss:$28 sps:$4 sm:$0xff]  }
 0x4de   :  { %7689 = vmatpush1.bf16.msra.mxu0 %v19462_v49  ;;  %v19536_v49 = vld [vmem:[%s27425_s7 + $0x9dc] ss:$28 sps:$4 sm:$0xff]  }
 0x4df   :  { %7853 = vmatpush1.bf16.msra.mxu1 %v19465_v21  ;;  %7690 = vmatprep.subr.bf16.mxu0 %v19470_v56  ;;  %v19539_v21 = vld [vmem:[%s27425_s7 + $0x9e4] ss:$28 sps:$4 sm:$0xff]   ;;  %v19534_v56 = vld [vmem:[%s27425_s7 + $0x9d8] ss:$28 sps:$4 sm:$0xff]  }
 0x4e0   :  { %7854 = vmatprep.subr.bf16.mxu1 %v19473_v57  ;;  %v4230_v57 = vrot.slane %v22844_v45, %v22396_v14 }
 0x4e2   :  { %7691 = vmatpush1.bf16.msra.mxu0 %v19468_v27  ;;  %v19537_v27 = vld [vmem:[%s27425_s7 + $0x9e0] ss:$28 sps:$4 sm:$0xff]  }
 0x4e3   :  { %7855 = vmatpush1.bf16.msra.mxu1 %v19471_v61  ;;  %7692 = vmatprep.subr.bf16.mxu0 %v19476_v60  ;;  %v19542_v61 = vld [vmem:[%s27425_s7 + $0xa14] ss:$28 sps:$4 sm:$0xff]   ;;  %v19545_v60 = vld [vmem:[%s27425_s7 + $0xa1c] ss:$28 sps:$4 sm:$0xff]  }
 0x4e4   :  { %7856 = vmatprep.subr.bf16.mxu1 %v19479_v62  ;;  %v4242_v62 = vrot.slane %v22844_v45, %v22478_v33 }
 0x4e6   :  { %7693 = vmatpush1.bf16.msra.mxu0 %v19474_v63  ;;  %v19540_v63 = vld [vmem:[%s27425_s7 + $0xa10] ss:$28 sps:$4 sm:$0xff]  }
 0x4e7   :  { %7857 = vmatpush1.bf16.msra.mxu1 %v19477_v0  ;;  %7694 = vmatprep.subr.bf16.mxu0 %v19482_v1  ;;  %v4688_v0 = vadd.f32 %v22950_v42, %v4230_v57  ;;  %v19543_v1 = vld [vmem:[%s27425_s7 + $0xa18] ss:$28 sps:$4 sm:$0xff]   ;;  %v19546_v42 = vld [vmem:[%s27425_s7 + $0xa48] ss:$28 sps:$4 sm:$0xff]   ;;  %v19597_v57 = vld [vmem:[%s27425_s7 + $0xc10] ss:$28 sps:$4 sm:$0xff]  }
 0x4e8   :  { %7858 = vmatprep.subr.bf16.mxu1 %v19485_v2  ;;  %v19548_v2 = vld [vmem:[%s27425_s7 + $0xa4c] ss:$28 sps:$4 sm:$0xff]  }
 0x4ea   :  { %7695 = vmatpush1.bf16.msra.mxu0 %v19480_v3  ;;  %v19551_v3 = vld [vmem:[%s27425_s7 + $0xa54] ss:$28 sps:$4 sm:$0xff]  }
 0x4eb   :  { %7859 = vmatpush1.bf16.msra.mxu1 %v19483_v4  ;;  %7696 = vmatprep.subr.bf16.mxu0 %v19488_v51  ;;  %v4731_v4 = vadd.f32 %v22956_v16, %v4242_v62  ;;  %v4739_v51 = vmax.f32 %v4688_v0, 0.0  ;;  %v19557_v16 = vld [vmem:[%s27425_s7 + $0xa8c] ss:$28 sps:$4 sm:$0xff]   ;;  %v19611_v0 = vld [vmem:[%s27425_s7 + $0xc84] ss:$28 sps:$4 sm:$0xff]  }
 0x4ec   :  { %7860 = vmatprep.subr.bf16.mxu1 %v19491_v7  ;;  %v19549_v7 = vld [vmem:[%s27425_s7 + $0xa50] ss:$28 sps:$4 sm:$0xff]   ;;  %v19603_v62 = vld [vmem:[%s27425_s7 + $0xc48] ss:$28 sps:$4 sm:$0xff]  }
 0x4ee   :  { %7697 = vmatpush1.bf16.msra.mxu0 %v19486_v10  ;;  %v19554_v10 = vld [vmem:[%s27425_s7 + $0xa84] ss:$28 sps:$4 sm:$0xff]  }
 0x4ef   :  { %7861 = vmatpush1.bf16.msra.mxu1 %v19489_v12  ;;  %7698 = vmatprep.subr.bf16.mxu0 %v19494_v17  ;;  %v4742_v12 = vmax.f32 %v4731_v4, 0.0  ;;  %v19552_v17 = vld [vmem:[%s27425_s7 + $0xa80] ss:$28 sps:$4 sm:$0xff]  }
 0x4f0   :  { %7862 = vmatprep.subr.bf16.mxu1 %v19497_v18  ;;  %v23281_v18 = vpack.c.bf16 %v4739_v51, %v4739_v51  ;;  %v19617_v4 = vld [vmem:[%s27425_s7 + $0xcbc] ss:$28 sps:$4 sm:$0xff]  }
 0x4f1   :  { %v19615_v51 = vld [vmem:[%s27425_s7 + $0xcb8] ss:$28 sps:$4 sm:$0xff]  }
 0x4f2   :  { %7699 = vmatpush1.bf16.msra.mxu0 %v19492_v20  ;;  %v19555_v20 = vld [vmem:[%s27425_s7 + $0xa88] ss:$28 sps:$4 sm:$0xff]  }
 0x4f3   :  { %7863 = vmatpush1.bf16.msra.mxu1 %v19495_v53  ;;  %7700 = vmatprep.subr.bf16.mxu0 %v19500_v22  ;;  %v19560_v53 = vld [vmem:[%s27425_s7 + $0xabc] ss:$28 sps:$4 sm:$0xff]   ;;  %v23289_v22 = vpack.c.bf16 %v4742_v12, %v4742_v12  ;;  %v19621_v12 = vld [vmem:[%s27425_s7 + $0xcf0] ss:$28 sps:$4 sm:$0xff]  }
 0x4f4   :  { %7864 = vmatprep.subr.bf16.mxu1 %v19503_v23  ;;  %v19563_v23 = vld [vmem:[%s27425_s7 + $0xac4] ss:$28 sps:$4 sm:$0xff]  }
 0x4f6   :  { %7701 = vmatpush1.bf16.msra.mxu0 %v19498_v24  ;;  %v19558_v24 = vld [vmem:[%s27425_s7 + $0xab8] ss:$28 sps:$4 sm:$0xff]  }
 0x4f7   :  { %7865 = vmatpush1.bf16.msra.mxu1 %v19501_v26  ;;  %7702 = vmatprep.subr.bf16.mxu0 %v19506_v54  ;;  %v19561_v26 = vld [vmem:[%s27425_s7 + $0xac0] ss:$28 sps:$4 sm:$0xff]   ;;  %v19566_v54 = vld [vmem:[%s27425_s7 + $0xaf4] ss:$28 sps:$4 sm:$0xff]  }
 0x4f8   :  { %7866 = vmatprep.subr.bf16.mxu1 %v19509_v59  ;;  %v19569_v59 = vld [vmem:[%s27425_s7 + $0xafc] ss:$28 sps:$4 sm:$0xff]  }
 0x4fa   :  { %7703 = vmatpush1.bf16.msra.mxu0 %v19504_v28  ;;  %v19564_v28 = vld [vmem:[%s27425_s7 + $0xaf0] ss:$28 sps:$4 sm:$0xff]  }
 0x4fb   :  { %7867 = vmatpush1.bf16.msra.mxu1 %v19507_v29  ;;  %7704 = vmatprep.subr.bf16.mxu0 %v19512_v31  ;;  %v19567_v29 = vld [vmem:[%s27425_s7 + $0xaf8] ss:$28 sps:$4 sm:$0xff]   ;;  %v19572_v31 = vld [vmem:[%s27425_s7 + $0xb2c] ss:$28 sps:$4 sm:$0xff]  }
 0x4fc   :  { %7868 = vmatprep.subr.bf16.mxu1 %v19515_v30  ;;  %v19575_v30 = vld [vmem:[%s27425_s7 + $0xb34] ss:$28 sps:$4 sm:$0xff]  }
 0x4fe   :  { %7705 = vmatpush1.bf16.msra.mxu0 %v19510_v34  ;;  %v19570_v34 = vld [vmem:[%s27425_s7 + $0xb28] ss:$28 sps:$4 sm:$0xff]  }
 0x4ff   :  { %7869 = vmatpush1.bf16.msra.mxu1 %v19513_v35  ;;  %7706 = vmatprep.subr.bf16.mxu0 %v19518_v36  ;;  %v19573_v35 = vld [vmem:[%s27425_s7 + $0xb30] ss:$28 sps:$4 sm:$0xff]   ;;  %v19578_v36 = vld [vmem:[%s27425_s7 + $0xb64] ss:$28 sps:$4 sm:$0xff]  }
 0x500   :  { %7870 = vmatprep.subr.bf16.mxu1 %v19521_v37  ;;  %v19581_v37 = vld [vmem:[%s27425_s7 + $0xb6c] ss:$28 sps:$4 sm:$0xff]  }
 0x502   :  { %7707 = vmatpush1.bf16.msra.mxu0 %v19516_v38  ;;  %v19576_v38 = vld [vmem:[%s27425_s7 + $0xb60] ss:$28 sps:$4 sm:$0xff]  }
 0x503   :  { %7871 = vmatpush1.bf16.msra.mxu1 %v19519_v52  ;;  %7708 = vmatprep.subr.bf16.mxu0 %v19524_v58  ;;  %v19579_v52 = vld [vmem:[%s27425_s7 + $0xb68] ss:$28 sps:$4 sm:$0xff]   ;;  %v19584_v58 = vld [vmem:[%s27425_s7 + $0xb9c] ss:$28 sps:$4 sm:$0xff]  }
 0x504   :  { %7872 = vmatprep.subr.bf16.mxu1 %v19527_v39  ;;  %v19587_v39 = vld [vmem:[%s27425_s7 + $0xba4] ss:$28 sps:$4 sm:$0xff]  }
 0x506   :  { %7709 = vmatpush1.bf16.msra.mxu0 %v19522_v19  ;;  %v19582_v19 = vld [vmem:[%s27425_s7 + $0xb98] ss:$28 sps:$4 sm:$0xff]  }
 0x507   :  { %7873 = vmatpush1.bf16.msra.mxu1 %v19525_v40  ;;  %7710 = vmatprep.subr.bf16.mxu0 %v19530_v41  ;;  %v19585_v40 = vld [vmem:[%s27425_s7 + $0xba0] ss:$28 sps:$4 sm:$0xff]   ;;  %v19590_v41 = vld [vmem:[%s27425_s7 + $0xbd4] ss:$28 sps:$4 sm:$0xff]  }
 0x508   :  { %7874 = vmatprep.subr.bf16.mxu1 %v19533_v55  ;;  %v19593_v55 = vld [vmem:[%s27425_s7 + $0xbdc] ss:$28 sps:$4 sm:$0xff]  }
 0x50a   :  { %7711 = vmatpush1.bf16.msra.mxu0 %v19528_v46  ;;  %v19588_v46 = vld [vmem:[%s27425_s7 + $0xbd0] ss:$28 sps:$4 sm:$0xff]  }
 0x50b   :  { %7875 = vmatpush1.bf16.msra.mxu1 %v19531_v47  ;;  %7712 = vmatprep.subr.bf16.mxu0 %v19536_v49  ;;  %v19591_v47 = vld [vmem:[%s27425_s7 + $0xbd8] ss:$28 sps:$4 sm:$0xff]   ;;  %v19596_v49 = vld [vmem:[%s27425_s7 + $0xc0c] ss:$28 sps:$4 sm:$0xff]  }
 0x50c   :  { %7876 = vmatprep.subr.bf16.mxu1 %v19539_v21  ;;  %v19599_v21 = vld [vmem:[%s27425_s7 + $0xc14] ss:$28 sps:$4 sm:$0xff]  }
 0x50e   :  { %7713 = vmatpush1.bf16.msra.mxu0 %v19534_v56  ;;  %v19594_v56 = vld [vmem:[%s27425_s7 + $0xc08] ss:$28 sps:$4 sm:$0xff]  }
 0x50f   :  { %7877 = vmatpush1.bf16.msra.mxu1 %v19537_v27  ;;  %7714 = vmatprep.subr.bf16.mxu0 %v19542_v61  ;;  %v19602_v27 = vld [vmem:[%s27425_s7 + $0xc44] ss:$28 sps:$4 sm:$0xff]   ;;  %v19605_v61 = vld [vmem:[%s27425_s7 + $0xc4c] ss:$28 sps:$4 sm:$0xff]  }
 0x510   :  { %7878 = vmatprep.subr.bf16.mxu1 %v19545_v60  ;;  %v19600_v60 = vld [vmem:[%s27425_s7 + $0xc40] ss:$28 sps:$4 sm:$0xff]  }
 0x512   :  { %7715 = vmatpush1.bf16.msra.mxu0 %v19540_v63  ;;  %v19608_v63 = vld [vmem:[%s27425_s7 + $0xc7c] ss:$28 sps:$4 sm:$0xff]  }
 0x513   :  { %7879 = vmatpush1.bf16.msra.mxu1 %v19543_v1  ;;  %7716 = vmatprep.subr.bf16.mxu0 %v19548_v2  ;;  %v19606_v1 = vld [vmem:[%s27425_s7 + $0xc78] ss:$28 sps:$4 sm:$0xff]   ;;  %v19609_v2 = vld [vmem:[%s27425_s7 + $0xc80] ss:$28 sps:$4 sm:$0xff]  }
 0x514   :  { %7880 = vmatprep.subr.bf16.mxu1 %v19551_v3  ;;  %v19614_v3 = vld [vmem:[%s27425_s7 + $0xcb4] ss:$28 sps:$4 sm:$0xff]  }
 0x516   :  { %7717 = vmatpush1.bf16.msra.mxu0 %v19546_v42  ;;  %v19612_v42 = vld [vmem:[%s27425_s7 + $0xcb0] ss:$28 sps:$4 sm:$0xff]  }
 0x517   :  { %7881 = vmatpush1.bf16.msra.mxu1 %v19549_v7  ;;  %7727 = vmatprep.subr.bf16.mxu0 %v19554_v10  ;;  %v19620_v7 = vld [vmem:[%s27425_s7 + $0xcec] ss:$28 sps:$4 sm:$0xff]   ;;  %v19623_v10 = vld [vmem:[%s27425_s7 + $0xcf4] ss:$28 sps:$4 sm:$0xff]  }
 0x518   :  { %7891 = vmatprep.subr.bf16.mxu1 %v19557_v16  ;;  %v19618_v16 = vld [vmem:[%s27425_s7 + $0xce8] ss:$28 sps:$4 sm:$0xff]  }
 0x519   :  { %7719 = vmatmul.mubr.bf16.vlgmr.msra.gmra.mrb[24].mxu0 %v23281_v18 }
 0x51a   :  { %7883 = vmatmul.mubr.bf16.vlgmr.msra.gmra.mrb[28].mxu1 %v23281_v18  ;;  %7728 = vmatpush1.bf16.msra.mxu0 %v19552_v17  ;;  %v19626_v17 = vld [vmem:[%s27425_s7 + $0xd24] ss:$28 sps:$4 sm:$0xff]  }
 0x51b   :  { %7759 = vmatprep.mubr.bf16.mxu0 %v23289_v22  ;;  %7892 = vmatpush1.bf16.msra.mxu1 %v19555_v20  ;;  %v19629_v20 = vld [vmem:[%s27425_s7 + $0xd2c] ss:$28 sps:$4 sm:$0xff]  }
 0x51c   :  { %7923 = vmatprep.mubr.bf16.mxu1 %v23289_v22  ;;  %7729 = vmatprep.subr.bf16.mxu0 %v19560_v53  ;;  %v19624_v53 = vld [vmem:[%s27425_s7 + $0xd20] ss:$28 sps:$4 sm:$0xff]  }
 0x51d   :  { %7893 = vmatprep.subr.bf16.mxu1 %v19563_v23  ;;  %v19627_v23 = vld [vmem:[%s27425_s7 + $0xd28] ss:$28 sps:$4 sm:$0xff]  }
 0x51e   :  { %7730 = vmatpush1.bf16.msra.mxu0 %v19558_v24  ;;  %v19632_v24 = vld [vmem:[%s27425_s7 + $0xd5c] ss:$28 sps:$4 sm:$0xff]  }
 0x51f   :  { %7894 = vmatpush1.bf16.msra.mxu1 %v19561_v26  ;;  %7731 = vmatprep.subr.bf16.mxu0 %v19566_v54  ;;  %v19635_v26 = vld [vmem:[%s27425_s7 + $0xd64] ss:$28 sps:$4 sm:$0xff]   ;;  %v19630_v54 = vld [vmem:[%s27425_s7 + $0xd58] ss:$28 sps:$4 sm:$0xff]  }
 0x520   :  { %7895 = vmatprep.subr.bf16.mxu1 %v19569_v59  ;;  %v4238_v59 = vrot.slane %v22844_v45, %v22475_v11  ;;  %v19636_v45 = vld [vmem:[%s27425_s7 + $0xd90] ss:$28 sps:$4 sm:$0xff]  }
 0x522   :  { %7732 = vmatpush1.bf16.msra.mxu0 %v19564_v28  ;;  %v19633_v28 = vld [vmem:[%s27425_s7 + $0xd60] ss:$28 sps:$4 sm:$0xff]  }
 0x523   :  { %7896 = vmatpush1.bf16.msra.mxu1 %v19567_v29  ;;  %7733 = vmatprep.subr.bf16.mxu0 %v19572_v31  ;;  %v19638_v29 = vld [vmem:[%s27425_s7 + $0xd94] ss:$28 sps:$4 sm:$0xff]   ;;  %v19641_v31 = vld [vmem:[%s27425_s7 + $0xd9c] ss:$28 sps:$4 sm:$0xff]  }
 0x524   :  { %7897 = vmatprep.subr.bf16.mxu1 %v19575_v30  ;;  %v4729_v30 = vadd.f32 %v22952_v43, %v4238_v59  ;;  %v19642_v43 = vld [vmem:[%s27425_s7 + $0xdc8] ss:$28 sps:$4 sm:$0xff]  }
 0x525   :  { %v19695_v59 = vld [vmem:[%s27425_s7 + $0x20c] ss:$28 sps:$4 sm:$0xff]  }
 0x526   :  { %7734 = vmatpush1.bf16.msra.mxu0 %v19570_v34  ;;  %v19639_v34 = vld [vmem:[%s27425_s7 + $0xd98] ss:$28 sps:$4 sm:$0xff]  }
 0x527   :  { %7898 = vmatpush1.bf16.msra.mxu1 %v19573_v35  ;;  %7735 = vmatprep.subr.bf16.mxu0 %v19578_v36  ;;  %v19644_v35 = vld [vmem:[%s27425_s7 + $0xdcc] ss:$28 sps:$4 sm:$0xff]   ;;  %v19647_v36 = vld [vmem:[%s27425_s7 + $0xdd4] ss:$28 sps:$4 sm:$0xff]  }
 0x528   :  { %7899 = vmatprep.subr.bf16.mxu1 %v19581_v37  ;;  %v4741_v37 = vmax.f32 %v4729_v30, 0.0  ;;  %v19701_v30 = vld [vmem:[%s27425_s7 + $0x5c8] ss:$28 sps:$4 sm:$0xff]  }
 0x52a   :  { %7736 = vmatpush1.bf16.msra.mxu0 %v19576_v38  ;;  %v19645_v38 = vld [vmem:[%s27425_s7 + $0xdd0] ss:$28 sps:$4 sm:$0xff]  }
 0x52b   :  { %7900 = vmatpush1.bf16.msra.mxu1 %v19579_v52  ;;  %7737 = vmatprep.subr.bf16.mxu0 %v19584_v58  ;;  %v19650_v52 = vld [vmem:[%s27425_s7 + $0x14] ss:$28 sps:$4 sm:$0xff]  }
 0x52c   :  { %7901 = vmatprep.subr.bf16.mxu1 %v19587_v39  ;;  %v19651_v58 = vld [vmem:[%s27425_s7 + $0x1d8] ss:$28 sps:$4 sm:$0xff]   ;;  %v19648_v39 = vld [vmem:[%s27425_s7 + $0x10] ss:$28 sps:$4 sm:$0xff]  }
 0x52e   :  { %7738 = vmatpush1.bf16.msra.mxu0 %v19582_v19  ;;  %v23484_v19 = vpack.c.bf16 %v4741_v37, %v4741_v37  ;;  %v19703_v37 = vld [vmem:[%s27425_s7 + $0x278] ss:$28 sps:$4 sm:$0xff]  }
 0x52f   :  { %7902 = vmatpush1.bf16.msra.mxu1 %v19585_v40  ;;  %7739 = vmatprep.subr.bf16.mxu0 %v19590_v41  ;;  %v19652_v40 = vld [vmem:[%s27425_s7 + $0x18] ss:$28 sps:$4 sm:$0xff]   ;;  %v19655_v41 = vld [vmem:[%s27425_s7 + $0x4c] ss:$28 sps:$4 sm:$0xff]  }
 0x530   :  { %7903 = vmatprep.subr.bf16.mxu1 %v19593_v55  ;;  %v19656_v55 = vld [vmem:[%s27425_s7 + $0x210] ss:$28 sps:$4 sm:$0xff]  }
 0x532   :  { %7740 = vmatpush1.bf16.msra.mxu0 %v19588_v46  ;;  %v19653_v46 = vld [vmem:[%s27425_s7 + $0x48] ss:$28 sps:$4 sm:$0xff]  }
 0x533   :  { %7904 = vmatpush1.bf16.msra.mxu1 %v19591_v47  ;;  %7741 = vmatprep.subr.bf16.mxu0 %v19596_v49  ;;  %v19657_v47 = vld [vmem:[%s27425_s7 + $0x50] ss:$28 sps:$4 sm:$0xff]   ;;  %v19660_v49 = vld [vmem:[%s27425_s7 + $0x84] ss:$28 sps:$4 sm:$0xff]  }
 0x534   :  { %7905 = vmatprep.subr.bf16.mxu1 %v19599_v21  ;;  %v19661_v21 = vld [vmem:[%s27425_s7 + $0x248] ss:$28 sps:$4 sm:$0xff]  }
 0x536   :  { %7742 = vmatpush1.bf16.msra.mxu0 %v19594_v56  ;;  %v19658_v56 = vld [vmem:[%s27425_s7 + $0x80] ss:$28 sps:$4 sm:$0xff]  }
 0x537   :  { %7906 = vmatpush1.bf16.msra.mxu1 %v19597_v57  ;;  %7743 = vmatprep.subr.bf16.mxu0 %v19602_v27  ;;  %v19662_v57 = vld [vmem:[%s27425_s7 + $0x88] ss:$28 sps:$4 sm:$0xff]   ;;  %v19666_v27 = vld [vmem:[%s27425_s7 + $0x280] ss:$28 sps:$4 sm:$0xff]  }
 0x538   :  { %7907 = vmatprep.subr.bf16.mxu1 %v19605_v61  ;;  %v19663_v61 = vld [vmem:[%s27425_s7 + $0xb8] ss:$28 sps:$4 sm:$0xff]  }
 0x53a   :  { %7744 = vmatpush1.bf16.msra.mxu0 %v19600_v60  ;;  %v19667_v60 = vld [vmem:[%s27425_s7 + $0xc0] ss:$28 sps:$4 sm:$0xff]  }
 0x53b   :  { %7908 = vmatpush1.bf16.msra.mxu1 %v19603_v62  ;;  %7745 = vmatprep.subr.bf16.mxu0 %v19608_v63  ;;  %v19670_v62 = vld [vmem:[%s27425_s7 + $0xf4] ss:$28 sps:$4 sm:$0xff]  }
 0x53c   :  { %7909 = vmatprep.subr.bf16.mxu1 %v19611_v0  ;;  %v19671_v63 = vld [vmem:[%s27425_s7 + $0x2b8] ss:$28 sps:$4 sm:$0xff]   ;;  %v19668_v0 = vld [vmem:[%s27425_s7 + $0xf0] ss:$28 sps:$4 sm:$0xff]  }
 0x53e   :  { %7746 = vmatpush1.bf16.msra.mxu0 %v19606_v1  ;;  %v19672_v1 = vld [vmem:[%s27425_s7 + $0xf8] ss:$28 sps:$4 sm:$0xff]  }
 0x53f   :  { %7910 = vmatpush1.bf16.msra.mxu1 %v19609_v2  ;;  %7747 = vmatprep.subr.bf16.mxu0 %v19614_v3  ;;  %v19675_v2 = vld [vmem:[%s27425_s7 + $0x12c] ss:$28 sps:$4 sm:$0xff]  }
 0x540   :  { %7911 = vmatprep.subr.bf16.mxu1 %v19617_v4  ;;  %v19676_v3 = vld [vmem:[%s27425_s7 + $0x2f0] ss:$28 sps:$4 sm:$0xff]   ;;  %v19673_v4 = vld [vmem:[%s27425_s7 + $0x128] ss:$28 sps:$4 sm:$0xff]  }
 0x542   :  { %7748 = vmatpush1.bf16.msra.mxu0 %v19612_v42  ;;  %v19677_v42 = vld [vmem:[%s27425_s7 + $0x130] ss:$28 sps:$4 sm:$0xff]  }
 0x543   :  { %7912 = vmatpush1.bf16.msra.mxu1 %v19615_v51  ;;  %7749 = vmatprep.subr.bf16.mxu0 %v19620_v7  ;;  %v19680_v51 = vld [vmem:[%s27425_s7 + $0x164] ss:$28 sps:$4 sm:$0xff]  }
 0x544   :  { %7913 = vmatprep.subr.bf16.mxu1 %v19623_v10  ;;  %v19681_v7 = vld [vmem:[%s27425_s7 + $0x328] ss:$28 sps:$4 sm:$0xff]   ;;  %v19678_v10 = vld [vmem:[%s27425_s7 + $0x160] ss:$28 sps:$4 sm:$0xff]  }
 0x546   :  { %7750 = vmatpush1.bf16.msra.mxu0 %v19618_v16  ;;  %v19682_v16 = vld [vmem:[%s27425_s7 + $0x168] ss:$28 sps:$4 sm:$0xff]  }
 0x547   :  { %7914 = vmatpush1.bf16.msra.mxu1 %v19621_v12  ;;  %7751 = vmatprep.subr.bf16.mxu0 %v19626_v17  ;;  %v19685_v12 = vld [vmem:[%s27425_s7 + $0x19c] ss:$28 sps:$4 sm:$0xff]  }
 0x548   :  { %7915 = vmatprep.subr.bf16.mxu1 %v19629_v20  ;;  %v19686_v17 = vld [vmem:[%s27425_s7 + $0x360] ss:$28 sps:$4 sm:$0xff]   ;;  %v19683_v20 = vld [vmem:[%s27425_s7 + $0x198] ss:$28 sps:$4 sm:$0xff]  }
 0x54a   :  { %7752 = vmatpush1.bf16.msra.mxu0 %v19624_v53  ;;  %v19687_v53 = vld [vmem:[%s27425_s7 + $0x1a0] ss:$28 sps:$4 sm:$0xff]  }
 0x54b   :  { %7916 = vmatpush1.bf16.msra.mxu1 %v19627_v23  ;;  %7753 = vmatprep.subr.bf16.mxu0 %v19632_v24  ;;  %v19690_v23 = vld [vmem:[%s27425_s7 + $0x1d4] ss:$28 sps:$4 sm:$0xff]  }
 0x54c   :  { %7917 = vmatprep.subr.bf16.mxu1 %v19635_v26  ;;  %v19691_v24 = vld [vmem:[%s27425_s7 + $0x558] ss:$28 sps:$4 sm:$0xff]   ;;  %v19688_v26 = vld [vmem:[%s27425_s7 + $0x1d0] ss:$28 sps:$4 sm:$0xff]  }
 0x54e   :  { %7754 = vmatpush1.bf16.msra.mxu0 %v19630_v54  ;;  %v19692_v54 = vld [vmem:[%s27425_s7 + $0x398] ss:$28 sps:$4 sm:$0xff]  }
 0x54f   :  { %7918 = vmatpush1.bf16.msra.mxu1 %v19633_v28  ;;  %7755 = vmatprep.subr.bf16.mxu0 %v19638_v29  ;;  %v19696_v28 = vld [vmem:[%s27425_s7 + $0x590] ss:$28 sps:$4 sm:$0xff]   ;;  %v19693_v29 = vld [vmem:[%s27425_s7 + $0x208] ss:$28 sps:$4 sm:$0xff]  }
 0x550   :  { %7919 = vmatprep.subr.bf16.mxu1 %v19641_v31  ;;  %v19697_v31 = vld [vmem:[%s27425_s7 + $0x3d0] ss:$28 sps:$4 sm:$0xff]  }
 0x552   :  { %7756 = vmatpush1.bf16.msra.mxu0 %v19636_v45  ;;  %v19700_v45 = vld [vmem:[%s27425_s7 + $0x244] ss:$28 sps:$4 sm:$0xff]  }
 0x553   :  { %7920 = vmatpush1.bf16.msra.mxu1 %v19639_v34  ;;  %7757 = vmatprep.subr.bf16.mxu0 %v19644_v35  ;;  %v19698_v34 = vld [vmem:[%s27425_s7 + $0x240] ss:$28 sps:$4 sm:$0xff]   ;;  %v19702_v35 = vld [vmem:[%s27425_s7 + $0x408] ss:$28 sps:$4 sm:$0xff]  }
 0x554   :  { %7921 = vmatprep.subr.bf16.mxu1 %v19647_v36  ;;  %v19705_v36 = vld [vmem:[%s27425_s7 + $0x27c] ss:$28 sps:$4 sm:$0xff]  }
 0x556   :  { %7758 = vmatpush1.bf16.msra.mxu0 %v19642_v43  ;;  %v19706_v43 = vld [vmem:[%s27425_s7 + $0x600] ss:$28 sps:$4 sm:$0xff]  }
 0x557   :  { %7922 = vmatpush1.bf16.msra.mxu1 %v19645_v38  ;;  %7932 = vmatprep.subr.bf16.mxu0 %v19650_v52  ;;  %v19707_v38 = vld [vmem:[%s27425_s7 + $0x440] ss:$28 sps:$4 sm:$0xff]   ;;  %v19710_v52 = vld [vmem:[%s27425_s7 + $0x2b4] ss:$28 sps:$4 sm:$0xff]  }
 0x558   :  { %18731 = vmatprep.subr.bf16.mxu1 %v19651_v58  ;;  %v19711_v58 = vld [vmem:[%s27425_s7 + $0x638] ss:$28 sps:$4 sm:$0xff]  }
 0x559   :  { %7760 = vmatmul.mubr.bf16.vlgmr.msra.gmra.mrb[24].mxu0 %v23484_v19 }
 0x55a   :  { %7924 = vmatmul.mubr.bf16.vlgmr.msra.gmra.mrb[28].mxu1 %v23484_v19  ;;  %7933 = vmatpush1.bf16.msra.mxu0 %v19648_v39  ;;  %v19708_v39 = vld [vmem:[%s27425_s7 + $0x2b0] ss:$28 sps:$4 sm:$0xff]  }
 0x55b   :  { %7964 = vmatprep.mubr.bf16.mxu0 %v22854_v5  ;;  %18732 = vmatpush3.bf16.msra.mxu1 %v19652_v40  ;;  %v19712_v40 = vld [vmem:[%s27425_s7 + $0x478] ss:$28 sps:$4 sm:$0xff]  }
 0x55c   :  { %8128 = vmatprep.mubr.bf16.mxu1 %v22854_v5  ;;  %7934 = vmatprep.subr.bf16.mxu0 %v19655_v41  ;;  %v19665_v5 = vld [vmem:[%s27425_s7 + $0xbc] ss:$28 sps:$4 sm:$0xff]   ;;  %v19715_v41 = vld [vmem:[%s27425_s7 + $0x2ec] ss:$28 sps:$4 sm:$0xff]  }
 0x55d   :  { %18733 = vmatprep.subr.bf16.mxu1 %v19656_v55  ;;  %v19716_v55 = vld [vmem:[%s27425_s7 + $0x670] ss:$28 sps:$4 sm:$0xff]  }
 0x55e   :  { %7935 = vmatpush1.bf16.msra.mxu0 %v19653_v46  ;;  %v19713_v46 = vld [vmem:[%s27425_s7 + $0x2e8] ss:$28 sps:$4 sm:$0xff]  }
 0x55f   :  { %18734 = vmatpush3.bf16.msra.mxu1 %v19657_v47  ;;  %7936 = vmatprep.subr.bf16.mxu0 %v19660_v49  ;;  %v19717_v47 = vld [vmem:[%s27425_s7 + $0x4b0] ss:$28 sps:$4 sm:$0xff]   ;;  %v19720_v49 = vld [vmem:[%s27425_s7 + $0x324] ss:$28 sps:$4 sm:$0xff]  }
 0x560   :  { %18735 = vmatprep.subr.bf16.mxu1 %v19661_v21  ;;  %v19721_v21 = vld [vmem:[%s27425_s7 + $0x6a8] ss:$28 sps:$4 sm:$0xff]  }
 0x562   :  { %7937 = vmatpush1.bf16.msra.mxu0 %v19658_v56  ;;  %v19718_v56 = vld [vmem:[%s27425_s7 + $0x320] ss:$28 sps:$4 sm:$0xff]  }
 0x563   :  { %18736 = vmatpush3.bf16.msra.mxu1 %v19662_v57  ;;  %7938 = vmatprep.subr.bf16.mxu0 %v19665_v5  ;;  %v19722_v57 = vld [vmem:[%s27425_s7 + $0x4e8] ss:$28 sps:$4 sm:$0xff]   ;;  %v19725_v5 = vld [vmem:[%s27425_s7 + $0x35c] ss:$28 sps:$4 sm:$0xff]  }
 0x564   :  { %18737 = vmatprep.subr.bf16.mxu1 %v19666_v27  ;;  %v19726_v27 = vld [vmem:[%s27425_s7 + $0x6e0] ss:$28 sps:$4 sm:$0xff]  }
 0x566   :  { %7939 = vmatpush1.bf16.msra.mxu0 %v19663_v61  ;;  %v19723_v61 = vld [vmem:[%s27425_s7 + $0x358] ss:$28 sps:$4 sm:$0xff]  }
 0x567   :  { %18738 = vmatpush3.bf16.msra.mxu1 %v19667_v60  ;;  %7940 = vmatprep.subr.bf16.mxu0 %v19670_v62  ;;  %v19727_v60 = vld [vmem:[%s27425_s7 + $0x520] ss:$28 sps:$4 sm:$0xff]   ;;  %v19730_v62 = vld [vmem:[%s27425_s7 + $0x394] ss:$28 sps:$4 sm:$0xff]  }
 0x568   :  { %18739 = vmatprep.subr.bf16.mxu1 %v19671_v63  ;;  %v19731_v63 = vld [vmem:[%s27425_s7 + $0x8d8] ss:$28 sps:$4 sm:$0xff]  }
 0x56a   :  { %7941 = vmatpush1.bf16.msra.mxu0 %v19668_v0  ;;  %v19728_v0 = vld [vmem:[%s27425_s7 + $0x390] ss:$28 sps:$4 sm:$0xff]  }
 0x56b   :  { %18740 = vmatpush3.bf16.msra.mxu1 %v19672_v1  ;;  %7942 = vmatprep.subr.bf16.mxu0 %v19675_v2  ;;  %v19732_v1 = vld [vmem:[%s27425_s7 + $0x718] ss:$28 sps:$4 sm:$0xff]   ;;  %v19735_v2 = vld [vmem:[%s27425_s7 + $0x3cc] ss:$28 sps:$4 sm:$0xff]  }
 0x56c   :  { %18741 = vmatprep.subr.bf16.mxu1 %v19676_v3  ;;  %v19736_v3 = vld [vmem:[%s27425_s7 + $0x910] ss:$28 sps:$4 sm:$0xff]  }
 0x56e   :  { %7943 = vmatpush1.bf16.msra.mxu0 %v19673_v4  ;;  %v19733_v4 = vld [vmem:[%s27425_s7 + $0x3c8] ss:$28 sps:$4 sm:$0xff]  }
 0x56f   :  { %18742 = vmatpush3.bf16.msra.mxu1 %v19677_v42  ;;  %7944 = vmatprep.subr.bf16.mxu0 %v19680_v51  ;;  %v19737_v42 = vld [vmem:[%s27425_s7 + $0x750] ss:$28 sps:$4 sm:$0xff]   ;;  %v19741_v51 = vld [vmem:[%s27425_s7 + $0x948] ss:$28 sps:$4 sm:$0xff]  }
 0x570   :  { %18743 = vmatprep.subr.bf16.mxu1 %v19681_v7  ;;  %v19742_v7 = vld [vmem:[%s27425_s7 + $0x788] ss:$28 sps:$4 sm:$0xff]  }
 0x572   :  { %7945 = vmatpush1.bf16.msra.mxu0 %v19678_v10  ;;  %v19745_v10 = vld [vmem:[%s27425_s7 + $0x43c] ss:$28 sps:$4 sm:$0xff]  }
 0x573   :  { %18744 = vmatpush3.bf16.msra.mxu1 %v19682_v16  ;;  %7946 = vmatprep.subr.bf16.mxu0 %v19685_v12  ;;  %v19746_v16 = vld [vmem:[%s27425_s7 + $0x980] ss:$28 sps:$4 sm:$0xff]   ;;  %v19743_v12 = vld [vmem:[%s27425_s7 + $0x438] ss:$28 sps:$4 sm:$0xff]  }
 0x574   :  { %18745 = vmatprep.subr.bf16.mxu1 %v19686_v17  ;;  %v19747_v17 = vld [vmem:[%s27425_s7 + $0x7c0] ss:$28 sps:$4 sm:$0xff]  }
 0x576   :  { %7947 = vmatpush1.bf16.msra.mxu0 %v19683_v20  ;;  %v19750_v20 = vld [vmem:[%s27425_s7 + $0x474] ss:$28 sps:$4 sm:$0xff]  }
 0x577   :  { %18746 = vmatpush3.bf16.msra.mxu1 %v19687_v53  ;;  %7948 = vmatprep.subr.bf16.mxu0 %v19690_v23  ;;  %v19751_v53 = vld [vmem:[%s27425_s7 + $0x9b8] ss:$28 sps:$4 sm:$0xff]   ;;  %v19748_v23 = vld [vmem:[%s27425_s7 + $0x470] ss:$28 sps:$4 sm:$0xff]  }
 0x578   :  { %18753 = vmatprep.subr.bf16.mxu1 %v19691_v24  ;;  %v19752_v24 = vld [vmem:[%s27425_s7 + $0x7f8] ss:$28 sps:$4 sm:$0xff]  }
 0x57a   :  { %8129 = vmatmul.mubr.bf16.vlgmr.msra.gmra.mrb[32].mxu1 %v22862_v9  ;;  %7949 = vmatpush1.bf16.msra.mxu0 %v19688_v26  ;;  %v19755_v26 = vld [vmem:[%s27425_s7 + $0x4ac] ss:$28 sps:$4 sm:$0xff]  }
 0x57b   :  { %18754 = vmatpush3.bf16.msra.mxu1 %v19692_v54  ;;  %8168 = vmatprep.mubr.bf16.mxu1 %v22872_v13  ;;  %v19756_v54 = vld [vmem:[%s27425_s7 + $0x9f0] ss:$28 sps:$4 sm:$0xff]  }
 0x57c   :  { %7950 = vmatprep.subr.bf16.mxu0 %v19695_v59  ;;  %18755 = vmatprep.subr.bf16.mxu1 %v19696_v28  ;;  %v19753_v59 = vld [vmem:[%s27425_s7 + $0x4a8] ss:$28 sps:$4 sm:$0xff]   ;;  %v19757_v28 = vld [vmem:[%s27425_s7 + $0x830] ss:$28 sps:$4 sm:$0xff]  }
 0x57e   :  { %7951 = vmatpush1.bf16.msra.mxu0 %v19693_v29  ;;  %v19760_v29 = vld [vmem:[%s27425_s7 + $0x4e4] ss:$28 sps:$4 sm:$0xff]  }
 0x57f   :  { %18756 = vmatpush3.bf16.msra.mxu1 %v19697_v31  ;;  %7952 = vmatprep.subr.bf16.mxu0 %v19700_v45  ;;  %v19761_v31 = vld [vmem:[%s27425_s7 + $0xa28] ss:$28 sps:$4 sm:$0xff]   ;;  %v19758_v45 = vld [vmem:[%s27425_s7 + $0x4e0] ss:$28 sps:$4 sm:$0xff]  }
 0x580   :  { %18757 = vmatprep.subr.bf16.mxu1 %v19701_v30  ;;  %v19762_v30 = vld [vmem:[%s27425_s7 + $0x868] ss:$28 sps:$4 sm:$0xff]  }
 0x582   :  { %7953 = vmatpush1.bf16.msra.mxu0 %v19698_v34  ;;  %v19765_v34 = vld [vmem:[%s27425_s7 + $0x51c] ss:$28 sps:$4 sm:$0xff]  }
 0x583   :  { %18758 = vmatpush3.bf16.msra.mxu1 %v19702_v35  ;;  %7954 = vmatprep.subr.bf16.mxu0 %v19705_v36  ;;  %v19766_v35 = vld [vmem:[%s27425_s7 + $0xa60] ss:$28 sps:$4 sm:$0xff]   ;;  %v19763_v36 = vld [vmem:[%s27425_s7 + $0x518] ss:$28 sps:$4 sm:$0xff]  }
 0x584   :  { %18759 = vmatprep.subr.bf16.mxu1 %v19706_v43  ;;  %v19767_v43 = vld [vmem:[%s27425_s7 + $0x8a0] ss:$28 sps:$4 sm:$0xff]  }
 0x586   :  { %7955 = vmatpush1.bf16.msra.mxu0 %v19703_v37  ;;  %v19770_v37 = vld [vmem:[%s27425_s7 + $0x554] ss:$28 sps:$4 sm:$0xff]  }
 0x587   :  { %18760 = vmatpush3.bf16.msra.mxu1 %v19707_v38  ;;  %7956 = vmatprep.subr.bf16.mxu0 %v19710_v52  ;;  %v19771_v38 = vld [vmem:[%s27425_s7 + $0xc58] ss:$28 sps:$4 sm:$0xff]   ;;  %v19768_v52 = vld [vmem:[%s27425_s7 + $0x550] ss:$28 sps:$4 sm:$0xff]  }
 0x588   :  { %18761 = vmatprep.subr.bf16.mxu1 %v19711_v58  ;;  %v19772_v58 = vld [vmem:[%s27425_s7 + $0xa98] ss:$28 sps:$4 sm:$0xff]  }
 0x58a   :  { %7957 = vmatpush1.bf16.msra.mxu0 %v19708_v39  ;;  %v19775_v39 = vld [vmem:[%s27425_s7 + $0x58c] ss:$28 sps:$4 sm:$0xff]  }
 0x58b   :  { %18762 = vmatpush3.bf16.msra.mxu1 %v19712_v40  ;;  %7958 = vmatprep.subr.bf16.mxu0 %v19715_v41  ;;  %v19776_v40 = vld [vmem:[%s27425_s7 + $0xc90] ss:$28 sps:$4 sm:$0xff]   ;;  %v19773_v41 = vld [vmem:[%s27425_s7 + $0x588] ss:$28 sps:$4 sm:$0xff]  }
 0x58c   :  { %18763 = vmatprep.subr.bf16.mxu1 %v19716_v55  ;;  %v19777_v55 = vld [vmem:[%s27425_s7 + $0xad0] ss:$28 sps:$4 sm:$0xff]  }
 0x58e   :  { %7959 = vmatpush1.bf16.msra.mxu0 %v19713_v46  ;;  %v19780_v46 = vld [vmem:[%s27425_s7 + $0x5c4] ss:$28 sps:$4 sm:$0xff]  }
 0x58f   :  { %18764 = vmatpush3.bf16.msra.mxu1 %v19717_v47  ;;  %7960 = vmatprep.subr.bf16.mxu0 %v19720_v49  ;;  %v19781_v47 = vld [vmem:[%s27425_s7 + $0xcc8] ss:$28 sps:$4 sm:$0xff]   ;;  %v19778_v49 = vld [vmem:[%s27425_s7 + $0x5c0] ss:$28 sps:$4 sm:$0xff]  }
 0x590   :  { %18765 = vmatprep.subr.bf16.mxu1 %v19721_v21  ;;  %v19782_v21 = vld [vmem:[%s27425_s7 + $0xb08] ss:$28 sps:$4 sm:$0xff]  }
 0x592   :  { %7961 = vmatpush1.bf16.msra.mxu0 %v19718_v56  ;;  %v19785_v56 = vld [vmem:[%s27425_s7 + $0x5fc] ss:$28 sps:$4 sm:$0xff]  }
 0x593   :  { %18766 = vmatpush3.bf16.msra.mxu1 %v19722_v57  ;;  %7962 = vmatprep.subr.bf16.mxu0 %v19725_v5  ;;  %v19786_v57 = vld [vmem:[%s27425_s7 + $0xd00] ss:$28 sps:$4 sm:$0xff]   ;;  %v19783_v5 = vld [vmem:[%s27425_s7 + $0x5f8] ss:$28 sps:$4 sm:$0xff]  }
 0x594   :  { %18767 = vmatprep.subr.bf16.mxu1 %v19726_v27  ;;  %v19787_v27 = vld [vmem:[%s27425_s7 + $0xb40] ss:$28 sps:$4 sm:$0xff]  }
 0x596   :  { %7963 = vmatpush1.bf16.msra.mxu0 %v19723_v61  ;;  %v19790_v61 = vld [vmem:[%s27425_s7 + $0x634] ss:$28 sps:$4 sm:$0xff]  }
 0x597   :  { %18768 = vmatpush3.bf16.msra.mxu1 %v19727_v60  ;;  %7973 = vmatprep.subr.bf16.mxu0 %v19730_v62  ;;  %v19791_v60 = vld [vmem:[%s27425_s7 + $0xd38] ss:$28 sps:$4 sm:$0xff]   ;;  %v19788_v62 = vld [vmem:[%s27425_s7 + $0x630] ss:$28 sps:$4 sm:$0xff]  }
 0x598   :  { %18775 = vmatprep.subr.bf16.mxu1 %v19731_v63  ;;  %v19792_v63 = vld [vmem:[%s27425_s7 + $0xb78] ss:$28 sps:$4 sm:$0xff]  }
 0x599   :  { %7965 = vmatmul.mubr.bf16.vlgmr.msra.gmra.mrb[28].mxu0 %v22862_v9  ;;  %v19740_v9 = vld [vmem:[%s27425_s7 + $0x404] ss:$28 sps:$4 sm:$0xff]  }
 0x59a   :  { %8169 = vmatmul.mubr.bf16.vlgmr.msra.gmra.mrb[36].mxu1 %v23075_v32  ;;  %7974 = vmatpush1.bf16.msra.mxu0 %v19728_v0  ;;  %v19795_v0 = vld [vmem:[%s27425_s7 + $0x66c] ss:$28 sps:$4 sm:$0xff]  }
 0x59b   :  { %8005 = vmatprep.mubr.bf16.mxu0 %v22872_v13  ;;  %18776 = vmatpush3.bf16.msra.mxu1 %v19732_v1  ;;  %v19738_v13 = vld [vmem:[%s27425_s7 + $0x400] ss:$28 sps:$4 sm:$0xff]   ;;  %v19796_v1 = vld [vmem:[%s27425_s7 + $0xd70] ss:$28 sps:$4 sm:$0xff]  }
 0x59c   :  { %8208 = vmatprep.mubr.bf16.mxu1 %v23080_v44  ;;  %7975 = vmatprep.subr.bf16.mxu0 %v19735_v2  ;;  %v19793_v2 = vld [vmem:[%s27425_s7 + $0x668] ss:$28 sps:$4 sm:$0xff]  }
 0x59d   :  { %18777 = vmatprep.subr.bf16.mxu1 %v19736_v3  ;;  %v19797_v3 = vld [vmem:[%s27425_s7 + $0xbb0] ss:$28 sps:$4 sm:$0xff]  }
 0x59e   :  { %7976 = vmatpush1.bf16.msra.mxu0 %v19733_v4  ;;  %v19800_v4 = vld [vmem:[%s27425_s7 + $0x6a4] ss:$28 sps:$4 sm:$0xff]  }
 0x59f   :  { %18778 = vmatpush3.bf16.msra.mxu1 %v19737_v42  ;;  %7977 = vmatprep.subr.bf16.mxu0 %v19740_v9  ;;  %v19801_v42 = vld [vmem:[%s27425_s7 + $0xda8] ss:$28 sps:$4 sm:$0xff]   ;;  %v19798_v9 = vld [vmem:[%s27425_s7 + $0x6a0] ss:$28 sps:$4 sm:$0xff]  }
 0x5a0   :  { %18779 = vmatprep.subr.bf16.mxu1 %v19741_v51  ;;  %v19802_v51 = vld [vmem:[%s27425_s7 + $0xbe8] ss:$28 sps:$4 sm:$0xff]  }
 0x5a2   :  { %7978 = vmatpush1.bf16.msra.mxu0 %v19738_v13  ;;  %v19805_v13 = vld [vmem:[%s27425_s7 + $0x6dc] ss:$28 sps:$4 sm:$0xff]  }
 0x5a3   :  { %18780 = vmatpush3.bf16.msra.mxu1 %v19742_v7  ;;  %7979 = vmatprep.subr.bf16.mxu0 %v19745_v10  ;;  %v19806_v7 = vld [vmem:[%s27425_s7 + $0xde0] ss:$28 sps:$4 sm:$0xff]  }
 0x5a4   :  { %18781 = vmatprep.subr.bf16.mxu1 %v19746_v16  ;;  %v8303_v10 = vld [vmem:[%s27419_s1] sm:$0xff] }
 0x5a5   :  { %v8307_v16 = vld [vmem:[%s27419_s1 + $0x20] sm:$0xff] }
 0x5a6   :  { %7980 = vmatpush1.bf16.msra.mxu0 %v19743_v12  ;;  %v19803_v12 = vld [vmem:[%s27425_s7 + $0x6d8] ss:$28 sps:$4 sm:$0xff]  }
 0x5a7   :  { %18782 = vmatpush3.bf16.msra.mxu1 %v19747_v17  ;;  %7981 = vmatprep.subr.bf16.mxu0 %v19750_v20  ;;  %v19807_v17 = vld [vmem:[%s27425_s7 + $0xc20] ss:$28 sps:$4 sm:$0xff]   ;;  %v19810_v20 = vld [vmem:[%s27425_s7 + $0x714] ss:$28 sps:$4 sm:$0xff]  }
 0x5a8   :  { %18783 = vmatprep.subr.bf16.mxu1 %v19751_v53  ;;  %v17619_v53 = vcombine.high %v8303_v10, %v8307_v16 }
 0x5aa   :  { %7982 = vmatpush1.bf16.msra.mxu0 %v19748_v23  ;;  %v8311_v23 = vld [vmem:[%s27419_s1 + $0x40] sm:$0xff] }
 0x5ab   :  { %18784 = vmatpush3.bf16.msra.mxu1 %v19752_v24  ;;  %7983 = vmatprep.subr.bf16.mxu0 %v19755_v26  ;;  %v8315_v24 = vld [vmem:[%s27419_s1 + $0x60] sm:$0xff]  ;;  %v19808_v26 = vld [vmem:[%s27425_s7 + $0x710] ss:$28 sps:$4 sm:$0xff]  }
 0x5ac   :  { %18785 = vmatprep.subr.bf16.mxu1 %v19756_v54  ;;  %v23894_v54 = vld [vmem:[%s27418_s0 + $0x1c] sm:$0xff] }
 0x5ae   :  { %7984 = vmatpush1.bf16.msra.mxu0 %v19753_v59  ;;  %v17618_v59 = vcombine.low %v8303_v10, %v8307_v16  ;;  %v19829_v10 = vld [vmem:[%s27425_s7 + $0x898] ss:$28 sps:$4 sm:$0xff]  }
 0x5af   :  { %18786 = vmatpush3.bf16.msra.mxu1 %v19757_v28  ;;  %7985 = vmatprep.subr.bf16.mxu0 %v19760_v29  ;;  %v19813_v28 = vld [vmem:[%s27425_s7 + $0x74c] ss:$28 sps:$4 sm:$0xff]   ;;  %v17627_v29 = vcombine.high %v8311_v23, %v8315_v24 }
 0x5b0   :  { %18787 = vmatprep.subr.bf16.mxu1 %v19761_v31  ;;  %v8319_v31 = vld [vmem:[%s27419_s1 + $0x80] sm:$0xff] }
 0x5b2   :  { %7986 = vmatpush1.bf16.msra.mxu0 %v19758_v45  ;;  %v8323_v45 = vld [vmem:[%s27419_s1 + $0xa0] sm:$0xff] }
 0x5b3   :  { %18788 = vmatpush3.bf16.msra.mxu1 %v19762_v30  ;;  %7987 = vmatprep.subr.bf16.mxu0 %v19765_v34  ;;  %v23908_v30 = vcombine.high %v23894_v54, %v23894_v54  ;;  %v19811_v34 = vld [vmem:[%s27425_s7 + $0x748] ss:$28 sps:$4 sm:$0xff]  }
 0x5b4   :  { %18789 = vmatprep.subr.bf16.mxu1 %v19766_v35  ;;  %v19816_v35 = vld [vmem:[%s27425_s7 + $0x784] ss:$28 sps:$4 sm:$0xff]  }
 0x5b6   :  { %7988 = vmatpush1.bf16.msra.mxu0 %v19763_v36  ;;  %v17635_v36 = vcombine.high %v8319_v31, %v8323_v45 }
 0x5b7   :  { %18790 = vmatpush3.bf16.msra.mxu1 %v19767_v43  ;;  %7989 = vmatprep.subr.bf16.mxu0 %v19770_v37  ;;  %v8327_v43 = vld [vmem:[%s27419_s1 + $0xc0] sm:$0xff] }
 0x5b8   :  { %18797 = vmatprep.subr.bf16.mxu1 %v19771_v38  ;;  %v8331_v37 = vld [vmem:[%s27419_s1 + $0xe0] sm:$0xff]  ;;  %v17634_v38 = vcombine.low %v8319_v31, %v8323_v45 }
 0x5b9   :  { %v19835_v31 = vld [vmem:[%s27425_s7 + $0x908] ss:$28 sps:$4 sm:$0xff]  }
 0x5ba   :  { %8209 = vmatmul.mubr.bf16.vlgmr.msra.gmra.mrb[40].mxu1 %v23281_v18  ;;  %7990 = vmatpush1.bf16.msra.mxu0 %v19768_v52  ;;  %v19819_v52 = vld [vmem:[%s27425_s7 + $0x7bc] ss:$28 sps:$4 sm:$0xff]  }
 0x5bb   :  { %18798 = vmatpush3.bf16.msra.mxu1 %v19772_v58  ;;  %8248 = vmatprep.mubr.bf16.mxu1 %v23289_v22  ;;  %v17643_v58 = vcombine.high %v8327_v43, %v8331_v37 }
 0x5bc   :  { %7991 = vmatprep.subr.bf16.mxu0 %v19775_v39  ;;  %18799 = vmatprep.subr.bf16.mxu1 %v19776_v40  ;;  %v8335_v39 = vld [vmem:[%s27419_s1 + $0x100] sm:$0xff] }
 0x5bd   :  { %v8339_v40 = vld [vmem:[%s27419_s1 + $0x120] sm:$0xff] }
 0x5be   :  { %7992 = vmatpush1.bf16.msra.mxu0 %v19773_v41  ;;  %v19817_v41 = vld [vmem:[%s27425_s7 + $0x7b8] ss:$28 sps:$4 sm:$0xff]  }
 0x5bf   :  { %18800 = vmatpush3.bf16.msra.mxu1 %v19777_v55  ;;  %7993 = vmatprep.subr.bf16.mxu0 %v19780_v46  ;;  %v17642_v55 = vcombine.low %v8327_v43, %v8331_v37  ;;  %v19822_v46 = vld [vmem:[%s27425_s7 + $0x7f4] ss:$28 sps:$4 sm:$0xff]   ;;  %v19838_v43 = vld [vmem:[%s27425_s7 + $0x940] ss:$28 sps:$4 sm:$0xff]  }
 0x5c0   :  { %18801 = vmatprep.subr.bf16.mxu1 %v19781_v47  ;;  %v17651_v47 = vcombine.high %v8335_v39, %v8339_v40 }
 0x5c2   :  { %7994 = vmatpush1.bf16.msra.mxu0 %v19778_v49  ;;  %v8343_v49 = vld [vmem:[%s27419_s1 + $0x140] sm:$0xff] }
 0x5c3   :  { %18802 = vmatpush3.bf16.msra.mxu1 %v19782_v21  ;;  %7995 = vmatprep.subr.bf16.mxu0 %v19785_v56  ;;  %v8347_v21 = vld [vmem:[%s27419_s1 + $0x160] sm:$0xff]  ;;  %v19820_v56 = vld [vmem:[%s27425_s7 + $0x7f0] ss:$28 sps:$4 sm:$0xff]  }
 0x5c4   :  { %18803 = vmatprep.subr.bf16.mxu1 %v19786_v57  ;;  %v17650_v57 = vcombine.low %v8335_v39, %v8339_v40  ;;  %v19841_v39 = vld [vmem:[%s27425_s7 + $0x978] ss:$28 sps:$4 sm:$0xff]  }
 0x5c6   :  { %7996 = vmatpush1.bf16.msra.mxu0 %v19783_v5  ;;  %v19825_v5 = vld [vmem:[%s27425_s7 + $0x82c] ss:$28 sps:$4 sm:$0xff]  }
 0x5c7   :  { %18804 = vmatpush3.bf16.msra.mxu1 %v19787_v27  ;;  %7997 = vmatprep.subr.bf16.mxu0 %v19790_v61  ;;  %v17659_v27 = vcombine.high %v8343_v49, %v8347_v21  ;;  %v8351_v61 = vld [vmem:[%s27419_s1 + $0x180] sm:$0xff] }
 0x5c8   :  { %18805 = vmatprep.subr.bf16.mxu1 %v19791_v60  ;;  %v8355_v60 = vld [vmem:[%s27419_s1 + $0x1a0] sm:$0xff] }
 0x5ca   :  { %7998 = vmatpush1.bf16.msra.mxu0 %v19788_v62  ;;  %v19823_v62 = vld [vmem:[%s27425_s7 + $0x828] ss:$28 sps:$4 sm:$0xff]  }
 0x5cb   :  { %18806 = vmatpush3.bf16.msra.mxu1 %v19792_v63  ;;  %7999 = vmatprep.subr.bf16.mxu0 %v19795_v0  ;;  %v17658_v63 = vcombine.low %v8343_v49, %v8347_v21  ;;  %v19828_v0 = vld [vmem:[%s27425_s7 + $0x864] ss:$28 sps:$4 sm:$0xff]   ;;  %v19844_v49 = vld [vmem:[%s27425_s7 + $0x9b0] ss:$28 sps:$4 sm:$0xff]  }
 0x5cc   :  { %18807 = vmatprep.subr.bf16.mxu1 %v19796_v1  ;;  %v17667_v1 = vcombine.high %v8351_v61, %v8355_v60 }
 0x5ce   :  { %8000 = vmatpush1.bf16.msra.mxu0 %v19793_v2  ;;  %v8359_v2 = vld [vmem:[%s27419_s1 + $0x1c0] sm:$0xff] }
 0x5cf   :  { %18808 = vmatpush3.bf16.msra.mxu1 %v19797_v3  ;;  %8001 = vmatprep.subr.bf16.mxu0 %v19800_v4  ;;  %v8363_v3 = vld [vmem:[%s27419_s1 + $0x1e0] sm:$0xff] }
 0x5d0   :  { %18809 = vmatprep.subr.bf16.mxu1 %v19801_v42  ;;  %v19826_v4 = vld [vmem:[%s27425_s7 + $0x860] ss:$28 sps:$4 sm:$0xff]   ;;  %v17666_v42 = vcombine.low %v8351_v61, %v8355_v60  ;;  %v17674_v16 = vcombine.low %v8359_v2, %v8363_v3  ;;  %v19847_v61 = vld [vmem:[%s27425_s7 + $0x9e8] ss:$28 sps:$4 sm:$0xff]  }
 0x5d2   :  { %8002 = vmatpush1.bf16.msra.mxu0 %v19798_v9  ;;  %v19831_v9 = vld [vmem:[%s27425_s7 + $0x89c] ss:$28 sps:$4 sm:$0xff]  }
 0x5d3   :  { %18810 = vmatpush3.bf16.msra.mxu1 %v19802_v51  ;;  %8003 = vmatprep.subr.bf16.mxu0 %v19805_v13  ;;  %v17675_v51 = vcombine.high %v8359_v2, %v8363_v3  ;;  %v8367_v13 = vld [vmem:[%s27419_s1 + $0x200] sm:$0xff] }
 0x5d4   :  { %18811 = vmatprep.subr.bf16.mxu1 %v19806_v7  ;;  %v8371_v7 = vld [vmem:[%s27419_s1 + $0x220] sm:$0xff] }
 0x5d5   :  { %v19850_v2 = vld [vmem:[%s27425_s7 + $0xa20] ss:$28 sps:$4 sm:$0xff]  }
 0x5d6   :  { %8004 = vmatpush1.bf16.msra.mxu0 %v19803_v12  ;;  %v19834_v12 = vld [vmem:[%s27425_s7 + $0x8d4] ss:$28 sps:$4 sm:$0xff]  }
 0x5d7   :  { %18812 = vmatpush3.bf16.msra.mxu1 %v19807_v17  ;;  %8014 = vmatprep.subr.bf16.mxu0 %v19810_v20  ;;  %v17683_v17 = vcombine.high %v8367_v13, %v8371_v7  ;;  %v8375_v20 = vld [vmem:[%s27419_s1 + $0x240] sm:$0xff] }
 0x5d8   :  { %11058 = vmatprep.subr.bf16.mxu1 %v17619_v53  ;;  %v8379_v53 = vld [vmem:[%s27419_s1 + $0x260] sm:$0xff] }
 0x5d9   :  { %8006 = vmatmul.mubr.bf16.vlgmr.msra.gmra.mrb[28].mxu0 %v23075_v32  ;;  %v17626_v32 = vcombine.low %v8311_v23, %v8315_v24  ;;  %v19832_v23 = vld [vmem:[%s27425_s7 + $0x8d0] ss:$28 sps:$4 sm:$0xff]   ;;  %v17682_v24 = vcombine.low %v8367_v13, %v8371_v7  ;;  %v17690_v45 = vcombine.low %v8375_v20, %v8379_v53  ;;  %v19853_v13 = vld [vmem:[%s27425_s7 + $0xa58] ss:$28 sps:$4 sm:$0xff]  }
 0x5da   :  { %8249 = vmatmul.mubr.bf16.vlgmr.msra.gmra.mrb[44].mxu1 %v23484_v19  ;;  %8015 = vmatpush1.bf16.msra.mxu0 %v19808_v26  ;;  %v19837_v26 = vld [vmem:[%s27425_s7 + $0x90c] ss:$28 sps:$4 sm:$0xff]  }
 0x5db   :  { %8046 = vmatprep.mubr.bf16.mxu0 %v23080_v44  ;;  %11059 = vmatpush1.bf16.msra.mxu1 %v17618_v59  ;;  %v19814_v44 = vld [vmem:[%s27425_s7 + $0x780] ss:$28 sps:$4 sm:$0xff]   ;;  %v17691_v59 = vcombine.high %v8375_v20, %v8379_v53 }
 0x5dc   :  { %8016 = vmatprep.subr.bf16.mxu0 %v19813_v28  ;;  %11060 = vmatprep.subr.bf16.mxu1 %v17627_v29  ;;  %v8383_v28 = vld [vmem:[%s27419_s1 + $0x280] sm:$0xff] }
 0x5dd   :  { %11090 = vmatprep.mubr.bf16.mxu1 %v23908_v30  ;;  %v8387_v29 = vld [vmem:[%s27419_s1 + $0x2a0] sm:$0xff] }
 0x5de   :  { %8017 = vmatpush1.bf16.msra.mxu0 %v19811_v34  ;;  %v19840_v34 = vld [vmem:[%s27425_s7 + $0x944] ss:$28 sps:$4 sm:$0xff]   ;;  %v17698_v37 = vcombine.low %v8383_v28, %v8387_v29 }
 0x5df   :  { %11061 = vmatpush1.bf16.msra.mxu1 %v17626_v32  ;;  %8018 = vmatprep.subr.bf16.mxu0 %v19816_v35  ;;  %v17699_v32 = vcombine.high %v8383_v28, %v8387_v29  ;;  %v8391_v35 = vld [vmem:[%s27419_s1 + $0x2c0] sm:$0xff] }
 0x5e0   :  { %11062 = vmatprep.subr.bf16.mxu1 %v17635_v36  ;;  %v8395_v36 = vld [vmem:[%s27419_s1 + $0x2e0] sm:$0xff] }
 0x5e1   :  { %v17706_v40 = vcombine.low %v8391_v35, %v8395_v36  ;;  %v8439_v20 = vld [vmem:[%s27419_s1 + $0x440] sm:$0xff] }
 0x5e2   :  { %8019 = vmatpush1.bf16.msra.mxu0 %v19814_v44  ;;  %v19843_v44 = vld [vmem:[%s27425_s7 + $0x97c] ss:$28 sps:$4 sm:$0xff]   ;;  %v8443_v53 = vld [vmem:[%s27419_s1 + $0x460] sm:$0xff] }
 0x5e3   :  { %11063 = vmatpush1.bf16.msra.mxu1 %v17634_v38  ;;  %8020 = vmatprep.subr.bf16.mxu0 %v19819_v52  ;;  %v17707_v38 = vcombine.high %v8391_v35, %v8395_v36  ;;  %v8399_v52 = vld [vmem:[%s27419_s1 + $0x300] sm:$0xff]  ;;  %v17755_v28 = vcombine.high %v8439_v20, %v8443_v53  ;;  %v19869_v36 = vld [vmem:[%s27425_s7 + $0xb3c] ss:$28 sps:$4 sm:$0xff]  }
 0x5e4   :  { %11064 = vmatprep.subr.bf16.mxu1 %v17643_v58  ;;  %v8403_v58 = vld [vmem:[%s27419_s1 + $0x320] sm:$0xff] }
 0x5e5   :  { %v17714_v21 = vcombine.low %v8399_v52, %v8403_v58  ;;  %v8447_v29 = vld [vmem:[%s27419_s1 + $0x480] sm:$0xff] }
 0x5e6   :  { %8021 = vmatpush1.bf16.msra.mxu0 %v19817_v41  ;;  %v19846_v41 = vld [vmem:[%s27425_s7 + $0x9b4] ss:$28 sps:$4 sm:$0xff]   ;;  %v8459_v35 = vld [vmem:[%s27419_s1 + $0x4e0] sm:$0xff] }
 0x5e7   :  { %11065 = vmatpush1.bf16.msra.mxu1 %v17642_v55  ;;  %8022 = vmatprep.subr.bf16.mxu0 %v19822_v46  ;;  %v17715_v55 = vcombine.high %v8399_v52, %v8403_v58  ;;  %v8407_v46 = vld [vmem:[%s27419_s1 + $0x340] sm:$0xff]  ;;  %v19872_v58 = vld [vmem:[%s27425_s7 + $0xb74] ss:$28 sps:$4 sm:$0xff]  }
 0x5e8   :  { %11066 = vmatprep.subr.bf16.mxu1 %v17651_v47  ;;  %v8411_v47 = vld [vmem:[%s27419_s1 + $0x360] sm:$0xff] }
 0x5e9   :  { %v17722_v60 = vcombine.low %v8407_v46, %v8411_v47  ;;  %v8467_v52 = vld [vmem:[%s27419_s1 + $0x520] sm:$0xff] }
 0x5ea   :  { %8023 = vmatpush1.bf16.msra.mxu0 %v19820_v56  ;;  %v19849_v56 = vld [vmem:[%s27425_s7 + $0x9ec] ss:$28 sps:$4 sm:$0xff]  }
 0x5eb   :  { %11067 = vmatpush1.bf16.msra.mxu1 %v17650_v57  ;;  %8024 = vmatprep.subr.bf16.mxu0 %v19825_v5  ;;  %v17723_v57 = vcombine.high %v8407_v46, %v8411_v47  ;;  %v8415_v5 = vld [vmem:[%s27419_s1 + $0x380] sm:$0xff] }
 0x5ec   :  { %11068 = vmatprep.subr.bf16.mxu1 %v17659_v27  ;;  %v8419_v27 = vld [vmem:[%s27419_s1 + $0x3a0] sm:$0xff] }
 0x5ed   :  { %v17730_v3 = vcombine.low %v8415_v5, %v8419_v27  ;;  %v8471_v46 = vld [vmem:[%s27419_s1 + $0x540] sm:$0xff] }
 0x5ee   :  { %8025 = vmatpush1.bf16.msra.mxu0 %v19823_v62  ;;  %v19852_v62 = vld [vmem:[%s27425_s7 + $0xa24] ss:$28 sps:$4 sm:$0xff]  }
 0x5ef   :  { %11069 = vmatpush1.bf16.msra.mxu1 %v17658_v63  ;;  %8026 = vmatprep.subr.bf16.mxu0 %v19828_v0  ;;  %v17731_v63 = vcombine.high %v8415_v5, %v8419_v27  ;;  %v8423_v0 = vld [vmem:[%s27419_s1 + $0x3c0] sm:$0xff] }
 0x5f0   :  { %11070 = vmatprep.subr.bf16.mxu1 %v17667_v1  ;;  %v8427_v1 = vld [vmem:[%s27419_s1 + $0x3e0] sm:$0xff] }
 0x5f1   :  { %v17738_v7 = vcombine.low %v8423_v0, %v8427_v1  ;;  %v8475_v47 = vld [vmem:[%s27419_s1 + $0x560] sm:$0xff] }
 0x5f2   :  { %8027 = vmatpush1.bf16.msra.mxu0 %v19826_v4  ;;  %v19855_v4 = vld [vmem:[%s27425_s7 + $0xa5c] ss:$28 sps:$4 sm:$0xff]  }
 0x5f3   :  { %11071 = vmatpush1.bf16.msra.mxu1 %v17666_v42  ;;  %8028 = vmatprep.subr.bf16.mxu0 %v19831_v9  ;;  %v17739_v42 = vcombine.high %v8423_v0, %v8427_v1  ;;  %v8431_v9 = vld [vmem:[%s27419_s1 + $0x400] sm:$0xff] }
 0x5f4   :  { %11072 = vmatprep.subr.bf16.mxu1 %v17675_v51  ;;  %v8435_v51 = vld [vmem:[%s27419_s1 + $0x420] sm:$0xff] }
 0x5f5   :  { %v19878_v0 = vld [vmem:[%s27425_s7 + $0xbe4] ss:$28 sps:$4 sm:$0xff]  }
 0x5f6   :  { %8029 = vmatpush1.bf16.msra.mxu0 %v19829_v10  ;;  %v19858_v10 = vld [vmem:[%s27425_s7 + $0xa94] ss:$28 sps:$4 sm:$0xff]  }
 0x5f7   :  { %11073 = vmatpush1.bf16.msra.mxu1 %v17674_v16  ;;  %8030 = vmatprep.subr.bf16.mxu0 %v19834_v12  ;;  %v17747_v16 = vcombine.high %v8431_v9, %v8435_v51  ;;  %v24090_v12 = vld [vmem:[%s27418_s0 + $0x24] sm:$0xff] }
 0x5f8   :  { %11074 = vmatprep.subr.bf16.mxu1 %v17683_v17  ;;  %v19856_v17 = vld [vmem:[%s27425_s7 + $0xa90] ss:$28 sps:$4 sm:$0xff]  }
 0x5fa   :  { %8031 = vmatpush1.bf16.msra.mxu0 %v19832_v23  ;;  %v24103_v23 = vcombine.low %v23894_v54, %v23894_v54  ;;  %v19861_v54 = vld [vmem:[%s27425_s7 + $0xac8] ss:$28 sps:$4 sm:$0xff]  }
 0x5fb   :  { %11075 = vmatpush1.bf16.msra.mxu1 %v17682_v24  ;;  %8032 = vmatprep.subr.bf16.mxu0 %v19837_v26  ;;  %v19863_v24 = vld [vmem:[%s27425_s7 + $0xacc] ss:$28 sps:$4 sm:$0xff]   ;;  %v17746_v26 = vcombine.low %v8431_v9, %v8435_v51 }
 0x5fc   :  { %11076 = vmatprep.subr.bf16.mxu1 %v17691_v59  ;;  %v24110_v59 = vcombine.high %v24090_v12, %v24090_v12 }
 0x5fe   :  { %8033 = vmatpush1.bf16.msra.mxu0 %v19835_v31  ;;  %v8451_v31 = vld [vmem:[%s27419_s1 + $0x4a0] sm:$0xff] }
 0x5ff   :  { %11077 = vmatpush1.bf16.msra.mxu1 %v17690_v45  ;;  %8034 = vmatprep.subr.bf16.mxu0 %v19840_v34  ;;  %v17763_v45 = vcombine.high %v8447_v29, %v8451_v31  ;;  %v19864_v34 = vld [vmem:[%s27425_s7 + $0xb00] ss:$28 sps:$4 sm:$0xff]  }
 0x600   :  { %11078 = vmatprep.subr.bf16.mxu1 %v17699_v32  ;;  %v8455_v32 = vld [vmem:[%s27419_s1 + $0x4c0] sm:$0xff] }
 0x602   :  { %8035 = vmatpush1.bf16.msra.mxu0 %v19838_v43  ;;  %v17762_v43 = vcombine.low %v8447_v29, %v8451_v31 }
 0x603   :  { %11079 = vmatpush1.bf16.msra.mxu1 %v17698_v37  ;;  %8036 = vmatprep.subr.bf16.mxu0 %v19843_v44  ;;  %v17771_v37 = vcombine.high %v8455_v32, %v8459_v35  ;;  %v19867_v44 = vld [vmem:[%s27425_s7 + $0xb38] ss:$28 sps:$4 sm:$0xff]  }
 0x604   :  { %11080 = vmatprep.subr.bf16.mxu1 %v17707_v38  ;;  %v8463_v38 = vld [vmem:[%s27419_s1 + $0x500] sm:$0xff] }
 0x606   :  { %8037 = vmatpush1.bf16.msra.mxu0 %v19841_v39  ;;  %v17770_v39 = vcombine.low %v8455_v32, %v8459_v35  ;;  %v19879_v32 = vld [vmem:[%s27425_s7 + $0xc18] ss:$28 sps:$4 sm:$0xff]  }
 0x607   :  { %11081 = vmatpush1.bf16.msra.mxu1 %v17706_v40  ;;  %8038 = vmatprep.subr.bf16.mxu0 %v19846_v41  ;;  %v19870_v40 = vld [vmem:[%s27425_s7 + $0xb70] ss:$28 sps:$4 sm:$0xff]   ;;  %v17779_v41 = vcombine.high %v8463_v38, %v8467_v52 }
 0x608   :  { %11082 = vmatprep.subr.bf16.mxu1 %v17715_v55  ;;  %v24158_v55 = vld [vmem:[%s27426_s8] sm:$0x7f] }
 0x609   :  { %v5276_v5 = vrot.slane %v24158_v55, %v22340_v50  ;;  %v5272_v27 = vrot.slane %v24158_v55, %v21965_v8 }
 0x60a   :  { %8039 = vmatpush1.bf16.msra.mxu0 %v19844_v49  ;;  %v19875_v49 = vld [vmem:[%s27425_s7 + $0xbac] ss:$28 sps:$4 sm:$0xff]  }
 0x60b   :  { %11083 = vmatpush1.bf16.msra.mxu1 %v17714_v21  ;;  %8040 = vmatprep.subr.bf16.mxu0 %v19849_v56  ;;  %v17778_v21 = vcombine.low %v8463_v38, %v8467_v52  ;;  %v5268_v56 = vrot.slane %v24158_v55, %v21962_v6  ;;  %v19884_v52 = vld [vmem:[%s27425_s7 + $0xc54] ss:$28 sps:$4 sm:$0xff]  }
 0x60c   :  { %11084 = vmatprep.subr.bf16.mxu1 %v17723_v57  ;;  %v17787_v57 = vcombine.high %v8471_v46, %v8475_v47 }
 0x60e   :  { %8041 = vmatpush1.bf16.msra.mxu0 %v19847_v61  ;;  %v19873_v61 = vld [vmem:[%s27425_s7 + $0xba8] ss:$28 sps:$4 sm:$0xff]  }
 0x60f   :  { %11085 = vmatpush1.bf16.msra.mxu1 %v17722_v60  ;;  %8042 = vmatprep.subr.bf16.mxu0 %v19852_v62  ;;  %v8479_v60 = vld [vmem:[%s27419_s1 + $0x580] sm:$0xff] }
 0x610   :  { %11086 = vmatprep.subr.bf16.mxu1 %v17731_v63  ;;  %v8483_v62 = vld [vmem:[%s27419_s1 + $0x5a0] sm:$0xff]  ;;  %v5280_v63 = vrot.slane %v24158_v55, %v22288_v25 }
 0x611   :  { %v17795_v9 = vcombine.high %v8479_v60, %v8483_v62 }
 0x612   :  { %8043 = vmatpush1.bf16.msra.mxu0 %v19850_v2  ;;  %v17786_v2 = vcombine.low %v8471_v46, %v8475_v47  ;;  %v8507_v46 = vld [vmem:[%s27419_s1 + $0x660] sm:$0xff]  ;;  %v19887_v47 = vld [vmem:[%s27425_s7 + $0xc8c] ss:$28 sps:$4 sm:$0xff]  }
 0x613   :  { %11087 = vmatpush1.bf16.msra.mxu1 %v17730_v3  ;;  %8044 = vmatprep.subr.bf16.mxu0 %v19855_v4 }
 0x614   :  { %11088 = vmatprep.subr.bf16.mxu1 %v17739_v42 }
 0x616   :  { %8045 = vmatpush1.bf16.msra.mxu0 %v19853_v13 }
 0x617   :  { %11089 = vmatpush1.bf16.msra.mxu1 %v17738_v7  ;;  %8055 = vmatprep.subr.bf16.mxu0 %v19858_v10 }
 0x618   :  { %11099 = vmatprep.subr.bf16.mxu1 %v17747_v16  ;;  %v19876_v16 = vld [vmem:[%s27425_s7 + $0xbe0] ss:$28 sps:$4 sm:$0xff]  }
 0x619   :  { %8047 = vmatmul.mubr.bf16.vlgmr.msra.gmra.mrb[28].mxu0 %v23281_v18  ;;  %v19866_v18 = vld [vmem:[%s27425_s7 + $0xb04] ss:$28 sps:$4 sm:$0xff]  }
 0x61a   :  { %8056 = vmatpush1.bf16.msra.mxu0 %v19856_v17  ;;  %8087 = vmatprep.mubr.bf16.mxu0 %v23289_v22  ;;  %v17754_v22 = vcombine.low %v8439_v20, %v8443_v53  ;;  %v8487_v17 = vld [vmem:[%s27419_s1 + $0x5c0] sm:$0xff] }
 0x61b   :  { %11091 = vmatmul.mubr.bf16.vlgmr.msra.gmra.mrb[48].mxu1 %v24103_v23  ;;  %8057 = vmatprep.subr.bf16.mxu0 %v19863_v24  ;;  %v8491_v20 = vld [vmem:[%s27419_s1 + $0x5e0] sm:$0xff] }
 0x61c   :  { %11100 = vmatpush1.bf16.msra.mxu1 %v17746_v26  ;;  %11131 = vmatprep.mubr.bf16.mxu1 %v24110_v59  ;;  %v17803_v35 = vcombine.high %v8487_v17, %v8491_v20 }
 0x61d   :  { %11101 = vmatprep.subr.bf16.mxu1 %v17755_v28 }
 0x61e   :  { %8058 = vmatpush1.bf16.msra.mxu0 %v19861_v54  ;;  %v19881_v54 = vld [vmem:[%s27425_s7 + $0xc1c] ss:$28 sps:$4 sm:$0xff]  }
 0x61f   :  { %8059 = vmatprep.subr.bf16.mxu0 %v19866_v18 }
 0x620   :  { %11102 = vmatpush1.bf16.msra.mxu1 %v17754_v22  ;;  %v17794_v22 = vcombine.low %v8479_v60, %v8483_v62 }
 0x621   :  { %11103 = vmatprep.subr.bf16.mxu1 %v17763_v45 }
 0x622   :  { %8060 = vmatpush1.bf16.msra.mxu0 %v19864_v34 }
 0x623   :  { %8061 = vmatprep.subr.bf16.mxu0 %v19869_v36 }
 0x624   :  { %11104 = vmatpush1.bf16.msra.mxu1 %v17762_v43 }
 0x625   :  { %11105 = vmatprep.subr.bf16.mxu1 %v17771_v37  ;;  %v8495_v37 = vld [vmem:[%s27419_s1 + $0x600] sm:$0xff] }
 0x626   :  { %8062 = vmatpush1.bf16.msra.mxu0 %v19867_v44  ;;  %v8499_v44 = vld [vmem:[%s27419_s1 + $0x620] sm:$0xff] }
 0x627   :  { %8063 = vmatprep.subr.bf16.mxu0 %v19872_v58  ;;  %v17802_v58 = vcombine.low %v8487_v17, %v8491_v20  ;;  %v19891_v17 = vld [vmem:[%s27425_s7 + $0xcf8] ss:$28 sps:$4 sm:$0xff]   ;;  %v8527_v20 = vld [vmem:[%s27419_s1 + $0x700] sm:$0xff] }
 0x628   :  { %11106 = vmatpush1.bf16.msra.mxu1 %v17770_v39  ;;  %v17811_v39 = vcombine.high %v8495_v37, %v8499_v44 }
 0x629   :  { %11107 = vmatprep.subr.bf16.mxu1 %v17779_v41  ;;  %v8503_v41 = vld [vmem:[%s27419_s1 + $0x640] sm:$0xff] }
 0x62a   :  { %8064 = vmatpush1.bf16.msra.mxu0 %v19870_v40  ;;  %v19882_v40 = vld [vmem:[%s27425_s7 + $0xc50] ss:$28 sps:$4 sm:$0xff]  }
 0x62b   :  { %8065 = vmatprep.subr.bf16.mxu0 %v19875_v49  ;;  %v17810_v49 = vcombine.low %v8495_v37, %v8499_v44  ;;  %v19902_v37 = vld [vmem:[%s27425_s7 + $0xda4] ss:$28 sps:$4 sm:$0xff]  }
 0x62c   :  { %11108 = vmatpush1.bf16.msra.mxu1 %v17778_v21  ;;  %v7761_v1 = vpop.f32.mrb[24].mxu0  ;;  %v17819_v21 = vcombine.high %v8503_v41, %v8507_v46 }
 0x62d   :  { %v19005_v3 = vadd.f32 %v7761_v1, %v5268_v56  ;;  %v7925_v4 = vpop.f32.mrb[28].mxu1  ;;  %v7763_v42 = vpop.f32.mrb[25].mxu0  ;;  %11109 = vmatprep.subr.bf16.mxu1 %v17787_v57  ;;  %v19885_v56 = vld [vmem:[%s27425_s7 + $0xc88] ss:$28 sps:$4 sm:$0xff]   ;;  %v19888_v1 = vld [vmem:[%s27425_s7 + $0xcc0] ss:$28 sps:$4 sm:$0xff]  }
 0x62e   :  { %v19007_v51 = vadd.f32 %v7925_v4, %v5276_v5  ;;  %v19006_v13 = vadd.f32 %v7763_v42, %v5272_v27  ;;  %v7927_v7 = vpop.f32.mrb[29].mxu1  ;;  %v7765_v10 = vpop.f32.mrb[26].mxu0  ;;  %8066 = vmatpush1.bf16.msra.mxu0 %v19873_v61  ;;  %v8511_v57 = vld [vmem:[%s27419_s1 + $0x680] sm:$0xff]  ;;  %v17818_v61 = vcombine.low %v8503_v41, %v8507_v46 }
 0x62f   :  { %v8256_v53 = vsub.f32 0.0, %v19005_v3  ;;  %v19008_v24 = vadd.f32 %v7927_v7, %v5280_v63  ;;  %v7929_v26 = vpop.f32.mrb[30].mxu1  ;;  %v7766_v28 = vpop.f32.mrb[27].mxu0  ;;  %8067 = vmatprep.subr.bf16.mxu0 %v19878_v0  ;;  %v8515_v5 = vld [vmem:[%s27419_s1 + $0x6a0] sm:$0xff] }
 0x630   :  { %v8258_v29 = vsub.f32 0.0, %v19007_v51  ;;  %v8257_v31 = vsub.f32 0.0, %v19006_v13  ;;  %11110 = vmatpush1.bf16.msra.mxu1 %v17786_v2  ;;  %v7930_v18 = vpop.f32.mrb[31].mxu1  ;;  %v19890_v27 = vld [vmem:[%s27425_s7 + $0xcc4] ss:$28 sps:$4 sm:$0xff]   ;;  %v17827_v62 = vcombine.high %v8511_v57, %v8515_v5  ;;  %v17826_v7 = vcombine.low %v8511_v57, %v8515_v5 }
 0x631   :  { %v8263_v45 = vmul.f32 1.442695, %v8256_v53  ;;  %v8259_v34 = vsub.f32 0.0, %v19008_v24  ;;  %11111 = vmatprep.subr.bf16.mxu1 %v17795_v9  ;;  %v8519_v2 = vld [vmem:[%s27419_s1 + $0x6c0] sm:$0xff]  ;;  %v19893_v9 = vld [vmem:[%s27425_s7 + $0xcfc] ss:$28 sps:$4 sm:$0xff]  }
 0x632   :  { %v8267_v36 = vmul.f32 1.442695, %v8258_v29  ;;  %v8265_v43 = vmul.f32 1.442695, %v8257_v31  ;;  %8068 = vmatpush1.bf16.msra.mxu0 %v19876_v16  ;;  %v8523_v3 = vld [vmem:[%s27419_s1 + $0x6e0] sm:$0xff] }
 0x633   :  { %20615 = vpow2.f32 %v8263_v45  ;;  %v8269_v38 = vmul.f32 1.442695, %v8259_v34  ;;  %8069 = vmatprep.subr.bf16.mxu0 %v19881_v54  ;;  %v17835_v16 = vcombine.high %v8519_v2, %v8523_v3  ;;  %v8531_v53 = vld [vmem:[%s27419_s1 + $0x720] sm:$0xff]  ;;  %v19896_v24 = vld [vmem:[%s27425_s7 + $0xd34] ss:$28 sps:$4 sm:$0xff]   ;;  %v17834_v26 = vcombine.low %v8519_v2, %v8523_v3  ;;  %v8312_v3 = vld [vmem:[%s27419_s1 + $0x48] sm:$0xff] }
 0x634   :  { %20617 = vpow2.f32 %v8267_v36  ;;  %11112 = vmatpush1.bf16.msra.mxu1 %v17794_v22  ;;  %v17843_v28 = vcombine.high %v8527_v20, %v8531_v53  ;;  %v19894_v54 = vld [vmem:[%s27425_s7 + $0xd30] ss:$28 sps:$4 sm:$0xff]   ;;  %v8535_v29 = vld [vmem:[%s27419_s1 + $0x740] sm:$0xff]  ;;  %v17842_v22 = vcombine.low %v8527_v20, %v8531_v53 }
 0x635   :  { %20619 = vpow2.f32 %v8265_v43  ;;  %11113 = vmatprep.subr.bf16.mxu1 %v17803_v35  ;;  %v8539_v31 = vld [vmem:[%s27419_s1 + $0x760] sm:$0xff]  ;;  %v19899_v18 = vld [vmem:[%s27425_s7 + $0xd6c] ss:$28 sps:$4 sm:$0xff]  }
 0x636   :  { %20621 = vpow2.f32 %v8269_v38  ;;  %8070 = vmatpush1.bf16.msra.mxu0 %v19879_v32  ;;  %v17851_v45 = vcombine.high %v8535_v29, %v8539_v31  ;;  %v19897_v32 = vld [vmem:[%s27425_s7 + $0xd68] ss:$28 sps:$4 sm:$0xff]   ;;  %v17850_v38 = vcombine.low %v8535_v29, %v8539_v31  ;;  %v19900_v41 = vld [vmem:[%s27425_s7 + $0xda0] ss:$28 sps:$4 sm:$0xff]  }
 0x637   :  { %8071 = vmatprep.subr.bf16.mxu0 %v19884_v52  ;;  %v8543_v35 = vld [vmem:[%s27419_s1 + $0x780] sm:$0xff]  ;;  %v8320_v20 = vld [vmem:[%s27419_s1 + $0x88] sm:$0xff] }
 0x638   :  { %11114 = vmatpush1.bf16.msra.mxu1 %v17802_v58  ;;  %v8547_v36 = vld [vmem:[%s27419_s1 + $0x7a0] sm:$0xff]  ;;  %v8324_v53 = vld [vmem:[%s27419_s1 + $0xa8] sm:$0xff] }
 0x639   :  { %11115 = vmatprep.subr.bf16.mxu1 %v17811_v39  ;;  %v17859_v39 = vcombine.high %v8543_v35, %v8547_v36  ;;  %v8551_v46 = vld [vmem:[%s27419_s1 + $0x7c0] sm:$0xff]  ;;  %v17858_v5 = vcombine.low %v8543_v35, %v8547_v36  ;;  %v17637_v29 = vcombine.high %v8320_v20, %v8324_v53  ;;  %v8328_v31 = vld [vmem:[%s27419_s1 + $0xc8] sm:$0xff] }
 0x63a   :  { %8072 = vmatpush1.bf16.msra.mxu0 %v19882_v40 }
 0x63b   :  { %8073 = vmatprep.subr.bf16.mxu0 %v19887_v47  ;;  %v8555_v47 = vld [vmem:[%s27419_s1 + $0x7e0] sm:$0xff] }
 0x63c   :  { %11116 = vmatpush1.bf16.msra.mxu1 %v17810_v49  ;;  %v17866_v2 = vcombine.low %v8551_v46, %v8555_v47 }
 0x63d   :  { %v20616_v60 = vpop.eup %20615  ;;  %11117 = vmatprep.subr.bf16.mxu1 %v17819_v21 }
 0x63e   :  { %v20618_v63 = vpop.eup %20617  ;;  %v8277_v0 = vadd.f32 1.0, %v20616_v60  ;;  %8074 = vmatpush1.bf16.msra.mxu0 %v19885_v56  ;;  %v19905_v56 = vld [vmem:[%s27425_s7 + $0xddc] ss:$28 sps:$4 sm:$0xff]   ;;  %v17867_v60 = vcombine.high %v8551_v46, %v8555_v47  ;;  %v8348_v46 = vld [vmem:[%s27419_s1 + $0x168] sm:$0xff] }
 0x63f   :  { %v20620_v4 = vpop.eup %20619  ;;  %v8279_v42 = vadd.f32 1.0, %v20618_v63  ;;  %8075 = vmatprep.subr.bf16.mxu0 %v19890_v27  ;;  %v8304_v27 = vld [vmem:[%s27419_s1 + $0x8] sm:$0xff]  ;;  %v8559_v63 = vld [vmem:[%s27419_s1 + $0x800] sm:$0xff] }
 0x640   :  { %v20622_v51 = vpop.eup %20621  ;;  %20623 = vrcp.f32 %v8277_v0  ;;  %v8278_v13 = vadd.f32 1.0, %v20620_v4  ;;  %11118 = vmatpush1.bf16.msra.mxu1 %v17818_v61  ;;  %v8308_v61 = vld [vmem:[%s27419_s1 + $0x28] sm:$0xff]  ;;  %v8563_v0 = vld [vmem:[%s27419_s1 + $0x820] sm:$0xff] }
 0x641   :  { %20625 = vrcp.f32 %v8279_v42  ;;  %v8280_v10 = vadd.f32 1.0, %v20622_v51  ;;  %11119 = vmatprep.subr.bf16.mxu1 %v17827_v62  ;;  %v19903_v62 = vld [vmem:[%s27425_s7 + $0xdd8] ss:$28 sps:$4 sm:$0xff]   ;;  %v8316_v4 = vld [vmem:[%s27419_s1 + $0x68] sm:$0xff]  ;;  %v17875_v42 = vcombine.high %v8559_v63, %v8563_v0  ;;  %v17620_v51 = vcombine.low %v8304_v27, %v8308_v61 }
 0x642   :  { %20627 = vrcp.f32 %v8278_v13  ;;  %8076 = vmatpush1.bf16.msra.mxu0 %v19888_v1  ;;  %v17621_v1 = vcombine.high %v8304_v27, %v8308_v61  ;;  %v8567_v13 = vld [vmem:[%s27419_s1 + $0x840] sm:$0xff]  ;;  %v8352_v61 = vld [vmem:[%s27419_s1 + $0x188] sm:$0xff] }
 0x643   :  { %20629 = vrcp.f32 %v8280_v10  ;;  %8077 = vmatprep.subr.bf16.mxu0 %v19893_v9  ;;  %v24323_v9 = vld [vmem:[%s27418_s0 + $0x2c] sm:$0xff]  ;;  %v24333_v10 = vcombine.low %v24090_v12, %v24090_v12 }
 0x644   :  { %11120 = vmatpush1.bf16.msra.mxu1 %v17826_v7  ;;  %v8571_v7 = vld [vmem:[%s27419_s1 + $0x860] sm:$0xff] }
 0x645   :  { %11121 = vmatprep.subr.bf16.mxu1 %v17835_v16  ;;  %v17629_v16 = vcombine.high %v8312_v3, %v8316_v4  ;;  %v17883_v12 = vcombine.high %v8567_v13, %v8571_v7 }
 0x646   :  { %8078 = vmatpush1.bf16.msra.mxu0 %v19891_v17  ;;  %v17874_v17 = vcombine.low %v8559_v63, %v8563_v0  ;;  %v8607_v0 = vld [vmem:[%s27419_s1 + $0x980] sm:$0xff] }
 0x647   :  { %8079 = vmatprep.subr.bf16.mxu0 %v19896_v24  ;;  %v24343_v24 = vcombine.high %v24323_v9, %v24323_v9 }
 0x648   :  { %11122 = vmatpush1.bf16.msra.mxu1 %v17834_v26  ;;  %v17628_v26 = vcombine.low %v8312_v3, %v8316_v4 }
 0x649   :  { %11123 = vmatprep.subr.bf16.mxu1 %v17843_v28  ;;  %v8575_v28 = vld [vmem:[%s27419_s1 + $0x880] sm:$0xff] }
 0x64a   :  { %v20624_v34 = vpop.eup %20623  ;;  %8080 = vmatpush1.bf16.msra.mxu0 %v19894_v54  ;;  %v8579_v54 = vld [vmem:[%s27419_s1 + $0x8a0] sm:$0xff] }
 0x64b   :  { %v20626_v43 = vpop.eup %20625  ;;  %8291 = vst [vmem:[#allocation2] sm:$0xff] %v20624_v34  ;;  %8081 = vmatprep.subr.bf16.mxu0 %v19899_v18  ;;  %v8332_v18 = vld [vmem:[%s27419_s1 + $0xe8] sm:$0xff]  ;;  %v8583_v34 = vld [vmem:[%s27419_s1 + $0x8c0] sm:$0xff]  ;;  %v17890_v36 = vcombine.low %v8575_v28, %v8579_v54 }
 0x64c   :  { %v20628_v44 = vpop.eup %20627  ;;  %8293 = vst [vmem:[#allocation2 + $0x10] sm:$0xff] %v20626_v43  ;;  %11124 = vmatpush1.bf16.msra.mxu1 %v17842_v22  ;;  %v17891_v22 = vcombine.high %v8575_v28, %v8579_v54  ;;  %v17645_v35 = vcombine.high %v8328_v31, %v8332_v18  ;;  %v8336_v43 = vld [vmem:[%s27419_s1 + $0x108] sm:$0xff] }
 0x64d   :  { %v20630_v52 = vpop.eup %20629  ;;  %8292 = vst [vmem:[#allocation2 + $0x8] sm:$0xff] %v20628_v44  ;;  %v18747_v58 = vpop.f32.mrb[32].mxu1  ;;  %11125 = vmatprep.subr.bf16.mxu1 %v17851_v45  ;;  %v17636_v45 = vcombine.low %v8320_v20, %v8324_v53  ;;  %v8619_v20 = vld [vmem:[%s27419_s1 + $0x9e0] sm:$0xff] }
 0x64e   :  { %8294 = vst [vmem:[#allocation2 + $0x18] sm:$0xff] %v20630_v52  ;;  %v18748_v40 = vpop.f32.mrb[33].mxu1  ;;  %8082 = vmatpush1.bf16.msra.mxu0 %v19897_v32  ;;  %v8587_v32 = vld [vmem:[%s27419_s1 + $0x8e0] sm:$0xff] }
 0x64f   :  { %v24294_v49 = vadd.f32 %v18748_v40, %v18747_v58  ;;  %v18750_v21 = vpop.f32.mrb[34].mxu1  ;;  %8083 = vmatprep.subr.bf16.mxu0 %v19902_v37  ;;  %v8340_v37 = vld [vmem:[%s27419_s1 + $0x128] sm:$0xff]  ;;  %v17899_v44 = vcombine.high %v8583_v34, %v8587_v32  ;;  %v8591_v52 = vld [vmem:[%s27419_s1 + $0x900] sm:$0xff]  ;;  %v17898_v40 = vcombine.low %v8583_v34, %v8587_v32 }
 0x650   :  { %11126 = vmatpush1.bf16.msra.mxu1 %v17850_v38  ;;  %v18751_v57 = vpop.f32.mrb[35].mxu1  ;;  %v17644_v38 = vcombine.low %v8328_v31, %v8332_v18  ;;  %v8595_v58 = vld [vmem:[%s27419_s1 + $0x920] sm:$0xff]  ;;  %v17652_v21 = vcombine.low %v8336_v43, %v8340_v37  ;;  %v8372_v31 = vld [vmem:[%s27419_s1 + $0x228] sm:$0xff] }
 0x651   :  { %11127 = vmatprep.subr.bf16.mxu1 %v17859_v39  ;;  %v17653_v39 = vcombine.high %v8336_v43, %v8340_v37  ;;  %v17907_v47 = vcombine.high %v8591_v52, %v8595_v58  ;;  %v8603_v57 = vld [vmem:[%s27419_s1 + $0x960] sm:$0xff]  ;;  %v17906_v27 = vcombine.low %v8591_v52, %v8595_v58  ;;  %v8380_v43 = vld [vmem:[%s27419_s1 + $0x268] sm:$0xff] }
 0x652   :  { %8084 = vmatpush1.bf16.msra.mxu0 %v19900_v41  ;;  %v8344_v41 = vld [vmem:[%s27419_s1 + $0x148] sm:$0xff]  ;;  %v8627_v34 = vld [vmem:[%s27419_s1 + $0xa20] sm:$0xff] }
 0x653   :  { %8085 = vmatprep.subr.bf16.mxu0 %v19905_v56  ;;  %v8599_v56 = vld [vmem:[%s27419_s1 + $0x940] sm:$0xff]  ;;  %v17660_v63 = vcombine.low %v8344_v41, %v8348_v46 }
 0x654   :  { %11128 = vmatpush1.bf16.msra.mxu1 %v17858_v5  ;;  %v17661_v5 = vcombine.high %v8344_v41, %v8348_v46  ;;  %v17914_v4 = vcombine.low %v8599_v56, %v8603_v57  ;;  %v8635_v52 = vld [vmem:[%s27419_s1 + $0xa60] sm:$0xff]  ;;  %v8388_v41 = vld [vmem:[%s27419_s1 + $0x2a8] sm:$0xff] }
 0x655   :  { %11129 = vmatprep.subr.bf16.mxu1 %v17867_v60  ;;  %v8356_v60 = vld [vmem:[%s27419_s1 + $0x1a8] sm:$0xff] }
 0x656   :  { %8086 = vmatpush1.bf16.msra.mxu0 %v19903_v62  ;;  %v17915_v62 = vcombine.high %v8599_v56, %v8603_v57  ;;  %v17669_v3 = vcombine.high %v8352_v61, %v8356_v60  ;;  %v8643_v56 = vld [vmem:[%s27419_s1 + $0xaa0] sm:$0xff] }
 0x657   :  { %11222 = vmatprep.subr.bf16.mxu0 %v17621_v1  ;;  %v8611_v1 = vld [vmem:[%s27419_s1 + $0x9a0] sm:$0xff] }
 0x658   :  { %11130 = vmatpush1.bf16.msra.mxu1 %v17866_v2  ;;  %v5292_v2 = vrot.slane %v24158_v55, %v22475_v11  ;;  %v8615_v55 = vld [vmem:[%s27419_s1 + $0x9c0] sm:$0xff] }
 0x659   :  { %8088 = vmatmul.mubr.bf16.vlgmr.msra.gmra.mrb[28].mxu0 %v23484_v19  ;;  %11140 = vmatprep.subr.bf16.mxu1 %v17875_v42  ;;  %v17882_v19 = vcombine.low %v8567_v13, %v8571_v7  ;;  %v8360_v42 = vld [vmem:[%s27419_s1 + $0x1c8] sm:$0xff]  ;;  %v17923_v7 = vcombine.high %v8607_v0, %v8611_v1 }
 0x65a   :  { %11223 = vmatpush1.bf16.msra.mxu0 %v17620_v51  ;;  %11254 = vmatprep.mubr.bf16.mxu0 %v23908_v30  ;;  %v8364_v51 = vld [vmem:[%s27419_s1 + $0x1e8] sm:$0xff]  ;;  %v8131_v53 = vadd.f32 %v24294_v49, %v5292_v2 }
 0x65b   :  { %11132 = vmatmul.mubr.bf16.vlgmr.msra.gmra.mrb[48].mxu1 %v24333_v10  ;;  %11224 = vmatprep.subr.bf16.mxu0 %v17629_v16  ;;  %v17677_v28 = vcombine.high %v8360_v42, %v8364_v51  ;;  %v17676_v49 = vcombine.low %v8360_v42, %v8364_v51 }
 0x65c   :  { %11141 = vmatpush1.bf16.msra.mxu1 %v17874_v17  ;;  %11172 = vmatprep.mubr.bf16.mxu1 %v24343_v24  ;;  %v17668_v17 = vcombine.low %v8352_v61, %v8356_v60  ;;  %v8396_v61 = vld [vmem:[%s27419_s1 + $0x2e8] sm:$0xff] }
 0x65d   :  { %11142 = vmatprep.subr.bf16.mxu1 %v17883_v12 }
 0x65e   :  { %11225 = vmatpush1.bf16.msra.mxu0 %v17628_v26 }
 0x65f   :  { %11226 = vmatprep.subr.bf16.mxu0 %v17637_v29  ;;  %v17922_v29 = vcombine.low %v8607_v0, %v8611_v1  ;;  %v8651_v0 = vld [vmem:[%s27419_s1 + $0xae0] sm:$0xff] }
 0x660   :  { %11143 = vmatpush1.bf16.msra.mxu1 %v17882_v19  ;;  %v8368_v19 = vld [vmem:[%s27419_s1 + $0x208] sm:$0xff] }
 0x661   :  { %11144 = vmatprep.subr.bf16.mxu1 %v17891_v22  ;;  %v17931_v22 = vcombine.high %v8615_v55, %v8619_v20  ;;  %v17685_v32 = vcombine.high %v8368_v19, %v8372_v31 }
 0x662   :  { %11227 = vmatpush1.bf16.msra.mxu0 %v17636_v45  ;;  %v8623_v45 = vld [vmem:[%s27419_s1 + $0xa00] sm:$0xff] }
 0x663   :  { %11228 = vmatprep.subr.bf16.mxu0 %v17645_v35  ;;  %v17930_v35 = vcombine.low %v8615_v55, %v8619_v20  ;;  %v17939_v37 = vcombine.high %v8623_v45, %v8627_v34  ;;  %v8408_v55 = vld [vmem:[%s27419_s1 + $0x348] sm:$0xff] }
 0x664   :  { %11145 = vmatpush1.bf16.msra.mxu1 %v17890_v36  ;;  %v8376_v36 = vld [vmem:[%s27419_s1 + $0x248] sm:$0xff] }
 0x665   :  { %11146 = vmatprep.subr.bf16.mxu1 %v17899_v44  ;;  %v17684_v44 = vcombine.low %v8368_v19, %v8372_v31  ;;  %v17693_v58 = vcombine.high %v8376_v36, %v8380_v43  ;;  %v8412_v20 = vld [vmem:[%s27419_s1 + $0x368] sm:$0xff] }
 0x666   :  { %11229 = vmatpush1.bf16.msra.mxu0 %v17644_v38  ;;  %v8631_v38 = vld [vmem:[%s27419_s1 + $0xa40] sm:$0xff]  ;;  %v8416_v19 = vld [vmem:[%s27419_s1 + $0x388] sm:$0xff] }
 0x667   :  { %11230 = vmatprep.subr.bf16.mxu0 %v17653_v39  ;;  %v17938_v39 = vcombine.low %v8623_v45, %v8627_v34  ;;  %v17947_v46 = vcombine.high %v8631_v38, %v8635_v52  ;;  %v8420_v31 = vld [vmem:[%s27419_s1 + $0x3a8] sm:$0xff]  ;;  %v8671_v45 = vld [vmem:[%s27419_s1 + $0xb80] sm:$0xff] }
 0x668   :  { %11147 = vmatpush1.bf16.msra.mxu1 %v17898_v40  ;;  %v8384_v40 = vld [vmem:[%s27419_s1 + $0x288] sm:$0xff]  ;;  %v8675_v34 = vld [vmem:[%s27419_s1 + $0xba0] sm:$0xff] }
 0x669   :  { %11148 = vmatprep.subr.bf16.mxu1 %v17907_v47  ;;  %v17692_v47 = vcombine.low %v8376_v36, %v8380_v43  ;;  %v17701_v57 = vcombine.high %v8384_v40, %v8388_v41  ;;  %v8424_v36 = vld [vmem:[%s27419_s1 + $0x3c8] sm:$0xff] }
 0x66a   :  { %11231 = vmatpush1.bf16.msra.mxu0 %v17652_v21  ;;  %v8639_v21 = vld [vmem:[%s27419_s1 + $0xa80] sm:$0xff]  ;;  %v8428_v43 = vld [vmem:[%s27419_s1 + $0x3e8] sm:$0xff] }
 0x66b   :  { %11232 = vmatprep.subr.bf16.mxu0 %v17661_v5  ;;  %v17946_v5 = vcombine.low %v8631_v38, %v8635_v52  ;;  %v17955_v60 = vcombine.high %v8639_v21, %v8643_v56  ;;  %v17954_v2 = vcombine.low %v8639_v21, %v8643_v56  ;;  %v17732_v52 = vcombine.low %v8416_v19, %v8420_v31  ;;  %v8432_v56 = vld [vmem:[%s27419_s1 + $0x408] sm:$0xff] }
 0x66c   :  { %11149 = vmatpush1.bf16.msra.mxu1 %v17906_v27  ;;  %v8392_v27 = vld [vmem:[%s27419_s1 + $0x2c8] sm:$0xff]  ;;  %v17986_v21 = vcombine.low %v8671_v45, %v8675_v34 }
 0x66d   :  { %v18769_v13 = vpop.f32.mrb[36].mxu1  ;;  %11150 = vmatprep.subr.bf16.mxu1 %v17915_v62  ;;  %v17700_v62 = vcombine.low %v8384_v40, %v8388_v41  ;;  %v17709_v1 = vcombine.high %v8392_v27, %v8396_v61  ;;  %v17708_v51 = vcombine.low %v8392_v27, %v8396_v61  ;;  %v17740_v61 = vcombine.low %v8424_v36, %v8428_v43 }
 0x66e   :  { %v18770_v16 = vpop.f32.mrb[37].mxu1  ;;  %11233 = vmatpush1.bf16.msra.mxu0 %v17660_v63  ;;  %v8647_v63 = vld [vmem:[%s27419_s1 + $0xac0] sm:$0xff] }
 0x66f   :  { %v18771_v12 = vadd.f32 %v18770_v16, %v18769_v13  ;;  %v18772_v26 = vpop.f32.mrb[38].mxu1  ;;  %11234 = vmatprep.subr.bf16.mxu0 %v17669_v3  ;;  %v8400_v3 = vld [vmem:[%s27419_s1 + $0x308] sm:$0xff]  ;;  %v17963_v42 = vcombine.high %v8647_v63, %v8651_v0  ;;  %v8655_v13 = vld [vmem:[%s27419_s1 + $0xb00] sm:$0xff] }
 0x670   :  { %11151 = vmatpush1.bf16.msra.mxu1 %v17914_v4  ;;  %v18773_v54 = vpop.f32.mrb[39].mxu1  ;;  %v8404_v4 = vld [vmem:[%s27419_s1 + $0x328] sm:$0xff]  ;;  %v8663_v26 = vld [vmem:[%s27419_s1 + $0xb40] sm:$0xff] }
 0x671   :  { %v24424_v18 = vadd.f32 %v18771_v12, %v8131_v53  ;;  %11152 = vmatprep.subr.bf16.mxu1 %v17923_v7  ;;  %v8659_v7 = vld [vmem:[%s27419_s1 + $0xb20] sm:$0xff]  ;;  %v17717_v16 = vcombine.high %v8400_v3, %v8404_v4  ;;  %v17716_v12 = vcombine.low %v8400_v3, %v8404_v4  ;;  %v17725_v54 = vcombine.high %v8408_v55, %v8412_v20 }
 0x672   :  { %11235 = vmatpush1.bf16.msra.mxu0 %v17668_v17  ;;  %v17962_v17 = vcombine.low %v8647_v63, %v8651_v0  ;;  %v17971_v53 = vcombine.high %v8655_v13, %v8659_v7  ;;  %v8695_v4 = vld [vmem:[%s27419_s1 + $0xc40] sm:$0xff] }
 0x673   :  { %11236 = vmatprep.subr.bf16.mxu0 %v17677_v28  ;;  %v8667_v28 = vld [vmem:[%s27419_s1 + $0xb60] sm:$0xff] }
 0x674   :  { %11153 = vmatpush1.bf16.msra.mxu1 %v17922_v29  ;;  %v17970_v29 = vcombine.low %v8655_v13, %v8659_v7 }
 0x675   :  { %11154 = vmatprep.subr.bf16.mxu1 %v17931_v22  ;;  %v17979_v22 = vcombine.high %v8663_v26, %v8667_v28 }
 0x676   :  { %11237 = vmatpush1.bf16.msra.mxu0 %v17676_v49  ;;  %v17724_v49 = vcombine.low %v8408_v55, %v8412_v20 }
 0x677   :  { %11238 = vmatprep.subr.bf16.mxu0 %v17685_v32  ;;  %v17733_v32 = vcombine.high %v8416_v19, %v8420_v31  ;;  %v8711_v31 = vld [vmem:[%s27419_s1 + $0xcc0] sm:$0xff] }
 0x678   :  { %11155 = vmatpush1.bf16.msra.mxu1 %v17930_v35  ;;  %v17978_v35 = vcombine.low %v8663_v26, %v8667_v28  ;;  %v8456_v28 = vld [vmem:[%s27419_s1 + $0x4c8] sm:$0xff] }
 0x679   :  { %11156 = vmatprep.subr.bf16.mxu1 %v17939_v37 }
 0x67a   :  { %11239 = vmatpush1.bf16.msra.mxu0 %v17684_v44  ;;  %v17987_v44 = vcombine.high %v8671_v45, %v8675_v34  ;;  %v8464_v34 = vld [vmem:[%s27419_s1 + $0x508] sm:$0xff] }
 0x67b   :  { %11240 = vmatprep.subr.bf16.mxu0 %v17693_v58  ;;  %v8679_v58 = vld [vmem:[%s27419_s1 + $0xbc0] sm:$0xff] }
 0x67c   :  { %11157 = vmatpush1.bf16.msra.mxu1 %v17938_v39  ;;  %v8683_v39 = vld [vmem:[%s27419_s1 + $0xbe0] sm:$0xff] }
 0x67d   :  { %11158 = vmatprep.subr.bf16.mxu1 %v17947_v46  ;;  %v17741_v46 = vcombine.high %v8424_v36, %v8428_v43  ;;  %v17995_v27 = vcombine.high %v8679_v58, %v8683_v39  ;;  %v17994_v0 = vcombine.low %v8679_v58, %v8683_v39  ;;  %v8719_v43 = vld [vmem:[%s27419_s1 + $0xd00] sm:$0xff]  ;;  %v8476_v58 = vld [vmem:[%s27419_s1 + $0x568] sm:$0xff] }
 0x67e   :  { %11241 = vmatpush1.bf16.msra.mxu0 %v17692_v47 }
 0x67f   :  { %11242 = vmatprep.subr.bf16.mxu0 %v17701_v57  ;;  %v8436_v57 = vld [vmem:[%s27419_s1 + $0x428] sm:$0xff] }
 0x680   :  { %11159 = vmatpush1.bf16.msra.mxu1 %v17946_v5  ;;  %v17749_v63 = vcombine.high %v8432_v56, %v8436_v57  ;;  %v17748_v3 = vcombine.low %v8432_v56, %v8436_v57  ;;  %v8480_v56 = vld [vmem:[%s27419_s1 + $0x588] sm:$0xff] }
 0x681   :  { %11160 = vmatprep.subr.bf16.mxu1 %v17955_v60  ;;  %v8687_v60 = vld [vmem:[%s27419_s1 + $0xc00] sm:$0xff]  ;;  %v8484_v57 = vld [vmem:[%s27419_s1 + $0x5a8] sm:$0xff] }
 0x682   :  { %11243 = vmatpush1.bf16.msra.mxu0 %v17700_v62  ;;  %v8691_v62 = vld [vmem:[%s27419_s1 + $0xc20] sm:$0xff] }
 0x683   :  { %11244 = vmatprep.subr.bf16.mxu0 %v17709_v1  ;;  %v8444_v1 = vld [vmem:[%s27419_s1 + $0x468] sm:$0xff]  ;;  %v18002_v7 = vcombine.low %v8687_v60, %v8691_v62 }
 0x684   :  { %11161 = vmatpush1.bf16.msra.mxu1 %v17954_v2  ;;  %v18003_v2 = vcombine.high %v8687_v60, %v8691_v62  ;;  %v8735_v60 = vld [vmem:[%s27419_s1 + $0xd80] sm:$0xff] }
 0x685   :  { %11162 = vmatprep.subr.bf16.mxu1 %v17963_v42  ;;  %v8699_v42 = vld [vmem:[%s27419_s1 + $0xc60] sm:$0xff] }
 0x686   :  { %11245 = vmatpush1.bf16.msra.mxu0 %v17708_v51  ;;  %v24545_v51 = vcombine.low %v24323_v9, %v24323_v9  ;;  %v18011_v55 = vcombine.high %v8695_v4, %v8699_v42  ;;  %v8703_v9 = vld [vmem:[%s27419_s1 + $0xc80] sm:$0xff]  ;;  %v18010_v26 = vcombine.low %v8695_v4, %v8699_v42  ;;  %v17796_v42 = vcombine.low %v8480_v56, %v8484_v57 }
 0x687   :  { %11246 = vmatprep.subr.bf16.mxu0 %v17717_v16  ;;  %v8448_v16 = vld [vmem:[%s27419_s1 + $0x488] sm:$0xff]  ;;  %v8739_v62 = vld [vmem:[%s27419_s1 + $0xda0] sm:$0xff] }
 0x688   :  { %11163 = vmatpush1.bf16.msra.mxu1 %v17962_v17  ;;  %v8452_v17 = vld [vmem:[%s27419_s1 + $0x4a8] sm:$0xff] }
 0x689   :  { %11164 = vmatprep.subr.bf16.mxu1 %v17971_v53  ;;  %v8707_v53 = vld [vmem:[%s27419_s1 + $0xca0] sm:$0xff]  ;;  %v17764_v19 = vcombine.low %v8448_v16, %v8452_v17 }
 0x68a   :  { %11247 = vmatpush1.bf16.msra.mxu0 %v17716_v12  ;;  %v17765_v12 = vcombine.high %v8448_v16, %v8452_v17  ;;  %v18018_v45 = vcombine.low %v8703_v9, %v8707_v53 }
 0x68b   :  { %11248 = vmatprep.subr.bf16.mxu0 %v17725_v54  ;;  %v8460_v54 = vld [vmem:[%s27419_s1 + $0x4e8] sm:$0xff] }
 0x68c   :  { %11165 = vmatpush1.bf16.msra.mxu1 %v17970_v29  ;;  %v18019_v29 = vcombine.high %v8703_v9, %v8707_v53  ;;  %v17772_v36 = vcombine.low %v8456_v28, %v8460_v54  ;;  %v18050_v9 = vcombine.low %v8735_v60, %v8739_v62  ;;  %v8496_v53 = vld [vmem:[%s27419_s1 + $0x608] sm:$0xff] }
 0x68d   :  { %v18791_v37 = vpop.f32.mrb[40].mxu1  ;;  %11166 = vmatprep.subr.bf16.mxu1 %v17979_v22  ;;  %v8715_v22 = vld [vmem:[%s27419_s1 + $0xce0] sm:$0xff] }
 0x68e   :  { %v18792_v38 = vpop.f32.mrb[41].mxu1  ;;  %11249 = vmatpush1.bf16.msra.mxu0 %v17724_v49  ;;  %v17773_v49 = vcombine.high %v8456_v28, %v8460_v54 }
 0x68f   :  { %v18793_v40 = vadd.f32 %v18792_v38, %v18791_v37  ;;  %v18794_v41 = vpop.f32.mrb[42].mxu1  ;;  %11250 = vmatprep.subr.bf16.mxu0 %v17733_v32  ;;  %v8468_v32 = vld [vmem:[%s27419_s1 + $0x528] sm:$0xff]  ;;  %v8723_v37 = vld [vmem:[%s27419_s1 + $0xd20] sm:$0xff]  ;;  %v18026_v38 = vcombine.low %v8711_v31, %v8715_v22 }
 0x690   :  { %11167 = vmatpush1.bf16.msra.mxu1 %v17978_v35  ;;  %v18795_v47 = vpop.f32.mrb[43].mxu1  ;;  %v18027_v35 = vcombine.high %v8711_v31, %v8715_v22  ;;  %v18035_v39 = vcombine.high %v8719_v43, %v8723_v37  ;;  %v8727_v41 = vld [vmem:[%s27419_s1 + $0xd40] sm:$0xff] }
 0x691   :  { %v24523_v5 = vadd.f32 %v18793_v40, %v24424_v18  ;;  %11168 = vmatprep.subr.bf16.mxu1 %v17987_v44  ;;  %v8440_v18 = vld [vmem:[%s27419_s1 + $0x448] sm:$0xff]  ;;  %v17781_v44 = vcombine.high %v8464_v34, %v8468_v32  ;;  %v17780_v40 = vcombine.low %v8464_v34, %v8468_v32 }
 0x692   :  { %11251 = vmatpush1.bf16.msra.mxu0 %v17732_v52  ;;  %v17757_v13 = vcombine.high %v8440_v18, %v8444_v1  ;;  %v17756_v20 = vcombine.low %v8440_v18, %v8444_v1  ;;  %v8472_v52 = vld [vmem:[%s27419_s1 + $0x548] sm:$0xff] }
 0x693   :  { %11252 = vmatprep.subr.bf16.mxu0 %v17741_v46  ;;  %v8731_v46 = vld [vmem:[%s27419_s1 + $0xd60] sm:$0xff]  ;;  %v17789_v47 = vcombine.high %v8472_v52, %v8476_v58  ;;  %v8488_v18 = vld [vmem:[%s27419_s1 + $0x5c8] sm:$0xff] }
 0x694   :  { %11169 = vmatpush1.bf16.msra.mxu1 %v17986_v21  ;;  %v18034_v21 = vcombine.low %v8719_v43, %v8723_v37  ;;  %v8492_v1 = vld [vmem:[%s27419_s1 + $0x5e8] sm:$0xff]  ;;  %v8317_v43 = vld [vmem:[%s27419_s1 + $0x70] sm:$0xff] }
 0x695   :  { %11170 = vmatprep.subr.bf16.mxu1 %v17995_v27  ;;  %v18043_v27 = vcombine.high %v8727_v41, %v8731_v46  ;;  %v17804_v54 = vcombine.low %v8488_v18, %v8492_v1  ;;  %v24651_v37 = vld [vmem:[%s27418_s0 + $0x34] ss:$0 sps:$4 sm:$0xff]  }
 0x696   :  { %11253 = vmatpush1.bf16.msra.mxu0 %v17740_v61  ;;  %v17788_v61 = vcombine.low %v8472_v52, %v8476_v58  ;;  %v8512_v52 = vld [vmem:[%s27419_s1 + $0x688] sm:$0xff] }
 0x697   :  { %11263 = vmatprep.subr.bf16.mxu0 %v17749_v63  ;;  %v17797_v63 = vcombine.high %v8480_v56, %v8484_v57  ;;  %v8516_v58 = vld [vmem:[%s27419_s1 + $0x6a8] sm:$0xff] }
 0x698   :  { %11171 = vmatpush1.bf16.msra.mxu1 %v17994_v0  ;;  %v18042_v0 = vcombine.low %v8727_v41, %v8731_v46  ;;  %v8321_v41 = vld [vmem:[%s27419_s1 + $0x90] sm:$0xff]  ;;  %v8520_v56 = vld [vmem:[%s27419_s1 + $0x6c8] sm:$0xff] }
 0x699   :  { %11181 = vmatprep.subr.bf16.mxu1 %v18003_v2  ;;  %11255 = vmatmul.mubr.bf16.vlgmr.msra.gmra.mrb[32].mxu0 %v24103_v23  ;;  %v8325_v46 = vld [vmem:[%s27419_s1 + $0xb0] sm:$0xff]  ;;  %v8524_v57 = vld [vmem:[%s27419_s1 + $0x6e8] sm:$0xff] }
 0x69a   :  { %11264 = vmatpush1.bf16.msra.mxu0 %v17748_v3  ;;  %11295 = vmatprep.mubr.bf16.mxu0 %v24110_v59  ;;  %v18051_v3 = vcombine.high %v8735_v60, %v8739_v62  ;;  %v8329_v60 = vld [vmem:[%s27419_s1 + $0xd0] sm:$0xff] }
 0x69b   :  { %11173 = vmatmul.mubr.bf16.vlgmr.msra.gmra.mrb[48].mxu1 %v24545_v51  ;;  %11265 = vmatprep.subr.bf16.mxu0 %v17757_v13  ;;  %v8743_v13 = vld [vmem:[%s27419_s1 + $0xdc0] sm:$0xff]  ;;  %v8333_v62 = vld [vmem:[%s27419_s1 + $0xf0] sm:$0xff] }
 0x69c   :  { %11182 = vmatpush1.bf16.msra.mxu1 %v18002_v7  ;;  %11213 = vmatprep.mubr.bf16.mxu1 %v20701_v48  ;;  %v8747_v7 = vld [vmem:[%s27419_s1 + $0xde0] sm:$0xff] }
 0x69d   :  { %11183 = vmatprep.subr.bf16.mxu1 %v18011_v55  ;;  %v17805_v55 = vcombine.high %v8488_v18, %v8492_v1  ;;  %v18059_v28 = vcombine.high %v8743_v13, %v8747_v7  ;;  %v8528_v18 = vld [vmem:[%s27419_s1 + $0x708] sm:$0xff] }
 0x69e   :  { %11266 = vmatpush1.bf16.msra.mxu0 %v17756_v20  ;;  %v8532_v1 = vld [vmem:[%s27419_s1 + $0x728] sm:$0xff] }
 0x69f   :  { %11267 = vmatprep.subr.bf16.mxu0 %v17765_v12  ;;  %v8500_v12 = vld [vmem:[%s27419_s1 + $0x628] sm:$0xff] }
 0x6a0   :  { %11184 = vmatpush1.bf16.msra.mxu1 %v18010_v26  ;;  %v17813_v22 = vcombine.high %v8496_v53, %v8500_v12 }
 0x6a1   :  { %11185 = vmatprep.subr.bf16.mxu1 %v18019_v29  ;;  %v8305_v29 = vld [vmem:[%s27419_s1 + $0x10] sm:$0xff] }
 0x6a2   :  { %11268 = vmatpush1.bf16.msra.mxu0 %v17764_v19  ;;  %v8309_v19 = vld [vmem:[%s27419_s1 + $0x30] sm:$0xff] }
 0x6a3   :  { %11269 = vmatprep.subr.bf16.mxu0 %v17773_v49  ;;  %v18058_v49 = vcombine.low %v8743_v13, %v8747_v7  ;;  %v17623_v32 = vcombine.high %v8305_v29, %v8309_v19  ;;  %v8337_v13 = vld [vmem:[%s27419_s1 + $0x110] sm:$0xff] }
 0x6a4   :  { %11186 = vmatpush1.bf16.msra.mxu1 %v18018_v45  ;;  %v8508_v45 = vld [vmem:[%s27419_s1 + $0x668] sm:$0xff]  ;;  %v8341_v7 = vld [vmem:[%s27419_s1 + $0x130] sm:$0xff] }
 0x6a5   :  { %11187 = vmatprep.subr.bf16.mxu1 %v18027_v35  ;;  %v17812_v35 = vcombine.low %v8496_v53, %v8500_v12  ;;  %v17844_v53 = vcombine.low %v8528_v18, %v8532_v1  ;;  %v8345_v12 = vld [vmem:[%s27419_s1 + $0x150] sm:$0xff] }
 0x6a6   :  { %11270 = vmatpush1.bf16.msra.mxu0 %v17772_v36  ;;  %v8313_v36 = vld [vmem:[%s27419_s1 + $0x50] sm:$0xff] }
 0x6a7   :  { %11271 = vmatprep.subr.bf16.mxu0 %v17781_v44 }
 0x6a8   :  { %11188 = vmatpush1.bf16.msra.mxu1 %v18026_v38  ;;  %v17622_v38 = vcombine.low %v8305_v29, %v8309_v19  ;;  %v8544_v29 = vld [vmem:[%s27419_s1 + $0x788] sm:$0xff] }
 0x6a9   :  { %11189 = vmatprep.subr.bf16.mxu1 %v18035_v39  ;;  %v17631_v39 = vcombine.high %v8313_v36, %v8317_v43  ;;  %v8548_v19 = vld [vmem:[%s27419_s1 + $0x7a8] sm:$0xff] }
 0x6aa   :  { %11272 = vmatpush1.bf16.msra.mxu0 %v17780_v40 }
 0x6ab   :  { %11273 = vmatprep.subr.bf16.mxu0 %v17789_v47  ;;  %v17829_v47 = vcombine.high %v8512_v52, %v8516_v58 }
 0x6ac   :  { %11190 = vmatpush1.bf16.msra.mxu1 %v18034_v21  ;;  %v17630_v21 = vcombine.low %v8313_v36, %v8317_v43 }
 0x6ad   :  { %v18813_v2 = vpop.f32.mrb[44].mxu1  ;;  %11191 = vmatprep.subr.bf16.mxu1 %v18043_v27  ;;  %v17639_v27 = vcombine.high %v8321_v41, %v8325_v46 }
 0x6ae   :  { %v18814_v4 = vpop.f32.mrb[45].mxu1  ;;  %11274 = vmatpush1.bf16.msra.mxu0 %v17788_v61  ;;  %v17828_v61 = vcombine.low %v8512_v52, %v8516_v58  ;;  %v8365_v52 = vld [vmem:[%s27419_s1 + $0x1f0] sm:$0xff] }
 0x6af   :  { %v18815_v16 = vadd.f32 %v18814_v4, %v18813_v2  ;;  %v18816_v17 = vpop.f32.mrb[46].mxu1  ;;  %11275 = vmatprep.subr.bf16.mxu0 %v17797_v63  ;;  %v17837_v63 = vcombine.high %v8520_v56, %v8524_v57 }
 0x6b0   :  { %11192 = vmatpush1.bf16.msra.mxu1 %v18042_v0  ;;  %v18817_v20 = vpop.f32.mrb[47].mxu1  ;;  %v17638_v0 = vcombine.low %v8321_v41, %v8325_v46  ;;  %v17646_v17 = vcombine.low %v8329_v60, %v8333_v62  ;;  %v8564_v41 = vld [vmem:[%s27419_s1 + $0x828] sm:$0xff] }
 0x6b1   :  { %v8251_v26 = vadd.f32 %v18815_v16, %v24523_v5  ;;  %11193 = vmatprep.subr.bf16.mxu1 %v18051_v3  ;;  %v8504_v5 = vld [vmem:[%s27419_s1 + $0x648] sm:$0xff]  ;;  %v17647_v3 = vcombine.high %v8329_v60, %v8333_v62  ;;  %v17845_v16 = vcombine.high %v8528_v18, %v8532_v1  ;;  %v8381_v18 = vld [vmem:[%s27419_s1 + $0x270] sm:$0xff] }
 0x6b2   :  { %11276 = vmatpush1.bf16.msra.mxu0 %v17796_v42  ;;  %v17821_v44 = vcombine.high %v8504_v5, %v8508_v45  ;;  %v17820_v40 = vcombine.low %v8504_v5, %v8508_v45  ;;  %v17836_v42 = vcombine.low %v8520_v56, %v8524_v57  ;;  %v8540_v20 = vld [vmem:[%s27419_s1 + $0x768] sm:$0xff]  ;;  %v8357_v5 = vld [vmem:[%s27419_s1 + $0x1b0] sm:$0xff]  ;;  %v17861_v45 = vcombine.high %v8544_v29, %v8548_v19 }
 0x6b3   :  { %v8262_v31 = vsub.f32 0.0, %v8251_v26  ;;  %11277 = vmatprep.subr.bf16.mxu0 %v17805_v55  ;;  %v8536_v55 = vld [vmem:[%s27419_s1 + $0x748] sm:$0xff]  ;;  %v8349_v26 = vld [vmem:[%s27419_s1 + $0x170] sm:$0xff] }
 0x6b4   :  { %11194 = vmatpush1.bf16.msra.mxu1 %v18050_v9  ;;  %v17655_v9 = vcombine.high %v8337_v13, %v8341_v7  ;;  %v8373_v56 = vld [vmem:[%s27419_s1 + $0x230] sm:$0xff]  ;;  %v8572_v60 = vld [vmem:[%s27419_s1 + $0x868] sm:$0xff] }
 0x6b5   :  { %v8275_v34 = vmul.f32 1.442695, %v8262_v31  ;;  %11195 = vmatprep.subr.bf16.mxu1 %v18059_v28  ;;  %v17853_v28 = vcombine.high %v8536_v55, %v8540_v20  ;;  %v17663_v31 = vcombine.high %v8345_v12, %v8349_v26 }
 0x6b6   :  { %11278 = vmatpush1.bf16.msra.mxu0 %v17804_v54  ;;  %v17654_v54 = vcombine.low %v8337_v13, %v8341_v7  ;;  %v8385_v7 = vld [vmem:[%s27419_s1 + $0x290] sm:$0xff] }
 0x6b7   :  { %20631 = vpow2.f32 %v8275_v34  ;;  %11279 = vmatprep.subr.bf16.mxu0 %v17813_v22  ;;  %v17852_v22 = vcombine.low %v8536_v55, %v8540_v20  ;;  %v17662_v34 = vcombine.low %v8345_v12, %v8349_v26  ;;  %v8584_v20 = vld [vmem:[%s27419_s1 + $0x8c8] sm:$0xff]  ;;  %v8393_v26 = vld [vmem:[%s27419_s1 + $0x2d0] sm:$0xff] }
 0x6b8   :  { %11196 = vmatpush1.bf16.msra.mxu1 %v18058_v49  ;;  %v8353_v49 = vld [vmem:[%s27419_s1 + $0x190] sm:$0xff] }
 0x6b9   :  { %11386 = vmatprep.subr.bf16.mxu1 %v17623_v32  ;;  %v8552_v32 = vld [vmem:[%s27419_s1 + $0x7c8] sm:$0xff]  ;;  %v17671_v36 = vcombine.high %v8353_v49, %v8357_v5 }
 0x6ba   :  { %11280 = vmatpush1.bf16.msra.mxu0 %v17812_v35  ;;  %v8556_v35 = vld [vmem:[%s27419_s1 + $0x7e8] sm:$0xff] }
 0x6bb   :  { %11214 = vmatmul.mubr.bf16.vlgmr.msra.gmra.mrb[48].mxu1 %v24651_v37  ;;  %11281 = vmatprep.subr.bf16.mxu0 %v17821_v44  ;;  %v17860_v44 = vcombine.low %v8544_v29, %v8548_v19  ;;  %v17869_v58 = vcombine.high %v8552_v32, %v8556_v35  ;;  %v8592_v19 = vld [vmem:[%s27419_s1 + $0x908] sm:$0xff] }
 0x6bc   :  { %11387 = vmatpush1.bf16.msra.mxu1 %v17622_v38  ;;  %11418 = vmatprep.mubr.bf16.mxu1 %v23908_v30  ;;  %v8361_v38 = vld [vmem:[%s27419_s1 + $0x1d0] sm:$0xff] }
 0x6bd   :  { %11388 = vmatprep.subr.bf16.mxu1 %v17631_v39  ;;  %v17670_v39 = vcombine.low %v8353_v49, %v8357_v5  ;;  %v17679_v46 = vcombine.high %v8361_v38, %v8365_v52  ;;  %v8401_v5 = vld [vmem:[%s27419_s1 + $0x310] sm:$0xff] }
 0x6be   :  { %11282 = vmatpush1.bf16.msra.mxu0 %v17820_v40  ;;  %v8560_v40 = vld [vmem:[%s27419_s1 + $0x808] sm:$0xff] }
 0x6bf   :  { %11283 = vmatprep.subr.bf16.mxu0 %v17829_v47  ;;  %v17868_v47 = vcombine.low %v8552_v32, %v8556_v35  ;;  %v17877_v57 = vcombine.high %v8560_v40, %v8564_v41  ;;  %v8600_v35 = vld [vmem:[%s27419_s1 + $0x948] sm:$0xff] }
 0x6c0   :  { %11389 = vmatpush1.bf16.msra.mxu1 %v17630_v21  ;;  %v8369_v21 = vld [vmem:[%s27419_s1 + $0x210] sm:$0xff] }
 0x6c1   :  { %v20632_v2 = vpop.eup %20631  ;;  %11390 = vmatprep.subr.bf16.mxu1 %v17639_v27  ;;  %v17678_v27 = vcombine.low %v8361_v38, %v8365_v52  ;;  %v17687_v62 = vcombine.high %v8369_v21, %v8373_v56  ;;  %v8409_v38 = vld [vmem:[%s27419_s1 + $0x350] sm:$0xff] }
 0x6c2   :  { %v8283_v4 = vadd.f32 1.0, %v20632_v2  ;;  %11284 = vmatpush1.bf16.msra.mxu0 %v17828_v61  ;;  %v8568_v61 = vld [vmem:[%s27419_s1 + $0x848] sm:$0xff]  ;;  %v17686_v2 = vcombine.low %v8369_v21, %v8373_v56  ;;  %v8413_v52 = vld [vmem:[%s27419_s1 + $0x370] sm:$0xff] }
 0x6c3   :  { %11285 = vmatprep.subr.bf16.mxu0 %v17837_v63  ;;  %v17876_v63 = vcombine.low %v8560_v40, %v8564_v41  ;;  %v17885_v1 = vcombine.high %v8568_v61, %v8572_v60  ;;  %v17884_v13 = vcombine.low %v8568_v61, %v8572_v60  ;;  %v8608_v40 = vld [vmem:[%s27419_s1 + $0x988] sm:$0xff]  ;;  %v8417_v21 = vld [vmem:[%s27419_s1 + $0x390] sm:$0xff] }
 0x6c4   :  { %20633 = vrcp.f32 %v8283_v4  ;;  %11391 = vmatpush1.bf16.msra.mxu1 %v17638_v0  ;;  %v8377_v0 = vld [vmem:[%s27419_s1 + $0x250] sm:$0xff]  ;;  %v8580_v4 = vld [vmem:[%s27419_s1 + $0x8a8] sm:$0xff] }
 0x6c5   :  { %11392 = vmatprep.subr.bf16.mxu1 %v17647_v3  ;;  %v8576_v3 = vld [vmem:[%s27419_s1 + $0x888] sm:$0xff]  ;;  %v17694_v55 = vcombine.low %v8377_v0, %v8381_v18  ;;  %v8421_v56 = vld [vmem:[%s27419_s1 + $0x3b0] sm:$0xff] }
 0x6c6   :  { %11286 = vmatpush1.bf16.msra.mxu0 %v17836_v42  ;;  %v17695_v42 = vcombine.high %v8377_v0, %v8381_v18  ;;  %v17892_v12 = vcombine.low %v8576_v3, %v8580_v4  ;;  %v8612_v41 = vld [vmem:[%s27419_s1 + $0x9a8] sm:$0xff]  ;;  %v8425_v0 = vld [vmem:[%s27419_s1 + $0x3d0] sm:$0xff] }
 0x6c7   :  { %11287 = vmatprep.subr.bf16.mxu0 %v17845_v16  ;;  %v8389_v16 = vld [vmem:[%s27419_s1 + $0x2b0] sm:$0xff]  ;;  %v8616_v61 = vld [vmem:[%s27419_s1 + $0x9c8] sm:$0xff] }
 0x6c8   :  { %11393 = vmatpush1.bf16.msra.mxu1 %v17646_v17  ;;  %v17893_v17 = vcombine.high %v8576_v3, %v8580_v4  ;;  %v17702_v29 = vcombine.low %v8385_v7, %v8389_v16  ;;  %v8620_v60 = vld [vmem:[%s27419_s1 + $0x9e8] sm:$0xff]  ;;  %v8429_v18 = vld [vmem:[%s27419_s1 + $0x3f0] sm:$0xff] }
 0x6c9   :  { %11394 = vmatprep.subr.bf16.mxu1 %v17655_v9  ;;  %v8588_v9 = vld [vmem:[%s27419_s1 + $0x8e8] sm:$0xff] }
 0x6ca   :  { %11288 = vmatpush1.bf16.msra.mxu0 %v17844_v53  ;;  %v17703_v53 = vcombine.high %v8385_v7, %v8389_v16  ;;  %v17900_v49 = vcombine.low %v8584_v20, %v8588_v9  ;;  %v8624_v3 = vld [vmem:[%s27419_s1 + $0xa08] sm:$0xff]  ;;  %v8433_v7 = vld [vmem:[%s27419_s1 + $0x410] sm:$0xff] }
 0x6cb   :  { %11289 = vmatprep.subr.bf16.mxu0 %v17853_v28  ;;  %v8397_v28 = vld [vmem:[%s27419_s1 + $0x2f0] sm:$0xff]  ;;  %v8628_v4 = vld [vmem:[%s27419_s1 + $0xa28] sm:$0xff] }
 0x6cc   :  { %11395 = vmatpush1.bf16.msra.mxu1 %v17654_v54  ;;  %v17901_v54 = vcombine.high %v8584_v20, %v8588_v9  ;;  %v17710_v32 = vcombine.low %v8393_v26, %v8397_v28  ;;  %v8437_v16 = vld [vmem:[%s27419_s1 + $0x430] sm:$0xff]  ;;  %v8632_v20 = vld [vmem:[%s27419_s1 + $0xa48] sm:$0xff] }
 0x6cd   :  { %11396 = vmatprep.subr.bf16.mxu1 %v17663_v31  ;;  %v8596_v31 = vld [vmem:[%s27419_s1 + $0x928] sm:$0xff] }
 0x6ce   :  { %v20634_v43 = vpop.eup %20633  ;;  %11290 = vmatpush1.bf16.msra.mxu0 %v17852_v22  ;;  %v17711_v22 = vcombine.high %v8393_v26, %v8397_v28  ;;  %v8636_v9 = vld [vmem:[%s27419_s1 + $0xa68] sm:$0xff]  ;;  %v8441_v26 = vld [vmem:[%s27419_s1 + $0x450] sm:$0xff] }
 0x6cf   :  { %8298 = vst.msk [vmem:[#allocation2 + $0x30] sm:$0xff] %vm8297_vm0, %v20634_v43  ;;  %11291 = vmatprep.subr.bf16.mxu0 %v17861_v45  ;;  %v8405_v45 = vld [vmem:[%s27419_s1 + $0x330] sm:$0xff] }
 0x6d0   :  { %11397 = vmatpush1.bf16.msra.mxu1 %v17662_v34  ;;  %v17909_v34 = vcombine.high %v8592_v19, %v8596_v31  ;;  %v17719_v43 = vcombine.high %v8401_v5, %v8405_v45  ;;  %v8445_v28 = vld [vmem:[%s27419_s1 + $0x470] sm:$0xff] }
 0x6d1   :  { %11398 = vmatprep.subr.bf16.mxu1 %v17671_v36  ;;  %v8604_v36 = vld [vmem:[%s27419_s1 + $0x968] sm:$0xff] }
 0x6d2   :  { %11292 = vmatpush1.bf16.msra.mxu0 %v17860_v44  ;;  %v17908_v44 = vcombine.low %v8592_v19, %v8596_v31  ;;  %v8640_v19 = vld [vmem:[%s27419_s1 + $0xa88] sm:$0xff] }
 0x6d3   :  { %11293 = vmatprep.subr.bf16.mxu0 %v17869_v58  ;;  %v17917_v58 = vcombine.high %v8600_v35, %v8604_v36  ;;  %v8644_v31 = vld [vmem:[%s27419_s1 + $0xaa8] sm:$0xff] }
 0x6d4   :  { %11399 = vmatpush1.bf16.msra.mxu1 %v17670_v39  ;;  %v17718_v39 = vcombine.low %v8401_v5, %v8405_v45  ;;  %v8449_v5 = vld [vmem:[%s27419_s1 + $0x490] sm:$0xff] }
 0x6d5   :  { %11400 = vmatprep.subr.bf16.mxu1 %v17679_v46  ;;  %v17727_v46 = vcombine.high %v8409_v38, %v8413_v52  ;;  %v8453_v45 = vld [vmem:[%s27419_s1 + $0x4b0] sm:$0xff] }
 0x6d6   :  { %11294 = vmatpush1.bf16.msra.mxu0 %v17868_v47  ;;  %v17916_v47 = vcombine.low %v8600_v35, %v8604_v36  ;;  %v8648_v35 = vld [vmem:[%s27419_s1 + $0xac8] sm:$0xff] }
 0x6d7   :  { %11304 = vmatprep.subr.bf16.mxu0 %v17877_v57  ;;  %v17925_v57 = vcombine.high %v8608_v40, %v8612_v41  ;;  %v8652_v36 = vld [vmem:[%s27419_s1 + $0xae8] sm:$0xff] }
 0x6d8   :  { %11401 = vmatpush1.bf16.msra.mxu1 %v17678_v27  ;;  %v17726_v27 = vcombine.low %v8409_v38, %v8413_v52  ;;  %v8457_v38 = vld [vmem:[%s27419_s1 + $0x4d0] sm:$0xff] }
 0x6d9   :  { %11402 = vmatprep.subr.bf16.mxu1 %v17687_v62  ;;  %11296 = vmatmul.mubr.bf16.vlgmr.msra.gmra.mrb[32].mxu0 %v24333_v10  ;;  %v17735_v62 = vcombine.high %v8417_v21, %v8421_v56  ;;  %v8461_v52 = vld [vmem:[%s27419_s1 + $0x4f0] sm:$0xff] }
 0x6da   :  { %11305 = vmatpush1.bf16.msra.mxu0 %v17876_v63  ;;  %11336 = vmatprep.mubr.bf16.mxu0 %v24343_v24  ;;  %v17924_v63 = vcombine.low %v8608_v40, %v8612_v41  ;;  %v8656_v40 = vld [vmem:[%s27419_s1 + $0xb08] sm:$0xff] }
 0x6db   :  { %11306 = vmatprep.subr.bf16.mxu0 %v17885_v1  ;;  %v17933_v1 = vcombine.high %v8616_v61, %v8620_v60  ;;  %v8660_v41 = vld [vmem:[%s27419_s1 + $0xb28] sm:$0xff] }
 0x6dc   :  { %11403 = vmatpush1.bf16.msra.mxu1 %v17686_v2  ;;  %v17734_v2 = vcombine.low %v8417_v21, %v8421_v56  ;;  %v8465_v21 = vld [vmem:[%s27419_s1 + $0x510] sm:$0xff] }
 0x6dd   :  { %11404 = vmatprep.subr.bf16.mxu1 %v17695_v42  ;;  %v17743_v42 = vcombine.high %v8425_v0, %v8429_v18  ;;  %v8469_v56 = vld [vmem:[%s27419_s1 + $0x530] sm:$0xff] }
 0x6de   :  { %11307 = vmatpush1.bf16.msra.mxu0 %v17884_v13  ;;  %v17932_v13 = vcombine.low %v8616_v61, %v8620_v60  ;;  %v8664_v61 = vld [vmem:[%s27419_s1 + $0xb48] sm:$0xff] }
 0x6df   :  { %11308 = vmatprep.subr.bf16.mxu0 %v17893_v17  ;;  %v17941_v17 = vcombine.high %v8624_v3, %v8628_v4  ;;  %v8668_v60 = vld [vmem:[%s27419_s1 + $0xb68] sm:$0xff] }
 0x6e0   :  { %11405 = vmatpush1.bf16.msra.mxu1 %v17694_v55  ;;  %v17742_v55 = vcombine.low %v8425_v0, %v8429_v18  ;;  %v8473_v0 = vld [vmem:[%s27419_s1 + $0x550] sm:$0xff] }
 0x6e1   :  { %11406 = vmatprep.subr.bf16.mxu1 %v17703_v53  ;;  %v17751_v53 = vcombine.high %v8433_v7, %v8437_v16  ;;  %v8477_v18 = vld [vmem:[%s27419_s1 + $0x570] sm:$0xff] }
 0x6e2   :  { %11309 = vmatpush1.bf16.msra.mxu0 %v17892_v12  ;;  %v17940_v12 = vcombine.low %v8624_v3, %v8628_v4  ;;  %v8672_v3 = vld [vmem:[%s27419_s1 + $0xb88] sm:$0xff] }
 0x6e3   :  { %11310 = vmatprep.subr.bf16.mxu0 %v17901_v54  ;;  %v17949_v54 = vcombine.high %v8632_v20, %v8636_v9  ;;  %v8676_v4 = vld [vmem:[%s27419_s1 + $0xba8] sm:$0xff] }
 0x6e4   :  { %11407 = vmatpush1.bf16.msra.mxu1 %v17702_v29  ;;  %v17750_v29 = vcombine.low %v8433_v7, %v8437_v16  ;;  %v8481_v7 = vld [vmem:[%s27419_s1 + $0x590] sm:$0xff] }
 0x6e5   :  { %11408 = vmatprep.subr.bf16.mxu1 %v17711_v22  ;;  %v17759_v22 = vcombine.high %v8441_v26, %v8445_v28  ;;  %v8485_v16 = vld [vmem:[%s27419_s1 + $0x5b0] sm:$0xff] }
 0x6e6   :  { %11311 = vmatpush1.bf16.msra.mxu0 %v17900_v49  ;;  %v17948_v49 = vcombine.low %v8632_v20, %v8636_v9  ;;  %v8680_v20 = vld [vmem:[%s27419_s1 + $0xbc8] sm:$0xff] }
 0x6e7   :  { %11312 = vmatprep.subr.bf16.mxu0 %v17909_v34  ;;  %v17957_v34 = vcombine.high %v8640_v19, %v8644_v31  ;;  %v8684_v9 = vld [vmem:[%s27419_s1 + $0xbe8] sm:$0xff] }
 0x6e8   :  { %11409 = vmatpush1.bf16.msra.mxu1 %v17710_v32  ;;  %v17758_v32 = vcombine.low %v8441_v26, %v8445_v28  ;;  %v8489_v26 = vld [vmem:[%s27419_s1 + $0x5d0] sm:$0xff] }
 0x6e9   :  { %11410 = vmatprep.subr.bf16.mxu1 %v17719_v43  ;;  %v17767_v43 = vcombine.high %v8449_v5, %v8453_v45  ;;  %v8493_v28 = vld [vmem:[%s27419_s1 + $0x5f0] sm:$0xff] }
 0x6ea   :  { %11313 = vmatpush1.bf16.msra.mxu0 %v17908_v44  ;;  %v17956_v44 = vcombine.low %v8640_v19, %v8644_v31  ;;  %v8688_v19 = vld [vmem:[%s27419_s1 + $0xc08] sm:$0xff] }
 0x6eb   :  { %11314 = vmatprep.subr.bf16.mxu0 %v17917_v58  ;;  %v17965_v58 = vcombine.high %v8648_v35, %v8652_v36  ;;  %v8692_v31 = vld [vmem:[%s27419_s1 + $0xc28] sm:$0xff] }
 0x6ec   :  { %11411 = vmatpush1.bf16.msra.mxu1 %v17718_v39  ;;  %v17766_v39 = vcombine.low %v8449_v5, %v8453_v45  ;;  %v8497_v5 = vld [vmem:[%s27419_s1 + $0x610] sm:$0xff] }
 0x6ed   :  { %11412 = vmatprep.subr.bf16.mxu1 %v17727_v46  ;;  %v17775_v46 = vcombine.high %v8457_v38, %v8461_v52  ;;  %v8501_v45 = vld [vmem:[%s27419_s1 + $0x630] sm:$0xff] }
 0x6ee   :  { %11315 = vmatpush1.bf16.msra.mxu0 %v17916_v47  ;;  %v17964_v47 = vcombine.low %v8648_v35, %v8652_v36  ;;  %v8696_v35 = vld [vmem:[%s27419_s1 + $0xc48] sm:$0xff] }
 0x6ef   :  { %11316 = vmatprep.subr.bf16.mxu0 %v17925_v57  ;;  %v17973_v57 = vcombine.high %v8656_v40, %v8660_v41  ;;  %v8700_v36 = vld [vmem:[%s27419_s1 + $0xc68] sm:$0xff] }
 0x6f0   :  { %11413 = vmatpush1.bf16.msra.mxu1 %v17726_v27  ;;  %v17774_v27 = vcombine.low %v8457_v38, %v8461_v52  ;;  %v8505_v38 = vld [vmem:[%s27419_s1 + $0x650] sm:$0xff] }
 0x6f1   :  { %11414 = vmatprep.subr.bf16.mxu1 %v17735_v62  ;;  %v17783_v62 = vcombine.high %v8465_v21, %v8469_v56  ;;  %v8509_v52 = vld [vmem:[%s27419_s1 + $0x670] sm:$0xff] }
 0x6f2   :  { %11317 = vmatpush1.bf16.msra.mxu0 %v17924_v63  ;;  %v17972_v63 = vcombine.low %v8656_v40, %v8660_v41  ;;  %v8704_v40 = vld [vmem:[%s27419_s1 + $0xc88] sm:$0xff] }
 0x6f3   :  { %11318 = vmatprep.subr.bf16.mxu0 %v17933_v1  ;;  %v17981_v1 = vcombine.high %v8664_v61, %v8668_v60  ;;  %v8708_v41 = vld [vmem:[%s27419_s1 + $0xca8] sm:$0xff] }
 0x6f4   :  { %11415 = vmatpush1.bf16.msra.mxu1 %v17734_v2  ;;  %v17782_v2 = vcombine.low %v8465_v21, %v8469_v56  ;;  %v8513_v21 = vld [vmem:[%s27419_s1 + $0x690] sm:$0xff] }
 0x6f5   :  { %11416 = vmatprep.subr.bf16.mxu1 %v17743_v42  ;;  %v17791_v42 = vcombine.high %v8473_v0, %v8477_v18  ;;  %v8517_v56 = vld [vmem:[%s27419_s1 + $0x6b0] sm:$0xff] }
 0x6f6   :  { %11319 = vmatpush1.bf16.msra.mxu0 %v17932_v13  ;;  %v17980_v13 = vcombine.low %v8664_v61, %v8668_v60  ;;  %v8712_v61 = vld [vmem:[%s27419_s1 + $0xcc8] sm:$0xff] }
 0x6f7   :  { %11320 = vmatprep.subr.bf16.mxu0 %v17941_v17  ;;  %v17989_v17 = vcombine.high %v8672_v3, %v8676_v4  ;;  %v8716_v60 = vld [vmem:[%s27419_s1 + $0xce8] sm:$0xff] }
 0x6f8   :  { %11417 = vmatpush1.bf16.msra.mxu1 %v17742_v55  ;;  %v17790_v55 = vcombine.low %v8473_v0, %v8477_v18  ;;  %v8521_v0 = vld [vmem:[%s27419_s1 + $0x6d0] sm:$0xff] }
 0x6f9   :  { %11427 = vmatprep.subr.bf16.mxu1 %v17751_v53  ;;  %v17799_v53 = vcombine.high %v8481_v7, %v8485_v16  ;;  %v8525_v18 = vld [vmem:[%s27419_s1 + $0x6f0] sm:$0xff] }
 0x6fa   :  { %11321 = vmatpush1.bf16.msra.mxu0 %v17940_v12  ;;  %v17988_v12 = vcombine.low %v8672_v3, %v8676_v4  ;;  %v8720_v3 = vld [vmem:[%s27419_s1 + $0xd08] sm:$0xff] }
 0x6fb   :  { %11419 = vmatmul.mubr.bf16.vlgmr.msra.gmra.mrb[52].mxu1 %v24103_v23  ;;  %11322 = vmatprep.subr.bf16.mxu0 %v17949_v54  ;;  %v17997_v54 = vcombine.high %v8680_v20, %v8684_v9  ;;  %v8724_v4 = vld [vmem:[%s27419_s1 + $0xd28] sm:$0xff] }
 0x6fc   :  { %11428 = vmatpush1.bf16.msra.mxu1 %v17750_v29  ;;  %11459 = vmatprep.mubr.bf16.mxu1 %v24110_v59  ;;  %v17798_v29 = vcombine.low %v8481_v7, %v8485_v16  ;;  %v8529_v7 = vld [vmem:[%s27419_s1 + $0x710] sm:$0xff] }
 0x6fd   :  { %11429 = vmatprep.subr.bf16.mxu1 %v17759_v22  ;;  %v17807_v22 = vcombine.high %v8489_v26, %v8493_v28  ;;  %v8533_v16 = vld [vmem:[%s27419_s1 + $0x730] sm:$0xff] }
 0x6fe   :  { %11323 = vmatpush1.bf16.msra.mxu0 %v17948_v49  ;;  %v17996_v49 = vcombine.low %v8680_v20, %v8684_v9  ;;  %v8728_v20 = vld [vmem:[%s27419_s1 + $0xd48] sm:$0xff] }
 0x6ff   :  { %11324 = vmatprep.subr.bf16.mxu0 %v17957_v34  ;;  %v18005_v34 = vcombine.high %v8688_v19, %v8692_v31  ;;  %v8732_v9 = vld [vmem:[%s27419_s1 + $0xd68] sm:$0xff] }
 0x700   :  { %11430 = vmatpush1.bf16.msra.mxu1 %v17758_v32  ;;  %v17806_v32 = vcombine.low %v8489_v26, %v8493_v28  ;;  %v8537_v26 = vld [vmem:[%s27419_s1 + $0x750] sm:$0xff] }
 0x701   :  { %11431 = vmatprep.subr.bf16.mxu1 %v17767_v43  ;;  %v17815_v43 = vcombine.high %v8497_v5, %v8501_v45  ;;  %v8541_v28 = vld [vmem:[%s27419_s1 + $0x770] sm:$0xff] }
 0x702   :  { %11325 = vmatpush1.bf16.msra.mxu0 %v17956_v44  ;;  %v18004_v44 = vcombine.low %v8688_v19, %v8692_v31  ;;  %v8736_v19 = vld [vmem:[%s27419_s1 + $0xd88] sm:$0xff] }
 0x703   :  { %11326 = vmatprep.subr.bf16.mxu0 %v17965_v58  ;;  %v18013_v58 = vcombine.high %v8696_v35, %v8700_v36  ;;  %v8740_v31 = vld [vmem:[%s27419_s1 + $0xda8] sm:$0xff] }
 0x704   :  { %11432 = vmatpush1.bf16.msra.mxu1 %v17766_v39  ;;  %v17814_v39 = vcombine.low %v8497_v5, %v8501_v45  ;;  %v17855_v5 = vcombine.high %v8537_v26, %v8541_v28 }
 0x705   :  { %11433 = vmatprep.subr.bf16.mxu1 %v17775_v46  ;;  %v17823_v46 = vcombine.high %v8505_v38, %v8509_v52 }
 0x706   :  { %11327 = vmatpush1.bf16.msra.mxu0 %v17964_v47  ;;  %v18012_v47 = vcombine.low %v8696_v35, %v8700_v36  ;;  %v8549_v35 = vld [vmem:[%s27419_s1 + $0x7b0] sm:$0xff]  ;;  %v18053_v36 = vcombine.high %v8736_v19, %v8740_v31 }
 0x707   :  { %11328 = vmatprep.subr.bf16.mxu0 %v17973_v57  ;;  %v18021_v57 = vcombine.high %v8704_v40, %v8708_v41 }
 0x708   :  { %11434 = vmatpush1.bf16.msra.mxu1 %v17774_v27  ;;  %v17822_v27 = vcombine.low %v8505_v38, %v8509_v52  ;;  %v8744_v38 = vld [vmem:[%s27419_s1 + $0xdc8] sm:$0xff] }
 0x709   :  { %11435 = vmatprep.subr.bf16.mxu1 %v17783_v62  ;;  %v17831_v62 = vcombine.high %v8513_v21, %v8517_v56  ;;  %v8748_v52 = vld [vmem:[%s27419_s1 + $0xde8] sm:$0xff] }
 0x70a   :  { %11329 = vmatpush1.bf16.msra.mxu0 %v17972_v63  ;;  %v18020_v63 = vcombine.low %v8704_v40, %v8708_v41 }
 0x70b   :  { %11330 = vmatprep.subr.bf16.mxu0 %v17981_v1  ;;  %v18029_v1 = vcombine.high %v8712_v61, %v8716_v60 }
 0x70c   :  { %11436 = vmatpush1.bf16.msra.mxu1 %v17782_v2  ;;  %v17830_v2 = vcombine.low %v8513_v21, %v8517_v56  ;;  %v8553_v21 = vld [vmem:[%s27419_s1 + $0x7d0] sm:$0xff] }
 0x70d   :  { %11437 = vmatprep.subr.bf16.mxu1 %v17791_v42  ;;  %v17839_v42 = vcombine.high %v8521_v0, %v8525_v18  ;;  %v8557_v56 = vld [vmem:[%s27419_s1 + $0x7f0] sm:$0xff] }
 0x70e   :  { %11331 = vmatpush1.bf16.msra.mxu0 %v17980_v13  ;;  %v18028_v13 = vcombine.low %v8712_v61, %v8716_v60  ;;  %v18061_v61 = vcombine.high %v8744_v38, %v8748_v52 }
 0x70f   :  { %11332 = vmatprep.subr.bf16.mxu0 %v17989_v17  ;;  %v18037_v17 = vcombine.high %v8720_v3, %v8724_v4 }
 0x710   :  { %11438 = vmatpush1.bf16.msra.mxu1 %v17790_v55  ;;  %v17838_v55 = vcombine.low %v8521_v0, %v8525_v18  ;;  %v8310_v0 = vld [vmem:[%s27419_s1 + $0x38] sm:$0xff] }
 0x711   :  { %11439 = vmatprep.subr.bf16.mxu1 %v17799_v53  ;;  %v17847_v53 = vcombine.high %v8529_v7, %v8533_v16 }
 0x712   :  { %11333 = vmatpush1.bf16.msra.mxu0 %v17988_v12  ;;  %v18036_v12 = vcombine.low %v8720_v3, %v8724_v4  ;;  %v18060_v3 = vcombine.low %v8744_v38, %v8748_v52  ;;  %v8561_v4 = vld [vmem:[%s27419_s1 + $0x810] sm:$0xff] }
 0x713   :  { %11334 = vmatprep.subr.bf16.mxu0 %v17997_v54  ;;  %v18045_v54 = vcombine.high %v8728_v20, %v8732_v9 }
 0x714   :  { %11440 = vmatpush1.bf16.msra.mxu1 %v17798_v29  ;;  %v17846_v29 = vcombine.low %v8529_v7, %v8533_v16  ;;  %v17870_v7 = vcombine.low %v8553_v21, %v8557_v56  ;;  %v8314_v16 = vld [vmem:[%s27419_s1 + $0x58] sm:$0xff] }
 0x715   :  { %11441 = vmatprep.subr.bf16.mxu1 %v17807_v22  ;;  %v20675_v22 = vld [vmem:[%s27426_s8] sm:$0x7f] }
 0x716   :  { %11335 = vmatpush1.bf16.msra.mxu0 %v17996_v49  ;;  %v5284_v49 = vrot.slane %v20675_v22, %v22396_v14  ;;  %v5288_v45 = vrot.slane %v20675_v22, %v22399_v15  ;;  %v8581_v22 = vld [vmem:[%s27419_s1 + $0x8b0] sm:$0xff] }
 0x717   :  { %11345 = vmatprep.subr.bf16.mxu0 %v18005_v34  ;;  %v18044_v34 = vcombine.low %v8728_v20, %v8732_v9  ;;  %v8569_v9 = vld [vmem:[%s27419_s1 + $0x850] sm:$0xff] }
 0x718   :  { %11442 = vmatpush1.bf16.msra.mxu1 %v17806_v32  ;;  %v8545_v32 = vld [vmem:[%s27419_s1 + $0x790] sm:$0xff] }
 0x719   :  { %11443 = vmatprep.subr.bf16.mxu1 %v17815_v43  ;;  %11337 = vmatmul.mubr.bf16.vlgmr.msra.gmra.mrb[32].mxu0 %v24545_v51  ;;  %v17863_v40 = vcombine.high %v8545_v32, %v8549_v35 }
 0x71a   :  { %11346 = vmatpush1.bf16.msra.mxu0 %v18004_v44  ;;  %11377 = vmatprep.mubr.bf16.mxu0 %v20701_v48  ;;  %v17854_v44 = vcombine.low %v8537_v26, %v8541_v28  ;;  %v8322_v28 = vld [vmem:[%s27419_s1 + $0x98] sm:$0xff] }
 0x71b   :  { %11347 = vmatprep.subr.bf16.mxu0 %v18013_v58 }
 0x71c   :  { %11444 = vmatpush1.bf16.msra.mxu1 %v17814_v39 }
 0x71d   :  { %11445 = vmatprep.subr.bf16.mxu1 %v17823_v46 }
 0x71e   :  { %11348 = vmatpush1.bf16.msra.mxu0 %v18012_v47  ;;  %v18052_v47 = vcombine.low %v8736_v19, %v8740_v31  ;;  %v8577_v31 = vld [vmem:[%s27419_s1 + $0x890] sm:$0xff] }
 0x71f   :  { %11349 = vmatprep.subr.bf16.mxu0 %v18021_v57 }
 0x720   :  { %11446 = vmatpush1.bf16.msra.mxu1 %v17822_v27 }
 0x721   :  { %11447 = vmatprep.subr.bf16.mxu1 %v17831_v62  ;;  %v17862_v62 = vcombine.low %v8545_v32, %v8549_v35  ;;  %v17895_v32 = vcombine.high %v8577_v31, %v8581_v22 }
 0x722   :  { %11350 = vmatpush1.bf16.msra.mxu0 %v18020_v63  ;;  %v8306_v63 = vld [vmem:[%s27419_s1 + $0x18] sm:$0xff] }
 0x723   :  { %11351 = vmatprep.subr.bf16.mxu0 %v18029_v1  ;;  %v17871_v1 = vcombine.high %v8553_v21, %v8557_v56  ;;  %v17624_v20 = vcombine.low %v8306_v63, %v8310_v0  ;;  %v8597_v21 = vld [vmem:[%s27419_s1 + $0x930] sm:$0xff] }
 0x724   :  { %11448 = vmatpush1.bf16.msra.mxu1 %v17830_v2 }
 0x725   :  { %11449 = vmatprep.subr.bf16.mxu1 %v17839_v42  ;;  %v8565_v42 = vld [vmem:[%s27419_s1 + $0x830] sm:$0xff] }
 0x726   :  { %11352 = vmatpush1.bf16.msra.mxu0 %v18028_v13  ;;  %v17625_v13 = vcombine.high %v8306_v63, %v8310_v0  ;;  %v17878_v26 = vcombine.low %v8561_v4, %v8565_v42  ;;  %v8601_v63 = vld [vmem:[%s27419_s1 + $0x950] sm:$0xff] }
 0x727   :  { %11353 = vmatprep.subr.bf16.mxu0 %v18037_v17  ;;  %v8318_v17 = vld [vmem:[%s27419_s1 + $0x78] sm:$0xff]  ;;  %v8605_v0 = vld [vmem:[%s27419_s1 + $0x970] sm:$0xff] }
 0x728   :  { %11450 = vmatpush1.bf16.msra.mxu1 %v17838_v55  ;;  %v17879_v55 = vcombine.high %v8561_v4, %v8565_v42  ;;  %v17632_v19 = vcombine.low %v8314_v16, %v8318_v17  ;;  %v17919_v4 = vcombine.high %v8601_v63, %v8605_v0 }
 0x729   :  { %11451 = vmatprep.subr.bf16.mxu1 %v17847_v53  ;;  %v8573_v53 = vld [vmem:[%s27419_s1 + $0x870] sm:$0xff] }
 0x72a   :  { %11354 = vmatpush1.bf16.msra.mxu0 %v18036_v12  ;;  %v17633_v12 = vcombine.high %v8314_v16, %v8318_v17  ;;  %v8613_v16 = vld [vmem:[%s27419_s1 + $0x9b0] sm:$0xff] }
 0x72b   :  { %11355 = vmatprep.subr.bf16.mxu0 %v18045_v54  ;;  %v8326_v54 = vld [vmem:[%s27419_s1 + $0xb8] sm:$0xff] }
 0x72c   :  { %11452 = vmatpush1.bf16.msra.mxu1 %v17846_v29  ;;  %v8089_v43 = vpop.f32.mrb[28].mxu0  ;;  %v17887_v29 = vcombine.high %v8569_v9, %v8573_v53 }
 0x72d   :  { %v19009_v58 = vadd.f32 %v8089_v43, %v5284_v49  ;;  %v8091_v39 = vpop.f32.mrb[29].mxu0  ;;  %11453 = vmatprep.subr.bf16.mxu1 %v17855_v5  ;;  %v17641_v49 = vcombine.high %v8322_v28, %v8326_v54  ;;  %v8330_v5 = vld [vmem:[%s27419_s1 + $0xd8] sm:$0xff]  ;;  %v8585_v43 = vld [vmem:[%s27419_s1 + $0x8d0] sm:$0xff] }
 0x72e   :  { %v19010_v41 = vadd.f32 %v8091_v39, %v5288_v45  ;;  %v8093_v46 = vpop.f32.mrb[30].mxu0  ;;  %11356 = vmatpush1.bf16.msra.mxu0 %v18044_v34  ;;  %v8334_v45 = vld [vmem:[%s27419_s1 + $0xf8] sm:$0xff] }
 0x72f   :  { %v8260_v57 = vsub.f32 0.0, %v19009_v58  ;;  %v8094_v27 = vpop.f32.mrb[31].mxu0  ;;  %11357 = vmatprep.subr.bf16.mxu0 %v18053_v36  ;;  %v17640_v36 = vcombine.low %v8322_v28, %v8326_v54  ;;  %v17649_v52 = vcombine.high %v8330_v5, %v8334_v45  ;;  %v17894_v58 = vcombine.low %v8577_v31, %v8581_v22  ;;  %v8338_v39 = vld [vmem:[%s27419_s1 + $0x118] sm:$0xff]  ;;  %v8617_v28 = vld [vmem:[%s27419_s1 + $0x9d0] sm:$0xff] }
 0x730   :  { %v8261_v60 = vsub.f32 0.0, %v19010_v41  ;;  %11454 = vmatpush1.bf16.msra.mxu1 %v17854_v44  ;;  %v8589_v44 = vld [vmem:[%s27419_s1 + $0x8f0] sm:$0xff]  ;;  %v17648_v46 = vcombine.low %v8330_v5, %v8334_v45  ;;  %v8346_v27 = vld [vmem:[%s27419_s1 + $0x158] sm:$0xff] }
 0x731   :  { %v8271_v18 = vmul.f32 1.442695, %v8260_v57  ;;  %11455 = vmatprep.subr.bf16.mxu1 %v17863_v40  ;;  %v8342_v40 = vld [vmem:[%s27419_s1 + $0x138] sm:$0xff]  ;;  %v17903_v41 = vcombine.high %v8585_v43, %v8589_v44  ;;  %v17902_v57 = vcombine.low %v8585_v43, %v8589_v44  ;;  %v8621_v54 = vld [vmem:[%s27419_s1 + $0x9f0] sm:$0xff] }
 0x732   :  { %v8273_v2 = vmul.f32 1.442695, %v8261_v60  ;;  %11358 = vmatpush1.bf16.msra.mxu0 %v18052_v47  ;;  %v8593_v47 = vld [vmem:[%s27419_s1 + $0x910] sm:$0xff]  ;;  %v17657_v56 = vcombine.high %v8338_v39, %v8342_v40  ;;  %v8370_v31 = vld [vmem:[%s27419_s1 + $0x218] sm:$0xff] }
 0x733   :  { %20635 = vpow2.f32 %v8271_v18  ;;  %11359 = vmatprep.subr.bf16.mxu0 %v18061_v61  ;;  %v8350_v61 = vld [vmem:[%s27419_s1 + $0x178] sm:$0xff]  ;;  %v17911_v60 = vcombine.high %v8593_v47, %v8597_v21  ;;  %v8625_v5 = vld [vmem:[%s27419_s1 + $0xa10] sm:$0xff] }
 0x734   :  { %20637 = vpow2.f32 %v8273_v2  ;;  %11456 = vmatpush1.bf16.msra.mxu1 %v17862_v62  ;;  %v17656_v62 = vcombine.low %v8338_v39, %v8342_v40  ;;  %v17665_v18 = vcombine.high %v8346_v27, %v8350_v61  ;;  %v8354_v2 = vld [vmem:[%s27419_s1 + $0x198] sm:$0xff]  ;;  %v8629_v45 = vld [vmem:[%s27419_s1 + $0xa30] sm:$0xff] }
 0x735   :  { %11457 = vmatprep.subr.bf16.mxu1 %v17871_v1  ;;  %v17910_v1 = vcombine.low %v8593_v47, %v8597_v21  ;;  %v8374_v22 = vld [vmem:[%s27419_s1 + $0x238] sm:$0xff]  ;;  %v8633_v44 = vld [vmem:[%s27419_s1 + $0xa50] sm:$0xff] }
 0x736   :  { %11360 = vmatpush1.bf16.msra.mxu0 %v18060_v3  ;;  %v8358_v3 = vld [vmem:[%s27419_s1 + $0x1b8] sm:$0xff]  ;;  %v17688_v43 = vcombine.low %v8370_v31, %v8374_v22  ;;  %v8641_v47 = vld [vmem:[%s27419_s1 + $0xa90] sm:$0xff] }
 0x737   :  { %11550 = vmatprep.subr.bf16.mxu0 %v17625_v13  ;;  %v17664_v13 = vcombine.low %v8346_v27, %v8350_v61  ;;  %v8386_v39 = vld [vmem:[%s27419_s1 + $0x298] sm:$0xff]  ;;  %v8645_v21 = vld [vmem:[%s27419_s1 + $0xab0] sm:$0xff] }
 0x738   :  { %11458 = vmatpush1.bf16.msra.mxu1 %v17870_v7  ;;  %v8609_v7 = vld [vmem:[%s27419_s1 + $0x990] sm:$0xff]  ;;  %v8390_v40 = vld [vmem:[%s27419_s1 + $0x2b8] sm:$0xff] }
 0x739   :  { %11378 = vmatmul.mubr.bf16.vlgmr.msra.gmra.mrb[32].mxu0 %v24651_v37  ;;  %11468 = vmatprep.subr.bf16.mxu1 %v17879_v55  ;;  %v17886_v37 = vcombine.low %v8569_v9, %v8573_v53  ;;  %v17673_v55 = vcombine.high %v8354_v2, %v8358_v3  ;;  %v8362_v9 = vld [vmem:[%s27419_s1 + $0x1d8] sm:$0xff] }
 0x73a   :  { %11551 = vmatpush1.bf16.msra.mxu0 %v17624_v20  ;;  %11582 = vmatprep.mubr.bf16.mxu0 %v23908_v30  ;;  %v17918_v20 = vcombine.low %v8601_v63, %v8605_v0  ;;  %v8366_v53 = vld [vmem:[%s27419_s1 + $0x1f8] sm:$0xff]  ;;  %v8649_v63 = vld [vmem:[%s27419_s1 + $0xad0] sm:$0xff] }
 0x73b   :  { %11460 = vmatmul.mubr.bf16.vlgmr.msra.gmra.mrb[52].mxu1 %v24333_v10  ;;  %11552 = vmatprep.subr.bf16.mxu0 %v17633_v12  ;;  %v17927_v12 = vcombine.high %v8609_v7, %v8613_v16  ;;  %v8394_v27 = vld [vmem:[%s27419_s1 + $0x2d8] sm:$0xff]  ;;  %v8653_v0 = vld [vmem:[%s27419_s1 + $0xaf0] sm:$0xff] }
 0x73c   :  { %11469 = vmatpush1.bf16.msra.mxu1 %v17878_v26  ;;  %11500 = vmatprep.mubr.bf16.mxu1 %v24343_v24  ;;  %v17672_v26 = vcombine.low %v8354_v2, %v8358_v3  ;;  %v8398_v61 = vld [vmem:[%s27419_s1 + $0x2f8] sm:$0xff] }
 0x73d   :  { %v20636_v34 = vpop.eup %20635  ;;  %11470 = vmatprep.subr.bf16.mxu1 %v17887_v29  ;;  %v17681_v29 = vcombine.high %v8362_v9, %v8366_v53  ;;  %v8402_v2 = vld [vmem:[%s27419_s1 + $0x318] sm:$0xff] }
 0x73e   :  { %v20638_v30 = vpop.eup %20637  ;;  %v8281_v35 = vadd.f32 1.0, %v20636_v34  ;;  %11553 = vmatpush1.bf16.msra.mxu0 %v17632_v19  ;;  %v17926_v19 = vcombine.low %v8609_v7, %v8613_v16  ;;  %v17689_v34 = vcombine.high %v8370_v31, %v8374_v22  ;;  %v8406_v3 = vld [vmem:[%s27419_s1 + $0x338] sm:$0xff]  ;;  %v8661_v7 = vld [vmem:[%s27419_s1 + $0xb30] sm:$0xff] }
 0x73f   :  { %v8282_v38 = vadd.f32 1.0, %v20638_v30  ;;  %11554 = vmatprep.subr.bf16.mxu0 %v17641_v49  ;;  %v17935_v49 = vcombine.high %v8617_v28, %v8621_v54  ;;  %v8378_v30 = vld [vmem:[%s27419_s1 + $0x258] sm:$0xff]  ;;  %v17721_v16 = vcombine.high %v8402_v2, %v8406_v3 }
 0x740   :  { %20639 = vrcp.f32 %v8281_v35  ;;  %11471 = vmatpush1.bf16.msra.mxu1 %v17886_v37  ;;  %v17680_v37 = vcombine.low %v8362_v9, %v8366_v53  ;;  %v8382_v35 = vld [vmem:[%s27419_s1 + $0x278] sm:$0xff]  ;;  %v17720_v53 = vcombine.low %v8402_v2, %v8406_v3 }
 0x741   :  { %20641 = vrcp.f32 %v8282_v38  ;;  %11472 = vmatprep.subr.bf16.mxu1 %v17895_v32  ;;  %v17934_v32 = vcombine.low %v8617_v28, %v8621_v54  ;;  %v8637_v38 = vld [vmem:[%s27419_s1 + $0xa70] sm:$0xff] }
 0x742   :  { %11555 = vmatpush1.bf16.msra.mxu0 %v17640_v36  ;;  %v17943_v36 = vcombine.high %v8625_v5, %v8629_v45 }
 0x743   :  { %11556 = vmatprep.subr.bf16.mxu0 %v17649_v52  ;;  %v17697_v52 = vcombine.high %v8378_v30, %v8382_v35 }
 0x744   :  { %11473 = vmatpush1.bf16.msra.mxu1 %v17894_v58  ;;  %v17942_v58 = vcombine.low %v8625_v5, %v8629_v45 }
 0x745   :  { %11474 = vmatprep.subr.bf16.mxu1 %v17903_v41  ;;  %v17951_v41 = vcombine.high %v8633_v44, %v8637_v38 }
 0x746   :  { %11557 = vmatpush1.bf16.msra.mxu0 %v17648_v46  ;;  %v17696_v46 = vcombine.low %v8378_v30, %v8382_v35 }
 0x747   :  { %11558 = vmatprep.subr.bf16.mxu0 %v17657_v56  ;;  %v17705_v56 = vcombine.high %v8386_v39, %v8390_v40 }
 0x748   :  { %11475 = vmatpush1.bf16.msra.mxu1 %v17902_v57  ;;  %v17950_v57 = vcombine.low %v8633_v44, %v8637_v38 }
 0x749   :  { %11476 = vmatprep.subr.bf16.mxu1 %v17911_v60  ;;  %v17959_v60 = vcombine.high %v8641_v47, %v8645_v21 }
 0x74a   :  { %v20640_v42 = vpop.eup %20639  ;;  %11559 = vmatpush1.bf16.msra.mxu0 %v17656_v62  ;;  %v17704_v62 = vcombine.low %v8386_v39, %v8390_v40 }
 0x74b   :  { %v20642_v17 = vpop.eup %20641  ;;  %8295 = vst [vmem:[#allocation2 + $0x20] sm:$0xff] %v20640_v42  ;;  %11560 = vmatprep.subr.bf16.mxu0 %v17665_v18  ;;  %v17713_v18 = vcombine.high %v8394_v27, %v8398_v61  ;;  %v17712_v42 = vcombine.low %v8394_v27, %v8398_v61 }
 0x74c   :  { %8296 = vst [vmem:[#allocation2 + $0x28] sm:$0xff] %v20642_v17  ;;  %11477 = vmatpush1.bf16.msra.mxu1 %v17910_v1  ;;  %v17958_v1 = vcombine.low %v8641_v47, %v8645_v21  ;;  %v17966_v17 = vcombine.low %v8649_v63, %v8653_v0 }
 0x74d   :  { %11478 = vmatprep.subr.bf16.mxu1 %v17919_v4  ;;  %v17967_v4 = vcombine.high %v8649_v63, %v8653_v0 }
 0x74e   :  { %11561 = vmatpush1.bf16.msra.mxu0 %v17664_v13  ;;  %v8657_v13 = vld [vmem:[%s27419_s1 + $0xb10] sm:$0xff] }
 0x74f   :  { %11562 = vmatprep.subr.bf16.mxu0 %v17673_v55  ;;  %v8410_v55 = vld [vmem:[%s27419_s1 + $0x358] sm:$0xff]  ;;  %v17975_v9 = vcombine.high %v8657_v13, %v8661_v7  ;;  %v17974_v54 = vcombine.low %v8657_v13, %v8661_v7 }
 0x750   :  { %11479 = vmatpush1.bf16.msra.mxu1 %v17918_v20  ;;  %v8414_v20 = vld [vmem:[%s27419_s1 + $0x378] sm:$0xff] }
 0x751   :  { %11480 = vmatprep.subr.bf16.mxu1 %v17927_v12  ;;  %v8665_v12 = vld [vmem:[%s27419_s1 + $0xb50] sm:$0xff]  ;;  %v17729_v28 = vcombine.high %v8410_v55, %v8414_v20  ;;  %v17728_v22 = vcombine.low %v8410_v55, %v8414_v20 }
 0x752   :  { %11563 = vmatpush1.bf16.msra.mxu0 %v17672_v26  ;;  %v8669_v26 = vld [vmem:[%s27419_s1 + $0xb70] sm:$0xff] }
 0x753   :  { %11564 = vmatprep.subr.bf16.mxu0 %v17681_v29  ;;  %v8418_v29 = vld [vmem:[%s27419_s1 + $0x398] sm:$0xff]  ;;  %v17983_v31 = vcombine.high %v8665_v12, %v8669_v26  ;;  %v17982_v45 = vcombine.low %v8665_v12, %v8669_v26  ;;  %v8713_v55 = vld [vmem:[%s27419_s1 + $0xcd0] sm:$0xff] }
 0x754   :  { %11481 = vmatpush1.bf16.msra.mxu1 %v17926_v19  ;;  %v8422_v19 = vld [vmem:[%s27419_s1 + $0x3b8] sm:$0xff]  ;;  %v8717_v20 = vld [vmem:[%s27419_s1 + $0xcf0] sm:$0xff] }
 0x755   :  { %11482 = vmatprep.subr.bf16.mxu1 %v17935_v49  ;;  %v8673_v49 = vld [vmem:[%s27419_s1 + $0xb90] sm:$0xff]  ;;  %v17737_v5 = vcombine.high %v8418_v29, %v8422_v19  ;;  %v17736_v35 = vcombine.low %v8418_v29, %v8422_v19  ;;  %v8466_v12 = vld [vmem:[%s27419_s1 + $0x518] sm:$0xff] }
 0x756   :  { %11565 = vmatpush1.bf16.msra.mxu0 %v17680_v37  ;;  %v8677_v37 = vld [vmem:[%s27419_s1 + $0xbb0] sm:$0xff]  ;;  %v8470_v26 = vld [vmem:[%s27419_s1 + $0x538] sm:$0xff] }
 0x757   :  { %11566 = vmatprep.subr.bf16.mxu0 %v17689_v34  ;;  %v8426_v34 = vld [vmem:[%s27419_s1 + $0x3d8] sm:$0xff]  ;;  %v17991_v30 = vcombine.high %v8673_v49, %v8677_v37  ;;  %v17990_v38 = vcombine.low %v8673_v49, %v8677_v37  ;;  %v8721_v29 = vld [vmem:[%s27419_s1 + $0xd10] sm:$0xff] }
 0x758   :  { %11483 = vmatpush1.bf16.msra.mxu1 %v17934_v32  ;;  %v8430_v32 = vld [vmem:[%s27419_s1 + $0x3f8] sm:$0xff]  ;;  %v8725_v19 = vld [vmem:[%s27419_s1 + $0xd30] sm:$0xff] }
 0x759   :  { %11484 = vmatprep.subr.bf16.mxu1 %v17943_v36  ;;  %v8681_v36 = vld [vmem:[%s27419_s1 + $0xbd0] sm:$0xff]  ;;  %v17745_v44 = vcombine.high %v8426_v34, %v8430_v32  ;;  %v17744_v40 = vcombine.low %v8426_v34, %v8430_v32  ;;  %v8474_v49 = vld [vmem:[%s27419_s1 + $0x558] sm:$0xff] }
 0x75a   :  { %11567 = vmatpush1.bf16.msra.mxu0 %v17688_v43  ;;  %v8685_v43 = vld [vmem:[%s27419_s1 + $0xbf0] sm:$0xff]  ;;  %v8478_v37 = vld [vmem:[%s27419_s1 + $0x578] sm:$0xff] }
 0x75b   :  { %11568 = vmatprep.subr.bf16.mxu0 %v17697_v52  ;;  %v8434_v52 = vld [vmem:[%s27419_s1 + $0x418] sm:$0xff]  ;;  %v17999_v39 = vcombine.high %v8681_v36, %v8685_v43  ;;  %v17998_v21 = vcombine.low %v8681_v36, %v8685_v43  ;;  %v8729_v34 = vld [vmem:[%s27419_s1 + $0xd50] sm:$0xff] }
 0x75c   :  { %11485 = vmatpush1.bf16.msra.mxu1 %v17942_v58  ;;  %v8438_v58 = vld [vmem:[%s27419_s1 + $0x438] sm:$0xff]  ;;  %v8733_v32 = vld [vmem:[%s27419_s1 + $0xd70] sm:$0xff] }
 0x75d   :  { %11486 = vmatprep.subr.bf16.mxu1 %v17951_v41  ;;  %v8689_v41 = vld [vmem:[%s27419_s1 + $0xc10] sm:$0xff]  ;;  %v17753_v47 = vcombine.high %v8434_v52, %v8438_v58  ;;  %v17752_v61 = vcombine.low %v8434_v52, %v8438_v58  ;;  %v8482_v36 = vld [vmem:[%s27419_s1 + $0x598] sm:$0xff] }
 0x75e   :  { %11569 = vmatpush1.bf16.msra.mxu0 %v17696_v46  ;;  %v8693_v46 = vld [vmem:[%s27419_s1 + $0xc30] sm:$0xff]  ;;  %v8486_v43 = vld [vmem:[%s27419_s1 + $0x5b8] sm:$0xff] }
 0x75f   :  { %11570 = vmatprep.subr.bf16.mxu0 %v17705_v56  ;;  %v8442_v56 = vld [vmem:[%s27419_s1 + $0x458] sm:$0xff]  ;;  %v18007_v27 = vcombine.high %v8689_v41, %v8693_v46  ;;  %v18006_v0 = vcombine.low %v8689_v41, %v8693_v46  ;;  %v8737_v52 = vld [vmem:[%s27419_s1 + $0xd90] sm:$0xff]  ;;  %v18046_v41 = vcombine.low %v8729_v34, %v8733_v32 }
 0x760   :  { %11487 = vmatpush1.bf16.msra.mxu1 %v17950_v57  ;;  %v8446_v57 = vld [vmem:[%s27419_s1 + $0x478] sm:$0xff]  ;;  %v8741_v58 = vld [vmem:[%s27419_s1 + $0xdb0] sm:$0xff] }
 0x761   :  { %11488 = vmatprep.subr.bf16.mxu1 %v17959_v60  ;;  %v8697_v60 = vld [vmem:[%s27419_s1 + $0xc50] sm:$0xff]  ;;  %v17761_v63 = vcombine.high %v8442_v56, %v8446_v57  ;;  %v17760_v3 = vcombine.low %v8442_v56, %v8446_v57  ;;  %v8490_v46 = vld [vmem:[%s27419_s1 + $0x5d8] sm:$0xff] }
 0x762   :  { %11571 = vmatpush1.bf16.msra.mxu0 %v17704_v62  ;;  %v8701_v62 = vld [vmem:[%s27419_s1 + $0xc70] sm:$0xff] }
 0x763   :  { %11572 = vmatprep.subr.bf16.mxu0 %v17713_v18  ;;  %v8450_v18 = vld [vmem:[%s27419_s1 + $0x498] sm:$0xff]  ;;  %v18015_v2 = vcombine.high %v8697_v60, %v8701_v62  ;;  %v18014_v7 = vcombine.low %v8697_v60, %v8701_v62  ;;  %v8749_v60 = vld [vmem:[%s27419_s1 + $0xdf0] sm:$0xff] }
 0x764   :  { %11489 = vmatpush1.bf16.msra.mxu1 %v17958_v1  ;;  %v8454_v1 = vld [vmem:[%s27419_s1 + $0x4b8] sm:$0xff] }
 0x765   :  { %11490 = vmatprep.subr.bf16.mxu1 %v17967_v4  ;;  %v8705_v4 = vld [vmem:[%s27419_s1 + $0xc90] sm:$0xff]  ;;  %v17769_v13 = vcombine.high %v8450_v18, %v8454_v1 }
 0x766   :  { %11573 = vmatpush1.bf16.msra.mxu0 %v17712_v42  ;;  %v8709_v42 = vld [vmem:[%s27419_s1 + $0xcb0] sm:$0xff] }
 0x767   :  { %11574 = vmatprep.subr.bf16.mxu0 %v17721_v16  ;;  %v8462_v16 = vld [vmem:[%s27419_s1 + $0x4f8] sm:$0xff] }
 0x768   :  { %11491 = vmatpush1.bf16.msra.mxu1 %v17966_v17  ;;  %v18023_v17 = vcombine.high %v8705_v4, %v8709_v42 }
 0x769   :  { %11492 = vmatprep.subr.bf16.mxu1 %v17975_v9 }
 0x76a   :  { %11575 = vmatpush1.bf16.msra.mxu0 %v17720_v53  ;;  %v18022_v53 = vcombine.low %v8705_v4, %v8709_v42 }
 0x76b   :  { %11576 = vmatprep.subr.bf16.mxu0 %v17729_v28  ;;  %v18031_v28 = vcombine.high %v8713_v55, %v8717_v20 }
 0x76c   :  { %11493 = vmatpush1.bf16.msra.mxu1 %v17974_v54 }
 0x76d   :  { %11494 = vmatprep.subr.bf16.mxu1 %v17983_v31  ;;  %v17785_v31 = vcombine.high %v8466_v12, %v8470_v26 }
 0x76e   :  { %11577 = vmatpush1.bf16.msra.mxu0 %v17728_v22  ;;  %v18030_v22 = vcombine.low %v8713_v55, %v8717_v20 }
 0x76f   :  { %11578 = vmatprep.subr.bf16.mxu0 %v17737_v5  ;;  %v18039_v5 = vcombine.high %v8721_v29, %v8725_v19 }
 0x770   :  { %11495 = vmatpush1.bf16.msra.mxu1 %v17982_v45  ;;  %v17784_v45 = vcombine.low %v8466_v12, %v8470_v26  ;;  %v8514_v12 = vld [vmem:[%s27419_s1 + $0x698] sm:$0xff] }
 0x771   :  { %11496 = vmatprep.subr.bf16.mxu1 %v17991_v30  ;;  %v17793_v30 = vcombine.high %v8474_v49, %v8478_v37  ;;  %v8518_v26 = vld [vmem:[%s27419_s1 + $0x6b8] sm:$0xff] }
 0x772   :  { %11579 = vmatpush1.bf16.msra.mxu0 %v17736_v35  ;;  %v18038_v35 = vcombine.low %v8721_v29, %v8725_v19  ;;  %v25362_v19 = vld [vmem:[%s27418_s0 + $0x34] ss:$0 sps:$4 sm:$0xff]  }
 0x773   :  { %11580 = vmatprep.subr.bf16.mxu0 %v17745_v44  ;;  %v18047_v44 = vcombine.high %v8729_v34, %v8733_v32  ;;  %v19916_v32 = vld [vmem:[%s27421_s3 + $0x10] sm:$0xff]  }
 0x774   :  { %11497 = vmatpush1.bf16.msra.mxu1 %v17990_v38  ;;  %v17792_v38 = vcombine.low %v8474_v49, %v8478_v37  ;;  %v8522_v49 = vld [vmem:[%s27419_s1 + $0x6d8] sm:$0xff] }
 0x775   :  { %11498 = vmatprep.subr.bf16.mxu1 %v17999_v39  ;;  %v25314_v39 = vld [vmem:[%s27420_s2] sm:$0xff]  ;;  %v8526_v37 = vld [vmem:[%s27419_s1 + $0x6f8] sm:$0xff] }
 0x776   :  { %11581 = vmatpush1.bf16.msra.mxu0 %v17744_v40  ;;  %v17801_v40 = vcombine.high %v8482_v36, %v8486_v43  ;;  %v8760_v57 = vrot.slane %v25314_v39, %v21965_v8  ;;  %v17841_v34 = vcombine.high %v8522_v49, %v8526_v37 }
 0x777   :  { %11591 = vmatprep.subr.bf16.mxu0 %v17753_v47  ;;  %v8494_v47 = vld [vmem:[%s27419_s1 + $0x5f8] sm:$0xff] }
 0x778   :  { %11499 = vmatpush1.bf16.msra.mxu1 %v17998_v21  ;;  %v18055_v21 = vcombine.high %v8737_v52, %v8741_v58 }
 0x779   :  { %11509 = vmatprep.subr.bf16.mxu1 %v18007_v27  ;;  %11583 = vmatmul.mubr.bf16.vlgmr.msra.gmra.mrb[36].mxu0 %v24103_v23  ;;  %v8458_v23 = vld [vmem:[%s27419_s1 + $0x4d8] sm:$0xff]  ;;  %v17800_v27 = vcombine.low %v8482_v36, %v8486_v43  ;;  %v17840_v43 = vcombine.low %v8522_v49, %v8526_v37 }
 0x77a   :  { %11592 = vmatpush1.bf16.msra.mxu0 %v17752_v61  ;;  %11623 = vmatprep.mubr.bf16.mxu0 %v24110_v59  ;;  %v17768_v59 = vcombine.low %v8450_v18, %v8454_v1  ;;  %v17777_v9 = vcombine.high %v8458_v23, %v8462_v16  ;;  %v17776_v54 = vcombine.low %v8458_v23, %v8462_v16  ;;  %v8745_v61 = vld [vmem:[%s27419_s1 + $0xdd0] sm:$0xff]  ;;  %v8498_v1 = vld [vmem:[%s27419_s1 + $0x618] sm:$0xff] }
 0x77b   :  { %11501 = vmatmul.mubr.bf16.vlgmr.msra.gmra.mrb[52].mxu1 %v24545_v51  ;;  %11593 = vmatprep.subr.bf16.mxu0 %v17761_v63  ;;  %v17809_v63 = vcombine.high %v8490_v46, %v8494_v47  ;;  %v18054_v18 = vcombine.low %v8737_v52, %v8741_v58  ;;  %v18063_v4 = vcombine.high %v8745_v61, %v8749_v60  ;;  %v8506_v16 = vld [vmem:[%s27419_s1 + $0x658] sm:$0xff] }
 0x77c   :  { %11510 = vmatpush1.bf16.msra.mxu1 %v18006_v0  ;;  %11541 = vmatprep.mubr.bf16.mxu1 %v20701_v48  ;;  %v18062_v23 = vcombine.low %v8745_v61, %v8749_v60  ;;  %v19917_v36 = vld [vmem:[%s27421_s3 + $0x58] sm:$0xff]  }
 0x77d   :  { %11511 = vmatprep.subr.bf16.mxu1 %v18015_v2  ;;  %v8502_v2 = vld [vmem:[%s27419_s1 + $0x638] sm:$0xff] }
 0x77e   :  { %11594 = vmatpush1.bf16.msra.mxu0 %v17760_v3  ;;  %v17816_v20 = vcombine.low %v8498_v1, %v8502_v2  ;;  %v8538_v52 = vld [vmem:[%s27419_s1 + $0x758] sm:$0xff] }
 0x77f   :  { %11595 = vmatprep.subr.bf16.mxu0 %v17769_v13  ;;  %v17808_v13 = vcombine.low %v8490_v46, %v8494_v47  ;;  %v8542_v58 = vld [vmem:[%s27419_s1 + $0x778] sm:$0xff]  ;;  %v19920_v47 = vld [vmem:[%s27421_s3 + $0x20] sm:$0xff]  }
 0x780   :  { %11512 = vmatpush1.bf16.msra.mxu1 %v18014_v7  ;;  %v17817_v7 = vcombine.high %v8498_v1, %v8502_v2  ;;  %v17857_v46 = vcombine.high %v8538_v52, %v8542_v58  ;;  %v17856_v61 = vcombine.low %v8538_v52, %v8542_v58  ;;  %v19923_v1 = vld [vmem:[%s27421_s3 + $0x70] sm:$0xff]   ;;  %v8586_v37 = vld [vmem:[%s27419_s1 + $0x8d8] sm:$0xff] }
 0x781   :  { %11513 = vmatprep.subr.bf16.mxu1 %v18023_v17  ;;  %v8510_v17 = vld [vmem:[%s27419_s1 + $0x678] sm:$0xff] }
 0x782   :  { %11596 = vmatpush1.bf16.msra.mxu0 %v17768_v59  ;;  %v19911_v59 = vld [vmem:[%s27421_s3 + $0x40] sm:$0xff]   ;;  %v17824_v29 = vcombine.low %v8506_v16, %v8510_v17  ;;  %v8606_v52 = vld [vmem:[%s27419_s1 + $0x978] sm:$0xff] }
 0x783   :  { %11597 = vmatprep.subr.bf16.mxu0 %v17777_v9  ;;  %v17825_v9 = vcombine.high %v8506_v16, %v8510_v17  ;;  %v19934_v58 = vld [vmem:[%s27421_s3 + $0x98] sm:$0xff]  }
 0x784   :  { %11514 = vmatpush1.bf16.msra.mxu1 %v18022_v53  ;;  %v19912_v53 = vld [vmem:[%s27421_s3] sm:$0xff]  }
 0x785   :  { %11515 = vmatprep.subr.bf16.mxu1 %v18031_v28  ;;  %v19913_v28 = vld [vmem:[%s27421_s3 + $0x48] sm:$0xff]  }
 0x786   :  { %11598 = vmatpush1.bf16.msra.mxu0 %v17776_v54 }
 0x787   :  { %11599 = vmatprep.subr.bf16.mxu0 %v17785_v31  ;;  %v17833_v31 = vcombine.high %v8514_v12, %v8518_v26 }
 0x788   :  { %11516 = vmatpush1.bf16.msra.mxu1 %v18030_v22  ;;  %v19914_v22 = vld [vmem:[%s27421_s3 + $0x8] sm:$0xff]  }
 0x789   :  { %11517 = vmatprep.subr.bf16.mxu1 %v18039_v5  ;;  %v19915_v5 = vld [vmem:[%s27421_s3 + $0x50] sm:$0xff]  }
 0x78a   :  { %11600 = vmatpush1.bf16.msra.mxu0 %v17784_v45  ;;  %v17832_v45 = vcombine.low %v8514_v12, %v8518_v26  ;;  %v8578_v26 = vld [vmem:[%s27419_s1 + $0x898] sm:$0xff] }
 0x78b   :  { %11601 = vmatprep.subr.bf16.mxu0 %v17793_v30  ;;  %v8530_v30 = vld [vmem:[%s27419_s1 + $0x718] sm:$0xff] }
 0x78c   :  { %11518 = vmatpush1.bf16.msra.mxu1 %v18038_v35  ;;  %v8534_v35 = vld [vmem:[%s27419_s1 + $0x738] sm:$0xff] }
 0x78d   :  { %11519 = vmatprep.subr.bf16.mxu1 %v18047_v44  ;;  %v17849_v44 = vcombine.high %v8530_v30, %v8534_v35 }
 0x78e   :  { %v25322_v56 = vpop.f32.mrb[48].mxu1  ;;  %11602 = vmatpush1.bf16.msra.mxu0 %v17792_v38  ;;  %v19918_v38 = vld [vmem:[%s27421_s3 + $0x18] sm:$0xff]  }
 0x78f   :  { %v11217_v62 = vpop.f32.mrb[49].mxu1  ;;  %11603 = vmatprep.subr.bf16.mxu0 %v17801_v40  ;;  %v19919_v40 = vld [vmem:[%s27421_s3 + $0x60] sm:$0xff]  }
 0x790   :  { %v11219_v0 = vpop.f32.mrb[50].mxu1  ;;  %11520 = vmatpush1.bf16.msra.mxu1 %v18046_v41  ;;  %v19012_v42 = vadd.f32 %v11217_v62, %v8760_v57  ;;  %v17848_v41 = vcombine.low %v8530_v30, %v8534_v35  ;;  %v8550_v57 = vld [vmem:[%s27419_s1 + $0x7b8] sm:$0xff]  ;;  %v19922_v62 = vld [vmem:[%s27421_s3 + $0x28] sm:$0xff]   ;;  %v19932_v35 = vld [vmem:[%s27421_s3 + $0x90] sm:$0xff]  }
 0x791   :  { %v11220_v3 = vpop.f32.mrb[51].mxu1  ;;  %11521 = vmatprep.subr.bf16.mxu1 %v18055_v21  ;;  %v8546_v21 = vld [vmem:[%s27419_s1 + $0x798] sm:$0xff] }
 0x792   :  { %11604 = vmatpush1.bf16.msra.mxu0 %v17800_v27  ;;  %v11715_v55 = vmax.f32 %v19012_v42, 0.0  ;;  %v19921_v27 = vld [vmem:[%s27421_s3 + $0x68] sm:$0xff]   ;;  %v17865_v60 = vcombine.high %v8546_v21, %v8550_v57  ;;  %v8558_v0 = vld [vmem:[%s27419_s1 + $0x7f8] sm:$0xff]  ;;  %v17864_v2 = vcombine.low %v8546_v21, %v8550_v57  ;;  %v19936_v57 = vld [vmem:[%s27421_s3 + $0xa0] sm:$0xff]  }
 0x793   :  { %11605 = vmatprep.subr.bf16.mxu0 %v17809_v63  ;;  %v8554_v63 = vld [vmem:[%s27419_s1 + $0x7d8] sm:$0xff] }
 0x794   :  { %11522 = vmatpush1.bf16.msra.mxu1 %v18054_v18  ;;  %v11723_v54 = vpack.c.bf16 %v11715_v55, %v11715_v55  ;;  %v8756_v18 = vrot.slane %v25314_v39, %v21962_v6  ;;  %v17873_v3 = vcombine.high %v8554_v63, %v8558_v0  ;;  %v8562_v42 = vld [vmem:[%s27419_s1 + $0x818] sm:$0xff]  ;;  %v17872_v16 = vcombine.low %v8554_v63, %v8558_v0  ;;  %v19938_v0 = vld [vmem:[%s27421_s3 + $0xa8] sm:$0xff]  }
 0x795   :  { %11523 = vmatprep.subr.bf16.mxu1 %v18063_v4  ;;  %v19924_v4 = vld [vmem:[%s27421_s3 + $0x30] sm:$0xff]   ;;  %v8570_v55 = vld [vmem:[%s27419_s1 + $0x858] sm:$0xff] }
 0x796   :  { %11606 = vmatpush1.bf16.msra.mxu0 %v17808_v13  ;;  %v8566_v13 = vld [vmem:[%s27419_s1 + $0x838] sm:$0xff] }
 0x797   :  { %11607 = vmatprep.subr.bf16.mxu0 %v17817_v7  ;;  %v19011_v7 = vadd.f32 %v25322_v56, %v8756_v18  ;;  %v17881_v17 = vcombine.high %v8562_v42, %v8566_v13  ;;  %v8574_v56 = vld [vmem:[%s27419_s1 + $0x878] sm:$0xff]  ;;  %v19939_v18 = vld [vmem:[%s27421_s3 + $0xf0] sm:$0xff]  }
 0x798   :  { %11524 = vmatpush1.bf16.msra.mxu1 %v18062_v23  ;;  %v19925_v23 = vld [vmem:[%s27421_s3 + $0x78] sm:$0xff]   ;;  %v17889_v12 = vcombine.high %v8570_v55, %v8574_v56 }
 0x799   :  { %18819 = vmatprep.subr.bf16.mxu1 %v19911_v59  ;;  %v19926_v59 = vld [vmem:[%s27421_s3 + $0x38] sm:$0xff]  }
 0x79a   :  { %11608 = vmatpush1.bf16.msra.mxu0 %v17816_v20  ;;  %v11714_v20 = vmax.f32 %v19011_v7, 0.0  ;;  %v8598_v30 = vld [vmem:[%s27419_s1 + $0x938] sm:$0xff] }
 0x79b   :  { %11542 = vmatmul.mubr.bf16.vlgmr.msra.gmra.mrb[52].mxu1 %v25362_v19  ;;  %11609 = vmatprep.subr.bf16.mxu0 %v17825_v9  ;;  %v19927_v9 = vld [vmem:[%s27421_s3 + $0xc0] sm:$0xff]   ;;  %v8614_v21 = vld [vmem:[%s27419_s1 + $0x9b8] sm:$0xff] }
 0x79c   :  { %18820 = vmatpush3.bf16.msra.mxu1 %v19912_v53  ;;  %12281 = vmatprep.mubr.bf16.mxu1 %v11723_v54  ;;  %v17880_v53 = vcombine.low %v8562_v42, %v8566_v13  ;;  %v19928_v54 = vld [vmem:[%s27421_s3 + $0x80] sm:$0xff]   ;;  %v8622_v63 = vld [vmem:[%s27419_s1 + $0x9f8] sm:$0xff]  ;;  %v19940_v42 = vld [vmem:[%s27421_s3 + $0xb0] sm:$0xff]  }
 0x79d   :  { %18821 = vmatprep.subr.bf16.mxu1 %v19913_v28  ;;  %v8582_v28 = vld [vmem:[%s27419_s1 + $0x8b8] sm:$0xff] }
 0x79e   :  { %11610 = vmatpush1.bf16.msra.mxu0 %v17824_v29  ;;  %v11722_v29 = vpack.c.bf16 %v11714_v20, %v11714_v20  ;;  %v17897_v49 = vcombine.high %v8578_v26, %v8582_v28  ;;  %v19941_v13 = vld [vmem:[%s27421_s3 + $0xf8] sm:$0xff]  }
 0x79f   :  { %11611 = vmatprep.subr.bf16.mxu0 %v17833_v31  ;;  %v19929_v31 = vld [vmem:[%s27421_s3 + $0xc8] sm:$0xff]  }
 0x7a0   :  { %18822 = vmatpush3.bf16.msra.mxu1 %v19914_v22  ;;  %v17888_v22 = vcombine.low %v8570_v55, %v8574_v56  ;;  %v19943_v55 = vld [vmem:[%s27421_s3 + $0x140] sm:$0xff]  }
 0x7a1   :  { %18823 = vmatprep.subr.bf16.mxu1 %v19915_v5  ;;  %v19930_v5 = vld [vmem:[%s27421_s3 + $0x88] sm:$0xff]  }
 0x7a2   :  { %11612 = vmatpush1.bf16.msra.mxu0 %v17832_v45  ;;  %v17896_v45 = vcombine.low %v8578_v26, %v8582_v28  ;;  %v8650_v28 = vld [vmem:[%s27419_s1 + $0xad8] sm:$0xff] }
 0x7a3   :  { %11613 = vmatprep.subr.bf16.mxu0 %v17841_v34 }
 0x7a4   :  { %18824 = vmatpush3.bf16.msra.mxu1 %v19916_v32  ;;  %v8594_v32 = vld [vmem:[%s27419_s1 + $0x918] sm:$0xff] }
 0x7a5   :  { %18825 = vmatprep.subr.bf16.mxu1 %v19917_v36  ;;  %v19933_v36 = vld [vmem:[%s27421_s3 + $0xd8] sm:$0xff]  }
 0x7a6   :  { %11614 = vmatpush1.bf16.msra.mxu0 %v17840_v43 }
 0x7a7   :  { %11615 = vmatprep.subr.bf16.mxu0 %v17849_v44  ;;  %v17913_v44 = vcombine.high %v8594_v32, %v8598_v30 }
 0x7a8   :  { %18826 = vmatpush3.bf16.msra.mxu1 %v19918_v38  ;;  %v8602_v38 = vld [vmem:[%s27419_s1 + $0x958] sm:$0xff] }
 0x7a9   :  { %18827 = vmatprep.subr.bf16.mxu1 %v19919_v40  ;;  %v19935_v40 = vld [vmem:[%s27421_s3 + $0xe0] sm:$0xff]  }
 0x7aa   :  { %11616 = vmatpush1.bf16.msra.mxu0 %v17848_v41  ;;  %v17912_v41 = vcombine.low %v8594_v32, %v8598_v30  ;;  %v8674_v32 = vld [vmem:[%s27419_s1 + $0xb98] sm:$0xff] }
 0x7ab   :  { %11617 = vmatprep.subr.bf16.mxu0 %v17857_v46  ;;  %v17921_v46 = vcombine.high %v8602_v38, %v8606_v52  ;;  %v8678_v30 = vld [vmem:[%s27419_s1 + $0xbb8] sm:$0xff] }
 0x7ac   :  { %18828 = vmatpush3.bf16.msra.mxu1 %v19920_v47  ;;  %v8610_v47 = vld [vmem:[%s27419_s1 + $0x998] sm:$0xff] }
 0x7ad   :  { %18829 = vmatprep.subr.bf16.mxu1 %v19921_v27  ;;  %v19937_v27 = vld [vmem:[%s27421_s3 + $0xe8] sm:$0xff]  }
 0x7ae   :  { %11618 = vmatpush1.bf16.msra.mxu0 %v17856_v61  ;;  %v17920_v61 = vcombine.low %v8602_v38, %v8606_v52  ;;  %v17992_v38 = vcombine.low %v8674_v32, %v8678_v30 }
 0x7af   :  { %11619 = vmatprep.subr.bf16.mxu0 %v17865_v60  ;;  %v17929_v60 = vcombine.high %v8610_v47, %v8614_v21 }
 0x7b0   :  { %18830 = vmatpush3.bf16.msra.mxu1 %v19922_v62  ;;  %v8618_v62 = vld [vmem:[%s27419_s1 + $0x9d8] sm:$0xff] }
 0x7b1   :  { %18831 = vmatprep.subr.bf16.mxu1 %v19923_v1  ;;  %v17928_v1 = vcombine.low %v8610_v47, %v8614_v21  ;;  %v17936_v7 = vcombine.low %v8618_v62, %v8622_v63  ;;  %v8698_v47 = vld [vmem:[%s27419_s1 + $0xc58] sm:$0xff] }
 0x7b2   :  { %11620 = vmatpush1.bf16.msra.mxu0 %v17864_v2  ;;  %v17937_v2 = vcombine.high %v8618_v62, %v8622_v63  ;;  %v8702_v21 = vld [vmem:[%s27419_s1 + $0xc78] sm:$0xff] }
 0x7b3   :  { %11621 = vmatprep.subr.bf16.mxu0 %v17873_v3  ;;  %v8626_v3 = vld [vmem:[%s27419_s1 + $0xa18] sm:$0xff]  ;;  %v18016_v62 = vcombine.low %v8698_v47, %v8702_v21 }
 0x7b4   :  { %18832 = vmatpush3.bf16.msra.mxu1 %v19924_v4  ;;  %v8630_v4 = vld [vmem:[%s27419_s1 + $0xa38] sm:$0xff] }
 0x7b5   :  { %18833 = vmatprep.subr.bf16.mxu1 %v19925_v23  ;;  %v17945_v23 = vcombine.high %v8626_v3, %v8630_v4  ;;  %v17944_v56 = vcombine.low %v8626_v3, %v8630_v4  ;;  %v8726_v3 = vld [vmem:[%s27419_s1 + $0xd38] sm:$0xff] }
 0x7b6   :  { %11622 = vmatpush1.bf16.msra.mxu0 %v17872_v16  ;;  %v8634_v16 = vld [vmem:[%s27419_s1 + $0xa58] sm:$0xff] }
 0x7b7   :  { %11632 = vmatprep.subr.bf16.mxu0 %v17881_v17  ;;  %v8638_v17 = vld [vmem:[%s27419_s1 + $0xa78] sm:$0xff] }
 0x7b8   :  { %18834 = vmatpush3.bf16.msra.mxu1 %v19926_v59  ;;  %v19942_v59 = vld [vmem:[%s27421_s3 + $0xb8] sm:$0xff]   ;;  %v17953_v20 = vcombine.high %v8634_v16, %v8638_v17 }
 0x7b9   :  { %11624 = vmatmul.mubr.bf16.vlgmr.msra.gmra.mrb[36].mxu0 %v24333_v10  ;;  %18841 = vmatprep.subr.bf16.mxu1 %v19927_v9  ;;  %v8590_v10 = vld [vmem:[%s27419_s1 + $0x8f8] sm:$0xff] }
 0x7ba   :  { %11633 = vmatpush1.bf16.msra.mxu0 %v17880_v53  ;;  %11664 = vmatprep.mubr.bf16.mxu0 %v24343_v24  ;;  %v19931_v24 = vld [vmem:[%s27421_s3 + $0xd0] sm:$0xff]   ;;  %v17905_v34 = vcombine.high %v8586_v37, %v8590_v10  ;;  %v17904_v43 = vcombine.low %v8586_v37, %v8590_v10  ;;  %v8642_v9 = vld [vmem:[%s27419_s1 + $0xa98] sm:$0xff] }
 0x7bb   :  { %12282 = vmatmul.mubr.bf16.vlgmr.msra.gmra.mrb[56].mxu1 %v11722_v29  ;;  %11634 = vmatprep.subr.bf16.mxu0 %v17889_v12  ;;  %v8646_v53 = vld [vmem:[%s27419_s1 + $0xab8] sm:$0xff]  ;;  %v17952_v12 = vcombine.low %v8634_v16, %v8638_v17 }
 0x7bc   :  { %18842 = vmatpush3.bf16.msra.mxu1 %v19928_v54  ;;  %v17961_v26 = vcombine.high %v8642_v9, %v8646_v53  ;;  %v8654_v54 = vld [vmem:[%s27419_s1 + $0xaf8] sm:$0xff]  ;;  %v17960_v29 = vcombine.low %v8642_v9, %v8646_v53 }
 0x7bd   :  { %18843 = vmatprep.subr.bf16.mxu1 %v19929_v31  ;;  %v17969_v31 = vcombine.high %v8650_v28, %v8654_v54  ;;  %v17968_v37 = vcombine.low %v8650_v28, %v8654_v54  ;;  %v8738_v17 = vld [vmem:[%s27419_s1 + $0xd98] sm:$0xff] }
 0x7be   :  { %11635 = vmatpush1.bf16.msra.mxu0 %v17888_v22  ;;  %v8658_v22 = vld [vmem:[%s27419_s1 + $0xb18] sm:$0xff] }
 0x7bf   :  { %11636 = vmatprep.subr.bf16.mxu0 %v17897_v49  ;;  %v8662_v49 = vld [vmem:[%s27419_s1 + $0xb38] sm:$0xff] }
 0x7c0   :  { %18844 = vmatpush3.bf16.msra.mxu1 %v19930_v5  ;;  %v17977_v10 = vcombine.high %v8658_v22, %v8662_v49  ;;  %v8666_v5 = vld [vmem:[%s27419_s1 + $0xb58] sm:$0xff] }
 0x7c1   :  { %18845 = vmatprep.subr.bf16.mxu1 %v19931_v24  ;;  %v8670_v24 = vld [vmem:[%s27419_s1 + $0xb78] sm:$0xff] }
 0x7c2   :  { %11637 = vmatpush1.bf16.msra.mxu0 %v17896_v45  ;;  %v17976_v45 = vcombine.low %v8658_v22, %v8662_v49 }
 0x7c3   :  { %11638 = vmatprep.subr.bf16.mxu0 %v17905_v34  ;;  %v17985_v34 = vcombine.high %v8666_v5, %v8670_v24 }
 0x7c4   :  { %18846 = vmatpush3.bf16.msra.mxu1 %v19932_v35  ;;  %v17984_v35 = vcombine.low %v8666_v5, %v8670_v24 }
 0x7c5   :  { %18847 = vmatprep.subr.bf16.mxu1 %v19933_v36  ;;  %v17993_v36 = vcombine.high %v8674_v32, %v8678_v30  ;;  %v19945_v30 = vld [vmem:[%s27421_s3 + $0x148] sm:$0xff]  }
 0x7c6   :  { %11639 = vmatpush1.bf16.msra.mxu0 %v17904_v43  ;;  %v8682_v43 = vld [vmem:[%s27419_s1 + $0xbd8] sm:$0xff] }
 0x7c7   :  { %11640 = vmatprep.subr.bf16.mxu0 %v17913_v44  ;;  %v8686_v44 = vld [vmem:[%s27419_s1 + $0xbf8] sm:$0xff] }
 0x7c8   :  { %18848 = vmatpush3.bf16.msra.mxu1 %v19934_v58  ;;  %v18001_v52 = vcombine.high %v8682_v43, %v8686_v44  ;;  %v8690_v58 = vld [vmem:[%s27419_s1 + $0xc18] sm:$0xff] }
 0x7c9   :  { %18849 = vmatprep.subr.bf16.mxu1 %v19935_v40  ;;  %v8694_v40 = vld [vmem:[%s27419_s1 + $0xc38] sm:$0xff] }
 0x7ca   :  { %11641 = vmatpush1.bf16.msra.mxu0 %v17912_v41  ;;  %v18000_v41 = vcombine.low %v8682_v43, %v8686_v44  ;;  %v19948_v43 = vld [vmem:[%s27421_s3 + $0x110] sm:$0xff]   ;;  %v19949_v44 = vld [vmem:[%s27421_s3 + $0x158] sm:$0xff]  }
 0x7cb   :  { %11642 = vmatprep.subr.bf16.mxu0 %v17921_v46  ;;  %v18009_v46 = vcombine.high %v8690_v58, %v8694_v40 }
 0x7cc   :  { %18850 = vmatpush3.bf16.msra.mxu1 %v19936_v57  ;;  %v18008_v57 = vcombine.low %v8690_v58, %v8694_v40  ;;  %v19953_v58 = vld [vmem:[%s27421_s3 + $0x168] sm:$0xff]  }
 0x7cd   :  { %18851 = vmatprep.subr.bf16.mxu1 %v19937_v27  ;;  %v18017_v27 = vcombine.high %v8698_v47, %v8702_v21  ;;  %v19954_v40 = vld [vmem:[%s27421_s3 + $0x128] sm:$0xff]   ;;  %v19957_v47 = vld [vmem:[%s27421_s3 + $0x178] sm:$0xff]  }
 0x7ce   :  { %11643 = vmatpush1.bf16.msra.mxu0 %v17920_v61  ;;  %v8706_v61 = vld [vmem:[%s27419_s1 + $0xc98] sm:$0xff] }
 0x7cf   :  { %11644 = vmatprep.subr.bf16.mxu0 %v17929_v60  ;;  %v8710_v60 = vld [vmem:[%s27419_s1 + $0xcb8] sm:$0xff] }
 0x7d0   :  { %18852 = vmatpush3.bf16.msra.mxu1 %v19938_v0  ;;  %v18025_v63 = vcombine.high %v8706_v61, %v8710_v60  ;;  %v8714_v0 = vld [vmem:[%s27419_s1 + $0xcd8] sm:$0xff] }
 0x7d1   :  { %18853 = vmatprep.subr.bf16.mxu1 %v19939_v18  ;;  %v8718_v18 = vld [vmem:[%s27419_s1 + $0xcf8] sm:$0xff] }
 0x7d2   :  { %11645 = vmatpush1.bf16.msra.mxu0 %v17928_v1  ;;  %v18024_v1 = vcombine.low %v8706_v61, %v8710_v60  ;;  %v18032_v4 = vcombine.low %v8714_v0, %v8718_v18  ;;  %v19958_v21 = vld [vmem:[%s27421_s3 + $0x138] sm:$0xff]   ;;  %v8776_v61 = vrot.slane %v25314_v39, %v22399_v15 }
 0x7d3   :  { %11646 = vmatprep.subr.bf16.mxu0 %v17937_v2  ;;  %v18033_v2 = vcombine.high %v8714_v0, %v8718_v18 }
 0x7d4   :  { %18854 = vmatpush3.bf16.msra.mxu1 %v19940_v42 }
 0x7d5   :  { %18855 = vmatprep.subr.bf16.mxu1 %v19941_v13  ;;  %v8730_v13 = vld [vmem:[%s27419_s1 + $0xd58] sm:$0xff] }
 0x7d6   :  { %11647 = vmatpush1.bf16.msra.mxu0 %v17936_v7  ;;  %v8734_v7 = vld [vmem:[%s27419_s1 + $0xd78] sm:$0xff] }
 0x7d7   :  { %11648 = vmatprep.subr.bf16.mxu0 %v17945_v23  ;;  %v18049_v16 = vcombine.high %v8730_v13, %v8734_v7 }
 0x7d8   :  { %18856 = vmatpush3.bf16.msra.mxu1 %v19942_v59  ;;  %v8742_v59 = vld [vmem:[%s27419_s1 + $0xdb8] sm:$0xff] }
 0x7d9   :  { %18863 = vmatprep.subr.bf16.mxu1 %v19943_v55  ;;  %v8764_v55 = vrot.slane %v25314_v39, %v22340_v50  ;;  %v18057_v9 = vcombine.high %v8738_v17, %v8742_v59  ;;  %v18056_v22 = vcombine.low %v8738_v17, %v8742_v59  ;;  %v19965_v17 = vld [vmem:[%s27421_s3 + $0x1d8] sm:$0xff]  }
 0x7da   :  { %11649 = vmatpush1.bf16.msra.mxu0 %v17944_v56  ;;  %v8768_v56 = vrot.slane %v25314_v39, %v22288_v25  ;;  %v19966_v59 = vld [vmem:[%s27421_s3 + $0x198] sm:$0xff]  }
 0x7db   :  { %11650 = vmatprep.subr.bf16.mxu0 %v17953_v20  ;;  %v18048_v20 = vcombine.low %v8730_v13, %v8734_v7  ;;  %v19961_v13 = vld [vmem:[%s27421_s3 + $0x1c8] sm:$0xff]  }
 0x7dc   :  { %v19962_v7 = vld [vmem:[%s27421_s3 + $0x188] sm:$0xff]  }
 0x7de   :  { %11651 = vmatpush1.bf16.msra.mxu0 %v17952_v12  ;;  %v8746_v12 = vld [vmem:[%s27419_s1 + $0xdd8] sm:$0xff] }
 0x7df   :  { %11652 = vmatprep.subr.bf16.mxu0 %v17961_v26  ;;  %v8750_v26 = vld [vmem:[%s27419_s1 + $0xdf8] sm:$0xff] }
 0x7e2   :  { %11653 = vmatpush1.bf16.msra.mxu0 %v17960_v29 }
 0x7e3   :  { %11654 = vmatprep.subr.bf16.mxu0 %v17969_v31 }
 0x7e6   :  { %11655 = vmatpush1.bf16.msra.mxu0 %v17968_v37 }
 0x7e7   :  { %11656 = vmatprep.subr.bf16.mxu0 %v17977_v10  ;;  %v18065_v10 = vcombine.high %v8746_v12, %v8750_v26 }
 0x7ea   :  { %11657 = vmatpush1.bf16.msra.mxu0 %v17976_v45  ;;  %v18064_v45 = vcombine.low %v8746_v12, %v8750_v26  ;;  %v19972_v12 = vld [vmem:[%s27421_s3 + $0x1b0] sm:$0xff]   ;;  %v19973_v26 = vld [vmem:[%s27421_s3 + $0x1f8] sm:$0xff]  }
 0x7eb   :  { %11658 = vmatprep.subr.bf16.mxu0 %v17985_v34  ;;  %v19944_v34 = vld [vmem:[%s27421_s3 + $0x100] sm:$0xff]  }
 0x7ee   :  { %11659 = vmatpush1.bf16.msra.mxu0 %v17984_v35  ;;  %v19946_v35 = vld [vmem:[%s27421_s3 + $0x108] sm:$0xff]  }
 0x7ef   :  { %11660 = vmatprep.subr.bf16.mxu0 %v17993_v36  ;;  %v19947_v36 = vld [vmem:[%s27421_s3 + $0x150] sm:$0xff]  }
 0x7f2   :  { %11661 = vmatpush1.bf16.msra.mxu0 %v17992_v38  ;;  %v19950_v38 = vld [vmem:[%s27421_s3 + $0x118] sm:$0xff]  }
 0x7f3   :  { %11662 = vmatprep.subr.bf16.mxu0 %v18001_v52  ;;  %v19952_v52 = vld [vmem:[%s27421_s3 + $0x120] sm:$0xff]  }
 0x7f6   :  { %11663 = vmatpush1.bf16.msra.mxu0 %v18000_v41  ;;  %v19955_v41 = vld [vmem:[%s27421_s3 + $0x170] sm:$0xff]  }
 0x7f7   :  { %11673 = vmatprep.subr.bf16.mxu0 %v18009_v46  ;;  %v19956_v46 = vld [vmem:[%s27421_s3 + $0x130] sm:$0xff]  }
 0x7f9   :  { %11665 = vmatmul.mubr.bf16.vlgmr.msra.gmra.mrb[36].mxu0 %v24545_v51  ;;  %v8722_v51 = vld [vmem:[%s27419_s1 + $0xd18] sm:$0xff] }
 0x7fa   :  { %11674 = vmatpush1.bf16.msra.mxu0 %v18008_v57  ;;  %11705 = vmatprep.mubr.bf16.mxu0 %v20701_v48  ;;  %v18041_v42 = vcombine.high %v8722_v51, %v8726_v3  ;;  %v18040_v23 = vcombine.low %v8722_v51, %v8726_v3  ;;  %v19959_v57 = vld [vmem:[%s27421_s3 + $0x1c0] sm:$0xff]  }
 0x7fb   :  { %11675 = vmatprep.subr.bf16.mxu0 %v18017_v27  ;;  %v8772_v27 = vrot.slane %v25314_v39, %v22396_v14 }
 0x7fe   :  { %11676 = vmatpush1.bf16.msra.mxu0 %v18016_v62 }
 0x7ff   :  { %11677 = vmatprep.subr.bf16.mxu0 %v18025_v63 }
 0x802   :  { %11678 = vmatpush1.bf16.msra.mxu0 %v18024_v1 }
 0x803   :  { %11679 = vmatprep.subr.bf16.mxu0 %v18033_v2 }
 0x806   :  { %11680 = vmatpush1.bf16.msra.mxu0 %v18032_v4  ;;  %v19960_v4 = vld [vmem:[%s27421_s3 + $0x180] sm:$0xff]  }
 0x807   :  { %11681 = vmatprep.subr.bf16.mxu0 %v18041_v42 }
 0x80a   :  { %11682 = vmatpush1.bf16.msra.mxu0 %v18040_v23  ;;  %v19963_v23 = vld [vmem:[%s27421_s3 + $0x1d0] sm:$0xff]  }
 0x80b   :  { %11683 = vmatprep.subr.bf16.mxu0 %v18049_v16  ;;  %v19964_v16 = vld [vmem:[%s27421_s3 + $0x190] sm:$0xff]  }
 0x80c   :  { %v11379_v53 = vpop.f32.mrb[32].mxu0 }
 0x80d   :  { %v19013_v28 = vadd.f32 %v11379_v53, %v8764_v55  ;;  %v11381_v54 = vpop.f32.mrb[33].mxu0  ;;  %v19967_v55 = vld [vmem:[%s27421_s3 + $0x1e0] sm:$0xff]   ;;  %v19971_v53 = vld [vmem:[%s27421_s3 + $0x1f0] sm:$0xff]  }
 0x80e   :  { %v19014_v29 = vadd.f32 %v11381_v54, %v8768_v56  ;;  %v11383_v31 = vpop.f32.mrb[34].mxu0  ;;  %11684 = vmatpush1.bf16.msra.mxu0 %v18048_v20  ;;  %v19968_v56 = vld [vmem:[%s27421_s3 + $0x1a0] sm:$0xff]   ;;  %v19969_v20 = vld [vmem:[%s27421_s3 + $0x1e8] sm:$0xff]  }
 0x80f   :  { %v11716_v49 = vmax.f32 %v19013_v28, 0.0  ;;  %v11384_v37 = vpop.f32.mrb[35].mxu0  ;;  %11685 = vmatprep.subr.bf16.mxu0 %v18057_v9  ;;  %v19970_v9 = vld [vmem:[%s27421_s3 + $0x1a8] sm:$0xff]  }
 0x810   :  { %v11717_v5 = vmax.f32 %v19014_v29, 0.0  ;;  %v12410_v37 = vld [vmem:[%s27423_s5] sm:$0xff] }
 0x811   :  { %v11724_v32 = vpack.c.bf16 %v11716_v49, %v11716_v49 }
 0x812   :  { %v11725_v24 = vpack.c.bf16 %v11717_v5, %v11717_v5  ;;  %11686 = vmatpush1.bf16.msra.mxu0 %v18056_v22  ;;  %v19974_v22 = vld [vmem:[%s27421_s3 + $0x1b8] sm:$0xff]   ;;  %v25748_v5 = vld [vmem:[%s27423_s5 + $0x8] sm:$0xff] }
 0x813   :  { %11687 = vmatprep.subr.bf16.mxu0 %v18065_v10  ;;  %v12414_v10 = vld [vmem:[%s27423_s5 + $0x20] sm:$0xff] }
 0x814   :  { %12321 = vmatprep.mubr.bf16.mxu1 %v11725_v24  ;;  %v18131_v24 = vcombine.low %v12410_v37, %v12414_v10 }
 0x815   :  { %12322 = vmatmul.mubr.bf16.vlgmr.msra.gmra.mrb[60].mxu1 %v11724_v32  ;;  %v12418_v32 = vld [vmem:[%s27423_s5 + $0x40] sm:$0xff] }
 0x816   :  { %11688 = vmatpush1.bf16.msra.mxu0 %v18064_v45  ;;  %18864 = vmatpush3.bf16.msra.mxu1 %v19944_v34  ;;  %v18132_v45 = vcombine.high %v12410_v37, %v12414_v10  ;;  %v25753_v34 = vld [vmem:[%s27423_s5 + $0x28] sm:$0xff] }
 0x817   :  { %18865 = vmatprep.subr.bf16.mxu1 %v19945_v30  ;;  %v12422_v30 = vld [vmem:[%s27423_s5 + $0x60] sm:$0xff]  ;;  %v12427_v37 = vld [vmem:[%s27423_s5 + $0x88] sm:$0xff] }
 0x818   :  { %12836 = vmatprep.subr.bf16.mxu0 %v18132_v45  ;;  %v12431_v10 = vld [vmem:[%s27423_s5 + $0xa8] sm:$0xff] }
 0x819   :  { %11706 = vmatmul.mubr.bf16.vlgmr.msra.gmra.mrb[36].mxu0 %v25362_v19  ;;  %v19951_v19 = vld [vmem:[%s27421_s3 + $0x160] sm:$0xff]   ;;  %v18150_v45 = vcombine.high %v12427_v37, %v12431_v10 }
 0x81a   :  { %18866 = vmatpush3.bf16.msra.mxu1 %v19946_v35  ;;  %12868 = vmatprep.mubr.bf16.mxu0 %v20701_v48  ;;  %v18134_v35 = vcombine.high %v25748_v5, %v25753_v34 }
 0x81b   :  { %18867 = vmatprep.subr.bf16.mxu1 %v19947_v36  ;;  %v18140_v36 = vcombine.high %v12418_v32, %v12422_v30  ;;  %12837 = vmatpush1.bf16.msra.mxu0 %v18131_v24 }
 0x81d   :  { %12838 = vmatprep.subr.bf16.mxu0 %v18140_v36  ;;  %v12447_v36 = vld [vmem:[%s27423_s5 + $0x128] sm:$0xff] }
 0x81e   :  { %18868 = vmatpush3.bf16.msra.mxu1 %v19948_v43  ;;  %v12426_v43 = vld [vmem:[%s27423_s5 + $0x80] sm:$0xff] }
 0x81f   :  { %18869 = vmatprep.subr.bf16.mxu1 %v19949_v44  ;;  %v12430_v44 = vld [vmem:[%s27423_s5 + $0xa0] sm:$0xff] }
 0x822   :  { %18870 = vmatpush3.bf16.msra.mxu1 %v19950_v38  ;;  %v18139_v38 = vcombine.low %v12418_v32, %v12422_v30  ;;  %v18149_v32 = vcombine.low %v12427_v37, %v12431_v10  ;;  %v12428_v10 = vld [vmem:[%s27423_s5 + $0x90] sm:$0xff] }
 0x823   :  { %18871 = vmatprep.subr.bf16.mxu1 %v19951_v19  ;;  %v18148_v19 = vcombine.high %v12426_v43, %v12430_v44 }
 0x824   :  { %12839 = vmatpush1.bf16.msra.mxu0 %v18139_v38  ;;  %v12451_v38 = vld [vmem:[%s27423_s5 + $0x148] sm:$0xff] }
 0x825   :  { %12840 = vmatprep.subr.bf16.mxu0 %v18148_v19  ;;  %v12455_v19 = vld [vmem:[%s27423_s5 + $0x168] sm:$0xff] }
 0x826   :  { %18872 = vmatpush3.bf16.msra.mxu1 %v19952_v52  ;;  %v12434_v52 = vld [vmem:[%s27423_s5 + $0xc0] sm:$0xff] }
 0x827   :  { %18873 = vmatprep.subr.bf16.mxu1 %v19953_v58  ;;  %v12438_v58 = vld [vmem:[%s27423_s5 + $0xe0] sm:$0xff] }
 0x82a   :  { %18874 = vmatpush3.bf16.msra.mxu1 %v19954_v40  ;;  %v18147_v40 = vcombine.low %v12426_v43, %v12430_v44 }
 0x82b   :  { %18875 = vmatprep.subr.bf16.mxu1 %v19955_v41  ;;  %v18156_v41 = vcombine.high %v12434_v52, %v12438_v58 }
 0x82c   :  { %12841 = vmatpush1.bf16.msra.mxu0 %v18147_v40  ;;  %v12459_v40 = vld [vmem:[%s27423_s5 + $0x188] sm:$0xff] }
 0x82d   :  { %12842 = vmatprep.subr.bf16.mxu0 %v18156_v41  ;;  %v12463_v41 = vld [vmem:[%s27423_s5 + $0x1a8] sm:$0xff] }
 0x82e   :  { %18876 = vmatpush3.bf16.msra.mxu1 %v19956_v46  ;;  %v12442_v46 = vld [vmem:[%s27423_s5 + $0x100] sm:$0xff] }
 0x82f   :  { %18877 = vmatprep.subr.bf16.mxu1 %v19957_v47  ;;  %v12446_v47 = vld [vmem:[%s27423_s5 + $0x120] sm:$0xff] }
 0x832   :  { %18878 = vmatpush3.bf16.msra.mxu1 %v19958_v21  ;;  %v18155_v21 = vcombine.low %v12434_v52, %v12438_v58  ;;  %v18174_v58 = vcombine.high %v12451_v38, %v12455_v19 }
 0x833   :  { %18885 = vmatprep.subr.bf16.mxu1 %v19959_v57  ;;  %v18164_v57 = vcombine.high %v12442_v46, %v12446_v47 }
 0x834   :  { %12843 = vmatpush1.bf16.msra.mxu0 %v18155_v21  ;;  %v18181_v21 = vcombine.low %v12459_v40, %v12463_v41 }
 0x835   :  { %12844 = vmatprep.subr.bf16.mxu0 %v18164_v57 }
 0x86e   :  { %v11543_v60 = vpop.f32.mrb[52].mxu1 }
 0x86f   :  { %v19015_v62 = vadd.f32 %v11543_v60, %v8772_v27  ;;  %v11545_v63 = vpop.f32.mrb[53].mxu1  ;;  %v12450_v27 = vld [vmem:[%s27423_s5 + $0x140] sm:$0xff]  ;;  %v18163_v60 = vcombine.low %v12442_v46, %v12446_v47  ;;  %v18173_v46 = vcombine.low %v12451_v38, %v12455_v19  ;;  %v18182_v47 = vcombine.high %v12459_v40, %v12463_v41  ;;  %v12441_v38 = vld [vmem:[%s27423_s5 + $0xf8] sm:$0xff]  ;;  %v12444_v41 = vld [vmem:[%s27423_s5 + $0x110] sm:$0xff] }
 0x870   :  { %v19016_v0 = vadd.f32 %v11545_v63, %v8776_v61  ;;  %v11547_v18 = vpop.f32.mrb[54].mxu1  ;;  %v12454_v61 = vld [vmem:[%s27423_s5 + $0x160] sm:$0xff] }
 0x871   :  { %v11718_v1 = vmax.f32 %v19015_v62, 0.0  ;;  %v11548_v2 = vpop.f32.mrb[55].mxu1  ;;  %v18172_v62 = vcombine.high %v12450_v27, %v12454_v61  ;;  %v12458_v63 = vld [vmem:[%s27423_s5 + $0x180] sm:$0xff]  ;;  %12845 = vmatpush1.bf16.msra.mxu0 %v18163_v60  ;;  %v18171_v18 = vcombine.low %v12450_v27, %v12454_v61  ;;  %v12467_v60 = vld [vmem:[%s27423_s5 + $0x1c8] sm:$0xff] }
 0x872   :  { %v11719_v51 = vmax.f32 %v19016_v0, 0.0  ;;  %v12462_v0 = vld [vmem:[%s27423_s5 + $0x1a0] sm:$0xff] }
 0x873   :  { %v11726_v42 = vpack.c.bf16 %v11718_v1, %v11718_v1  ;;  %12846 = vmatprep.subr.bf16.mxu0 %v18172_v62  ;;  %v18180_v1 = vcombine.high %v12458_v63, %v12462_v0  ;;  %v18179_v2 = vcombine.low %v12458_v63, %v12462_v0  ;;  %v12466_v27 = vld [vmem:[%s27423_s5 + $0x1c0] sm:$0xff]  ;;  %v12471_v0 = vld [vmem:[%s27423_s5 + $0x1e8] sm:$0xff] }
 0x874   :  { %v11727_v3 = vpack.c.bf16 %v11719_v51, %v11719_v51  ;;  %v18066_v51 = vld [vmem:[%s27422_s4] ss:$0 sm:$0xff] }
 0x875   :  { %12847 = vmatpush1.bf16.msra.mxu0 %v18171_v18  ;;  %v12470_v61 = vld [vmem:[%s27423_s5 + $0x1e0] sm:$0xff] }
 0x876   :  { %12361 = vmatprep.mubr.bf16.mxu1 %v11727_v3  ;;  %12848 = vmatprep.subr.bf16.mxu0 %v18180_v1  ;;  %v18188_v63 = vcombine.high %v12466_v27, %v12470_v61 }
 0x877   :  { %12362 = vmatmul.mubr.bf16.vlgmr.msra.gmra.mrb[64].mxu1 %v11726_v42  ;;  %v8780_v42 = vrot.slane %v25314_v39, %v22475_v11 }
 0x878   :  { %18886 = vmatpush3.bf16.msra.mxu1 %v19960_v4 }
 0x879   :  { %18887 = vmatprep.subr.bf16.mxu1 %v19961_v13  ;;  %12849 = vmatpush1.bf16.msra.mxu0 %v18179_v2  ;;  %v18187_v2 = vcombine.low %v12466_v27, %v12470_v61 }
 0x87a   :  { %12850 = vmatprep.subr.bf16.mxu0 %v18188_v63  ;;  %v12453_v63 = vld [vmem:[%s27423_s5 + $0x158] sm:$0xff] }
 0x87c   :  { %18888 = vmatpush3.bf16.msra.mxu1 %v19962_v7 }
 0x87d   :  { %18889 = vmatprep.subr.bf16.mxu1 %v19963_v23  ;;  %12851 = vmatpush1.bf16.msra.mxu0 %v18187_v2 }
 0x880   :  { %18890 = vmatpush3.bf16.msra.mxu1 %v19964_v16  ;;  %v8784_v16 = vrot.slane %v25314_v39, %v22478_v33  ;;  %v12423_v39 = vld [vmem:[%s27423_s5 + $0x68] sm:$0xff] }
 0x881   :  { %18891 = vmatprep.subr.bf16.mxu1 %v19965_v17 }
 0x884   :  { %18892 = vmatpush3.bf16.msra.mxu1 %v19966_v59 }
 0x885   :  { %18893 = vmatprep.subr.bf16.mxu1 %v19967_v55 }
 0x888   :  { %18894 = vmatpush3.bf16.msra.mxu1 %v19968_v56 }
 0x889   :  { %18895 = vmatprep.subr.bf16.mxu1 %v19969_v20 }
 0x88c   :  { %18896 = vmatpush3.bf16.msra.mxu1 %v19970_v9 }
 0x88d   :  { %18897 = vmatprep.subr.bf16.mxu1 %v19971_v53 }
 0x88e   :  { %v18835_v28 = vpop.f32.mrb[56].mxu1 }
 0x88f   :  { %v18836_v54 = vpop.f32.mrb[57].mxu1 }
 0x890   :  { %v18837_v29 = vadd.f32 %v18836_v54, %v18835_v28  ;;  %v18838_v31 = vpop.f32.mrb[58].mxu1  ;;  %18898 = vmatpush3.bf16.msra.mxu1 %v19972_v12  ;;  %v12419_v54 = vld [vmem:[%s27423_s5 + $0x48] sm:$0xff] }
 0x891   :  { %v18839_v49 = vpop.f32.mrb[59].mxu1  ;;  %18899 = vmatprep.subr.bf16.mxu1 %v19973_v26  ;;  %v18133_v31 = vcombine.low %v25748_v5, %v25753_v34  ;;  %v18141_v24 = vcombine.low %v12419_v54, %v12423_v39  ;;  %v12435_v5 = vld [vmem:[%s27423_s5 + $0xc8] sm:$0xff] }
 0x892   :  { %v12284_v13 = vadd.f32 %v18837_v29, %v18066_v51  ;;  %v18142_v49 = vcombine.high %v12419_v54, %v12423_v39  ;;  %v12439_v34 = vld [vmem:[%s27423_s5 + $0xe8] sm:$0xff]  ;;  %v18189_v51 = vcombine.low %v12467_v60, %v12471_v0  ;;  %v12424_v54 = vld [vmem:[%s27423_s5 + $0x70] sm:$0xff]  ;;  %v12421_v39 = vld [vmem:[%s27423_s5 + $0x58] sm:$0xff] }
 0x893   :  { %v18158_v30 = vcombine.high %v12435_v5, %v12439_v34  ;;  %v18157_v43 = vcombine.low %v12435_v5, %v12439_v34  ;;  %v12433_v5 = vld [vmem:[%s27423_s5 + $0xb8] sm:$0xff] }
 0x894   :  { %18900 = vmatpush3.bf16.msra.mxu1 %v19974_v22 }
 0x895   :  { %12877 = vmatprep.subr.bf16.mxu1 %v18134_v35  ;;  %v12443_v35 = vld [vmem:[%s27423_s5 + $0x108] sm:$0xff] }
 0x896   :  { %v18166_v44 = vcombine.high %v12443_v35, %v12447_v36  ;;  %v18165_v52 = vcombine.low %v12443_v35, %v12447_v36  ;;  %v12436_v36 = vld [vmem:[%s27423_s5 + $0xd0] sm:$0xff] }
 0x8e8   :  { %v18857_v3 = vpop.f32.mrb[60].mxu1 }
 0x8e9   :  { %v18858_v4 = vpop.f32.mrb[61].mxu1 }
 0x8ea   :  { %v18859_v7 = vadd.f32 %v18858_v4, %v18857_v3  ;;  %v18860_v23 = vpop.f32.mrb[62].mxu1  ;;  %v18190_v3 = vcombine.high %v12467_v60, %v12471_v0  ;;  %v12452_v60 = vld [vmem:[%s27423_s5 + $0x150] sm:$0xff]  ;;  %v12457_v0 = vld [vmem:[%s27423_s5 + $0x178] sm:$0xff] }
 0x8eb   :  { %v18861_v17 = vpop.f32.mrb[63].mxu1  ;;  %v12413_v23 = vld [vmem:[%s27423_s5 + $0x18] sm:$0xff] }
 0x8ec   :  { %v25800_v59 = vadd.f32 %v18859_v7, %v12284_v13  ;;  %v11707_v55 = vpop.f32.mrb[36].mxu0  ;;  %v12412_v13 = vld [vmem:[%s27423_s5 + $0x10] sm:$0xff] }
 0x8ed   :  { %v19017_v56 = vadd.f32 %v11707_v55, %v8780_v42  ;;  %v11709_v20 = vpop.f32.mrb[37].mxu0  ;;  %v12416_v7 = vld [vmem:[%s27423_s5 + $0x30] sm:$0xff] }
 0x8ee   :  { %v19018_v9 = vadd.f32 %v11709_v20, %v8784_v16  ;;  %v11711_v53 = vpop.f32.mrb[38].mxu0  ;;  %v18135_v16 = vcombine.low %v12412_v13, %v12416_v7  ;;  %v18136_v17 = vcombine.high %v12412_v13, %v12416_v7  ;;  %v12465_v13 = vld [vmem:[%s27423_s5 + $0x1b8] sm:$0xff] }
 0x8ef   :  { %v11720_v12 = vmax.f32 %v19017_v56, 0.0  ;;  %v11712_v26 = vpop.f32.mrb[39].mxu0 }
 0x8f0   :  { %v11721_v28 = vmax.f32 %v19018_v9, 0.0  ;;  %12918 = vmatprep.subr.bf16.mxu0 %v18136_v17  ;;  %v12420_v26 = vld [vmem:[%s27423_s5 + $0x50] sm:$0xff] }
 0x8f1   :  { %v11728_v22 = vpack.c.bf16 %v11720_v12, %v11720_v12  ;;  %v18143_v34 = vcombine.low %v12420_v26, %v12424_v54 }
 0x8f2   :  { %v11729_v29 = vpack.c.bf16 %v11721_v28, %v11721_v28 }
 0x8f4   :  { %12401 = vmatprep.mubr.bf16.mxu1 %v11729_v29  ;;  %v12425_v29 = vld [vmem:[%s27423_s5 + $0x78] sm:$0xff] }
 0x8f5   :  { %12402 = vmatmul.mubr.bf16.vlgmr.msra.gmra.mrb[68].mxu1 %v11728_v22  ;;  %v18146_v37 = vcombine.high %v12421_v39, %v12425_v29 }
 0x8f6   :  { %12878 = vmatpush1.bf16.msra.mxu1 %v18133_v31  ;;  %12909 = vmatprep.mubr.bf16.mxu1 %v20701_v48 }
 0x8f7   :  { %12879 = vmatprep.subr.bf16.mxu1 %v18142_v49  ;;  %v18144_v49 = vcombine.high %v12420_v26, %v12424_v54 }
 0x8fa   :  { %12880 = vmatpush1.bf16.msra.mxu1 %v18141_v24  ;;  %v12432_v24 = vld [vmem:[%s27423_s5 + $0xb0] sm:$0xff] }
 0x8fb   :  { %12881 = vmatprep.subr.bf16.mxu1 %v18150_v45  ;;  %v12429_v45 = vld [vmem:[%s27423_s5 + $0x98] sm:$0xff]  ;;  %v18151_v19 = vcombine.low %v12428_v10, %v12432_v24 }
 0x8fc   :  { %v18154_v35 = vcombine.high %v12429_v45, %v12433_v5 }
 0x8fe   :  { %12882 = vmatpush1.bf16.msra.mxu1 %v18149_v32  ;;  %v18145_v32 = vcombine.low %v12421_v39, %v12425_v29  ;;  %v19977_v39 = vld [vmem:[%s27425_s7 + $0x4] ss:$28 sps:$4 sm:$0xff]   ;;  %v19980_v29 = vld [vmem:[%s27425_s7 + $0xc] ss:$28 sps:$4 sm:$0xff]  }
 0x8ff   :  { %12883 = vmatprep.subr.bf16.mxu1 %v18158_v30  ;;  %v18152_v30 = vcombine.high %v12428_v10, %v12432_v24  ;;  %v19986_v10 = vld [vmem:[%s27425_s7 + $0x44] ss:$28 sps:$4 sm:$0xff]   ;;  %v19981_v24 = vld [vmem:[%s27425_s7 + $0x38] ss:$28 sps:$4 sm:$0xff]  }
 0x902   :  { %12884 = vmatpush1.bf16.msra.mxu1 %v18157_v43  ;;  %v12440_v43 = vld [vmem:[%s27423_s5 + $0xf0] sm:$0xff] }
 0x903   :  { %12885 = vmatprep.subr.bf16.mxu1 %v18166_v44  ;;  %v12437_v44 = vld [vmem:[%s27423_s5 + $0xd8] sm:$0xff] }
 0x904   :  { %v18162_v40 = vcombine.high %v12437_v44, %v12441_v38 }
 0x906   :  { %12886 = vmatpush1.bf16.msra.mxu1 %v18165_v52  ;;  %v18153_v52 = vcombine.low %v12429_v45, %v12433_v5  ;;  %v19984_v45 = vld [vmem:[%s27425_s7 + $0x40] ss:$28 sps:$4 sm:$0xff]   ;;  %v19989_v5 = vld [vmem:[%s27425_s7 + $0x74] ss:$28 sps:$4 sm:$0xff]  }
 0x907   :  { %12887 = vmatprep.subr.bf16.mxu1 %v18174_v58  ;;  %v18160_v58 = vcombine.high %v12436_v36, %v12440_v43 }
 0x90a   :  { %12888 = vmatpush1.bf16.msra.mxu1 %v18173_v46  ;;  %v12448_v46 = vld [vmem:[%s27423_s5 + $0x130] sm:$0xff] }
 0x90b   :  { %12889 = vmatprep.subr.bf16.mxu1 %v18182_v47  ;;  %v12449_v47 = vld [vmem:[%s27423_s5 + $0x138] sm:$0xff]  ;;  %v18168_v27 = vcombine.high %v12444_v41, %v12448_v46 }
 0x90e   :  { %12890 = vmatpush1.bf16.msra.mxu1 %v18181_v21  ;;  %v18159_v21 = vcombine.low %v12436_v36, %v12440_v43  ;;  %v19993_v36 = vld [vmem:[%s27425_s7 + $0xa8] ss:$28 sps:$4 sm:$0xff]   ;;  %v19996_v43 = vld [vmem:[%s27425_s7 + $0xb0] ss:$28 sps:$4 sm:$0xff]  }
 0x90f   :  { %12891 = vmatprep.subr.bf16.mxu1 %v18190_v3  ;;  %v12460_v3 = vld [vmem:[%s27423_s5 + $0x190] sm:$0xff] }
 0x912   :  { %12892 = vmatpush1.bf16.msra.mxu1 %v18189_v51  ;;  %v18178_v51 = vcombine.high %v12453_v63, %v12457_v0 }
 0x94a   :  { %v18879_v57 = vpop.f32.mrb[64].mxu1 }
 0x94b   :  { %v18880_v62 = vpop.f32.mrb[65].mxu1 }
 0x94c   :  { %v18881_v18 = vadd.f32 %v18880_v62, %v18879_v57  ;;  %v18882_v1 = vpop.f32.mrb[66].mxu1  ;;  %v18161_v57 = vcombine.low %v12437_v44, %v12441_v38  ;;  %v12456_v62 = vld [vmem:[%s27423_s5 + $0x170] sm:$0xff]  ;;  %v20001_v44 = vld [vmem:[%s27425_s7 + $0xe4] ss:$28 sps:$4 sm:$0xff]   ;;  %v20004_v38 = vld [vmem:[%s27425_s7 + $0xec] ss:$28 sps:$4 sm:$0xff]  }
 0x94d   :  { %v18883_v4 = vpop.f32.mrb[67].mxu1  ;;  %v18176_v2 = vcombine.high %v12452_v60, %v12456_v62  ;;  %v18175_v7 = vcombine.low %v12452_v60, %v12456_v62  ;;  %v20017_v60 = vld [vmem:[%s27425_s7 + $0x188] ss:$28 sps:$4 sm:$0xff]   ;;  %v20020_v62 = vld [vmem:[%s27425_s7 + $0x190] ss:$28 sps:$4 sm:$0xff]  }
 0x94e   :  { %v12364_v42 = vadd.f32 %v18881_v18, %v25800_v59  ;;  %v12417_v59 = vld [vmem:[%s27423_s5 + $0x38] sm:$0xff]  ;;  %v18167_v18 = vcombine.low %v12444_v41, %v12448_v46  ;;  %v12464_v4 = vld [vmem:[%s27423_s5 + $0x1b0] sm:$0xff] }
 0x94f   :  { %v18137_v55 = vcombine.low %v12413_v23, %v12417_v59  ;;  %v18138_v56 = vcombine.high %v12413_v23, %v12417_v59  ;;  %v18177_v23 = vcombine.low %v12453_v63, %v12457_v0  ;;  %v12468_v59 = vld [vmem:[%s27423_s5 + $0x1d0] sm:$0xff]  ;;  %v20008_v46 = vld [vmem:[%s27425_s7 + $0x120] ss:$28 sps:$4 sm:$0xff]   ;;  %v20028_v0 = vld [vmem:[%s27425_s7 + $0x1cc] ss:$28 sps:$4 sm:$0xff]  }
 0x950   :  { %v20005_v41 = vld [vmem:[%s27425_s7 + $0x118] ss:$28 sps:$4 sm:$0xff]   ;;  %v20025_v63 = vld [vmem:[%s27425_s7 + $0x1c4] ss:$28 sps:$4 sm:$0xff]  }
 0x951   :  { %12959 = vmatprep.subr.bf16.mxu1 %v18138_v56  ;;  %v12469_v56 = vld [vmem:[%s27423_s5 + $0x1d8] sm:$0xff] }
 0x9c8   :  { %v18901_v20 = vpop.f32.mrb[68].mxu1 }
 0x9c9   :  { %v18902_v9 = vpop.f32.mrb[69].mxu1 }
 0x9ca   :  { %v18903_v53 = vadd.f32 %v18902_v9, %v18901_v20  ;;  %v18904_v12 = vpop.f32.mrb[70].mxu1  ;;  %v12473_v20 = vld [vmem:[%s27423_s5 + $0x1f8] sm:$0xff]  ;;  %v18183_v9 = vcombine.low %v12460_v3, %v12464_v4 }
 0x9cb   :  { %v18905_v28 = vpop.f32.mrb[71].mxu1  ;;  %v18194_v26 = vcombine.high %v12469_v56, %v12473_v20  ;;  %v18193_v54 = vcombine.low %v12469_v56, %v12473_v20  ;;  %v20049_v56 = vld [vmem:[%s27425_s7 + $0x2a4] ss:$28 sps:$4 sm:$0xff]   ;;  %v20052_v20 = vld [vmem:[%s27425_s7 + $0x2ac] ss:$28 sps:$4 sm:$0xff]  }
 0x9cc   :  { %v12404_v31 = vadd.f32 %v18903_v53, %v12364_v42  ;;  %v12461_v42 = vld [vmem:[%s27423_s5 + $0x198] sm:$0xff] }
 0x9cd   :  { %v18186_v17 = vcombine.high %v12461_v42, %v12465_v13  ;;  %v18185_v53 = vcombine.low %v12461_v42, %v12465_v13  ;;  %v20037_v42 = vld [vmem:[%s27425_s7 + $0x234] ss:$28 sps:$4 sm:$0xff]   ;;  %v20040_v13 = vld [vmem:[%s27425_s7 + $0x23c] ss:$28 sps:$4 sm:$0xff]  }
 0x9ce   :  { %v25878_v22 = vpack.c.bf16 %v12404_v31, %v12404_v31  ;;  %v19975_v31 = vld [vmem:[%s27425_s7] ss:$28 sps:$4 sm:$0xff]  }
 0x9d0   :  { %12869 = vmatmul.mubr.bf16.vlgmr.msra.gmra.mrb[40].mxu0 %v25878_v22  ;;  %12910 = vmatmul.mubr.bf16.vlgmr.msra.gmra.mrb[72].mxu1 %v25878_v22 }
 0x9d1   :  { %12919 = vmatpush1.bf16.msra.mxu0 %v18135_v16  ;;  %12960 = vmatpush1.bf16.msra.mxu1 %v18137_v55  ;;  %v18184_v16 = vcombine.high %v12460_v3, %v12464_v4  ;;  %v12472_v55 = vld [vmem:[%s27423_s5 + $0x1f0] sm:$0xff]  ;;  %v20032_v4 = vld [vmem:[%s27425_s7 + $0x200] ss:$28 sps:$4 sm:$0xff]  }
 0x9d2   :  { %12920 = vmatprep.subr.bf16.mxu0 %v18144_v49  ;;  %12961 = vmatprep.subr.bf16.mxu1 %v18146_v37  ;;  %v18192_v12 = vcombine.high %v12468_v59, %v12472_v55  ;;  %v18191_v28 = vcombine.low %v12468_v59, %v12472_v55  ;;  %v19978_v49 = vld [vmem:[%s27425_s7 + $0x8] ss:$28 sps:$4 sm:$0xff]   ;;  %v19983_v37 = vld [vmem:[%s27425_s7 + $0x3c] ss:$28 sps:$4 sm:$0xff]   ;;  %v20044_v55 = vld [vmem:[%s27425_s7 + $0x270] ss:$28 sps:$4 sm:$0xff]  }
 0x9d3   :  { %12950 = vmatprep.mubr.bf16.mxu0 %v20701_v48  ;;  %12991 = vmatprep.mubr.bf16.mxu1 %v20701_v48  ;;  %v12445_v48 = vld [vmem:[%s27423_s5 + $0x118] sm:$0xff]  ;;  %v20041_v59 = vld [vmem:[%s27425_s7 + $0x268] ss:$28 sps:$4 sm:$0xff]  }
 0x9d4   :  { %v18170_v61 = vcombine.high %v12445_v48, %v12449_v47  ;;  %v18169_v1 = vcombine.low %v12445_v48, %v12449_v47  ;;  %v20013_v48 = vld [vmem:[%s27425_s7 + $0x154] ss:$28 sps:$4 sm:$0xff]   ;;  %v20016_v47 = vld [vmem:[%s27425_s7 + $0x15c] ss:$28 sps:$4 sm:$0xff]  }
 0x9d5   :  { %12921 = vmatpush1.bf16.msra.mxu0 %v18143_v34  ;;  %12962 = vmatpush1.bf16.msra.mxu1 %v18145_v32  ;;  %v19987_v34 = vld [vmem:[%s27425_s7 + $0x70] ss:$28 sps:$4 sm:$0xff]   ;;  %v19990_v32 = vld [vmem:[%s27425_s7 + $0x78] ss:$28 sps:$4 sm:$0xff]  }
 0x9d6   :  { %12922 = vmatprep.subr.bf16.mxu0 %v18152_v30  ;;  %12963 = vmatprep.subr.bf16.mxu1 %v18154_v35  ;;  %v19995_v30 = vld [vmem:[%s27425_s7 + $0xac] ss:$28 sps:$4 sm:$0xff]   ;;  %v19998_v35 = vld [vmem:[%s27425_s7 + $0xb4] ss:$28 sps:$4 sm:$0xff]  }
 0x9d7   :  { %v20029_v3 = vld [vmem:[%s27425_s7 + $0x1f8] ss:$28 sps:$4 sm:$0xff]  }
 0x9d9   :  { %12923 = vmatpush1.bf16.msra.mxu0 %v18151_v19  ;;  %12964 = vmatpush1.bf16.msra.mxu1 %v18153_v52  ;;  %v19999_v19 = vld [vmem:[%s27425_s7 + $0xe0] ss:$28 sps:$4 sm:$0xff]   ;;  %v20002_v52 = vld [vmem:[%s27425_s7 + $0xe8] ss:$28 sps:$4 sm:$0xff]  }
 0x9da   :  { %12924 = vmatprep.subr.bf16.mxu0 %v18160_v58  ;;  %12965 = vmatprep.subr.bf16.mxu1 %v18162_v40  ;;  %v20007_v58 = vld [vmem:[%s27425_s7 + $0x11c] ss:$28 sps:$4 sm:$0xff]   ;;  %v20010_v40 = vld [vmem:[%s27425_s7 + $0x124] ss:$28 sps:$4 sm:$0xff]  }
 0x9dd   :  { %12925 = vmatpush1.bf16.msra.mxu0 %v18159_v21  ;;  %12966 = vmatpush1.bf16.msra.mxu1 %v18161_v57  ;;  %v20011_v21 = vld [vmem:[%s27425_s7 + $0x150] ss:$28 sps:$4 sm:$0xff]   ;;  %v20014_v57 = vld [vmem:[%s27425_s7 + $0x158] ss:$28 sps:$4 sm:$0xff]  }
 0x9de   :  { %12926 = vmatprep.subr.bf16.mxu0 %v18168_v27  ;;  %12967 = vmatprep.subr.bf16.mxu1 %v18170_v61  ;;  %v20019_v27 = vld [vmem:[%s27425_s7 + $0x18c] ss:$28 sps:$4 sm:$0xff]   ;;  %v20022_v61 = vld [vmem:[%s27425_s7 + $0x194] ss:$28 sps:$4 sm:$0xff]  }
 0x9e1   :  { %12927 = vmatpush1.bf16.msra.mxu0 %v18167_v18  ;;  %12968 = vmatpush1.bf16.msra.mxu1 %v18169_v1  ;;  %v20023_v18 = vld [vmem:[%s27425_s7 + $0x1c0] ss:$28 sps:$4 sm:$0xff]   ;;  %v20026_v1 = vld [vmem:[%s27425_s7 + $0x1c8] ss:$28 sps:$4 sm:$0xff]  }
 0x9e2   :  { %12928 = vmatprep.subr.bf16.mxu0 %v18176_v2  ;;  %12969 = vmatprep.subr.bf16.mxu1 %v18178_v51  ;;  %v20031_v2 = vld [vmem:[%s27425_s7 + $0x1fc] ss:$28 sps:$4 sm:$0xff]   ;;  %v20034_v51 = vld [vmem:[%s27425_s7 + $0x204] ss:$28 sps:$4 sm:$0xff]  }
 0x9e5   :  { %12929 = vmatpush1.bf16.msra.mxu0 %v18175_v7  ;;  %12970 = vmatpush1.bf16.msra.mxu1 %v18177_v23  ;;  %v20035_v7 = vld [vmem:[%s27425_s7 + $0x230] ss:$28 sps:$4 sm:$0xff]   ;;  %v20038_v23 = vld [vmem:[%s27425_s7 + $0x238] ss:$28 sps:$4 sm:$0xff]  }
 0x9e6   :  { %12930 = vmatprep.subr.bf16.mxu0 %v18184_v16  ;;  %12971 = vmatprep.subr.bf16.mxu1 %v18186_v17  ;;  %v20043_v16 = vld [vmem:[%s27425_s7 + $0x26c] ss:$28 sps:$4 sm:$0xff]   ;;  %v20046_v17 = vld [vmem:[%s27425_s7 + $0x274] ss:$28 sps:$4 sm:$0xff]  }
 0x9e9   :  { %12931 = vmatpush1.bf16.msra.mxu0 %v18183_v9  ;;  %12972 = vmatpush1.bf16.msra.mxu1 %v18185_v53  ;;  %v20047_v9 = vld [vmem:[%s27425_s7 + $0x2a0] ss:$28 sps:$4 sm:$0xff]   ;;  %v20050_v53 = vld [vmem:[%s27425_s7 + $0x2a8] ss:$28 sps:$4 sm:$0xff]  }
 0x9ea   :  { %12932 = vmatprep.subr.bf16.mxu0 %v18192_v12  ;;  %12973 = vmatprep.subr.bf16.mxu1 %v18194_v26  ;;  %v20055_v12 = vld [vmem:[%s27425_s7 + $0x2dc] ss:$28 sps:$4 sm:$0xff]   ;;  %v20058_v26 = vld [vmem:[%s27425_s7 + $0x2e4] ss:$28 sps:$4 sm:$0xff]  }
 0x9ed   :  { %12933 = vmatpush1.bf16.msra.mxu0 %v18191_v28  ;;  %12974 = vmatpush1.bf16.msra.mxu1 %v18193_v54  ;;  %v20053_v28 = vld [vmem:[%s27425_s7 + $0x2d8] ss:$28 sps:$4 sm:$0xff]   ;;  %v20056_v54 = vld [vmem:[%s27425_s7 + $0x2e0] ss:$28 sps:$4 sm:$0xff]  }
 0x9ee   :  { %15869 = vmatprep.subr.bf16.mxu0 %v19977_v39  ;;  %16033 = vmatprep.subr.bf16.mxu1 %v19980_v29  ;;  %v20061_v39 = vld [vmem:[%s27425_s7 + $0x314] ss:$28 sps:$4 sm:$0xff]   ;;  %v20064_v29 = vld [vmem:[%s27425_s7 + $0x31c] ss:$28 sps:$4 sm:$0xff]  }
 0x9f0   :  { %12951 = vmatmul.mubr.bf16.vlgmr.msra.gmra.mrb[44].mxu0 %v25878_v22  ;;  %12992 = vmatmul.mubr.bf16.vlgmr.msra.gmra.mrb[76].mxu1 %v25878_v22  ;;  %v19992_v22 = vld [vmem:[%s27425_s7 + $0x7c] ss:$28 sps:$4 sm:$0xff]  }
 0x9f1   :  { %15870 = vmatpush1.bf16.msra.mxu0 %v19975_v31  ;;  %16034 = vmatpush1.bf16.msra.mxu1 %v19978_v49  ;;  %v20059_v31 = vld [vmem:[%s27425_s7 + $0x310] ss:$28 sps:$4 sm:$0xff]   ;;  %v20062_v49 = vld [vmem:[%s27425_s7 + $0x318] ss:$28 sps:$4 sm:$0xff]  }
 0x9f2   :  { %15871 = vmatprep.subr.bf16.mxu0 %v19983_v37  ;;  %16035 = vmatprep.subr.bf16.mxu1 %v19986_v10  ;;  %v20067_v37 = vld [vmem:[%s27425_s7 + $0x34c] ss:$28 sps:$4 sm:$0xff]   ;;  %v20070_v10 = vld [vmem:[%s27425_s7 + $0x354] ss:$28 sps:$4 sm:$0xff]  }
 0x9f5   :  { %15872 = vmatpush1.bf16.msra.mxu0 %v19981_v24  ;;  %16036 = vmatpush1.bf16.msra.mxu1 %v19984_v45  ;;  %v20065_v24 = vld [vmem:[%s27425_s7 + $0x348] ss:$28 sps:$4 sm:$0xff]   ;;  %v20068_v45 = vld [vmem:[%s27425_s7 + $0x350] ss:$28 sps:$4 sm:$0xff]  }
 0x9f6   :  { %15873 = vmatprep.subr.bf16.mxu0 %v19989_v5  ;;  %16037 = vmatprep.subr.bf16.mxu1 %v19992_v22  ;;  %v20073_v5 = vld [vmem:[%s27425_s7 + $0x384] ss:$28 sps:$4 sm:$0xff]   ;;  %v20076_v22 = vld [vmem:[%s27425_s7 + $0x38c] ss:$28 sps:$4 sm:$0xff]  }
 0x9f9   :  { %15874 = vmatpush1.bf16.msra.mxu0 %v19987_v34  ;;  %16038 = vmatpush1.bf16.msra.mxu1 %v19990_v32  ;;  %v26159_v34 = vld [vmem:[%s27424_s6] sm:$0xff] }
 0x9fa   :  { %15875 = vmatprep.subr.bf16.mxu0 %v19995_v30  ;;  %16039 = vmatprep.subr.bf16.mxu1 %v19998_v35  ;;  %v12479_v32 = vrot.slane %v26159_v34, %v21962_v6  ;;  %v12483_v30 = vrot.slane %v26159_v34, %v21965_v8  ;;  %v12491_v35 = vrot.slane %v26159_v34, %v22288_v25 }
 0x9fd   :  { %15876 = vmatpush1.bf16.msra.mxu0 %v19993_v36  ;;  %16040 = vmatpush1.bf16.msra.mxu1 %v19996_v43 }
 0x9fe   :  { %15877 = vmatprep.subr.bf16.mxu0 %v20001_v44  ;;  %16041 = vmatprep.subr.bf16.mxu1 %v20004_v38 }
 0xa01   :  { %15878 = vmatpush1.bf16.msra.mxu0 %v19999_v19  ;;  %16042 = vmatpush1.bf16.msra.mxu1 %v20002_v52 }
 0xa02   :  { %15879 = vmatprep.subr.bf16.mxu0 %v20007_v58  ;;  %16043 = vmatprep.subr.bf16.mxu1 %v20010_v40 }
 0xa05   :  { %15880 = vmatpush1.bf16.msra.mxu0 %v20005_v41  ;;  %16044 = vmatpush1.bf16.msra.mxu1 %v20008_v46 }
 0xa06   :  { %15881 = vmatprep.subr.bf16.mxu0 %v20013_v48  ;;  %16045 = vmatprep.subr.bf16.mxu1 %v20016_v47 }
 0xa09   :  { %15882 = vmatpush1.bf16.msra.mxu0 %v20011_v21  ;;  %16046 = vmatpush1.bf16.msra.mxu1 %v20014_v57 }
 0xa0a   :  { %15883 = vmatprep.subr.bf16.mxu0 %v20019_v27  ;;  %16047 = vmatprep.subr.bf16.mxu1 %v20022_v61  ;;  %v20071_v61 = vld [vmem:[%s27425_s7 + $0x380] ss:$28 sps:$4 sm:$0xff]  }
 0xa0d   :  { %15884 = vmatpush1.bf16.msra.mxu0 %v20017_v60  ;;  %16048 = vmatpush1.bf16.msra.mxu1 %v20020_v62  ;;  %v20074_v60 = vld [vmem:[%s27425_s7 + $0x388] ss:$28 sps:$4 sm:$0xff]  }
 0xa0e   :  { %15885 = vmatprep.subr.bf16.mxu0 %v20025_v63  ;;  %16049 = vmatprep.subr.bf16.mxu1 %v20028_v0  ;;  %v20079_v63 = vld [vmem:[%s27425_s7 + $0x3bc] ss:$28 sps:$4 sm:$0xff]   ;;  %v20082_v0 = vld [vmem:[%s27425_s7 + $0x3c4] ss:$28 sps:$4 sm:$0xff]  }
 0xa11   :  { %15886 = vmatpush1.bf16.msra.mxu0 %v20023_v18  ;;  %16050 = vmatpush1.bf16.msra.mxu1 %v20026_v1  ;;  %v20077_v1 = vld [vmem:[%s27425_s7 + $0x3b8] ss:$28 sps:$4 sm:$0xff]  }
 0xa12   :  { %15887 = vmatprep.subr.bf16.mxu0 %v20031_v2  ;;  %16051 = vmatprep.subr.bf16.mxu1 %v20034_v51  ;;  %v20080_v2 = vld [vmem:[%s27425_s7 + $0x3c0] ss:$28 sps:$4 sm:$0xff]   ;;  %v20085_v51 = vld [vmem:[%s27425_s7 + $0x3f4] ss:$28 sps:$4 sm:$0xff]  }
 0xa15   :  { %15888 = vmatpush1.bf16.msra.mxu0 %v20029_v3  ;;  %16052 = vmatpush1.bf16.msra.mxu1 %v20032_v4  ;;  %v20088_v3 = vld [vmem:[%s27425_s7 + $0x3fc] ss:$28 sps:$4 sm:$0xff]   ;;  %v20083_v4 = vld [vmem:[%s27425_s7 + $0x3f0] ss:$28 sps:$4 sm:$0xff]  }
 0xa16   :  { %15889 = vmatprep.subr.bf16.mxu0 %v20037_v42  ;;  %16053 = vmatprep.subr.bf16.mxu1 %v20040_v13  ;;  %v20086_v42 = vld [vmem:[%s27425_s7 + $0x3f8] ss:$28 sps:$4 sm:$0xff]   ;;  %v20091_v13 = vld [vmem:[%s27425_s7 + $0x42c] ss:$28 sps:$4 sm:$0xff]  }
 0xa19   :  { %15890 = vmatpush1.bf16.msra.mxu0 %v20035_v7  ;;  %16054 = vmatpush1.bf16.msra.mxu1 %v20038_v23  ;;  %v20094_v7 = vld [vmem:[%s27425_s7 + $0x434] ss:$28 sps:$4 sm:$0xff]   ;;  %v20089_v23 = vld [vmem:[%s27425_s7 + $0x428] ss:$28 sps:$4 sm:$0xff]  }
 0xa1a   :  { %15891 = vmatprep.subr.bf16.mxu0 %v20043_v16  ;;  %16055 = vmatprep.subr.bf16.mxu1 %v20046_v17  ;;  %v20092_v16 = vld [vmem:[%s27425_s7 + $0x430] ss:$28 sps:$4 sm:$0xff]   ;;  %v20097_v17 = vld [vmem:[%s27425_s7 + $0x464] ss:$28 sps:$4 sm:$0xff]  }
 0xa1d   :  { %15892 = vmatpush1.bf16.msra.mxu0 %v20041_v59  ;;  %16056 = vmatpush1.bf16.msra.mxu1 %v20044_v55  ;;  %v20100_v59 = vld [vmem:[%s27425_s7 + $0x46c] ss:$28 sps:$4 sm:$0xff]   ;;  %v20095_v55 = vld [vmem:[%s27425_s7 + $0x460] ss:$28 sps:$4 sm:$0xff]  }
 0xa1e   :  { %15893 = vmatprep.subr.bf16.mxu0 %v20049_v56  ;;  %16057 = vmatprep.subr.bf16.mxu1 %v20052_v20  ;;  %v20098_v56 = vld [vmem:[%s27425_s7 + $0x468] ss:$28 sps:$4 sm:$0xff]   ;;  %v20103_v20 = vld [vmem:[%s27425_s7 + $0x49c] ss:$28 sps:$4 sm:$0xff]  }
 0xa21   :  { %15894 = vmatpush1.bf16.msra.mxu0 %v20047_v9  ;;  %16058 = vmatpush1.bf16.msra.mxu1 %v20050_v53  ;;  %v20106_v9 = vld [vmem:[%s27425_s7 + $0x4a4] ss:$28 sps:$4 sm:$0xff]   ;;  %v20101_v53 = vld [vmem:[%s27425_s7 + $0x498] ss:$28 sps:$4 sm:$0xff]  }
 0xa22   :  { %15895 = vmatprep.subr.bf16.mxu0 %v20055_v12  ;;  %16059 = vmatprep.subr.bf16.mxu1 %v20058_v26  ;;  %v20104_v12 = vld [vmem:[%s27425_s7 + $0x4a0] ss:$28 sps:$4 sm:$0xff]   ;;  %v20109_v26 = vld [vmem:[%s27425_s7 + $0x4d4] ss:$28 sps:$4 sm:$0xff]  }
 0xa25   :  { %15896 = vmatpush1.bf16.msra.mxu0 %v20053_v28  ;;  %16060 = vmatpush1.bf16.msra.mxu1 %v20056_v54  ;;  %v20112_v28 = vld [vmem:[%s27425_s7 + $0x4dc] ss:$28 sps:$4 sm:$0xff]   ;;  %v20107_v54 = vld [vmem:[%s27425_s7 + $0x4d0] ss:$28 sps:$4 sm:$0xff]  }
 0xa26   :  { %15897 = vmatprep.subr.bf16.mxu0 %v20061_v39  ;;  %16061 = vmatprep.subr.bf16.mxu1 %v20064_v29  ;;  %v20110_v39 = vld [vmem:[%s27425_s7 + $0x4d8] ss:$28 sps:$4 sm:$0xff]   ;;  %v20115_v29 = vld [vmem:[%s27425_s7 + $0x50c] ss:$28 sps:$4 sm:$0xff]  }
 0xa29   :  { %15898 = vmatpush1.bf16.msra.mxu0 %v20059_v31  ;;  %16062 = vmatpush1.bf16.msra.mxu1 %v20062_v49  ;;  %v20118_v31 = vld [vmem:[%s27425_s7 + $0x514] ss:$28 sps:$4 sm:$0xff]  }
 0xa2a   :  { %15899 = vmatprep.subr.bf16.mxu0 %v20067_v37  ;;  %16063 = vmatprep.subr.bf16.mxu1 %v20070_v10 }
 0xa2d   :  { %15900 = vmatpush1.bf16.msra.mxu0 %v20065_v24  ;;  %16064 = vmatpush1.bf16.msra.mxu1 %v20068_v45 }
 0xa2e   :  { %15910 = vmatprep.subr.bf16.mxu0 %v20073_v5  ;;  %16074 = vmatprep.subr.bf16.mxu1 %v20076_v22  ;;  %v20113_v22 = vld [vmem:[%s27425_s7 + $0x508] ss:$28 sps:$4 sm:$0xff]  }
 0xaa3   :  { %v12870_v36 = vpop.f32.mrb[40].mxu0  ;;  %v26167_v43 = vpop.f32.mrb[72].mxu1 }
 0xaa4   :  { %v12871_v44 = vadd.f32 %v12870_v36, %v12479_v32  ;;  %v12872_v38 = vpop.f32.mrb[41].mxu0  ;;  %v12913_v19 = vpop.f32.mrb[73].mxu1  ;;  %v20116_v32 = vld [vmem:[%s27425_s7 + $0x510] ss:$28 sps:$4 sm:$0xff]   ;;  %v20121_v36 = vld [vmem:[%s27425_s7 + $0x544] ss:$28 sps:$4 sm:$0xff]  }
 0xaa5   :  { %v12873_v52 = vadd.f32 %v12872_v38, %v12483_v30  ;;  %v12914_v58 = vadd.f32 %v12913_v19, %v12491_v35  ;;  %v12874_v40 = vpop.f32.mrb[42].mxu0  ;;  %v12915_v41 = vpop.f32.mrb[74].mxu1  ;;  %v20119_v38 = vld [vmem:[%s27425_s7 + $0x540] ss:$28 sps:$4 sm:$0xff]   ;;  %v20122_v19 = vld [vmem:[%s27425_s7 + $0x548] ss:$28 sps:$4 sm:$0xff]  }
 0xaa6   :  { %v13000_v46 = vmax.f32 %v12871_v44, 0.0  ;;  %v12875_v48 = vpop.f32.mrb[43].mxu0  ;;  %v12916_v47 = vpop.f32.mrb[75].mxu1  ;;  %v20124_v44 = vld [vmem:[%s27425_s7 + $0x54c] ss:$28 sps:$4 sm:$0xff]  }
 0xaa7   :  { %v13001_v21 = vmax.f32 %v12873_v52, 0.0  ;;  %v13003_v57 = vmax.f32 %v12914_v58, 0.0  ;;  %v20127_v52 = vld [vmem:[%s27425_s7 + $0x57c] ss:$28 sps:$4 sm:$0xff]   ;;  %v20130_v58 = vld [vmem:[%s27425_s7 + $0x584] ss:$28 sps:$4 sm:$0xff]  }
 0xaa8   :  { %v26177_v62 = vpack.c.bf16 %v13000_v46, %v13000_v46  ;;  %v20125_v40 = vld [vmem:[%s27425_s7 + $0x578] ss:$28 sps:$4 sm:$0xff]   ;;  %v20128_v41 = vld [vmem:[%s27425_s7 + $0x580] ss:$28 sps:$4 sm:$0xff]   ;;  %v20131_v47 = vld [vmem:[%s27425_s7 + $0x5b0] ss:$28 sps:$4 sm:$0xff]  }
 0xaa9   :  { %v26169_v27 = vpack.c.bf16 %v13001_v21, %v13001_v21  ;;  %v26187_v18 = vpack.c.bf16 %v13003_v57, %v13003_v57  ;;  %v20133_v46 = vld [vmem:[%s27425_s7 + $0x5b4] ss:$28 sps:$4 sm:$0xff]   ;;  %v20136_v48 = vld [vmem:[%s27425_s7 + $0x5bc] ss:$28 sps:$4 sm:$0xff]   ;;  %v20139_v57 = vld [vmem:[%s27425_s7 + $0x5ec] ss:$28 sps:$4 sm:$0xff]  }
 0xaaa   :  { %v20134_v21 = vld [vmem:[%s27425_s7 + $0x5b8] ss:$28 sps:$4 sm:$0xff]  }
 0xaab   :  { %15901 = vmatprep.mubr.bf16.mxu0 %v26169_v27  ;;  %16065 = vmatprep.mubr.bf16.mxu1 %v26169_v27 }
 0xaac   :  { %15902 = vmatmul.mubr.bf16.vlgmr.msra.gmra.mrb[48].mxu0 %v26177_v62  ;;  %16066 = vmatmul.mubr.bf16.vlgmr.msra.gmra.mrb[80].mxu1 %v26177_v62 }
 0xaad   :  { %15911 = vmatpush1.bf16.msra.mxu0 %v20071_v61  ;;  %16075 = vmatpush1.bf16.msra.mxu1 %v20074_v60  ;;  %v20142_v61 = vld [vmem:[%s27425_s7 + $0x5f4] ss:$28 sps:$4 sm:$0xff]   ;;  %v20137_v60 = vld [vmem:[%s27425_s7 + $0x5e8] ss:$28 sps:$4 sm:$0xff]  }
 0xaae   :  { %15942 = vmatprep.mubr.bf16.mxu0 %v26187_v18  ;;  %16106 = vmatprep.mubr.bf16.mxu1 %v26187_v18 }
 0xaaf   :  { %15912 = vmatprep.subr.bf16.mxu0 %v20079_v63  ;;  %16076 = vmatprep.subr.bf16.mxu1 %v20082_v0  ;;  %v20140_v63 = vld [vmem:[%s27425_s7 + $0x5f0] ss:$28 sps:$4 sm:$0xff]   ;;  %v20145_v0 = vld [vmem:[%s27425_s7 + $0x624] ss:$28 sps:$4 sm:$0xff]  }
 0xab1   :  { %15913 = vmatpush1.bf16.msra.mxu0 %v20077_v1  ;;  %16077 = vmatpush1.bf16.msra.mxu1 %v20080_v2  ;;  %v20148_v1 = vld [vmem:[%s27425_s7 + $0x62c] ss:$28 sps:$4 sm:$0xff]   ;;  %v20143_v2 = vld [vmem:[%s27425_s7 + $0x620] ss:$28 sps:$4 sm:$0xff]  }
 0xab2   :  { %15914 = vmatprep.subr.bf16.mxu0 %v20085_v51  ;;  %16078 = vmatprep.subr.bf16.mxu1 %v20088_v3  ;;  %v20146_v51 = vld [vmem:[%s27425_s7 + $0x628] ss:$28 sps:$4 sm:$0xff]   ;;  %v20151_v3 = vld [vmem:[%s27425_s7 + $0x65c] ss:$28 sps:$4 sm:$0xff]  }
 0xab5   :  { %15915 = vmatpush1.bf16.msra.mxu0 %v20083_v4  ;;  %16079 = vmatpush1.bf16.msra.mxu1 %v20086_v42  ;;  %v20154_v4 = vld [vmem:[%s27425_s7 + $0x664] ss:$28 sps:$4 sm:$0xff]   ;;  %v20149_v42 = vld [vmem:[%s27425_s7 + $0x658] ss:$28 sps:$4 sm:$0xff]  }
 0xab6   :  { %15916 = vmatprep.subr.bf16.mxu0 %v20091_v13  ;;  %16080 = vmatprep.subr.bf16.mxu1 %v20094_v7  ;;  %v20152_v13 = vld [vmem:[%s27425_s7 + $0x660] ss:$28 sps:$4 sm:$0xff]   ;;  %v12487_v7 = vrot.slane %v26159_v34, %v22340_v50 }
 0xab9   :  { %15917 = vmatpush1.bf16.msra.mxu0 %v20089_v23  ;;  %16081 = vmatpush1.bf16.msra.mxu1 %v20092_v16  ;;  %v20157_v23 = vld [vmem:[%s27425_s7 + $0x694] ss:$28 sps:$4 sm:$0xff]   ;;  %v20160_v16 = vld [vmem:[%s27425_s7 + $0x69c] ss:$28 sps:$4 sm:$0xff]  }
 0xaba   :  { %15918 = vmatprep.subr.bf16.mxu0 %v20097_v17  ;;  %16082 = vmatprep.subr.bf16.mxu1 %v20100_v59  ;;  %v12499_v17 = vrot.slane %v26159_v34, %v22399_v15  ;;  %v20155_v59 = vld [vmem:[%s27425_s7 + $0x690] ss:$28 sps:$4 sm:$0xff]  }
 0xabd   :  { %15919 = vmatpush1.bf16.msra.mxu0 %v20095_v55  ;;  %16083 = vmatpush1.bf16.msra.mxu1 %v20098_v56  ;;  %v20158_v55 = vld [vmem:[%s27425_s7 + $0x698] ss:$28 sps:$4 sm:$0xff]   ;;  %v12912_v56 = vadd.f32 %v26167_v43, %v12487_v7  ;;  %v20164_v43 = vld [vmem:[%s27425_s7 + $0x6d0] ss:$28 sps:$4 sm:$0xff]  }
 0xabe   :  { %15920 = vmatprep.subr.bf16.mxu0 %v20103_v20  ;;  %16084 = vmatprep.subr.bf16.mxu1 %v20106_v9  ;;  %v20163_v20 = vld [vmem:[%s27425_s7 + $0x6cc] ss:$28 sps:$4 sm:$0xff]   ;;  %v20166_v9 = vld [vmem:[%s27425_s7 + $0x6d4] ss:$28 sps:$4 sm:$0xff]  }
 0xabf   :  { %v20220_v7 = vld [vmem:[%s27425_s7 + $0x8cc] ss:$28 sps:$4 sm:$0xff]  }
 0xac1   :  { %15921 = vmatpush1.bf16.msra.mxu0 %v20101_v53  ;;  %16085 = vmatpush1.bf16.msra.mxu1 %v20104_v12  ;;  %v20161_v12 = vld [vmem:[%s27425_s7 + $0x6c8] ss:$28 sps:$4 sm:$0xff]  }
 0xac2   :  { %15922 = vmatprep.subr.bf16.mxu0 %v20109_v26  ;;  %16086 = vmatprep.subr.bf16.mxu1 %v20112_v28  ;;  %v13002_v26 = vmax.f32 %v12912_v56, 0.0  ;;  %v20169_v28 = vld [vmem:[%s27425_s7 + $0x704] ss:$28 sps:$4 sm:$0xff]  }
 0xac3   :  { %v26265_v49 = vpop.f32.mrb[44].mxu0  ;;  %v26267_v37 = vpop.f32.mrb[76].mxu1  ;;  %v20224_v56 = vld [vmem:[%s27425_s7 + $0x900] ss:$28 sps:$4 sm:$0xff]  }
 0xac4   :  { %v26269_v10 = vpop.f32.mrb[45].mxu0  ;;  %v26271_v24 = vpop.f32.mrb[77].mxu1 }
 0xac5   :  { %v12956_v45 = vpop.f32.mrb[46].mxu0  ;;  %v12997_v5 = vpop.f32.mrb[78].mxu1  ;;  %15923 = vmatpush1.bf16.msra.mxu0 %v20107_v54  ;;  %16087 = vmatpush1.bf16.msra.mxu1 %v20110_v39  ;;  %v12955_v53 = vadd.f32 %v26269_v10, %v12499_v17  ;;  %v20172_v54 = vld [vmem:[%s27425_s7 + $0x70c] ss:$28 sps:$4 sm:$0xff]   ;;  %v20223_v17 = vld [vmem:[%s27425_s7 + $0x8fc] ss:$28 sps:$4 sm:$0xff]  }
 0xac6   :  { %v12957_v30 = vpop.f32.mrb[47].mxu0  ;;  %v12998_v35 = vpop.f32.mrb[79].mxu1  ;;  %15924 = vmatprep.subr.bf16.mxu0 %v20115_v29  ;;  %16088 = vmatprep.subr.bf16.mxu1 %v20118_v31  ;;  %v20167_v29 = vld [vmem:[%s27425_s7 + $0x700] ss:$28 sps:$4 sm:$0xff]   ;;  %v26390_v31 = vpack.c.bf16 %v13002_v26, %v13002_v26  ;;  %v20170_v10 = vld [vmem:[%s27425_s7 + $0x708] ss:$28 sps:$4 sm:$0xff]  }
 0xac7   :  { %v13005_v39 = vmax.f32 %v12955_v53, 0.0  ;;  %v20175_v5 = vld [vmem:[%s27425_s7 + $0x73c] ss:$28 sps:$4 sm:$0xff]   ;;  %v20181_v35 = vld [vmem:[%s27425_s7 + $0x774] ss:$28 sps:$4 sm:$0xff]  }
 0xac8   :  { %v20176_v30 = vld [vmem:[%s27425_s7 + $0x740] ss:$28 sps:$4 sm:$0xff]   ;;  %v20227_v53 = vld [vmem:[%s27425_s7 + $0x930] ss:$28 sps:$4 sm:$0xff]  }
 0xac9   :  { %15925 = vmatpush1.bf16.msra.mxu0 %v20113_v22  ;;  %16089 = vmatpush1.bf16.msra.mxu1 %v20116_v32  ;;  %v26395_v45 = vpack.c.bf16 %v13005_v39, %v13005_v39  ;;  %v20178_v22 = vld [vmem:[%s27425_s7 + $0x744] ss:$28 sps:$4 sm:$0xff]   ;;  %v20173_v32 = vld [vmem:[%s27425_s7 + $0x738] ss:$28 sps:$4 sm:$0xff]  }
 0xaca   :  { %15926 = vmatprep.subr.bf16.mxu0 %v20121_v36  ;;  %16090 = vmatprep.subr.bf16.mxu1 %v20124_v44  ;;  %v20184_v36 = vld [vmem:[%s27425_s7 + $0x77c] ss:$28 sps:$4 sm:$0xff]   ;;  %v20179_v44 = vld [vmem:[%s27425_s7 + $0x770] ss:$28 sps:$4 sm:$0xff]   ;;  %v20241_v39 = vld [vmem:[%s27425_s7 + $0x9a4] ss:$28 sps:$4 sm:$0xff]  }
 0xacb   :  { %v20238_v26 = vld [vmem:[%s27425_s7 + $0x974] ss:$28 sps:$4 sm:$0xff]  }
 0xacd   :  { %15927 = vmatpush1.bf16.msra.mxu0 %v20119_v38  ;;  %16091 = vmatpush1.bf16.msra.mxu1 %v20122_v19  ;;  %v20182_v38 = vld [vmem:[%s27425_s7 + $0x778] ss:$28 sps:$4 sm:$0xff]   ;;  %v20187_v19 = vld [vmem:[%s27425_s7 + $0x7ac] ss:$28 sps:$4 sm:$0xff]  }
 0xace   :  { %15928 = vmatprep.subr.bf16.mxu0 %v20127_v52  ;;  %16092 = vmatprep.subr.bf16.mxu1 %v20130_v58  ;;  %v20190_v52 = vld [vmem:[%s27425_s7 + $0x7b4] ss:$28 sps:$4 sm:$0xff]   ;;  %v20185_v58 = vld [vmem:[%s27425_s7 + $0x7a8] ss:$28 sps:$4 sm:$0xff]  }
 0xad1   :  { %15929 = vmatpush1.bf16.msra.mxu0 %v20125_v40  ;;  %16093 = vmatpush1.bf16.msra.mxu1 %v20128_v41  ;;  %v20188_v40 = vld [vmem:[%s27425_s7 + $0x7b0] ss:$28 sps:$4 sm:$0xff]   ;;  %v20193_v41 = vld [vmem:[%s27425_s7 + $0x7e4] ss:$28 sps:$4 sm:$0xff]  }
 0xad2   :  { %15930 = vmatprep.subr.bf16.mxu0 %v20133_v46  ;;  %16094 = vmatprep.subr.bf16.mxu1 %v20136_v48  ;;  %v20196_v46 = vld [vmem:[%s27425_s7 + $0x7ec] ss:$28 sps:$4 sm:$0xff]   ;;  %v20191_v48 = vld [vmem:[%s27425_s7 + $0x7e0] ss:$28 sps:$4 sm:$0xff]  }
 0xad5   :  { %15931 = vmatpush1.bf16.msra.mxu0 %v20131_v47  ;;  %16095 = vmatpush1.bf16.msra.mxu1 %v20134_v21  ;;  %v20194_v47 = vld [vmem:[%s27425_s7 + $0x7e8] ss:$28 sps:$4 sm:$0xff]   ;;  %v20199_v21 = vld [vmem:[%s27425_s7 + $0x81c] ss:$28 sps:$4 sm:$0xff]  }
 0xad6   :  { %15932 = vmatprep.subr.bf16.mxu0 %v20139_v57  ;;  %16096 = vmatprep.subr.bf16.mxu1 %v20142_v61  ;;  %v20202_v57 = vld [vmem:[%s27425_s7 + $0x824] ss:$28 sps:$4 sm:$0xff]   ;;  %v20197_v61 = vld [vmem:[%s27425_s7 + $0x818] ss:$28 sps:$4 sm:$0xff]  }
 0xad9   :  { %15933 = vmatpush1.bf16.msra.mxu0 %v20137_v60  ;;  %16097 = vmatpush1.bf16.msra.mxu1 %v20140_v63  ;;  %v20200_v60 = vld [vmem:[%s27425_s7 + $0x820] ss:$28 sps:$4 sm:$0xff]   ;;  %v20205_v63 = vld [vmem:[%s27425_s7 + $0x854] ss:$28 sps:$4 sm:$0xff]  }
 0xada   :  { %15934 = vmatprep.subr.bf16.mxu0 %v20145_v0  ;;  %16098 = vmatprep.subr.bf16.mxu1 %v20148_v1  ;;  %v20208_v0 = vld [vmem:[%s27425_s7 + $0x85c] ss:$28 sps:$4 sm:$0xff]   ;;  %v20203_v1 = vld [vmem:[%s27425_s7 + $0x850] ss:$28 sps:$4 sm:$0xff]  }
 0xadd   :  { %15935 = vmatpush1.bf16.msra.mxu0 %v20143_v2  ;;  %16099 = vmatpush1.bf16.msra.mxu1 %v20146_v51  ;;  %v20206_v2 = vld [vmem:[%s27425_s7 + $0x858] ss:$28 sps:$4 sm:$0xff]   ;;  %v20211_v51 = vld [vmem:[%s27425_s7 + $0x88c] ss:$28 sps:$4 sm:$0xff]  }
 0xade   :  { %15936 = vmatprep.subr.bf16.mxu0 %v20151_v3  ;;  %16100 = vmatprep.subr.bf16.mxu1 %v20154_v4  ;;  %v20214_v3 = vld [vmem:[%s27425_s7 + $0x894] ss:$28 sps:$4 sm:$0xff]   ;;  %v20209_v4 = vld [vmem:[%s27425_s7 + $0x888] ss:$28 sps:$4 sm:$0xff]  }
 0xae1   :  { %15937 = vmatpush1.bf16.msra.mxu0 %v20149_v42  ;;  %16101 = vmatpush1.bf16.msra.mxu1 %v20152_v13  ;;  %v20212_v42 = vld [vmem:[%s27425_s7 + $0x890] ss:$28 sps:$4 sm:$0xff]   ;;  %v20217_v13 = vld [vmem:[%s27425_s7 + $0x8c4] ss:$28 sps:$4 sm:$0xff]  }
 0xae2   :  { %15938 = vmatprep.subr.bf16.mxu0 %v20157_v23  ;;  %16102 = vmatprep.subr.bf16.mxu1 %v20160_v16  ;;  %v20215_v23 = vld [vmem:[%s27425_s7 + $0x8c0] ss:$28 sps:$4 sm:$0xff]   ;;  %v20218_v16 = vld [vmem:[%s27425_s7 + $0x8c8] ss:$28 sps:$4 sm:$0xff]  }
 0xae5   :  { %15939 = vmatpush1.bf16.msra.mxu0 %v20155_v59  ;;  %16103 = vmatpush1.bf16.msra.mxu1 %v20158_v55  ;;  %v20226_v59 = vld [vmem:[%s27425_s7 + $0x904] ss:$28 sps:$4 sm:$0xff]   ;;  %v20221_v55 = vld [vmem:[%s27425_s7 + $0x8f8] ss:$28 sps:$4 sm:$0xff]  }
 0xae6   :  { %15940 = vmatprep.subr.bf16.mxu0 %v20163_v20  ;;  %16104 = vmatprep.subr.bf16.mxu1 %v20166_v9  ;;  %v20229_v20 = vld [vmem:[%s27425_s7 + $0x934] ss:$28 sps:$4 sm:$0xff]   ;;  %v20232_v9 = vld [vmem:[%s27425_s7 + $0x93c] ss:$28 sps:$4 sm:$0xff]  }
 0xae9   :  { %15941 = vmatpush1.bf16.msra.mxu0 %v20161_v12  ;;  %16105 = vmatpush1.bf16.msra.mxu1 %v20164_v43  ;;  %v20230_v12 = vld [vmem:[%s27425_s7 + $0x938] ss:$28 sps:$4 sm:$0xff]   ;;  %v20235_v43 = vld [vmem:[%s27425_s7 + $0x96c] ss:$28 sps:$4 sm:$0xff]  }
 0xaea   :  { %15951 = vmatprep.subr.bf16.mxu0 %v20169_v28  ;;  %16115 = vmatprep.subr.bf16.mxu1 %v20172_v54  ;;  %v20233_v28 = vld [vmem:[%s27425_s7 + $0x968] ss:$28 sps:$4 sm:$0xff]   ;;  %v20236_v54 = vld [vmem:[%s27425_s7 + $0x970] ss:$28 sps:$4 sm:$0xff]  }
 0xaec   :  { %15943 = vmatmul.mubr.bf16.vlgmr.msra.gmra.mrb[48].mxu0 %v26390_v31  ;;  %16107 = vmatmul.mubr.bf16.vlgmr.msra.gmra.mrb[80].mxu1 %v26390_v31 }
 0xaed   :  { %15952 = vmatpush1.bf16.msra.mxu0 %v20167_v29  ;;  %15983 = vmatprep.mubr.bf16.mxu0 %v26395_v45  ;;  %v20244_v29 = vld [vmem:[%s27425_s7 + $0x9ac] ss:$28 sps:$4 sm:$0xff]  }
 0xaee   :  { %16116 = vmatpush1.bf16.msra.mxu1 %v20170_v10  ;;  %16147 = vmatprep.mubr.bf16.mxu1 %v26395_v45  ;;  %v20239_v10 = vld [vmem:[%s27425_s7 + $0x9a0] ss:$28 sps:$4 sm:$0xff]  }
 0xaef   :  { %15953 = vmatprep.subr.bf16.mxu0 %v20175_v5  ;;  %16117 = vmatprep.subr.bf16.mxu1 %v20178_v22  ;;  %v20242_v5 = vld [vmem:[%s27425_s7 + $0x9a8] ss:$28 sps:$4 sm:$0xff]   ;;  %v20247_v22 = vld [vmem:[%s27425_s7 + $0x9dc] ss:$28 sps:$4 sm:$0xff]  }
 0xaf1   :  { %15954 = vmatpush1.bf16.msra.mxu0 %v20173_v32  ;;  %v20250_v32 = vld [vmem:[%s27425_s7 + $0x9e4] ss:$28 sps:$4 sm:$0xff]  }
 0xaf2   :  { %16118 = vmatpush1.bf16.msra.mxu1 %v20176_v30  ;;  %15955 = vmatprep.subr.bf16.mxu0 %v20181_v35  ;;  %v20245_v30 = vld [vmem:[%s27425_s7 + $0x9d8] ss:$28 sps:$4 sm:$0xff]   ;;  %v12495_v35 = vrot.slane %v26159_v34, %v22396_v14 }
 0xaf3   :  { %16119 = vmatprep.subr.bf16.mxu1 %v20184_v36  ;;  %v20248_v36 = vld [vmem:[%s27425_s7 + $0x9e0] ss:$28 sps:$4 sm:$0xff]  }
 0xaf5   :  { %15956 = vmatpush1.bf16.msra.mxu0 %v20179_v44  ;;  %v20253_v44 = vld [vmem:[%s27425_s7 + $0xa14] ss:$28 sps:$4 sm:$0xff]  }
 0xaf6   :  { %16120 = vmatpush1.bf16.msra.mxu1 %v20182_v38  ;;  %15957 = vmatprep.subr.bf16.mxu0 %v20187_v19  ;;  %v20256_v38 = vld [vmem:[%s27425_s7 + $0xa1c] ss:$28 sps:$4 sm:$0xff]   ;;  %v12507_v19 = vrot.slane %v26159_v34, %v22478_v33  ;;  %v20262_v33 = vld [vmem:[%s27425_s7 + $0xa54] ss:$28 sps:$4 sm:$0xff]  }
 0xaf7   :  { %16121 = vmatprep.subr.bf16.mxu1 %v20190_v52  ;;  %v20251_v52 = vld [vmem:[%s27425_s7 + $0xa10] ss:$28 sps:$4 sm:$0xff]  }
 0xaf9   :  { %15958 = vmatpush1.bf16.msra.mxu0 %v20185_v58  ;;  %v12953_v58 = vadd.f32 %v26265_v49, %v12495_v35  ;;  %v20257_v49 = vld [vmem:[%s27425_s7 + $0xa48] ss:$28 sps:$4 sm:$0xff]  }
 0xafa   :  { %16122 = vmatpush1.bf16.msra.mxu1 %v20188_v40  ;;  %15959 = vmatprep.subr.bf16.mxu0 %v20193_v41  ;;  %v20254_v40 = vld [vmem:[%s27425_s7 + $0xa18] ss:$28 sps:$4 sm:$0xff]   ;;  %v20259_v41 = vld [vmem:[%s27425_s7 + $0xa4c] ss:$28 sps:$4 sm:$0xff]  }
 0xafb   :  { %16123 = vmatprep.subr.bf16.mxu1 %v20196_v46  ;;  %v12996_v46 = vadd.f32 %v26271_v24, %v12507_v19  ;;  %v20268_v24 = vld [vmem:[%s27425_s7 + $0xa8c] ss:$28 sps:$4 sm:$0xff]   ;;  %v20322_v19 = vld [vmem:[%s27425_s7 + $0xc84] ss:$28 sps:$4 sm:$0xff]  }
 0xafc   :  { %v20316_v35 = vld [vmem:[%s27425_s7 + $0xc4c] ss:$28 sps:$4 sm:$0xff]  }
 0xafd   :  { %15960 = vmatpush1.bf16.msra.mxu0 %v20191_v48  ;;  %v13004_v48 = vmax.f32 %v12953_v58, 0.0  ;;  %v20320_v58 = vld [vmem:[%s27425_s7 + $0xc80] ss:$28 sps:$4 sm:$0xff]  }
 0xafe   :  { %16124 = vmatpush1.bf16.msra.mxu1 %v20194_v47  ;;  %15961 = vmatprep.subr.bf16.mxu0 %v20199_v21  ;;  %v20260_v47 = vld [vmem:[%s27425_s7 + $0xa50] ss:$28 sps:$4 sm:$0xff]   ;;  %v20265_v21 = vld [vmem:[%s27425_s7 + $0xa84] ss:$28 sps:$4 sm:$0xff]  }
 0xaff   :  { %16125 = vmatprep.subr.bf16.mxu1 %v20202_v57  ;;  %v13007_v57 = vmax.f32 %v12996_v46, 0.0  ;;  %v20326_v46 = vld [vmem:[%s27425_s7 + $0xcb8] ss:$28 sps:$4 sm:$0xff]  }
 0xb01   :  { %15962 = vmatpush1.bf16.msra.mxu0 %v20197_v61  ;;  %v20263_v61 = vld [vmem:[%s27425_s7 + $0xa80] ss:$28 sps:$4 sm:$0xff]  }
 0xb02   :  { %16126 = vmatpush1.bf16.msra.mxu1 %v20200_v60  ;;  %15963 = vmatprep.subr.bf16.mxu0 %v20205_v63  ;;  %v26596_v60 = vpack.c.bf16 %v13004_v48, %v13004_v48  ;;  %v20266_v63 = vld [vmem:[%s27425_s7 + $0xa88] ss:$28 sps:$4 sm:$0xff]   ;;  %v20334_v48 = vld [vmem:[%s27425_s7 + $0xcf4] ss:$28 sps:$4 sm:$0xff]  }
 0xb03   :  { %16127 = vmatprep.subr.bf16.mxu1 %v20208_v0  ;;  %v20271_v0 = vld [vmem:[%s27425_s7 + $0xabc] ss:$28 sps:$4 sm:$0xff]  }
 0xb05   :  { %15964 = vmatpush1.bf16.msra.mxu0 %v20203_v1  ;;  %v26604_v1 = vpack.c.bf16 %v13007_v57, %v13007_v57  ;;  %v20340_v57 = vld [vmem:[%s27425_s7 + $0xd2c] ss:$28 sps:$4 sm:$0xff]  }
 0xb06   :  { %16128 = vmatpush1.bf16.msra.mxu1 %v20206_v2  ;;  %15965 = vmatprep.subr.bf16.mxu0 %v20211_v51  ;;  %v20274_v2 = vld [vmem:[%s27425_s7 + $0xac4] ss:$28 sps:$4 sm:$0xff]   ;;  %v20269_v51 = vld [vmem:[%s27425_s7 + $0xab8] ss:$28 sps:$4 sm:$0xff]  }
 0xb07   :  { %16129 = vmatprep.subr.bf16.mxu1 %v20214_v3  ;;  %v20272_v3 = vld [vmem:[%s27425_s7 + $0xac0] ss:$28 sps:$4 sm:$0xff]  }
 0xb09   :  { %15966 = vmatpush1.bf16.msra.mxu0 %v20209_v4  ;;  %v20277_v4 = vld [vmem:[%s27425_s7 + $0xaf4] ss:$28 sps:$4 sm:$0xff]  }
 0xb0a   :  { %16130 = vmatpush1.bf16.msra.mxu1 %v20212_v42  ;;  %15967 = vmatprep.subr.bf16.mxu0 %v20217_v13  ;;  %v20280_v42 = vld [vmem:[%s27425_s7 + $0xafc] ss:$28 sps:$4 sm:$0xff]   ;;  %v20275_v13 = vld [vmem:[%s27425_s7 + $0xaf0] ss:$28 sps:$4 sm:$0xff]  }
 0xb0b   :  { %16131 = vmatprep.subr.bf16.mxu1 %v20220_v7  ;;  %v20278_v7 = vld [vmem:[%s27425_s7 + $0xaf8] ss:$28 sps:$4 sm:$0xff]  }
 0xb0d   :  { %15968 = vmatpush1.bf16.msra.mxu0 %v20215_v23  ;;  %v20283_v23 = vld [vmem:[%s27425_s7 + $0xb2c] ss:$28 sps:$4 sm:$0xff]  }
 0xb0e   :  { %16132 = vmatpush1.bf16.msra.mxu1 %v20218_v16  ;;  %15969 = vmatprep.subr.bf16.mxu0 %v20223_v17  ;;  %v20286_v16 = vld [vmem:[%s27425_s7 + $0xb34] ss:$28 sps:$4 sm:$0xff]   ;;  %v20281_v17 = vld [vmem:[%s27425_s7 + $0xb28] ss:$28 sps:$4 sm:$0xff]  }
 0xb0f   :  { %16133 = vmatprep.subr.bf16.mxu1 %v20226_v59  ;;  %v20284_v59 = vld [vmem:[%s27425_s7 + $0xb30] ss:$28 sps:$4 sm:$0xff]  }
 0xb11   :  { %15970 = vmatpush1.bf16.msra.mxu0 %v20221_v55  ;;  %v20289_v55 = vld [vmem:[%s27425_s7 + $0xb64] ss:$28 sps:$4 sm:$0xff]  }
 0xb12   :  { %16134 = vmatpush1.bf16.msra.mxu1 %v20224_v56  ;;  %15971 = vmatprep.subr.bf16.mxu0 %v20229_v20  ;;  %v20292_v56 = vld [vmem:[%s27425_s7 + $0xb6c] ss:$28 sps:$4 sm:$0xff]   ;;  %v20287_v20 = vld [vmem:[%s27425_s7 + $0xb60] ss:$28 sps:$4 sm:$0xff]  }
 0xb13   :  { %16135 = vmatprep.subr.bf16.mxu1 %v20232_v9  ;;  %v20290_v9 = vld [vmem:[%s27425_s7 + $0xb68] ss:$28 sps:$4 sm:$0xff]  }
 0xb15   :  { %15972 = vmatpush1.bf16.msra.mxu0 %v20227_v53  ;;  %v20295_v53 = vld [vmem:[%s27425_s7 + $0xb9c] ss:$28 sps:$4 sm:$0xff]  }
 0xb16   :  { %16136 = vmatpush1.bf16.msra.mxu1 %v20230_v12  ;;  %15973 = vmatprep.subr.bf16.mxu0 %v20235_v43  ;;  %v20298_v12 = vld [vmem:[%s27425_s7 + $0xba4] ss:$28 sps:$4 sm:$0xff]   ;;  %v20293_v43 = vld [vmem:[%s27425_s7 + $0xb98] ss:$28 sps:$4 sm:$0xff]  }
 0xb17   :  { %16137 = vmatprep.subr.bf16.mxu1 %v20238_v26  ;;  %v20296_v26 = vld [vmem:[%s27425_s7 + $0xba0] ss:$28 sps:$4 sm:$0xff]  }
 0xb19   :  { %15974 = vmatpush1.bf16.msra.mxu0 %v20233_v28  ;;  %v20301_v28 = vld [vmem:[%s27425_s7 + $0xbd4] ss:$28 sps:$4 sm:$0xff]  }
 0xb1a   :  { %16138 = vmatpush1.bf16.msra.mxu1 %v20236_v54  ;;  %15975 = vmatprep.subr.bf16.mxu0 %v20241_v39  ;;  %v20304_v54 = vld [vmem:[%s27425_s7 + $0xbdc] ss:$28 sps:$4 sm:$0xff]   ;;  %v20299_v39 = vld [vmem:[%s27425_s7 + $0xbd0] ss:$28 sps:$4 sm:$0xff]  }
 0xb1b   :  { %16139 = vmatprep.subr.bf16.mxu1 %v20244_v29  ;;  %v20302_v29 = vld [vmem:[%s27425_s7 + $0xbd8] ss:$28 sps:$4 sm:$0xff]  }
 0xb1d   :  { %15976 = vmatpush1.bf16.msra.mxu0 %v20239_v10  ;;  %v20307_v10 = vld [vmem:[%s27425_s7 + $0xc0c] ss:$28 sps:$4 sm:$0xff]  }
 0xb1e   :  { %16140 = vmatpush1.bf16.msra.mxu1 %v20242_v5  ;;  %15977 = vmatprep.subr.bf16.mxu0 %v20247_v22  ;;  %v20310_v5 = vld [vmem:[%s27425_s7 + $0xc14] ss:$28 sps:$4 sm:$0xff]   ;;  %v20305_v22 = vld [vmem:[%s27425_s7 + $0xc08] ss:$28 sps:$4 sm:$0xff]  }
 0xb1f   :  { %16141 = vmatprep.subr.bf16.mxu1 %v20250_v32  ;;  %v20308_v32 = vld [vmem:[%s27425_s7 + $0xc10] ss:$28 sps:$4 sm:$0xff]  }
 0xb21   :  { %15978 = vmatpush1.bf16.msra.mxu0 %v20245_v30  ;;  %v20313_v30 = vld [vmem:[%s27425_s7 + $0xc44] ss:$28 sps:$4 sm:$0xff]  }
 0xb22   :  { %16142 = vmatpush1.bf16.msra.mxu1 %v20248_v36  ;;  %15979 = vmatprep.subr.bf16.mxu0 %v20253_v44  ;;  %v20311_v36 = vld [vmem:[%s27425_s7 + $0xc40] ss:$28 sps:$4 sm:$0xff]   ;;  %v20314_v44 = vld [vmem:[%s27425_s7 + $0xc48] ss:$28 sps:$4 sm:$0xff]  }
 0xb23   :  { %16143 = vmatprep.subr.bf16.mxu1 %v20256_v38  ;;  %v20319_v38 = vld [vmem:[%s27425_s7 + $0xc7c] ss:$28 sps:$4 sm:$0xff]  }
 0xb25   :  { %15980 = vmatpush1.bf16.msra.mxu0 %v20251_v52  ;;  %v20317_v52 = vld [vmem:[%s27425_s7 + $0xc78] ss:$28 sps:$4 sm:$0xff]  }
 0xb26   :  { %16144 = vmatpush1.bf16.msra.mxu1 %v20254_v40  ;;  %15981 = vmatprep.subr.bf16.mxu0 %v20259_v41  ;;  %v20325_v40 = vld [vmem:[%s27425_s7 + $0xcb4] ss:$28 sps:$4 sm:$0xff]   ;;  %v20328_v41 = vld [vmem:[%s27425_s7 + $0xcbc] ss:$28 sps:$4 sm:$0xff]  }
 0xb27   :  { %16145 = vmatprep.subr.bf16.mxu1 %v20262_v33  ;;  %v20323_v33 = vld [vmem:[%s27425_s7 + $0xcb0] ss:$28 sps:$4 sm:$0xff]  }
 0xb29   :  { %15982 = vmatpush1.bf16.msra.mxu0 %v20257_v49  ;;  %v20331_v49 = vld [vmem:[%s27425_s7 + $0xcec] ss:$28 sps:$4 sm:$0xff]  }
 0xb2a   :  { %16146 = vmatpush1.bf16.msra.mxu1 %v20260_v47  ;;  %15992 = vmatprep.subr.bf16.mxu0 %v20265_v21  ;;  %v20329_v47 = vld [vmem:[%s27425_s7 + $0xce8] ss:$28 sps:$4 sm:$0xff]   ;;  %v20332_v21 = vld [vmem:[%s27425_s7 + $0xcf0] ss:$28 sps:$4 sm:$0xff]  }
 0xb2b   :  { %16156 = vmatprep.subr.bf16.mxu1 %v20268_v24  ;;  %v20337_v24 = vld [vmem:[%s27425_s7 + $0xd24] ss:$28 sps:$4 sm:$0xff]  }
 0xb2c   :  { %15984 = vmatmul.mubr.bf16.vlgmr.msra.gmra.mrb[48].mxu0 %v26596_v60 }
 0xb2d   :  { %16148 = vmatmul.mubr.bf16.vlgmr.msra.gmra.mrb[80].mxu1 %v26596_v60  ;;  %15993 = vmatpush1.bf16.msra.mxu0 %v20263_v61  ;;  %v20335_v61 = vld [vmem:[%s27425_s7 + $0xd20] ss:$28 sps:$4 sm:$0xff]  }
 0xb2e   :  { %16024 = vmatprep.mubr.bf16.mxu0 %v26604_v1  ;;  %16157 = vmatpush1.bf16.msra.mxu1 %v20266_v63  ;;  %v20338_v63 = vld [vmem:[%s27425_s7 + $0xd28] ss:$28 sps:$4 sm:$0xff]  }
 0xb2f   :  { %16188 = vmatprep.mubr.bf16.mxu1 %v26604_v1  ;;  %15994 = vmatprep.subr.bf16.mxu0 %v20271_v0  ;;  %v20343_v0 = vld [vmem:[%s27425_s7 + $0xd5c] ss:$28 sps:$4 sm:$0xff]  }
 0xb30   :  { %16158 = vmatprep.subr.bf16.mxu1 %v20274_v2  ;;  %v20346_v2 = vld [vmem:[%s27425_s7 + $0xd64] ss:$28 sps:$4 sm:$0xff]  }
 0xb31   :  { %15995 = vmatpush1.bf16.msra.mxu0 %v20269_v51  ;;  %v20341_v51 = vld [vmem:[%s27425_s7 + $0xd58] ss:$28 sps:$4 sm:$0xff]  }
 0xb32   :  { %16159 = vmatpush1.bf16.msra.mxu1 %v20272_v3  ;;  %15996 = vmatprep.subr.bf16.mxu0 %v20277_v4  ;;  %v12503_v3 = vrot.slane %v26159_v34, %v22475_v11  ;;  %v20344_v4 = vld [vmem:[%s27425_s7 + $0xd60] ss:$28 sps:$4 sm:$0xff]   ;;  %v20347_v34 = vld [vmem:[%s27425_s7 + $0xd90] ss:$28 sps:$4 sm:$0xff]  }
 0xb33   :  { %16160 = vmatprep.subr.bf16.mxu1 %v20280_v42  ;;  %v20349_v42 = vld [vmem:[%s27425_s7 + $0xd94] ss:$28 sps:$4 sm:$0xff]  }
 0xb35   :  { %15997 = vmatpush1.bf16.msra.mxu0 %v20275_v13  ;;  %v20352_v13 = vld [vmem:[%s27425_s7 + $0xd9c] ss:$28 sps:$4 sm:$0xff]  }
 0xb36   :  { %16161 = vmatpush1.bf16.msra.mxu1 %v20278_v7  ;;  %15998 = vmatprep.subr.bf16.mxu0 %v20283_v23  ;;  %v12994_v7 = vadd.f32 %v26267_v37, %v12503_v3  ;;  %v20350_v23 = vld [vmem:[%s27425_s7 + $0xd98] ss:$28 sps:$4 sm:$0xff]   ;;  %v20353_v37 = vld [vmem:[%s27425_s7 + $0xdc8] ss:$28 sps:$4 sm:$0xff]  }
 0xb37   :  { %16162 = vmatprep.subr.bf16.mxu1 %v20286_v16  ;;  %v20355_v16 = vld [vmem:[%s27425_s7 + $0xdcc] ss:$28 sps:$4 sm:$0xff]  }
 0xb38   :  { %v20404_v3 = vld [vmem:[%s27425_s7 + $0x208] ss:$28 sps:$4 sm:$0xff]  }
 0xb39   :  { %15999 = vmatpush1.bf16.msra.mxu0 %v20281_v17  ;;  %v20358_v17 = vld [vmem:[%s27425_s7 + $0xdd4] ss:$28 sps:$4 sm:$0xff]  }
 0xb3a   :  { %16163 = vmatpush1.bf16.msra.mxu1 %v20284_v59  ;;  %16000 = vmatprep.subr.bf16.mxu0 %v20289_v55  ;;  %v13006_v59 = vmax.f32 %v12994_v7, 0.0  ;;  %v20356_v55 = vld [vmem:[%s27425_s7 + $0xdd0] ss:$28 sps:$4 sm:$0xff]   ;;  %v20413_v7 = vld [vmem:[%s27425_s7 + $0x408] ss:$28 sps:$4 sm:$0xff]  }
 0xb3b   :  { %16164 = vmatprep.subr.bf16.mxu1 %v20292_v56  ;;  %v20361_v56 = vld [vmem:[%s27425_s7 + $0x14] ss:$28 sps:$4 sm:$0xff]  }
 0xb3d   :  { %16001 = vmatpush1.bf16.msra.mxu0 %v20287_v20  ;;  %v20362_v20 = vld [vmem:[%s27425_s7 + $0x1d8] ss:$28 sps:$4 sm:$0xff]  }
 0xb3e   :  { %16165 = vmatpush1.bf16.msra.mxu1 %v20290_v9  ;;  %16002 = vmatprep.subr.bf16.mxu0 %v20295_v53  ;;  %v20359_v9 = vld [vmem:[%s27425_s7 + $0x10] ss:$28 sps:$4 sm:$0xff]   ;;  %v26799_v53 = vpack.c.bf16 %v13006_v59, %v13006_v59 }
 0xb3f   :  { %16166 = vmatprep.subr.bf16.mxu1 %v20298_v12  ;;  %v20363_v12 = vld [vmem:[%s27425_s7 + $0x18] ss:$28 sps:$4 sm:$0xff]  }
 0xb40   :  { %v20421_v59 = vld [vmem:[%s27425_s7 + $0x2b4] ss:$28 sps:$4 sm:$0xff]  }
 0xb41   :  { %16003 = vmatpush1.bf16.msra.mxu0 %v20293_v43  ;;  %v20366_v43 = vld [vmem:[%s27425_s7 + $0x4c] ss:$28 sps:$4 sm:$0xff]  }
 0xb42   :  { %16167 = vmatpush1.bf16.msra.mxu1 %v20296_v26  ;;  %16004 = vmatprep.subr.bf16.mxu0 %v20301_v28  ;;  %v20367_v26 = vld [vmem:[%s27425_s7 + $0x210] ss:$28 sps:$4 sm:$0xff]   ;;  %v20364_v28 = vld [vmem:[%s27425_s7 + $0x48] ss:$28 sps:$4 sm:$0xff]  }
 0xb43   :  { %16168 = vmatprep.subr.bf16.mxu1 %v20304_v54  ;;  %v20368_v54 = vld [vmem:[%s27425_s7 + $0x50] ss:$28 sps:$4 sm:$0xff]  }
 0xb45   :  { %16005 = vmatpush1.bf16.msra.mxu0 %v20299_v39  ;;  %v20371_v39 = vld [vmem:[%s27425_s7 + $0x84] ss:$28 sps:$4 sm:$0xff]  }
 0xb46   :  { %16169 = vmatpush1.bf16.msra.mxu1 %v20302_v29  ;;  %16006 = vmatprep.subr.bf16.mxu0 %v20307_v10  ;;  %v20372_v29 = vld [vmem:[%s27425_s7 + $0x248] ss:$28 sps:$4 sm:$0xff]   ;;  %v20369_v10 = vld [vmem:[%s27425_s7 + $0x80] ss:$28 sps:$4 sm:$0xff]  }
 0xb47   :  { %16170 = vmatprep.subr.bf16.mxu1 %v20310_v5  ;;  %v20373_v5 = vld [vmem:[%s27425_s7 + $0x88] ss:$28 sps:$4 sm:$0xff]  }
 0xb49   :  { %16007 = vmatpush1.bf16.msra.mxu0 %v20305_v22  ;;  %v20377_v22 = vld [vmem:[%s27425_s7 + $0x280] ss:$28 sps:$4 sm:$0xff]  }
 0xb4a   :  { %16171 = vmatpush1.bf16.msra.mxu1 %v20308_v32  ;;  %16008 = vmatprep.subr.bf16.mxu0 %v20313_v30  ;;  %v20374_v32 = vld [vmem:[%s27425_s7 + $0xb8] ss:$28 sps:$4 sm:$0xff]   ;;  %v20378_v30 = vld [vmem:[%s27425_s7 + $0xc0] ss:$28 sps:$4 sm:$0xff]  }
 0xb4b   :  { %16172 = vmatprep.subr.bf16.mxu1 %v20316_v35  ;;  %v20381_v35 = vld [vmem:[%s27425_s7 + $0xf4] ss:$28 sps:$4 sm:$0xff]  }
 0xb4d   :  { %16009 = vmatpush1.bf16.msra.mxu0 %v20311_v36  ;;  %v20382_v36 = vld [vmem:[%s27425_s7 + $0x2b8] ss:$28 sps:$4 sm:$0xff]  }
 0xb4e   :  { %16173 = vmatpush1.bf16.msra.mxu1 %v20314_v44  ;;  %16010 = vmatprep.subr.bf16.mxu0 %v20319_v38  ;;  %v20379_v44 = vld [vmem:[%s27425_s7 + $0xf0] ss:$28 sps:$4 sm:$0xff]   ;;  %v20383_v38 = vld [vmem:[%s27425_s7 + $0xf8] ss:$28 sps:$4 sm:$0xff]  }
 0xb4f   :  { %16174 = vmatprep.subr.bf16.mxu1 %v20322_v19  ;;  %v20386_v19 = vld [vmem:[%s27425_s7 + $0x12c] ss:$28 sps:$4 sm:$0xff]  }
 0xb51   :  { %16011 = vmatpush1.bf16.msra.mxu0 %v20317_v52  ;;  %v20387_v52 = vld [vmem:[%s27425_s7 + $0x2f0] ss:$28 sps:$4 sm:$0xff]  }
 0xb52   :  { %16175 = vmatpush1.bf16.msra.mxu1 %v20320_v58  ;;  %16012 = vmatprep.subr.bf16.mxu0 %v20325_v40  ;;  %v20384_v58 = vld [vmem:[%s27425_s7 + $0x128] ss:$28 sps:$4 sm:$0xff]   ;;  %v20388_v40 = vld [vmem:[%s27425_s7 + $0x130] ss:$28 sps:$4 sm:$0xff]  }
 0xb53   :  { %16176 = vmatprep.subr.bf16.mxu1 %v20328_v41  ;;  %v20391_v41 = vld [vmem:[%s27425_s7 + $0x164] ss:$28 sps:$4 sm:$0xff]  }
 0xb55   :  { %16013 = vmatpush1.bf16.msra.mxu0 %v20323_v33  ;;  %v20392_v33 = vld [vmem:[%s27425_s7 + $0x328] ss:$28 sps:$4 sm:$0xff]  }
 0xb56   :  { %16177 = vmatpush1.bf16.msra.mxu1 %v20326_v46  ;;  %16014 = vmatprep.subr.bf16.mxu0 %v20331_v49  ;;  %v20389_v46 = vld [vmem:[%s27425_s7 + $0x160] ss:$28 sps:$4 sm:$0xff]   ;;  %v20393_v49 = vld [vmem:[%s27425_s7 + $0x168] ss:$28 sps:$4 sm:$0xff]  }
 0xb57   :  { %16178 = vmatprep.subr.bf16.mxu1 %v20334_v48  ;;  %v20396_v48 = vld [vmem:[%s27425_s7 + $0x19c] ss:$28 sps:$4 sm:$0xff]  }
 0xb59   :  { %16015 = vmatpush1.bf16.msra.mxu0 %v20329_v47  ;;  %v20397_v47 = vld [vmem:[%s27425_s7 + $0x360] ss:$28 sps:$4 sm:$0xff]  }
 0xb5a   :  { %16179 = vmatpush1.bf16.msra.mxu1 %v20332_v21  ;;  %16016 = vmatprep.subr.bf16.mxu0 %v20337_v24  ;;  %v20394_v21 = vld [vmem:[%s27425_s7 + $0x198] ss:$28 sps:$4 sm:$0xff]   ;;  %v20398_v24 = vld [vmem:[%s27425_s7 + $0x1a0] ss:$28 sps:$4 sm:$0xff]  }
 0xb5b   :  { %16180 = vmatprep.subr.bf16.mxu1 %v20340_v57  ;;  %v20401_v57 = vld [vmem:[%s27425_s7 + $0x1d4] ss:$28 sps:$4 sm:$0xff]  }
 0xb5d   :  { %16017 = vmatpush1.bf16.msra.mxu0 %v20335_v61  ;;  %v20402_v61 = vld [vmem:[%s27425_s7 + $0x558] ss:$28 sps:$4 sm:$0xff]  }
 0xb5e   :  { %16181 = vmatpush1.bf16.msra.mxu1 %v20338_v63  ;;  %16018 = vmatprep.subr.bf16.mxu0 %v20343_v0  ;;  %v20399_v63 = vld [vmem:[%s27425_s7 + $0x1d0] ss:$28 sps:$4 sm:$0xff]   ;;  %v20403_v0 = vld [vmem:[%s27425_s7 + $0x398] ss:$28 sps:$4 sm:$0xff]  }
 0xb5f   :  { %16182 = vmatprep.subr.bf16.mxu1 %v20346_v2  ;;  %v20406_v2 = vld [vmem:[%s27425_s7 + $0x20c] ss:$28 sps:$4 sm:$0xff]  }
 0xb61   :  { %16019 = vmatpush1.bf16.msra.mxu0 %v20341_v51  ;;  %v20407_v51 = vld [vmem:[%s27425_s7 + $0x590] ss:$28 sps:$4 sm:$0xff]  }
 0xb62   :  { %16183 = vmatpush1.bf16.msra.mxu1 %v20344_v4  ;;  %16020 = vmatprep.subr.bf16.mxu0 %v20349_v42  ;;  %v20408_v4 = vld [vmem:[%s27425_s7 + $0x3d0] ss:$28 sps:$4 sm:$0xff]   ;;  %v20411_v42 = vld [vmem:[%s27425_s7 + $0x244] ss:$28 sps:$4 sm:$0xff]  }
 0xb63   :  { %16184 = vmatprep.subr.bf16.mxu1 %v20352_v13  ;;  %v20412_v13 = vld [vmem:[%s27425_s7 + $0x5c8] ss:$28 sps:$4 sm:$0xff]  }
 0xb65   :  { %16021 = vmatpush1.bf16.msra.mxu0 %v20347_v34  ;;  %v20409_v34 = vld [vmem:[%s27425_s7 + $0x240] ss:$28 sps:$4 sm:$0xff]  }
 0xb66   :  { %16185 = vmatpush1.bf16.msra.mxu1 %v20350_v23  ;;  %16022 = vmatprep.subr.bf16.mxu0 %v20355_v16  ;;  %v20416_v23 = vld [vmem:[%s27425_s7 + $0x27c] ss:$28 sps:$4 sm:$0xff]  }
 0xb67   :  { %16186 = vmatprep.subr.bf16.mxu1 %v20358_v17  ;;  %v20417_v16 = vld [vmem:[%s27425_s7 + $0x600] ss:$28 sps:$4 sm:$0xff]   ;;  %v20414_v17 = vld [vmem:[%s27425_s7 + $0x278] ss:$28 sps:$4 sm:$0xff]  }
 0xb69   :  { %16023 = vmatpush1.bf16.msra.mxu0 %v20353_v37  ;;  %v20418_v37 = vld [vmem:[%s27425_s7 + $0x440] ss:$28 sps:$4 sm:$0xff]  }
 0xb6a   :  { %16187 = vmatpush1.bf16.msra.mxu1 %v20356_v55  ;;  %16197 = vmatprep.subr.bf16.mxu0 %v20361_v56  ;;  %v20422_v55 = vld [vmem:[%s27425_s7 + $0x638] ss:$28 sps:$4 sm:$0xff]   ;;  %v20419_v56 = vld [vmem:[%s27425_s7 + $0x2b0] ss:$28 sps:$4 sm:$0xff]  }
 0xb6b   :  { %18907 = vmatprep.subr.bf16.mxu1 %v20362_v20  ;;  %v20423_v20 = vld [vmem:[%s27425_s7 + $0x478] ss:$28 sps:$4 sm:$0xff]  }
 0xb6c   :  { %16025 = vmatmul.mubr.bf16.vlgmr.msra.gmra.mrb[48].mxu0 %v26799_v53 }
 0xb6d   :  { %16189 = vmatmul.mubr.bf16.vlgmr.msra.gmra.mrb[80].mxu1 %v26799_v53  ;;  %16198 = vmatpush1.bf16.msra.mxu0 %v20359_v9  ;;  %v20426_v9 = vld [vmem:[%s27425_s7 + $0x2ec] ss:$28 sps:$4 sm:$0xff]  }
 0xb6e   :  { %16229 = vmatprep.mubr.bf16.mxu0 %v26169_v27  ;;  %18908 = vmatpush3.bf16.msra.mxu1 %v20363_v12  ;;  %v20427_v12 = vld [vmem:[%s27425_s7 + $0x670] ss:$28 sps:$4 sm:$0xff]  }
 0xb6f   :  { %16393 = vmatprep.mubr.bf16.mxu1 %v26169_v27  ;;  %16199 = vmatprep.subr.bf16.mxu0 %v20366_v43  ;;  %v20376_v27 = vld [vmem:[%s27425_s7 + $0xbc] ss:$28 sps:$4 sm:$0xff]   ;;  %v20424_v43 = vld [vmem:[%s27425_s7 + $0x2e8] ss:$28 sps:$4 sm:$0xff]  }
 0xb70   :  { %18909 = vmatprep.subr.bf16.mxu1 %v20367_v26  ;;  %v20428_v26 = vld [vmem:[%s27425_s7 + $0x4b0] ss:$28 sps:$4 sm:$0xff]  }
 0xb71   :  { %16200 = vmatpush1.bf16.msra.mxu0 %v20364_v28  ;;  %v20431_v28 = vld [vmem:[%s27425_s7 + $0x324] ss:$28 sps:$4 sm:$0xff]  }
 0xb72   :  { %18910 = vmatpush3.bf16.msra.mxu1 %v20368_v54  ;;  %16201 = vmatprep.subr.bf16.mxu0 %v20371_v39  ;;  %v20432_v54 = vld [vmem:[%s27425_s7 + $0x6a8] ss:$28 sps:$4 sm:$0xff]   ;;  %v20429_v39 = vld [vmem:[%s27425_s7 + $0x320] ss:$28 sps:$4 sm:$0xff]  }
 0xb73   :  { %18911 = vmatprep.subr.bf16.mxu1 %v20372_v29  ;;  %v20433_v29 = vld [vmem:[%s27425_s7 + $0x4e8] ss:$28 sps:$4 sm:$0xff]  }
 0xb75   :  { %16202 = vmatpush1.bf16.msra.mxu0 %v20369_v10  ;;  %v20436_v10 = vld [vmem:[%s27425_s7 + $0x35c] ss:$28 sps:$4 sm:$0xff]  }
 0xb76   :  { %18912 = vmatpush3.bf16.msra.mxu1 %v20373_v5  ;;  %16203 = vmatprep.subr.bf16.mxu0 %v20376_v27  ;;  %v20437_v5 = vld [vmem:[%s27425_s7 + $0x6e0] ss:$28 sps:$4 sm:$0xff]   ;;  %v20434_v27 = vld [vmem:[%s27425_s7 + $0x358] ss:$28 sps:$4 sm:$0xff]  }
 0xb77   :  { %18913 = vmatprep.subr.bf16.mxu1 %v20377_v22  ;;  %v20438_v22 = vld [vmem:[%s27425_s7 + $0x520] ss:$28 sps:$4 sm:$0xff]  }
 0xb79   :  { %16204 = vmatpush1.bf16.msra.mxu0 %v20374_v32  ;;  %v20441_v32 = vld [vmem:[%s27425_s7 + $0x394] ss:$28 sps:$4 sm:$0xff]  }
 0xb7a   :  { %18914 = vmatpush3.bf16.msra.mxu1 %v20378_v30  ;;  %16205 = vmatprep.subr.bf16.mxu0 %v20381_v35  ;;  %v20442_v30 = vld [vmem:[%s27425_s7 + $0x8d8] ss:$28 sps:$4 sm:$0xff]   ;;  %v20439_v35 = vld [vmem:[%s27425_s7 + $0x390] ss:$28 sps:$4 sm:$0xff]  }
 0xb7b   :  { %18915 = vmatprep.subr.bf16.mxu1 %v20382_v36  ;;  %v20443_v36 = vld [vmem:[%s27425_s7 + $0x718] ss:$28 sps:$4 sm:$0xff]  }
 0xb7d   :  { %16206 = vmatpush1.bf16.msra.mxu0 %v20379_v44  ;;  %v20446_v44 = vld [vmem:[%s27425_s7 + $0x3cc] ss:$28 sps:$4 sm:$0xff]  }
 0xb7e   :  { %18916 = vmatpush3.bf16.msra.mxu1 %v20383_v38  ;;  %16207 = vmatprep.subr.bf16.mxu0 %v20386_v19  ;;  %v20447_v38 = vld [vmem:[%s27425_s7 + $0x910] ss:$28 sps:$4 sm:$0xff]   ;;  %v20444_v19 = vld [vmem:[%s27425_s7 + $0x3c8] ss:$28 sps:$4 sm:$0xff]  }
 0xb7f   :  { %18917 = vmatprep.subr.bf16.mxu1 %v20387_v52  ;;  %v20448_v52 = vld [vmem:[%s27425_s7 + $0x750] ss:$28 sps:$4 sm:$0xff]  }
 0xb81   :  { %16208 = vmatpush1.bf16.msra.mxu0 %v20384_v58  ;;  %v20452_v58 = vld [vmem:[%s27425_s7 + $0x948] ss:$28 sps:$4 sm:$0xff]  }
 0xb82   :  { %18918 = vmatpush3.bf16.msra.mxu1 %v20388_v40  ;;  %16209 = vmatprep.subr.bf16.mxu0 %v20391_v41  ;;  %v20453_v40 = vld [vmem:[%s27425_s7 + $0x788] ss:$28 sps:$4 sm:$0xff]   ;;  %v20456_v41 = vld [vmem:[%s27425_s7 + $0x43c] ss:$28 sps:$4 sm:$0xff]  }
 0xb83   :  { %18919 = vmatprep.subr.bf16.mxu1 %v20392_v33  ;;  %v20457_v33 = vld [vmem:[%s27425_s7 + $0x980] ss:$28 sps:$4 sm:$0xff]  }
 0xb85   :  { %16210 = vmatpush1.bf16.msra.mxu0 %v20389_v46  ;;  %v20454_v46 = vld [vmem:[%s27425_s7 + $0x438] ss:$28 sps:$4 sm:$0xff]  }
 0xb86   :  { %18920 = vmatpush3.bf16.msra.mxu1 %v20393_v49  ;;  %16211 = vmatprep.subr.bf16.mxu0 %v20396_v48  ;;  %v20458_v49 = vld [vmem:[%s27425_s7 + $0x7c0] ss:$28 sps:$4 sm:$0xff]   ;;  %v20461_v48 = vld [vmem:[%s27425_s7 + $0x474] ss:$28 sps:$4 sm:$0xff]  }
 0xb87   :  { %18921 = vmatprep.subr.bf16.mxu1 %v20397_v47  ;;  %v20462_v47 = vld [vmem:[%s27425_s7 + $0x9b8] ss:$28 sps:$4 sm:$0xff]  }
 0xb89   :  { %16212 = vmatpush1.bf16.msra.mxu0 %v20394_v21  ;;  %v20459_v21 = vld [vmem:[%s27425_s7 + $0x470] ss:$28 sps:$4 sm:$0xff]  }
 0xb8a   :  { %18922 = vmatpush3.bf16.msra.mxu1 %v20398_v24  ;;  %16213 = vmatprep.subr.bf16.mxu0 %v20401_v57  ;;  %v20463_v24 = vld [vmem:[%s27425_s7 + $0x7f8] ss:$28 sps:$4 sm:$0xff]   ;;  %v20466_v57 = vld [vmem:[%s27425_s7 + $0x4ac] ss:$28 sps:$4 sm:$0xff]  }
 0xb8b   :  { %18929 = vmatprep.subr.bf16.mxu1 %v20402_v61  ;;  %v20467_v61 = vld [vmem:[%s27425_s7 + $0x9f0] ss:$28 sps:$4 sm:$0xff]  }
 0xb8d   :  { %16394 = vmatmul.mubr.bf16.vlgmr.msra.gmra.mrb[84].mxu1 %v26177_v62  ;;  %16214 = vmatpush1.bf16.msra.mxu0 %v20399_v63  ;;  %v20464_v63 = vld [vmem:[%s27425_s7 + $0x4a8] ss:$28 sps:$4 sm:$0xff]  }
 0xb8e   :  { %18930 = vmatpush3.bf16.msra.mxu1 %v20403_v0  ;;  %16433 = vmatprep.mubr.bf16.mxu1 %v26187_v18  ;;  %v20468_v0 = vld [vmem:[%s27425_s7 + $0x830] ss:$28 sps:$4 sm:$0xff]  }
 0xb8f   :  { %16215 = vmatprep.subr.bf16.mxu0 %v20406_v2  ;;  %18931 = vmatprep.subr.bf16.mxu1 %v20407_v51  ;;  %v20471_v2 = vld [vmem:[%s27425_s7 + $0x4e4] ss:$28 sps:$4 sm:$0xff]  }
 0xb90   :  { %v20472_v51 = vld [vmem:[%s27425_s7 + $0xa28] ss:$28 sps:$4 sm:$0xff]  }
 0xb91   :  { %16216 = vmatpush1.bf16.msra.mxu0 %v20404_v3  ;;  %v20469_v3 = vld [vmem:[%s27425_s7 + $0x4e0] ss:$28 sps:$4 sm:$0xff]  }
 0xb92   :  { %18932 = vmatpush3.bf16.msra.mxu1 %v20408_v4  ;;  %16217 = vmatprep.subr.bf16.mxu0 %v20411_v42  ;;  %v20473_v4 = vld [vmem:[%s27425_s7 + $0x868] ss:$28 sps:$4 sm:$0xff]   ;;  %v20476_v42 = vld [vmem:[%s27425_s7 + $0x51c] ss:$28 sps:$4 sm:$0xff]  }
 0xb93   :  { %18933 = vmatprep.subr.bf16.mxu1 %v20412_v13  ;;  %v20477_v13 = vld [vmem:[%s27425_s7 + $0xa60] ss:$28 sps:$4 sm:$0xff]  }
 0xb95   :  { %16218 = vmatpush1.bf16.msra.mxu0 %v20409_v34  ;;  %v20474_v34 = vld [vmem:[%s27425_s7 + $0x518] ss:$28 sps:$4 sm:$0xff]  }
 0xb96   :  { %18934 = vmatpush3.bf16.msra.mxu1 %v20413_v7  ;;  %16219 = vmatprep.subr.bf16.mxu0 %v20416_v23  ;;  %v20478_v7 = vld [vmem:[%s27425_s7 + $0x8a0] ss:$28 sps:$4 sm:$0xff]   ;;  %v20481_v23 = vld [vmem:[%s27425_s7 + $0x554] ss:$28 sps:$4 sm:$0xff]  }
 0xb97   :  { %18935 = vmatprep.subr.bf16.mxu1 %v20417_v16  ;;  %v20482_v16 = vld [vmem:[%s27425_s7 + $0xc58] ss:$28 sps:$4 sm:$0xff]  }
 0xb99   :  { %16220 = vmatpush1.bf16.msra.mxu0 %v20414_v17  ;;  %v20479_v17 = vld [vmem:[%s27425_s7 + $0x550] ss:$28 sps:$4 sm:$0xff]  }
 0xb9a   :  { %18936 = vmatpush3.bf16.msra.mxu1 %v20418_v37  ;;  %16221 = vmatprep.subr.bf16.mxu0 %v20421_v59  ;;  %v20483_v37 = vld [vmem:[%s27425_s7 + $0xa98] ss:$28 sps:$4 sm:$0xff]   ;;  %v20486_v59 = vld [vmem:[%s27425_s7 + $0x58c] ss:$28 sps:$4 sm:$0xff]  }
 0xb9b   :  { %18937 = vmatprep.subr.bf16.mxu1 %v20422_v55  ;;  %v20487_v55 = vld [vmem:[%s27425_s7 + $0xc90] ss:$28 sps:$4 sm:$0xff]  }
 0xb9d   :  { %16222 = vmatpush1.bf16.msra.mxu0 %v20419_v56  ;;  %v20484_v56 = vld [vmem:[%s27425_s7 + $0x588] ss:$28 sps:$4 sm:$0xff]  }
 0xb9e   :  { %18938 = vmatpush3.bf16.msra.mxu1 %v20423_v20  ;;  %16223 = vmatprep.subr.bf16.mxu0 %v20426_v9  ;;  %v20488_v20 = vld [vmem:[%s27425_s7 + $0xad0] ss:$28 sps:$4 sm:$0xff]   ;;  %v20491_v9 = vld [vmem:[%s27425_s7 + $0x5c4] ss:$28 sps:$4 sm:$0xff]  }
 0xb9f   :  { %18939 = vmatprep.subr.bf16.mxu1 %v20427_v12  ;;  %v20492_v12 = vld [vmem:[%s27425_s7 + $0xcc8] ss:$28 sps:$4 sm:$0xff]  }
 0xba1   :  { %16224 = vmatpush1.bf16.msra.mxu0 %v20424_v43  ;;  %v20489_v43 = vld [vmem:[%s27425_s7 + $0x5c0] ss:$28 sps:$4 sm:$0xff]  }
 0xba2   :  { %18940 = vmatpush3.bf16.msra.mxu1 %v20428_v26  ;;  %16225 = vmatprep.subr.bf16.mxu0 %v20431_v28  ;;  %v20493_v26 = vld [vmem:[%s27425_s7 + $0xb08] ss:$28 sps:$4 sm:$0xff]   ;;  %v20496_v28 = vld [vmem:[%s27425_s7 + $0x5fc] ss:$28 sps:$4 sm:$0xff]  }
 0xba3   :  { %18941 = vmatprep.subr.bf16.mxu1 %v20432_v54  ;;  %v20497_v54 = vld [vmem:[%s27425_s7 + $0xd00] ss:$28 sps:$4 sm:$0xff]  }
 0xba5   :  { %16226 = vmatpush1.bf16.msra.mxu0 %v20429_v39  ;;  %v20494_v39 = vld [vmem:[%s27425_s7 + $0x5f8] ss:$28 sps:$4 sm:$0xff]  }
 0xba6   :  { %18942 = vmatpush3.bf16.msra.mxu1 %v20433_v29  ;;  %16227 = vmatprep.subr.bf16.mxu0 %v20436_v10  ;;  %v20498_v29 = vld [vmem:[%s27425_s7 + $0xb40] ss:$28 sps:$4 sm:$0xff]   ;;  %v20501_v10 = vld [vmem:[%s27425_s7 + $0x634] ss:$28 sps:$4 sm:$0xff]  }
 0xba7   :  { %18943 = vmatprep.subr.bf16.mxu1 %v20437_v5  ;;  %v20502_v5 = vld [vmem:[%s27425_s7 + $0xd38] ss:$28 sps:$4 sm:$0xff]  }
 0xba9   :  { %16228 = vmatpush1.bf16.msra.mxu0 %v20434_v27  ;;  %v20499_v27 = vld [vmem:[%s27425_s7 + $0x630] ss:$28 sps:$4 sm:$0xff]  }
 0xbaa   :  { %18944 = vmatpush3.bf16.msra.mxu1 %v20438_v22  ;;  %16238 = vmatprep.subr.bf16.mxu0 %v20441_v32  ;;  %v20503_v22 = vld [vmem:[%s27425_s7 + $0xb78] ss:$28 sps:$4 sm:$0xff]   ;;  %v20506_v32 = vld [vmem:[%s27425_s7 + $0x66c] ss:$28 sps:$4 sm:$0xff]  }
 0xbab   :  { %18951 = vmatprep.subr.bf16.mxu1 %v20442_v30  ;;  %v20507_v30 = vld [vmem:[%s27425_s7 + $0xd70] ss:$28 sps:$4 sm:$0xff]  }
 0xbac   :  { %16230 = vmatmul.mubr.bf16.vlgmr.msra.gmra.mrb[52].mxu0 %v26177_v62  ;;  %v20451_v62 = vld [vmem:[%s27425_s7 + $0x404] ss:$28 sps:$4 sm:$0xff]  }
 0xbad   :  { %16434 = vmatmul.mubr.bf16.vlgmr.msra.gmra.mrb[88].mxu1 %v26390_v31  ;;  %16239 = vmatpush1.bf16.msra.mxu0 %v20439_v35  ;;  %v20504_v35 = vld [vmem:[%s27425_s7 + $0x668] ss:$28 sps:$4 sm:$0xff]  }
 0xbae   :  { %16270 = vmatprep.mubr.bf16.mxu0 %v26187_v18  ;;  %18952 = vmatpush3.bf16.msra.mxu1 %v20443_v36  ;;  %v20449_v18 = vld [vmem:[%s27425_s7 + $0x400] ss:$28 sps:$4 sm:$0xff]   ;;  %v20508_v36 = vld [vmem:[%s27425_s7 + $0xbb0] ss:$28 sps:$4 sm:$0xff]  }
 0xbaf   :  { %16473 = vmatprep.mubr.bf16.mxu1 %v26395_v45  ;;  %16240 = vmatprep.subr.bf16.mxu0 %v20446_v44  ;;  %v20511_v44 = vld [vmem:[%s27425_s7 + $0x6a4] ss:$28 sps:$4 sm:$0xff]  }
 0xbb0   :  { %18953 = vmatprep.subr.bf16.mxu1 %v20447_v38  ;;  %v20512_v38 = vld [vmem:[%s27425_s7 + $0xda8] ss:$28 sps:$4 sm:$0xff]  }
 0xbb1   :  { %16241 = vmatpush1.bf16.msra.mxu0 %v20444_v19  ;;  %v20509_v19 = vld [vmem:[%s27425_s7 + $0x6a0] ss:$28 sps:$4 sm:$0xff]  }
 0xbb2   :  { %18954 = vmatpush3.bf16.msra.mxu1 %v20448_v52  ;;  %16242 = vmatprep.subr.bf16.mxu0 %v20451_v62  ;;  %v20513_v52 = vld [vmem:[%s27425_s7 + $0xbe8] ss:$28 sps:$4 sm:$0xff]   ;;  %v20516_v62 = vld [vmem:[%s27425_s7 + $0x6dc] ss:$28 sps:$4 sm:$0xff]  }
 0xbb3   :  { %18955 = vmatprep.subr.bf16.mxu1 %v20452_v58  ;;  %v20517_v58 = vld [vmem:[%s27425_s7 + $0xde0] ss:$28 sps:$4 sm:$0xff]  }
 0xbb5   :  { %16243 = vmatpush1.bf16.msra.mxu0 %v20449_v18  ;;  %v20514_v18 = vld [vmem:[%s27425_s7 + $0x6d8] ss:$28 sps:$4 sm:$0xff]  }
 0xbb6   :  { %18956 = vmatpush3.bf16.msra.mxu1 %v20453_v40  ;;  %16244 = vmatprep.subr.bf16.mxu0 %v20456_v41  ;;  %v20518_v40 = vld [vmem:[%s27425_s7 + $0xc20] ss:$28 sps:$4 sm:$0xff]   ;;  %v20521_v41 = vld [vmem:[%s27425_s7 + $0x714] ss:$28 sps:$4 sm:$0xff]  }
 0xbb7   :  { %18957 = vmatprep.subr.bf16.mxu1 %v20457_v33  ;;  %v20519_v33 = vld [vmem:[%s27425_s7 + $0x710] ss:$28 sps:$4 sm:$0xff]  }
 0xbb9   :  { %16245 = vmatpush1.bf16.msra.mxu0 %v20454_v46  ;;  %v20524_v46 = vld [vmem:[%s27425_s7 + $0x74c] ss:$28 sps:$4 sm:$0xff]  }
 0xbba   :  { %18958 = vmatpush3.bf16.msra.mxu1 %v20458_v49  ;;  %16246 = vmatprep.subr.bf16.mxu0 %v20461_v48  ;;  %v20522_v49 = vld [vmem:[%s27425_s7 + $0x748] ss:$28 sps:$4 sm:$0xff]  }
 0xbbb   :  { %18959 = vmatprep.subr.bf16.mxu1 %v20462_v47  ;;  %v20527_v48 = vld [vmem:[%s27425_s7 + $0x784] ss:$28 sps:$4 sm:$0xff]  }
 0xbbc   :  { %v20525_v47 = vld [vmem:[%s27425_s7 + $0x780] ss:$28 sps:$4 sm:$0xff]  }
 0xbbd   :  { %16247 = vmatpush1.bf16.msra.mxu0 %v20459_v21  ;;  %v20533_v21 = vld [vmem:[%s27425_s7 + $0x7f4] ss:$28 sps:$4 sm:$0xff]  }
 0xbbe   :  { %18960 = vmatpush3.bf16.msra.mxu1 %v20463_v24  ;;  %16248 = vmatprep.subr.bf16.mxu0 %v20466_v57  ;;  %v20531_v24 = vld [vmem:[%s27425_s7 + $0x7f0] ss:$28 sps:$4 sm:$0xff]  }
 0xbbf   :  { %18961 = vmatprep.subr.bf16.mxu1 %v20467_v61  ;;  %v20536_v57 = vld [vmem:[%s27425_s7 + $0x82c] ss:$28 sps:$4 sm:$0xff]  }
 0xbc0   :  { %v20534_v61 = vld [vmem:[%s27425_s7 + $0x828] ss:$28 sps:$4 sm:$0xff]  }
 0xbc1   :  { %16249 = vmatpush1.bf16.msra.mxu0 %v20464_v63  ;;  %v20539_v63 = vld [vmem:[%s27425_s7 + $0x864] ss:$28 sps:$4 sm:$0xff]  }
 0xbc2   :  { %18962 = vmatpush3.bf16.msra.mxu1 %v20468_v0  ;;  %16250 = vmatprep.subr.bf16.mxu0 %v20471_v2  ;;  %v20537_v0 = vld [vmem:[%s27425_s7 + $0x860] ss:$28 sps:$4 sm:$0xff]  }
 0xbc3   :  { %18963 = vmatprep.subr.bf16.mxu1 %v20472_v51  ;;  %v20542_v2 = vld [vmem:[%s27425_s7 + $0x89c] ss:$28 sps:$4 sm:$0xff]  }
 0xbc4   :  { %v20540_v51 = vld [vmem:[%s27425_s7 + $0x898] ss:$28 sps:$4 sm:$0xff]  }
 0xbc5   :  { %16251 = vmatpush1.bf16.msra.mxu0 %v20469_v3  ;;  %v20545_v3 = vld [vmem:[%s27425_s7 + $0x8d4] ss:$28 sps:$4 sm:$0xff]  }
 0xbc6   :  { %18964 = vmatpush3.bf16.msra.mxu1 %v20473_v4  ;;  %16252 = vmatprep.subr.bf16.mxu0 %v20476_v42  ;;  %v20543_v4 = vld [vmem:[%s27425_s7 + $0x8d0] ss:$28 sps:$4 sm:$0xff]  }
 0xbc7   :  { %18965 = vmatprep.subr.bf16.mxu1 %v20477_v13  ;;  %v20548_v42 = vld [vmem:[%s27425_s7 + $0x90c] ss:$28 sps:$4 sm:$0xff]  }
 0xbc8   :  { %v20546_v13 = vld [vmem:[%s27425_s7 + $0x908] ss:$28 sps:$4 sm:$0xff]  }
 0xbc9   :  { %16253 = vmatpush1.bf16.msra.mxu0 %v20474_v34  ;;  %v20551_v34 = vld [vmem:[%s27425_s7 + $0x944] ss:$28 sps:$4 sm:$0xff]  }
 0xbca   :  { %18966 = vmatpush3.bf16.msra.mxu1 %v20478_v7  ;;  %16254 = vmatprep.subr.bf16.mxu0 %v20481_v23  ;;  %v20549_v7 = vld [vmem:[%s27425_s7 + $0x940] ss:$28 sps:$4 sm:$0xff]  }
 0xbcb   :  { %18973 = vmatprep.subr.bf16.mxu1 %v20482_v16  ;;  %v20554_v23 = vld [vmem:[%s27425_s7 + $0x97c] ss:$28 sps:$4 sm:$0xff]  }
 0xbcc   :  { %v20552_v16 = vld [vmem:[%s27425_s7 + $0x978] ss:$28 sps:$4 sm:$0xff]  }
 0xbcd   :  { %16474 = vmatmul.mubr.bf16.vlgmr.msra.gmra.mrb[92].mxu1 %v26596_v60  ;;  %16255 = vmatpush1.bf16.msra.mxu0 %v20479_v17  ;;  %v20557_v17 = vld [vmem:[%s27425_s7 + $0x9b4] ss:$28 sps:$4 sm:$0xff]  }
 0xbce   :  { %18974 = vmatpush3.bf16.msra.mxu1 %v20483_v37  ;;  %16513 = vmatprep.mubr.bf16.mxu1 %v26604_v1  ;;  %v20555_v37 = vld [vmem:[%s27425_s7 + $0x9b0] ss:$28 sps:$4 sm:$0xff]  }
 0xbcf   :  { %16256 = vmatprep.subr.bf16.mxu0 %v20486_v59  ;;  %18975 = vmatprep.subr.bf16.mxu1 %v20487_v55  ;;  %v20560_v59 = vld [vmem:[%s27425_s7 + $0x9ec] ss:$28 sps:$4 sm:$0xff]  }
 0xbd0   :  { %v20558_v55 = vld [vmem:[%s27425_s7 + $0x9e8] ss:$28 sps:$4 sm:$0xff]  }
 0xbd1   :  { %16257 = vmatpush1.bf16.msra.mxu0 %v20484_v56  ;;  %v20563_v56 = vld [vmem:[%s27425_s7 + $0xa24] ss:$28 sps:$4 sm:$0xff]  }
 0xbd2   :  { %18976 = vmatpush3.bf16.msra.mxu1 %v20488_v20  ;;  %16258 = vmatprep.subr.bf16.mxu0 %v20491_v9  ;;  %v20561_v20 = vld [vmem:[%s27425_s7 + $0xa20] ss:$28 sps:$4 sm:$0xff]  }
 0xbd3   :  { %18977 = vmatprep.subr.bf16.mxu1 %v20492_v12  ;;  %v20566_v9 = vld [vmem:[%s27425_s7 + $0xa5c] ss:$28 sps:$4 sm:$0xff]  }
 0xbd4   :  { %v20564_v12 = vld [vmem:[%s27425_s7 + $0xa58] ss:$28 sps:$4 sm:$0xff]  }
 0xbd5   :  { %16259 = vmatpush1.bf16.msra.mxu0 %v20489_v43  ;;  %v20569_v43 = vld [vmem:[%s27425_s7 + $0xa94] ss:$28 sps:$4 sm:$0xff]  }
 0xbd6   :  { %18978 = vmatpush3.bf16.msra.mxu1 %v20493_v26  ;;  %16260 = vmatprep.subr.bf16.mxu0 %v20496_v28  ;;  %v20567_v26 = vld [vmem:[%s27425_s7 + $0xa90] ss:$28 sps:$4 sm:$0xff]  }
 0xbd7   :  { %18979 = vmatprep.subr.bf16.mxu1 %v20497_v54  ;;  %v20572_v28 = vld [vmem:[%s27425_s7 + $0xacc] ss:$28 sps:$4 sm:$0xff]  }
 0xbd8   :  { %v20570_v54 = vld [vmem:[%s27425_s7 + $0xac8] ss:$28 sps:$4 sm:$0xff]  }
 0xbd9   :  { %16261 = vmatpush1.bf16.msra.mxu0 %v20494_v39  ;;  %v20575_v39 = vld [vmem:[%s27425_s7 + $0xb04] ss:$28 sps:$4 sm:$0xff]  }
 0xbda   :  { %18980 = vmatpush3.bf16.msra.mxu1 %v20498_v29  ;;  %16262 = vmatprep.subr.bf16.mxu0 %v20501_v10  ;;  %v20573_v29 = vld [vmem:[%s27425_s7 + $0xb00] ss:$28 sps:$4 sm:$0xff]   ;;  %v20581_v10 = vld [vmem:[%s27425_s7 + $0xb74] ss:$28 sps:$4 sm:$0xff]  }
 0xbdb   :  { %18981 = vmatprep.subr.bf16.mxu1 %v20502_v5  ;;  %v20579_v5 = vld [vmem:[%s27425_s7 + $0xb70] ss:$28 sps:$4 sm:$0xff]  }
 0xbdd   :  { %16263 = vmatpush1.bf16.msra.mxu0 %v20499_v27  ;;  %v27322_v27 = vld [vmem:[%s27426_s8] sm:$0x7f] }
 0xbde   :  { %18982 = vmatpush3.bf16.msra.mxu1 %v20503_v22  ;;  %16264 = vmatprep.subr.bf16.mxu0 %v20506_v32  ;;  %v20584_v22 = vld [vmem:[%s27425_s7 + $0xbac] ss:$28 sps:$4 sm:$0xff]   ;;  %v13533_v32 = vrot.slane %v27322_v27, %v21962_v6 }
 0xbdf   :  { %18983 = vmatprep.subr.bf16.mxu1 %v20507_v30  ;;  %v13541_v30 = vrot.slane %v27322_v27, %v22340_v50 }
 0xbe1   :  { %16265 = vmatpush1.bf16.msra.mxu0 %v20504_v35  ;;  %v13537_v35 = vrot.slane %v27322_v27, %v21965_v8 }
 0xbe2   :  { %18984 = vmatpush3.bf16.msra.mxu1 %v20508_v36  ;;  %16266 = vmatprep.subr.bf16.mxu0 %v20511_v44  ;;  %v20582_v36 = vld [vmem:[%s27425_s7 + $0xba8] ss:$28 sps:$4 sm:$0xff]   ;;  %v13545_v44 = vrot.slane %v27322_v27, %v22288_v25 }
 0xbe3   :  { %18985 = vmatprep.subr.bf16.mxu1 %v20512_v38  ;;  %v20587_v38 = vld [vmem:[%s27425_s7 + $0xbe4] ss:$28 sps:$4 sm:$0xff]  }
 0xbe5   :  { %16267 = vmatpush1.bf16.msra.mxu0 %v20509_v19 }
 0xbe6   :  { %18986 = vmatpush3.bf16.msra.mxu1 %v20513_v52  ;;  %16268 = vmatprep.subr.bf16.mxu0 %v20516_v62 }
 0xbe7   :  { %18987 = vmatprep.subr.bf16.mxu1 %v20517_v58 }
 0xbe9   :  { %16269 = vmatpush1.bf16.msra.mxu0 %v20514_v18 }
 0xbea   :  { %18988 = vmatpush3.bf16.msra.mxu1 %v20518_v40  ;;  %16279 = vmatprep.subr.bf16.mxu0 %v20521_v41  ;;  %v20585_v40 = vld [vmem:[%s27425_s7 + $0xbe0] ss:$28 sps:$4 sm:$0xff]  }
 0xbec   :  { %16271 = vmatmul.mubr.bf16.vlgmr.msra.gmra.mrb[52].mxu0 %v26390_v31  ;;  %v20530_v31 = vld [vmem:[%s27425_s7 + $0x7bc] ss:$28 sps:$4 sm:$0xff]  }
 0xbed   :  { %16514 = vmatmul.mubr.bf16.vlgmr.msra.gmra.mrb[96].mxu1 %v26799_v53  ;;  %16280 = vmatpush1.bf16.msra.mxu0 %v20519_v33 }
 0xbee   :  { %16311 = vmatprep.mubr.bf16.mxu0 %v26395_v45  ;;  %16281 = vmatprep.subr.bf16.mxu0 %v20524_v46  ;;  %v20528_v45 = vld [vmem:[%s27425_s7 + $0x7b8] ss:$28 sps:$4 sm:$0xff]  }
 0xbf1   :  { %16282 = vmatpush1.bf16.msra.mxu0 %v20522_v49  ;;  %v20590_v49 = vld [vmem:[%s27425_s7 + $0xc1c] ss:$28 sps:$4 sm:$0xff]  }
 0xbf2   :  { %16283 = vmatprep.subr.bf16.mxu0 %v20527_v48 }
 0xbf5   :  { %16284 = vmatpush1.bf16.msra.mxu0 %v20525_v47 }
 0xbf6   :  { %16285 = vmatprep.subr.bf16.mxu0 %v20530_v31 }
 0xbf9   :  { %16286 = vmatpush1.bf16.msra.mxu0 %v20528_v45 }
 0xbfa   :  { %16287 = vmatprep.subr.bf16.mxu0 %v20533_v21 }
 0xbfd   :  { %16288 = vmatpush1.bf16.msra.mxu0 %v20531_v24 }
 0xbfe   :  { %16289 = vmatprep.subr.bf16.mxu0 %v20536_v57 }
 0xc01   :  { %16290 = vmatpush1.bf16.msra.mxu0 %v20534_v61  ;;  %v20588_v61 = vld [vmem:[%s27425_s7 + $0xc18] ss:$28 sps:$4 sm:$0xff]  }
 0xc02   :  { %16291 = vmatprep.subr.bf16.mxu0 %v20539_v63 }
 0xc05   :  { %16292 = vmatpush1.bf16.msra.mxu0 %v20537_v0  ;;  %v20593_v0 = vld [vmem:[%s27425_s7 + $0xc54] ss:$28 sps:$4 sm:$0xff]  }
 0xc06   :  { %16293 = vmatprep.subr.bf16.mxu0 %v20542_v2  ;;  %v20591_v2 = vld [vmem:[%s27425_s7 + $0xc50] ss:$28 sps:$4 sm:$0xff]  }
 0xc09   :  { %16294 = vmatpush1.bf16.msra.mxu0 %v20540_v51  ;;  %v20596_v51 = vld [vmem:[%s27425_s7 + $0xc8c] ss:$28 sps:$4 sm:$0xff]  }
 0xc0a   :  { %16295 = vmatprep.subr.bf16.mxu0 %v20545_v3  ;;  %v20594_v3 = vld [vmem:[%s27425_s7 + $0xc88] ss:$28 sps:$4 sm:$0xff]  }
 0xc0d   :  { %16296 = vmatpush1.bf16.msra.mxu0 %v20543_v4  ;;  %v20599_v4 = vld [vmem:[%s27425_s7 + $0xcc4] ss:$28 sps:$4 sm:$0xff]  }
 0xc0e   :  { %16297 = vmatprep.subr.bf16.mxu0 %v20548_v42 }
 0xc11   :  { %16298 = vmatpush1.bf16.msra.mxu0 %v20546_v13 }
 0xc12   :  { %16299 = vmatprep.subr.bf16.mxu0 %v20551_v34 }
 0xc15   :  { %16300 = vmatpush1.bf16.msra.mxu0 %v20549_v7  ;;  %v20597_v7 = vld [vmem:[%s27425_s7 + $0xcc0] ss:$28 sps:$4 sm:$0xff]  }
 0xc16   :  { %16301 = vmatprep.subr.bf16.mxu0 %v20554_v23 }
 0xc19   :  { %16302 = vmatpush1.bf16.msra.mxu0 %v20552_v16 }
 0xc1a   :  { %16303 = vmatprep.subr.bf16.mxu0 %v20557_v17  ;;  %v20602_v17 = vld [vmem:[%s27425_s7 + $0xcfc] ss:$28 sps:$4 sm:$0xff]  }
 0xc1d   :  { %16304 = vmatpush1.bf16.msra.mxu0 %v20555_v37 }
 0xc1e   :  { %16305 = vmatprep.subr.bf16.mxu0 %v20560_v59 }
 0xc21   :  { %16306 = vmatpush1.bf16.msra.mxu0 %v20558_v55 }
 0xc22   :  { %16307 = vmatprep.subr.bf16.mxu0 %v20563_v56  ;;  %v20600_v56 = vld [vmem:[%s27425_s7 + $0xcf8] ss:$28 sps:$4 sm:$0xff]  }
 0xc25   :  { %16308 = vmatpush1.bf16.msra.mxu0 %v20561_v20  ;;  %v20605_v20 = vld [vmem:[%s27425_s7 + $0xd34] ss:$28 sps:$4 sm:$0xff]  }
 0xc26   :  { %16309 = vmatprep.subr.bf16.mxu0 %v20566_v9  ;;  %v20603_v9 = vld [vmem:[%s27425_s7 + $0xd30] ss:$28 sps:$4 sm:$0xff]  }
 0xc29   :  { %16310 = vmatpush1.bf16.msra.mxu0 %v20564_v12  ;;  %v20608_v12 = vld [vmem:[%s27425_s7 + $0xd6c] ss:$28 sps:$4 sm:$0xff]  }
 0xc2a   :  { %16320 = vmatprep.subr.bf16.mxu0 %v20569_v43 }
 0xc2c   :  { %16312 = vmatmul.mubr.bf16.vlgmr.msra.gmra.mrb[52].mxu0 %v26596_v60  ;;  %v20578_v60 = vld [vmem:[%s27425_s7 + $0xb3c] ss:$28 sps:$4 sm:$0xff]  }
 0xc2d   :  { %16321 = vmatpush1.bf16.msra.mxu0 %v20567_v26  ;;  %16352 = vmatprep.mubr.bf16.mxu0 %v26604_v1  ;;  %v20576_v1 = vld [vmem:[%s27425_s7 + $0xb38] ss:$28 sps:$4 sm:$0xff]   ;;  %v20606_v26 = vld [vmem:[%s27425_s7 + $0xd68] ss:$28 sps:$4 sm:$0xff]  }
 0xc2e   :  { %16322 = vmatprep.subr.bf16.mxu0 %v20572_v28 }
 0xc31   :  { %16323 = vmatpush1.bf16.msra.mxu0 %v20570_v54  ;;  %v20611_v54 = vld [vmem:[%s27425_s7 + $0xda4] ss:$28 sps:$4 sm:$0xff]  }
 0xc32   :  { %16324 = vmatprep.subr.bf16.mxu0 %v20575_v39 }
 0xc35   :  { %16325 = vmatpush1.bf16.msra.mxu0 %v20573_v29 }
 0xc36   :  { %16326 = vmatprep.subr.bf16.mxu0 %v20578_v60 }
 0xc39   :  { %16327 = vmatpush1.bf16.msra.mxu0 %v20576_v1 }
 0xc3a   :  { %16328 = vmatprep.subr.bf16.mxu0 %v20581_v10  ;;  %v20609_v10 = vld [vmem:[%s27425_s7 + $0xda0] ss:$28 sps:$4 sm:$0xff]  }
 0xc3d   :  { %16329 = vmatpush1.bf16.msra.mxu0 %v20579_v5 }
 0xc3e   :  { %16330 = vmatprep.subr.bf16.mxu0 %v20584_v22 }
 0xc3f   :  { %v16026_v6 = vpop.f32.mrb[48].mxu0 }
 0xc40   :  { %v19019_v19 = vadd.f32 %v16026_v6, %v13533_v32  ;;  %v16190_v52 = vpop.f32.mrb[80].mxu1  ;;  %v16028_v62 = vpop.f32.mrb[49].mxu0  ;;  %v20614_v32 = vld [vmem:[%s27425_s7 + $0xddc] ss:$28 sps:$4 sm:$0xff]  }
 0xc41   :  { %v19021_v50 = vadd.f32 %v16190_v52, %v13541_v30  ;;  %v19020_v58 = vadd.f32 %v16028_v62, %v13537_v35  ;;  %v16192_v18 = vpop.f32.mrb[81].mxu1  ;;  %v16030_v8 = vpop.f32.mrb[50].mxu0  ;;  %16331 = vmatpush1.bf16.msra.mxu0 %v20582_v36  ;;  %v20612_v35 = vld [vmem:[%s27425_s7 + $0xdd8] ss:$28 sps:$4 sm:$0xff]   ;;  %v13557_v36 = vrot.slane %v27322_v27, %v22475_v11  ;;  %s20702_s7 = smov [#allocation2]  }
 0xc42   :  { %v16521_v41 = vsub.f32 0.0, %v19019_v19  ;;  %v19022_v25 = vadd.f32 %v16192_v18, %v13545_v44  ;;  %v16194_v33 = vpop.f32.mrb[82].mxu1  ;;  %v16031_v46 = vpop.f32.mrb[51].mxu0  ;;  %16332 = vmatprep.subr.bf16.mxu0 %v20587_v38  ;;  %s16568_s12 = sshll.u32 %s20702_s7, 4  ;;  %s16569_s12 = int_to_ptr.vmem [resolvable:$true] %s16568_s12 }
 0xc43   :  { %v16523_v48 = vsub.f32 0.0, %v19021_v50  ;;  %v16522_v47 = vsub.f32 0.0, %v19020_v58  ;;  %v16195_v31 = vpop.f32.mrb[83].mxu1  ;;  %s20677_s3 = scalar_lea.vmem %s16569_s12, 1792  ;;  %p20682_p1 = scmp.lt.s32.totalorder %s16569_s12, %s16569_s12 }
 0xc44   :  { %v16528_v45 = vmul.f32 1.442695, %v16521_v41  ;;  %v16524_v21 = vsub.f32 0.0, %v19022_v25  ;;  %p20678_p0 = scmp.ne.s32.totalorder %s16569_s12, %s20677_s3  ;;  %p20683_p2 = scmp.lt.s32.totalorder %s20677_s3, %s20677_s3 }
 0xc45   :  { %v16532_v24 = vmul.f32 1.442695, %v16523_v48  ;;  %v16530_v57 = vmul.f32 1.442695, %v16522_v47  ;;  %16333 = vmatpush1.bf16.msra.mxu0 %v20585_v40 }
 0xc46   :  { %20643 = vpow2.f32 %v16528_v45  ;;  %v16534_v63 = vmul.f32 1.442695, %v16524_v21  ;;  %16334 = vmatprep.subr.bf16.mxu0 %v20590_v49  ;;  %p20684_p3 = por %p20683_p2, %p20682_p1 }
 0xc47   :  { %20645 = vpow2.f32 %v16532_v24 }
 0xc48   :  { %20647 = vpow2.f32 %v16530_v57  ;;  %v13549_v57 = vrot.slane %v27322_v27, %v22396_v14  ;;  %p20685_p4 = pnand %p20684_p3, %p20678_p0 }
 0xc49   :  { %20649 = vpow2.f32 %v16534_v63  ;;  %16335 = vmatpush1.bf16.msra.mxu0 %v20588_v61  ;;  %v13553_v61 = vrot.slane %v27322_v27, %v22399_v15 }
 0xc4a   :  { %16336 = vmatprep.subr.bf16.mxu0 %v20593_v0 }
 0xc4d   :  { %16337 = vmatpush1.bf16.msra.mxu0 %v20591_v2 }
 0xc4e   :  { %16338 = vmatprep.subr.bf16.mxu0 %v20596_v51 }
 0xc50   :  { %v20644_v42 = vpop.eup %20643 }
 0xc51   :  { %v20646_v13 = vpop.eup %20645  ;;  %v16542_v34 = vadd.f32 1.0, %v20644_v42  ;;  %16339 = vmatpush1.bf16.msra.mxu0 %v20594_v3 }
 0xc52   :  { %v20648_v23 = vpop.eup %20647  ;;  %v16544_v16 = vadd.f32 1.0, %v20646_v13  ;;  %16340 = vmatprep.subr.bf16.mxu0 %v20599_v4 }
 0xc53   :  { %v20650_v37 = vpop.eup %20649  ;;  %20651 = vrcp.f32 %v16542_v34  ;;  %v16543_v59 = vadd.f32 1.0, %v20648_v23 }
 0xc54   :  { %20653 = vrcp.f32 %v16544_v16  ;;  %v16545_v55 = vadd.f32 1.0, %v20650_v37 }
 0xc55   :  { %20655 = vrcp.f32 %v16543_v59  ;;  %16341 = vmatpush1.bf16.msra.mxu0 %v20597_v7 }
 0xc56   :  { %20657 = vrcp.f32 %v16545_v55  ;;  %16342 = vmatprep.subr.bf16.mxu0 %v20602_v17 }
 0xc59   :  { %16343 = vmatpush1.bf16.msra.mxu0 %v20600_v56 }
 0xc5a   :  { %16344 = vmatprep.subr.bf16.mxu0 %v20605_v20 }
 0xc5d   :  { %v20652_v43 = vpop.eup %20651  ;;  %16345 = vmatpush1.bf16.msra.mxu0 %v20603_v9 }
 0xc5e   :  { %v20654_v28 = vpop.eup %20653  ;;  %16556 = vst [vmem:[#allocation2 + $0x38] sm:$0xff] %v20652_v43  ;;  %16346 = vmatprep.subr.bf16.mxu0 %v20608_v12 }
 0xc5f   :  { %v20656_v39 = vpop.eup %20655  ;;  %16558 = vst [vmem:[#allocation2 + $0x48] sm:$0xff] %v20654_v28 }
 0xc60   :  { %v20658_v29 = vpop.eup %20657  ;;  %16557 = vst [vmem:[#allocation2 + $0x40] sm:$0xff] %v20656_v39  ;;  %v18923_v60 = vpop.f32.mrb[84].mxu1 }
 0xc61   :  { %16559 = vst [vmem:[#allocation2 + $0x50] sm:$0xff] %v20658_v29  ;;  %v18924_v1 = vpop.f32.mrb[85].mxu1  ;;  %16347 = vmatpush1.bf16.msra.mxu0 %v20606_v26 }
 0xc62   :  { %v18925_v5 = vadd.f32 %v18924_v1, %v18923_v60  ;;  %v18926_v22 = vpop.f32.mrb[86].mxu1  ;;  %16348 = vmatprep.subr.bf16.mxu0 %v20611_v54 }
 0xc63   :  { %v18927_v30 = vpop.f32.mrb[87].mxu1 }
 0xc64   :  { %v16396_v6 = vadd.f32 %v18925_v5, %v13557_v36 }
 0xc65   :  { %16349 = vmatpush1.bf16.msra.mxu0 %v20609_v10 }
 0xc66   :  { %16350 = vmatprep.subr.bf16.mxu0 %v20614_v32 }
 0xc69   :  { %16351 = vmatpush1.bf16.msra.mxu0 %v20612_v35 }
 0xc6c   :  { %16353 = vmatmul.mubr.bf16.vlgmr.msra.gmra.mrb[52].mxu0 %v26799_v53 }
 0xc80   :  { %v18945_v44 = vpop.f32.mrb[88].mxu1 }
 0xc81   :  { %v18946_v38 = vpop.f32.mrb[89].mxu1 }
 0xc82   :  { %v18947_v19 = vadd.f32 %v18946_v38, %v18945_v44  ;;  %v18948_v52 = vpop.f32.mrb[90].mxu1 }
 0xc83   :  { %v18949_v62 = vpop.f32.mrb[91].mxu1 }
 0xc84   :  { %v16436_v50 = vadd.f32 %v18947_v19, %v16396_v6 }
 0xca0   :  { %v18967_v58 = vpop.f32.mrb[92].mxu1 }
 0xca1   :  { %v18968_v18 = vpop.f32.mrb[93].mxu1 }
 0xca2   :  { %v18969_v8 = vadd.f32 %v18968_v18, %v18967_v58  ;;  %v18970_v40 = vpop.f32.mrb[94].mxu1 }
 0xca3   :  { %v18971_v41 = vpop.f32.mrb[95].mxu1 }
 0xca4   :  { %v16476_v25 = vadd.f32 %v18969_v8, %v16436_v50 }
 0xcc0   :  { %v18989_v33 = vpop.f32.mrb[96].mxu1 }
 0xcc1   :  { %v18990_v46 = vpop.f32.mrb[97].mxu1 }
 0xcc2   :  { %v18991_v49 = vadd.f32 %v18990_v46, %v18989_v33  ;;  %v18992_v53 = vpop.f32.mrb[98].mxu1 }
 0xcc3   :  { %v18993_v48 = vpop.f32.mrb[99].mxu1 }
 0xcc4   :  { %v16516_v47 = vadd.f32 %v18991_v49, %v16476_v25 }
 0xcc6   :  { %v16527_v11 = vsub.f32 0.0, %v16516_v47 }
 0xcc8   :  { %v16540_v31 = vmul.f32 1.442695, %v16527_v11 }
 0xcca   :  { %20659 = vpow2.f32 %v16540_v31 }
 0xcd4   :  { %v20660_v45 = vpop.eup %20659 }
 0xcd5   :  { %v16548_v21 = vadd.f32 1.0, %v20660_v45 }
 0xcd7   :  { %20661 = vrcp.f32 %v16548_v21 }
 0xce1   :  { %v20662_v24 = vpop.eup %20661 }
 0xce2   :  { %16562 = vst.msk [vmem:[#allocation2 + $0x68] sm:$0xff] %vm8297_vm0, %v20662_v24 }
 0xd3f   :  { %v16354_v63 = vpop.f32.mrb[52].mxu0 }
 0xd40   :  { %v19023_v0 = vadd.f32 %v16354_v63, %v13549_v57  ;;  %v16356_v2 = vpop.f32.mrb[53].mxu0 }
 0xd41   :  { %v19024_v51 = vadd.f32 %v16356_v2, %v13553_v61  ;;  %v16358_v3 = vpop.f32.mrb[54].mxu0 }
 0xd42   :  { %v16525_v4 = vsub.f32 0.0, %v19023_v0  ;;  %v16359_v42 = vpop.f32.mrb[55].mxu0 }
 0xd43   :  { %v16526_v13 = vsub.f32 0.0, %v19024_v51 }
 0xd44   :  { %v16536_v34 = vmul.f32 1.442695, %v16525_v4 }
 0xd45   :  { %v16538_v7 = vmul.f32 1.442695, %v16526_v13 }
 0xd46   :  { %20663 = vpow2.f32 %v16536_v34 }
 0xd47   :  { %20665 = vpow2.f32 %v16538_v7 }
 0xd50   :  { %v20664_v23 = vpop.eup %20663 }
 0xd51   :  { %v20666_v16 = vpop.eup %20665  ;;  %v16546_v17 = vadd.f32 1.0, %v20664_v23 }
 0xd52   :  { %v16547_v37 = vadd.f32 1.0, %v20666_v16 }
 0xd53   :  { %20667 = vrcp.f32 %v16546_v17 }
 0xd54   :  { %20669 = vrcp.f32 %v16547_v37 }
 0xd5d   :  { %v20668_v14 = vpop.eup %20667 }
 0xd5e   :  { %v20670_v15 = vpop.eup %20669  ;;  %16560 = vst [vmem:[#allocation2 + $0x58] sm:$0xff] %v20668_v14 }
 0xd5f   :  { %16561 = vst [vmem:[#allocation2 + $0x60] sm:$0xff] %v20670_v15 }
 0xd60   :  { %20688 = shalt.err (!%p20685_p4)
}
 0xd61   :  { %s20689_s14 = scalar_lea.hbm %s27427_s9, 1792 }
 0xd62   :  { %p20690_p5 = scmp.ne.s32.totalorder %s27427_s9, %s20689_s14  ;;  %p20693_p6 = scmp.lt.u32.totalorder %s20689_s14, %s27427_s9 }
 0xd64   :  { %p20695_p7 = pnand %p20693_p6, %p20690_p5 }
 0xd66   :  { %20698 = shalt.err (!%p20695_p7)
}
 0xd67   :  { %s20703_s18 = smov 896   ;;  %s20704_s19 = smov 56  }
 0xd68   :  { %16574 = dma.vmem_to_hbm [thread:$0]  %s16569_s12, 1792, %s27427_s9, [#allocation3], %s20703_s18, %s20703_s18, %s20704_s19  }
 0xd69   :  { %20699 = dma.done.wait [#allocation3], 1792  }
 0xd6a   :  { %20700 = vsyncadd [#allocation3], 4294965504 }
 0xd6b   :  { %16578 = vsyncpa [#allocation3], 1 }

</bundles_post_ra>
